<compile_context>
chip_gen: v7x
topology: tpu7x:2x2x1
jax: 0.10.0
libtpu: 0.0.40
codegen_flags: <defaults>
</compile_context>

<pallas_src>
import math

import jax
import jax.numpy as jnp
import numpy as np
from jax.experimental import pallas as pl
from jax.experimental.pallas import tpu as pltpu


# ----------------------------------------------------------------------------
# Host-side constant 0/1 selection operators (numpy at trace time).
# Activations are stored flat as (N*H*W, C) with rows ordered (n, h, w).
# ----------------------------------------------------------------------------

def _im2col_sel(n, h, w, k, p, scale):
    """(k*k, n*h*w, n*(h//scale)*(w//scale)) 0/1 shift-selection operator.

    Row (t, flat(b,i,j)) selects the source row feeding conv tap t=(dy,dx) at
    output position (b,i,j); out-of-frame taps are all-zero rows (zero pad).
    scale=2 additionally composes a nearest 2x upsample of the source, so the
    consumer of an Upsample(2) output can read the low-resolution tensor.
    """
    hs, ws = h // scale, w // scale
    mat = np.zeros((k * k, n * h * w, n * hs * ws), dtype=np.float32)
    for t in range(k * k):
        dy, dx = divmod(t, k)
        for b in range(n):
            for i in range(h):
                si = i + dy - p
                if not (0 <= si < h):
                    continue
                for j in range(w):
                    sj = j + dx - p
                    if 0 <= sj < w:
                        r = (b * h + i) * w + j
                        c = (b * hs + si // scale) * ws + sj // scale
                        mat[t, r, c] = 1.0
    return mat


def _pool_sel(n, h, w):
    """(4, n*(h/2)*(w/2), n*h*w): the four 2x2 max-pool tap selections."""
    h2, w2 = h // 2, w // 2
    mat = np.zeros((4, n * h2 * w2, n * h * w), dtype=np.float32)
    for q in range(4):
        qi, qj = divmod(q, 2)
        for b in range(n):
            for i in range(h2):
                for j in range(w2):
                    r = (b * h2 + i) * w2 + j
                    c = (b * h + 2 * i + qi) * w + 2 * j + qj
                    mat[q, r, c] = 1.0
    return mat


# ----------------------------------------------------------------------------
# Fused UNet kernel
# ----------------------------------------------------------------------------

def _make_unet_kernel(N, H, W, K, nf, nc, eps):
    KK = K * K
    R1 = N * H * W
    R2 = N * (H // 2) * (W // 2)
    R4 = N * (H // 4) * (W // 4)

    def bn_relu(y):
        """BatchNorm2d (training batch stats, gamma=1, beta=0) + ReLU, fp32."""
        mean = jnp.mean(y, axis=0, keepdims=True)
        cen = y - mean
        var = jnp.mean(cen * cen, axis=0, keepdims=True)
        return jnp.maximum(cen * jax.lax.rsqrt(var + eps), 0.0)

    def conv(parts, b_ref):
        """KxK 'same' conv: per-tap shift-selection matmul + weight matmul.

        parts: list of (sel_ref (KK, rows, src_rows) bf16,
                        y (src_rows, cin) fp32 value,
                        w_ref (KK, cin, cout) bf16).
        Skip concatenations never materialise: each input part carries the
        matching slice of the weight (split on the host along Cin).
        """
        rows = parts[0][0].shape[1]
        cout = parts[0][2].shape[-1]
        acc = jnp.zeros((rows, cout), jnp.float32)
        for sel_ref, y, w_ref in parts:
            yb = y.astype(jnp.bfloat16)
            for t in range(KK):
                sh = jnp.dot(sel_ref[t], yb,
                             preferred_element_type=jnp.float32)
                acc = acc + jnp.dot(sh.astype(jnp.bfloat16), w_ref[t],
                                    preferred_element_type=jnp.float32)
        return acc + b_ref[...]

    def kernel(xcolp_ref, xcol_ref,
               w1_ref, b1_ref,
               g8_ref, w2_ref, b2_ref,
               pool2_ref,
               g4_ref, w3_ref, b3_ref,
               w4a_ref, w4b_ref, b4_ref,
               g8up_ref, w5a_ref, w5b_ref, b5_ref,
               gfin_ref, w6a_ref, w6b_ref, b6_ref,
               o_ref):
        # -- downconv1: conv -> maxpool(2) -> BN -> ReLU.
        # Pool taps were pre-composed with the input im2col on the host
        # (xcolp_ref[q] = im2col rows of pool tap q); bias commutes with max.
        w1 = w1_ref[...]
        z = jnp.dot(xcolp_ref[0], w1, preferred_element_type=jnp.float32)
        for q in range(1, 4):
            z = jnp.maximum(
                z, jnp.dot(xcolp_ref[q], w1,
                           preferred_element_type=jnp.float32))
        out1 = bn_relu(z + b1_ref[...])                           # (R2, nf)

        # -- downconv2: conv -> maxpool(2) -> BN -> ReLU.
        c2 = conv([(g8_ref, out1, w2_ref)], b2_ref)               # (R2, 2nf)
        pz = jnp.dot(pool2_ref[0], c2, preferred_element_type=jnp.float32)
        for q in range(1, 4):
            pz = jnp.maximum(
                pz, jnp.dot(pool2_ref[q], c2,
                            preferred_element_type=jnp.float32))
        out2 = bn_relu(pz)                                        # (R4, 2nf)

        # -- rfconv: conv -> BN -> ReLU.
        out3 = bn_relu(conv([(g4_ref, out2, w3_ref)], b3_ref))    # (R4, 2nf)

        # -- upconv1: conv(cat(out3, out2)) -> upsample(2x) -> BN -> ReLU.
        # Nearest upsample commutes with BN stats and ReLU, so the result is
        # kept at quarter resolution; the next conv composes the upsample
        # into its shift-selection operator (g8up).
        out4q = bn_relu(conv([(g4_ref, out3, w4a_ref),
                              (g4_ref, out2, w4b_ref)], b4_ref))  # (R4, nf)

        # -- upconv2: conv(cat(out4, out1)) -> upsample(2x) -> BN -> ReLU.
        out5h = bn_relu(conv([(g8up_ref, out4q, w5a_ref),
                              (g8_ref, out1, w5b_ref)], b5_ref))  # (R2, nc)

        # -- finalconv: conv(cat(out5, x)); the out5 taps come through the
        # upsample-composed selection (gfin), the x taps from the host im2col.
        out = conv([(gfin_ref, out5h, w6a_ref)], b6_ref)          # (R1, nc)
        out = out + jnp.dot(xcol_ref[...], w6b_ref[...],
                            preferred_element_type=jnp.float32)
        o_ref[...] = out

    return kernel


# ----------------------------------------------------------------------------
# Parameter init (matches MyConv2d.reset_parameters: uniform(-stdv, stdv))
# ----------------------------------------------------------------------------

def init_conv_params(key, cin, cout, k):
    stdv = 1.0 / math.sqrt(cin * k * k)
    kw, kb = jax.random.split(key)
    w = jax.random.uniform(kw, (cout, cin, k, k), jnp.float32, -stdv, stdv)
    b = jax.random.uniform(kb, (cout,), jnp.float32, -stdv, stdv)
    return w, b          # PyTorch layout (Cout, Cin, K, K), (Cout,)


def init_unet_params(key, kernel, num_filters, num_colours):
    keys = jax.random.split(key, 6)
    nf, nc = num_filters, num_colours
    return {
        "down1": init_conv_params(keys[0], 1, nf, kernel),
        "down2": init_conv_params(keys[1], nf, nf * 2, kernel),
        "rf": init_conv_params(keys[2], nf * 2, nf * 2, kernel),
        "up1": init_conv_params(keys[3], nf * 4, nf, kernel),
        "up2": init_conv_params(keys[4], nf * 2, nc, kernel),
        "final": init_conv_params(keys[5], nc + 1, nc, kernel),
    }


# ----------------------------------------------------------------------------
# Public forward wrapper (NCHW in -> NCHW out)
# ----------------------------------------------------------------------------

def unet_forward(params, x_nchw, kernel, num_filters, num_colours, eps=1e-5):
    N, cin0, H, W = x_nchw.shape
    assert cin0 == 1 and H % 4 == 0 and W % 4 == 0
    K = kernel
    p = K // 2
    KK = K * K
    nf, nc = num_filters, num_colours
    H2, W2, H4, W4 = H // 2, W // 2, H // 4, W // 4
    R1, R2 = N * H * W, N * H2 * W2

    # ---- input im2col (+ the pool-tap-composed variant): pure data relayout
    # done once on the host; no model FLOPs are performed here.
    x = x_nchw[:, 0].astype(jnp.float32)                         # (N, H, W)
    xpad = jnp.pad(x, ((0, 0), (p, p), (p, p)))
    cols = jnp.stack([xpad[:, dy:dy + H, dx:dx + W]
                      for dy in range(K) for dx in range(K)], axis=-1)
    xcol = cols.reshape(R1, KK).astype(jnp.bfloat16)             # (R1, KK)
    xcolp = jnp.stack([cols[:, qi::2, qj::2, :]
                       for qi in range(2) for qj in range(2)], axis=0)
    xcolp = xcolp.reshape(4, R2, KK).astype(jnp.bfloat16)        # (4, R2, KK)

    # ---- weights: (Cout, Cin, K, K) -> (K*K, Cin, Cout) bf16 (tap-major).
    def w3d(w):
        cout, cin = w.shape[0], w.shape[1]
        return (jnp.transpose(w, (2, 3, 1, 0)).reshape(KK, cin, cout)
                .astype(jnp.bfloat16))

    def w2col(w):          # Cin == 1: (K*K, Cout)
        cout = w.shape[0]
        return (jnp.transpose(w, (2, 3, 1, 0)).reshape(KK, cout)
                .astype(jnp.bfloat16))

    def b2d(b):
        return b.reshape(1, -1).astype(jnp.float32)

    w1, b1 = params["down1"]
    w2, b2 = params["down2"]
    wr, br = params["rf"]
    wu1, bu1 = params["up1"]
    wu2, bu2 = params["up2"]
    wf, bf = params["final"]

    # Skip-connection convs: split the weight along Cin so the kernel never
    # materialises a channel concatenation.
    wu1a, wu1b = wu1[:, :2 * nf], wu1[:, 2 * nf:]      # cat(out3, out2)
    wu2a, wu2b = wu2[:, :nf], wu2[:, nf:]              # cat(out4, out1)
    wfa, wfb = wf[:, :nc], wf[:, nc:]                  # cat(out5, x)

    # ---- constant structural operators (numpy at trace time).
    bfc = lambda m: jnp.asarray(m, dtype=jnp.bfloat16)
    g8 = bfc(_im2col_sel(N, H2, W2, K, p, 1))          # conv at H/2
    g4 = bfc(_im2col_sel(N, H4, W4, K, p, 1))          # conv at H/4
    g8up = bfc(_im2col_sel(N, H2, W2, K, p, 2))        # conv at H/2 of up(H/4)
    gfin = bfc(_im2col_sel(N, H, W, K, p, 2))          # conv at H of up(H/2)
    pool2 = jnp.asarray(_pool_sel(N, H2, W2))          # fp32 (feeds BN stats)

    kernel_fn = _make_unet_kernel(N, H, W, K, nf, nc, eps)
    vmem = pl.BlockSpec(memory_space=pltpu.MemorySpace.VMEM)

    operands = (
        xcolp, xcol,
        w2col(w1), b2d(b1),
        g8, w3d(w2), b2d(b2),
        pool2,
        g4, w3d(wr), b2d(br),
        w3d(wu1a), w3d(wu1b), b2d(bu1),
        g8up, w3d(wu2a), w3d(wu2b), b2d(bu2),
        gfin, w3d(wfa), w2col(wfb), b2d(bf),
    )

    out2d = pl.pallas_call(
        kernel_fn,
        out_shape=jax.ShapeDtypeStruct((R1, nc), jnp.float32),
        in_specs=[vmem] * len(operands),
        out_specs=vmem,
        compiler_params=pltpu.CompilerParams(
            vmem_limit_bytes=32 * 1024 * 1024),
    )(*operands)

    return jnp.transpose(out2d.reshape(N, H, W, nc), (0, 3, 1, 2))


# ----------------------------------------------------------------------------
# Pure-JAX (XLA) reference of the same forward pass, for a numerical check.
# ----------------------------------------------------------------------------

def _reference_forward(params, x_nchw, kernel, eps=1e-5):
    p = kernel // 2

    def conv(x, w, b):
        y = jax.lax.conv_general_dilated(
            x, w, window_strides=(1, 1), padding=[(p, p), (p, p)],
            dimension_numbers=("NCHW", "OIHW", "NCHW"),
            precision=jax.lax.Precision.HIGHEST)
        return y + b.reshape(1, -1, 1, 1)

    def bn_relu(x):
        mean = jnp.mean(x, axis=(0, 2, 3), keepdims=True)
        var = jnp.mean((x - mean) ** 2, axis=(0, 2, 3), keepdims=True)
        return jnp.maximum((x - mean) / jnp.sqrt(var + eps), 0.0)

    def pool(x):
        n, c, h, w = x.shape
        return x.reshape(n, c, h // 2, 2, w // 2, 2).max(axis=(3, 5))

    def up(x):
        return jnp.repeat(jnp.repeat(x, 2, axis=2), 2, axis=3)

    out1 = bn_relu(pool(conv(x_nchw, *params["down1"])))
    out2 = bn_relu(pool(conv(out1, *params["down2"])))
    out3 = bn_relu(conv(out2, *params["rf"]))
    out4 = bn_relu(up(conv(jnp.concatenate([out3, out2], 1), *params["up1"])))
    out5 = bn_relu(up(conv(jnp.concatenate([out4, out1], 1), *params["up2"])))
    return conv(jnp.concatenate([out5, x_nchw], 1), *params["final"])


# ----------------------------------------------------------------------------
# Main
# ----------------------------------------------------------------------------

if __name__ == "__main__":
    KERNEL = 3
    NUM_FILTERS = 4
    NUM_COLOURS = 3
    N, H, W = 2, 16, 16

    root = jax.random.PRNGKey(0)
    k_param, k_x = jax.random.split(root)
    params = init_unet_params(k_param, KERNEL, NUM_FILTERS, NUM_COLOURS)
    x = jax.random.normal(k_x, (N, 1, H, W), dtype=jnp.float32)

    fwd = jax.jit(lambda p, xx: unet_forward(p, xx, KERNEL, NUM_FILTERS,
                                             NUM_COLOURS))
    out = fwd(params, x)
    jax.block_until_ready(out)

    assert out.shape == (N, NUM_COLOURS, H, W), out.shape
    assert out.dtype == jnp.float32

    # Cross-check against the plain-XLA reference (loose tolerance: the
    # kernel's conv matmul operands are bf16; accumulation and BN are fp32).
    ref = jax.jit(lambda p, xx: _reference_forward(p, xx, KERNEL))(params, x)
    np.testing.assert_allclose(np.asarray(out), np.asarray(ref),
                               rtol=0.1, atol=0.1)

    print("KERNEL_OK")
</pallas_src>

<mosaic_0001>
module attributes {stable_mosaic.version = 11 : i64} {
  func.func @kernel(%arg0: memref<4x128x9xbf16, #tpu.memory_space<vmem>>, %arg1: memref<512x9xbf16, #tpu.memory_space<vmem>>, %arg2: memref<9x4xbf16, #tpu.memory_space<vmem>>, %arg3: memref<1x4xf32, #tpu.memory_space<vmem>>, %arg4: memref<9x128x128xbf16, #tpu.memory_space<vmem>>, %arg5: memref<9x4x8xbf16, #tpu.memory_space<vmem>>, %arg6: memref<1x8xf32, #tpu.memory_space<vmem>>, %arg7: memref<4x32x128xf32, #tpu.memory_space<vmem>>, %arg8: memref<9x32x32xbf16, #tpu.memory_space<vmem>>, %arg9: memref<9x8x8xbf16, #tpu.memory_space<vmem>>, %arg10: memref<1x8xf32, #tpu.memory_space<vmem>>, %arg11: memref<9x8x4xbf16, #tpu.memory_space<vmem>>, %arg12: memref<9x8x4xbf16, #tpu.memory_space<vmem>>, %arg13: memref<1x4xf32, #tpu.memory_space<vmem>>, %arg14: memref<9x128x32xbf16, #tpu.memory_space<vmem>>, %arg15: memref<9x4x3xbf16, #tpu.memory_space<vmem>>, %arg16: memref<9x4x3xbf16, #tpu.memory_space<vmem>>, %arg17: memref<1x3xf32, #tpu.memory_space<vmem>>, %arg18: memref<9x512x128xbf16, #tpu.memory_space<vmem>>, %arg19: memref<9x3x3xbf16, #tpu.memory_space<vmem>>, %arg20: memref<9x3xbf16, #tpu.memory_space<vmem>>, %arg21: memref<1x3xf32, #tpu.memory_space<vmem>>, %arg22: memref<512x3xf32, #tpu.memory_space<vmem>>) attributes {dimension_semantics = [], scalar_prefetch = 0 : i64, scratch_operands = 0 : i64, tpu.core_type = #tpu.core_type<tc>} {
    %c0 = arith.constant 0 : index
    %c0_0 = arith.constant 0 : index
    %0 = vector.load %arg2[%c0, %c0_0] : memref<9x4xbf16, #tpu.memory_space<vmem>>, vector<9x4xbf16>
    %c0_1 = arith.constant 0 : index
    %c0_2 = arith.constant 0 : index
    %c0_3 = arith.constant 0 : index
    %1 = vector.load %arg0[%c0_1, %c0_2, %c0_3] : memref<4x128x9xbf16, #tpu.memory_space<vmem>>, vector<1x128x9xbf16>
    %2 = vector.shape_cast %1 : vector<1x128x9xbf16> to vector<128x9xbf16>
    %cst = arith.constant dense<0.000000e+00> : vector<128x4xf32>
    %3 = tpu.matmul %2, %0, %cst {dimension_numbers = #tpu.dot_dimension_numbers<[1], [0], [0], [1], [0, 0, 1, 1], [], []>} : vector<128x9xbf16>, vector<9x4xbf16>, vector<128x4xf32> -> vector<128x4xf32>
    %c1 = arith.constant 1 : index
    %c0_4 = arith.constant 0 : index
    %c0_5 = arith.constant 0 : index
    %4 = vector.load %arg0[%c1, %c0_4, %c0_5] : memref<4x128x9xbf16, #tpu.memory_space<vmem>>, vector<1x128x9xbf16>
    %5 = vector.shape_cast %4 : vector<1x128x9xbf16> to vector<128x9xbf16>
    %cst_6 = arith.constant dense<0.000000e+00> : vector<128x4xf32>
    %6 = tpu.matmul %5, %0, %cst_6 {dimension_numbers = #tpu.dot_dimension_numbers<[1], [0], [0], [1], [0, 0, 1, 1], [], []>} : vector<128x9xbf16>, vector<9x4xbf16>, vector<128x4xf32> -> vector<128x4xf32>
    %7 = arith.maximumf %3, %6 : vector<128x4xf32>
    %c2 = arith.constant 2 : index
    %c0_7 = arith.constant 0 : index
    %c0_8 = arith.constant 0 : index
    %8 = vector.load %arg0[%c2, %c0_7, %c0_8] : memref<4x128x9xbf16, #tpu.memory_space<vmem>>, vector<1x128x9xbf16>
    %9 = vector.shape_cast %8 : vector<1x128x9xbf16> to vector<128x9xbf16>
    %cst_9 = arith.constant dense<0.000000e+00> : vector<128x4xf32>
    %10 = tpu.matmul %9, %0, %cst_9 {dimension_numbers = #tpu.dot_dimension_numbers<[1], [0], [0], [1], [0, 0, 1, 1], [], []>} : vector<128x9xbf16>, vector<9x4xbf16>, vector<128x4xf32> -> vector<128x4xf32>
    %11 = arith.maximumf %7, %10 : vector<128x4xf32>
    %c3 = arith.constant 3 : index
    %c0_10 = arith.constant 0 : index
    %c0_11 = arith.constant 0 : index
    %12 = vector.load %arg0[%c3, %c0_10, %c0_11] : memref<4x128x9xbf16, #tpu.memory_space<vmem>>, vector<1x128x9xbf16>
    %13 = vector.shape_cast %12 : vector<1x128x9xbf16> to vector<128x9xbf16>
    %cst_12 = arith.constant dense<0.000000e+00> : vector<128x4xf32>
    %14 = tpu.matmul %13, %0, %cst_12 {dimension_numbers = #tpu.dot_dimension_numbers<[1], [0], [0], [1], [0, 0, 1, 1], [], []>} : vector<128x9xbf16>, vector<9x4xbf16>, vector<128x4xf32> -> vector<128x4xf32>
    %15 = arith.maximumf %11, %14 : vector<128x4xf32>
    %c0_13 = arith.constant 0 : index
    %c0_14 = arith.constant 0 : index
    %16 = vector.load %arg3[%c0_13, %c0_14] : memref<1x4xf32, #tpu.memory_space<vmem>>, vector<1x4xf32>
    %17 = vector.broadcast %16 : vector<1x4xf32> to vector<128x4xf32>
    %18 = arith.addf %15, %17 : vector<128x4xf32>
    %cst_15 = arith.constant dense<0.000000e+00> : vector<4xf32>
    %19 = vector.multi_reduction <add>, %18, %cst_15 [0] : vector<128x4xf32> to vector<4xf32>
    %20 = vector.shape_cast %19 : vector<4xf32> to vector<1x4xf32>
    %cst_16 = arith.constant 1.280000e+02 : f32
    %21 = vector.broadcast %cst_16 : f32 to vector<1x4xf32>
    %22 = arith.divf %20, %21 : vector<1x4xf32>
    %23 = vector.broadcast %22 : vector<1x4xf32> to vector<128x4xf32>
    %24 = arith.subf %18, %23 : vector<128x4xf32>
    %25 = arith.mulf %24, %24 : vector<128x4xf32>
    %cst_17 = arith.constant dense<0.000000e+00> : vector<4xf32>
    %26 = vector.multi_reduction <add>, %25, %cst_17 [0] : vector<128x4xf32> to vector<4xf32>
    %27 = vector.shape_cast %26 : vector<4xf32> to vector<1x4xf32>
    %cst_18 = arith.constant 1.280000e+02 : f32
    %28 = vector.broadcast %cst_18 : f32 to vector<1x4xf32>
    %29 = arith.divf %27, %28 : vector<1x4xf32>
    %cst_19 = arith.constant 9.99999974E-6 : f32
    %30 = vector.broadcast %cst_19 : f32 to vector<1x4xf32>
    %31 = arith.addf %29, %30 : vector<1x4xf32>
    %32 = math.rsqrt %31 : vector<1x4xf32>
    %33 = vector.broadcast %32 : vector<1x4xf32> to vector<128x4xf32>
    %34 = arith.mulf %24, %33 : vector<128x4xf32>
    %cst_20 = arith.constant 0.000000e+00 : f32
    %35 = vector.broadcast %cst_20 : f32 to vector<128x4xf32>
    %36 = arith.maximumf %34, %35 : vector<128x4xf32>
    %cst_21 = arith.constant 0.000000e+00 : f32
    %37 = vector.broadcast %cst_21 : f32 to vector<128x8xf32>
    %38 = arith.truncf %36 : vector<128x4xf32> to vector<128x4xbf16>
    %c0_22 = arith.constant 0 : index
    %c0_23 = arith.constant 0 : index
    %c0_24 = arith.constant 0 : index
    %39 = vector.load %arg4[%c0_22, %c0_23, %c0_24] : memref<9x128x128xbf16, #tpu.memory_space<vmem>>, vector<1x128x128xbf16>
    %40 = vector.shape_cast %39 : vector<1x128x128xbf16> to vector<128x128xbf16>
    %cst_25 = arith.constant dense<0.000000e+00> : vector<128x4xf32>
    %41 = tpu.matmul %40, %38, %cst_25 {dimension_numbers = #tpu.dot_dimension_numbers<[1], [0], [0], [1], [0, 0, 1, 1], [], []>} : vector<128x128xbf16>, vector<128x4xbf16>, vector<128x4xf32> -> vector<128x4xf32>
    %42 = arith.truncf %41 : vector<128x4xf32> to vector<128x4xbf16>
    %c0_26 = arith.constant 0 : index
    %c0_27 = arith.constant 0 : index
    %c0_28 = arith.constant 0 : index
    %43 = vector.load %arg5[%c0_26, %c0_27, %c0_28] : memref<9x4x8xbf16, #tpu.memory_space<vmem>>, vector<1x4x8xbf16>
    %44 = vector.shape_cast %43 : vector<1x4x8xbf16> to vector<4x8xbf16>
    %cst_29 = arith.constant dense<0.000000e+00> : vector<128x8xf32>
    %45 = tpu.matmul %42, %44, %cst_29 {dimension_numbers = #tpu.dot_dimension_numbers<[1], [0], [0], [1], [0, 0, 1, 1], [], []>} : vector<128x4xbf16>, vector<4x8xbf16>, vector<128x8xf32> -> vector<128x8xf32>
    %46 = arith.addf %37, %45 : vector<128x8xf32>
    %c1_30 = arith.constant 1 : index
    %c0_31 = arith.constant 0 : index
    %c0_32 = arith.constant 0 : index
    %47 = vector.load %arg4[%c1_30, %c0_31, %c0_32] : memref<9x128x128xbf16, #tpu.memory_space<vmem>>, vector<1x128x128xbf16>
    %48 = vector.shape_cast %47 : vector<1x128x128xbf16> to vector<128x128xbf16>
    %cst_33 = arith.constant dense<0.000000e+00> : vector<128x4xf32>
    %49 = tpu.matmul %48, %38, %cst_33 {dimension_numbers = #tpu.dot_dimension_numbers<[1], [0], [0], [1], [0, 0, 1, 1], [], []>} : vector<128x128xbf16>, vector<128x4xbf16>, vector<128x4xf32> -> vector<128x4xf32>
    %50 = arith.truncf %49 : vector<128x4xf32> to vector<128x4xbf16>
    %c1_34 = arith.constant 1 : index
    %c0_35 = arith.constant 0 : index
    %c0_36 = arith.constant 0 : index
    %51 = vector.load %arg5[%c1_34, %c0_35, %c0_36] : memref<9x4x8xbf16, #tpu.memory_space<vmem>>, vector<1x4x8xbf16>
    %52 = vector.shape_cast %51 : vector<1x4x8xbf16> to vector<4x8xbf16>
    %cst_37 = arith.constant dense<0.000000e+00> : vector<128x8xf32>
    %53 = tpu.matmul %50, %52, %cst_37 {dimension_numbers = #tpu.dot_dimension_numbers<[1], [0], [0], [1], [0, 0, 1, 1], [], []>} : vector<128x4xbf16>, vector<4x8xbf16>, vector<128x8xf32> -> vector<128x8xf32>
    %54 = arith.addf %46, %53 : vector<128x8xf32>
    %c2_38 = arith.constant 2 : index
    %c0_39 = arith.constant 0 : index
    %c0_40 = arith.constant 0 : index
    %55 = vector.load %arg4[%c2_38, %c0_39, %c0_40] : memref<9x128x128xbf16, #tpu.memory_space<vmem>>, vector<1x128x128xbf16>
    %56 = vector.shape_cast %55 : vector<1x128x128xbf16> to vector<128x128xbf16>
    %cst_41 = arith.constant dense<0.000000e+00> : vector<128x4xf32>
    %57 = tpu.matmul %56, %38, %cst_41 {dimension_numbers = #tpu.dot_dimension_numbers<[1], [0], [0], [1], [0, 0, 1, 1], [], []>} : vector<128x128xbf16>, vector<128x4xbf16>, vector<128x4xf32> -> vector<128x4xf32>
    %58 = arith.truncf %57 : vector<128x4xf32> to vector<128x4xbf16>
    %c2_42 = arith.constant 2 : index
    %c0_43 = arith.constant 0 : index
    %c0_44 = arith.constant 0 : index
    %59 = vector.load %arg5[%c2_42, %c0_43, %c0_44] : memref<9x4x8xbf16, #tpu.memory_space<vmem>>, vector<1x4x8xbf16>
    %60 = vector.shape_cast %59 : vector<1x4x8xbf16> to vector<4x8xbf16>
    %cst_45 = arith.constant dense<0.000000e+00> : vector<128x8xf32>
    %61 = tpu.matmul %58, %60, %cst_45 {dimension_numbers = #tpu.dot_dimension_numbers<[1], [0], [0], [1], [0, 0, 1, 1], [], []>} : vector<128x4xbf16>, vector<4x8xbf16>, vector<128x8xf32> -> vector<128x8xf32>
    %62 = arith.addf %54, %61 : vector<128x8xf32>
    %c3_46 = arith.constant 3 : index
    %c0_47 = arith.constant 0 : index
    %c0_48 = arith.constant 0 : index
    %63 = vector.load %arg4[%c3_46, %c0_47, %c0_48] : memref<9x128x128xbf16, #tpu.memory_space<vmem>>, vector<1x128x128xbf16>
    %64 = vector.shape_cast %63 : vector<1x128x128xbf16> to vector<128x128xbf16>
    %cst_49 = arith.constant dense<0.000000e+00> : vector<128x4xf32>
    %65 = tpu.matmul %64, %38, %cst_49 {dimension_numbers = #tpu.dot_dimension_numbers<[1], [0], [0], [1], [0, 0, 1, 1], [], []>} : vector<128x128xbf16>, vector<128x4xbf16>, vector<128x4xf32> -> vector<128x4xf32>
    %66 = arith.truncf %65 : vector<128x4xf32> to vector<128x4xbf16>
    %c3_50 = arith.constant 3 : index
    %c0_51 = arith.constant 0 : index
    %c0_52 = arith.constant 0 : index
    %67 = vector.load %arg5[%c3_50, %c0_51, %c0_52] : memref<9x4x8xbf16, #tpu.memory_space<vmem>>, vector<1x4x8xbf16>
    %68 = vector.shape_cast %67 : vector<1x4x8xbf16> to vector<4x8xbf16>
    %cst_53 = arith.constant dense<0.000000e+00> : vector<128x8xf32>
    %69 = tpu.matmul %66, %68, %cst_53 {dimension_numbers = #tpu.dot_dimension_numbers<[1], [0], [0], [1], [0, 0, 1, 1], [], []>} : vector<128x4xbf16>, vector<4x8xbf16>, vector<128x8xf32> -> vector<128x8xf32>
    %70 = arith.addf %62, %69 : vector<128x8xf32>
    %c4 = arith.constant 4 : index
    %c0_54 = arith.constant 0 : index
    %c0_55 = arith.constant 0 : index
    %71 = vector.load %arg4[%c4, %c0_54, %c0_55] : memref<9x128x128xbf16, #tpu.memory_space<vmem>>, vector<1x128x128xbf16>
    %72 = vector.shape_cast %71 : vector<1x128x128xbf16> to vector<128x128xbf16>
    %cst_56 = arith.constant dense<0.000000e+00> : vector<128x4xf32>
    %73 = tpu.matmul %72, %38, %cst_56 {dimension_numbers = #tpu.dot_dimension_numbers<[1], [0], [0], [1], [0, 0, 1, 1], [], []>} : vector<128x128xbf16>, vector<128x4xbf16>, vector<128x4xf32> -> vector<128x4xf32>
    %74 = arith.truncf %73 : vector<128x4xf32> to vector<128x4xbf16>
    %c4_57 = arith.constant 4 : index
    %c0_58 = arith.constant 0 : index
    %c0_59 = arith.constant 0 : index
    %75 = vector.load %arg5[%c4_57, %c0_58, %c0_59] : memref<9x4x8xbf16, #tpu.memory_space<vmem>>, vector<1x4x8xbf16>
    %76 = vector.shape_cast %75 : vector<1x4x8xbf16> to vector<4x8xbf16>
    %cst_60 = arith.constant dense<0.000000e+00> : vector<128x8xf32>
    %77 = tpu.matmul %74, %76, %cst_60 {dimension_numbers = #tpu.dot_dimension_numbers<[1], [0], [0], [1], [0, 0, 1, 1], [], []>} : vector<128x4xbf16>, vector<4x8xbf16>, vector<128x8xf32> -> vector<128x8xf32>
    %78 = arith.addf %70, %77 : vector<128x8xf32>
    %c5 = arith.constant 5 : index
    %c0_61 = arith.constant 0 : index
    %c0_62 = arith.constant 0 : index
    %79 = vector.load %arg4[%c5, %c0_61, %c0_62] : memref<9x128x128xbf16, #tpu.memory_space<vmem>>, vector<1x128x128xbf16>
    %80 = vector.shape_cast %79 : vector<1x128x128xbf16> to vector<128x128xbf16>
    %cst_63 = arith.constant dense<0.000000e+00> : vector<128x4xf32>
    %81 = tpu.matmul %80, %38, %cst_63 {dimension_numbers = #tpu.dot_dimension_numbers<[1], [0], [0], [1], [0, 0, 1, 1], [], []>} : vector<128x128xbf16>, vector<128x4xbf16>, vector<128x4xf32> -> vector<128x4xf32>
    %82 = arith.truncf %81 : vector<128x4xf32> to vector<128x4xbf16>
    %c5_64 = arith.constant 5 : index
    %c0_65 = arith.constant 0 : index
    %c0_66 = arith.constant 0 : index
    %83 = vector.load %arg5[%c5_64, %c0_65, %c0_66] : memref<9x4x8xbf16, #tpu.memory_space<vmem>>, vector<1x4x8xbf16>
    %84 = vector.shape_cast %83 : vector<1x4x8xbf16> to vector<4x8xbf16>
    %cst_67 = arith.constant dense<0.000000e+00> : vector<128x8xf32>
    %85 = tpu.matmul %82, %84, %cst_67 {dimension_numbers = #tpu.dot_dimension_numbers<[1], [0], [0], [1], [0, 0, 1, 1], [], []>} : vector<128x4xbf16>, vector<4x8xbf16>, vector<128x8xf32> -> vector<128x8xf32>
    %86 = arith.addf %78, %85 : vector<128x8xf32>
    %c6 = arith.constant 6 : index
    %c0_68 = arith.constant 0 : index
    %c0_69 = arith.constant 0 : index
    %87 = vector.load %arg4[%c6, %c0_68, %c0_69] : memref<9x128x128xbf16, #tpu.memory_space<vmem>>, vector<1x128x128xbf16>
    %88 = vector.shape_cast %87 : vector<1x128x128xbf16> to vector<128x128xbf16>
    %cst_70 = arith.constant dense<0.000000e+00> : vector<128x4xf32>
    %89 = tpu.matmul %88, %38, %cst_70 {dimension_numbers = #tpu.dot_dimension_numbers<[1], [0], [0], [1], [0, 0, 1, 1], [], []>} : vector<128x128xbf16>, vector<128x4xbf16>, vector<128x4xf32> -> vector<128x4xf32>
    %90 = arith.truncf %89 : vector<128x4xf32> to vector<128x4xbf16>
    %c6_71 = arith.constant 6 : index
    %c0_72 = arith.constant 0 : index
    %c0_73 = arith.constant 0 : index
    %91 = vector.load %arg5[%c6_71, %c0_72, %c0_73] : memref<9x4x8xbf16, #tpu.memory_space<vmem>>, vector<1x4x8xbf16>
    %92 = vector.shape_cast %91 : vector<1x4x8xbf16> to vector<4x8xbf16>
    %cst_74 = arith.constant dense<0.000000e+00> : vector<128x8xf32>
    %93 = tpu.matmul %90, %92, %cst_74 {dimension_numbers = #tpu.dot_dimension_numbers<[1], [0], [0], [1], [0, 0, 1, 1], [], []>} : vector<128x4xbf16>, vector<4x8xbf16>, vector<128x8xf32> -> vector<128x8xf32>
    %94 = arith.addf %86, %93 : vector<128x8xf32>
    %c7 = arith.constant 7 : index
    %c0_75 = arith.constant 0 : index
    %c0_76 = arith.constant 0 : index
    %95 = vector.load %arg4[%c7, %c0_75, %c0_76] : memref<9x128x128xbf16, #tpu.memory_space<vmem>>, vector<1x128x128xbf16>
    %96 = vector.shape_cast %95 : vector<1x128x128xbf16> to vector<128x128xbf16>
    %cst_77 = arith.constant dense<0.000000e+00> : vector<128x4xf32>
    %97 = tpu.matmul %96, %38, %cst_77 {dimension_numbers = #tpu.dot_dimension_numbers<[1], [0], [0], [1], [0, 0, 1, 1], [], []>} : vector<128x128xbf16>, vector<128x4xbf16>, vector<128x4xf32> -> vector<128x4xf32>
    %98 = arith.truncf %97 : vector<128x4xf32> to vector<128x4xbf16>
    %c7_78 = arith.constant 7 : index
    %c0_79 = arith.constant 0 : index
    %c0_80 = arith.constant 0 : index
    %99 = vector.load %arg5[%c7_78, %c0_79, %c0_80] : memref<9x4x8xbf16, #tpu.memory_space<vmem>>, vector<1x4x8xbf16>
    %100 = vector.shape_cast %99 : vector<1x4x8xbf16> to vector<4x8xbf16>
    %cst_81 = arith.constant dense<0.000000e+00> : vector<128x8xf32>
    %101 = tpu.matmul %98, %100, %cst_81 {dimension_numbers = #tpu.dot_dimension_numbers<[1], [0], [0], [1], [0, 0, 1, 1], [], []>} : vector<128x4xbf16>, vector<4x8xbf16>, vector<128x8xf32> -> vector<128x8xf32>
    %102 = arith.addf %94, %101 : vector<128x8xf32>
    %c8 = arith.constant 8 : index
    %c0_82 = arith.constant 0 : index
    %c0_83 = arith.constant 0 : index
    %103 = vector.load %arg4[%c8, %c0_82, %c0_83] : memref<9x128x128xbf16, #tpu.memory_space<vmem>>, vector<1x128x128xbf16>
    %104 = vector.shape_cast %103 : vector<1x128x128xbf16> to vector<128x128xbf16>
    %cst_84 = arith.constant dense<0.000000e+00> : vector<128x4xf32>
    %105 = tpu.matmul %104, %38, %cst_84 {dimension_numbers = #tpu.dot_dimension_numbers<[1], [0], [0], [1], [0, 0, 1, 1], [], []>} : vector<128x128xbf16>, vector<128x4xbf16>, vector<128x4xf32> -> vector<128x4xf32>
    %106 = arith.truncf %105 : vector<128x4xf32> to vector<128x4xbf16>
    %c8_85 = arith.constant 8 : index
    %c0_86 = arith.constant 0 : index
    %c0_87 = arith.constant 0 : index
    %107 = vector.load %arg5[%c8_85, %c0_86, %c0_87] : memref<9x4x8xbf16, #tpu.memory_space<vmem>>, vector<1x4x8xbf16>
    %108 = vector.shape_cast %107 : vector<1x4x8xbf16> to vector<4x8xbf16>
    %cst_88 = arith.constant dense<0.000000e+00> : vector<128x8xf32>
    %109 = tpu.matmul %106, %108, %cst_88 {dimension_numbers = #tpu.dot_dimension_numbers<[1], [0], [0], [1], [0, 0, 1, 1], [], []>} : vector<128x4xbf16>, vector<4x8xbf16>, vector<128x8xf32> -> vector<128x8xf32>
    %110 = arith.addf %102, %109 : vector<128x8xf32>
    %c0_89 = arith.constant 0 : index
    %c0_90 = arith.constant 0 : index
    %111 = vector.load %arg6[%c0_89, %c0_90] : memref<1x8xf32, #tpu.memory_space<vmem>>, vector<1x8xf32>
    %112 = vector.broadcast %111 : vector<1x8xf32> to vector<128x8xf32>
    %113 = arith.addf %110, %112 : vector<128x8xf32>
    %c0_91 = arith.constant 0 : index
    %c0_92 = arith.constant 0 : index
    %c0_93 = arith.constant 0 : index
    %114 = vector.load %arg7[%c0_91, %c0_92, %c0_93] : memref<4x32x128xf32, #tpu.memory_space<vmem>>, vector<1x32x128xf32>
    %115 = vector.shape_cast %114 : vector<1x32x128xf32> to vector<32x128xf32>
    %cst_94 = arith.constant dense<0.000000e+00> : vector<32x8xf32>
    %116 = tpu.matmul %115, %113, %cst_94 {dimension_numbers = #tpu.dot_dimension_numbers<[1], [0], [0], [1], [0, 0, 1, 1], [], []>} : vector<32x128xf32>, vector<128x8xf32>, vector<32x8xf32> -> vector<32x8xf32>
    %c1_95 = arith.constant 1 : index
    %c0_96 = arith.constant 0 : index
    %c0_97 = arith.constant 0 : index
    %117 = vector.load %arg7[%c1_95, %c0_96, %c0_97] : memref<4x32x128xf32, #tpu.memory_space<vmem>>, vector<1x32x128xf32>
    %118 = vector.shape_cast %117 : vector<1x32x128xf32> to vector<32x128xf32>
    %cst_98 = arith.constant dense<0.000000e+00> : vector<32x8xf32>
    %119 = tpu.matmul %118, %113, %cst_98 {dimension_numbers = #tpu.dot_dimension_numbers<[1], [0], [0], [1], [0, 0, 1, 1], [], []>} : vector<32x128xf32>, vector<128x8xf32>, vector<32x8xf32> -> vector<32x8xf32>
    %120 = arith.maximumf %116, %119 : vector<32x8xf32>
    %c2_99 = arith.constant 2 : index
    %c0_100 = arith.constant 0 : index
    %c0_101 = arith.constant 0 : index
    %121 = vector.load %arg7[%c2_99, %c0_100, %c0_101] : memref<4x32x128xf32, #tpu.memory_space<vmem>>, vector<1x32x128xf32>
    %122 = vector.shape_cast %121 : vector<1x32x128xf32> to vector<32x128xf32>
    %cst_102 = arith.constant dense<0.000000e+00> : vector<32x8xf32>
    %123 = tpu.matmul %122, %113, %cst_102 {dimension_numbers = #tpu.dot_dimension_numbers<[1], [0], [0], [1], [0, 0, 1, 1], [], []>} : vector<32x128xf32>, vector<128x8xf32>, vector<32x8xf32> -> vector<32x8xf32>
    %124 = arith.maximumf %120, %123 : vector<32x8xf32>
    %c3_103 = arith.constant 3 : index
    %c0_104 = arith.constant 0 : index
    %c0_105 = arith.constant 0 : index
    %125 = vector.load %arg7[%c3_103, %c0_104, %c0_105] : memref<4x32x128xf32, #tpu.memory_space<vmem>>, vector<1x32x128xf32>
    %126 = vector.shape_cast %125 : vector<1x32x128xf32> to vector<32x128xf32>
    %cst_106 = arith.constant dense<0.000000e+00> : vector<32x8xf32>
    %127 = tpu.matmul %126, %113, %cst_106 {dimension_numbers = #tpu.dot_dimension_numbers<[1], [0], [0], [1], [0, 0, 1, 1], [], []>} : vector<32x128xf32>, vector<128x8xf32>, vector<32x8xf32> -> vector<32x8xf32>
    %128 = arith.maximumf %124, %127 : vector<32x8xf32>
    %cst_107 = arith.constant dense<0.000000e+00> : vector<8xf32>
    %129 = vector.multi_reduction <add>, %128, %cst_107 [0] : vector<32x8xf32> to vector<8xf32>
    %130 = vector.shape_cast %129 : vector<8xf32> to vector<1x8xf32>
    %cst_108 = arith.constant 3.200000e+01 : f32
    %131 = vector.broadcast %cst_108 : f32 to vector<1x8xf32>
    %132 = arith.divf %130, %131 : vector<1x8xf32>
    %133 = vector.broadcast %132 : vector<1x8xf32> to vector<32x8xf32>
    %134 = arith.subf %128, %133 : vector<32x8xf32>
    %135 = arith.mulf %134, %134 : vector<32x8xf32>
    %cst_109 = arith.constant dense<0.000000e+00> : vector<8xf32>
    %136 = vector.multi_reduction <add>, %135, %cst_109 [0] : vector<32x8xf32> to vector<8xf32>
    %137 = vector.shape_cast %136 : vector<8xf32> to vector<1x8xf32>
    %cst_110 = arith.constant 3.200000e+01 : f32
    %138 = vector.broadcast %cst_110 : f32 to vector<1x8xf32>
    %139 = arith.divf %137, %138 : vector<1x8xf32>
    %cst_111 = arith.constant 9.99999974E-6 : f32
    %140 = vector.broadcast %cst_111 : f32 to vector<1x8xf32>
    %141 = arith.addf %139, %140 : vector<1x8xf32>
    %142 = math.rsqrt %141 : vector<1x8xf32>
    %143 = vector.broadcast %142 : vector<1x8xf32> to vector<32x8xf32>
    %144 = arith.mulf %134, %143 : vector<32x8xf32>
    %cst_112 = arith.constant 0.000000e+00 : f32
    %145 = vector.broadcast %cst_112 : f32 to vector<32x8xf32>
    %146 = arith.maximumf %144, %145 : vector<32x8xf32>
    %cst_113 = arith.constant 0.000000e+00 : f32
    %147 = vector.broadcast %cst_113 : f32 to vector<32x8xf32>
    %148 = arith.truncf %146 : vector<32x8xf32> to vector<32x8xbf16>
    %c0_114 = arith.constant 0 : index
    %c0_115 = arith.constant 0 : index
    %c0_116 = arith.constant 0 : index
    %149 = vector.load %arg8[%c0_114, %c0_115, %c0_116] : memref<9x32x32xbf16, #tpu.memory_space<vmem>>, vector<1x32x32xbf16>
    %150 = vector.shape_cast %149 : vector<1x32x32xbf16> to vector<32x32xbf16>
    %cst_117 = arith.constant dense<0.000000e+00> : vector<32x8xf32>
    %151 = tpu.matmul %150, %148, %cst_117 {dimension_numbers = #tpu.dot_dimension_numbers<[1], [0], [0], [1], [0, 0, 1, 1], [], []>} : vector<32x32xbf16>, vector<32x8xbf16>, vector<32x8xf32> -> vector<32x8xf32>
    %152 = arith.truncf %151 : vector<32x8xf32> to vector<32x8xbf16>
    %c0_118 = arith.constant 0 : index
    %c0_119 = arith.constant 0 : index
    %c0_120 = arith.constant 0 : index
    %153 = vector.load %arg9[%c0_118, %c0_119, %c0_120] : memref<9x8x8xbf16, #tpu.memory_space<vmem>>, vector<1x8x8xbf16>
    %154 = vector.shape_cast %153 : vector<1x8x8xbf16> to vector<8x8xbf16>
    %cst_121 = arith.constant dense<0.000000e+00> : vector<32x8xf32>
    %155 = tpu.matmul %152, %154, %cst_121 {dimension_numbers = #tpu.dot_dimension_numbers<[1], [0], [0], [1], [0, 0, 1, 1], [], []>} : vector<32x8xbf16>, vector<8x8xbf16>, vector<32x8xf32> -> vector<32x8xf32>
    %156 = arith.addf %147, %155 : vector<32x8xf32>
    %c1_122 = arith.constant 1 : index
    %c0_123 = arith.constant 0 : index
    %c0_124 = arith.constant 0 : index
    %157 = vector.load %arg8[%c1_122, %c0_123, %c0_124] : memref<9x32x32xbf16, #tpu.memory_space<vmem>>, vector<1x32x32xbf16>
    %158 = vector.shape_cast %157 : vector<1x32x32xbf16> to vector<32x32xbf16>
    %cst_125 = arith.constant dense<0.000000e+00> : vector<32x8xf32>
    %159 = tpu.matmul %158, %148, %cst_125 {dimension_numbers = #tpu.dot_dimension_numbers<[1], [0], [0], [1], [0, 0, 1, 1], [], []>} : vector<32x32xbf16>, vector<32x8xbf16>, vector<32x8xf32> -> vector<32x8xf32>
    %160 = arith.truncf %159 : vector<32x8xf32> to vector<32x8xbf16>
    %c1_126 = arith.constant 1 : index
    %c0_127 = arith.constant 0 : index
    %c0_128 = arith.constant 0 : index
    %161 = vector.load %arg9[%c1_126, %c0_127, %c0_128] : memref<9x8x8xbf16, #tpu.memory_space<vmem>>, vector<1x8x8xbf16>
    %162 = vector.shape_cast %161 : vector<1x8x8xbf16> to vector<8x8xbf16>
    %cst_129 = arith.constant dense<0.000000e+00> : vector<32x8xf32>
    %163 = tpu.matmul %160, %162, %cst_129 {dimension_numbers = #tpu.dot_dimension_numbers<[1], [0], [0], [1], [0, 0, 1, 1], [], []>} : vector<32x8xbf16>, vector<8x8xbf16>, vector<32x8xf32> -> vector<32x8xf32>
    %164 = arith.addf %156, %163 : vector<32x8xf32>
    %c2_130 = arith.constant 2 : index
    %c0_131 = arith.constant 0 : index
    %c0_132 = arith.constant 0 : index
    %165 = vector.load %arg8[%c2_130, %c0_131, %c0_132] : memref<9x32x32xbf16, #tpu.memory_space<vmem>>, vector<1x32x32xbf16>
    %166 = vector.shape_cast %165 : vector<1x32x32xbf16> to vector<32x32xbf16>
    %cst_133 = arith.constant dense<0.000000e+00> : vector<32x8xf32>
    %167 = tpu.matmul %166, %148, %cst_133 {dimension_numbers = #tpu.dot_dimension_numbers<[1], [0], [0], [1], [0, 0, 1, 1], [], []>} : vector<32x32xbf16>, vector<32x8xbf16>, vector<32x8xf32> -> vector<32x8xf32>
    %168 = arith.truncf %167 : vector<32x8xf32> to vector<32x8xbf16>
    %c2_134 = arith.constant 2 : index
    %c0_135 = arith.constant 0 : index
    %c0_136 = arith.constant 0 : index
    %169 = vector.load %arg9[%c2_134, %c0_135, %c0_136] : memref<9x8x8xbf16, #tpu.memory_space<vmem>>, vector<1x8x8xbf16>
    %170 = vector.shape_cast %169 : vector<1x8x8xbf16> to vector<8x8xbf16>
    %cst_137 = arith.constant dense<0.000000e+00> : vector<32x8xf32>
    %171 = tpu.matmul %168, %170, %cst_137 {dimension_numbers = #tpu.dot_dimension_numbers<[1], [0], [0], [1], [0, 0, 1, 1], [], []>} : vector<32x8xbf16>, vector<8x8xbf16>, vector<32x8xf32> -> vector<32x8xf32>
    %172 = arith.addf %164, %171 : vector<32x8xf32>
    %c3_138 = arith.constant 3 : index
    %c0_139 = arith.constant 0 : index
    %c0_140 = arith.constant 0 : index
    %173 = vector.load %arg8[%c3_138, %c0_139, %c0_140] : memref<9x32x32xbf16, #tpu.memory_space<vmem>>, vector<1x32x32xbf16>
    %174 = vector.shape_cast %173 : vector<1x32x32xbf16> to vector<32x32xbf16>
    %cst_141 = arith.constant dense<0.000000e+00> : vector<32x8xf32>
    %175 = tpu.matmul %174, %148, %cst_141 {dimension_numbers = #tpu.dot_dimension_numbers<[1], [0], [0], [1], [0, 0, 1, 1], [], []>} : vector<32x32xbf16>, vector<32x8xbf16>, vector<32x8xf32> -> vector<32x8xf32>
    %176 = arith.truncf %175 : vector<32x8xf32> to vector<32x8xbf16>
    %c3_142 = arith.constant 3 : index
    %c0_143 = arith.constant 0 : index
    %c0_144 = arith.constant 0 : index
    %177 = vector.load %arg9[%c3_142, %c0_143, %c0_144] : memref<9x8x8xbf16, #tpu.memory_space<vmem>>, vector<1x8x8xbf16>
    %178 = vector.shape_cast %177 : vector<1x8x8xbf16> to vector<8x8xbf16>
    %cst_145 = arith.constant dense<0.000000e+00> : vector<32x8xf32>
    %179 = tpu.matmul %176, %178, %cst_145 {dimension_numbers = #tpu.dot_dimension_numbers<[1], [0], [0], [1], [0, 0, 1, 1], [], []>} : vector<32x8xbf16>, vector<8x8xbf16>, vector<32x8xf32> -> vector<32x8xf32>
    %180 = arith.addf %172, %179 : vector<32x8xf32>
    %c4_146 = arith.constant 4 : index
    %c0_147 = arith.constant 0 : index
    %c0_148 = arith.constant 0 : index
    %181 = vector.load %arg8[%c4_146, %c0_147, %c0_148] : memref<9x32x32xbf16, #tpu.memory_space<vmem>>, vector<1x32x32xbf16>
    %182 = vector.shape_cast %181 : vector<1x32x32xbf16> to vector<32x32xbf16>
    %cst_149 = arith.constant dense<0.000000e+00> : vector<32x8xf32>
    %183 = tpu.matmul %182, %148, %cst_149 {dimension_numbers = #tpu.dot_dimension_numbers<[1], [0], [0], [1], [0, 0, 1, 1], [], []>} : vector<32x32xbf16>, vector<32x8xbf16>, vector<32x8xf32> -> vector<32x8xf32>
    %184 = arith.truncf %183 : vector<32x8xf32> to vector<32x8xbf16>
    %c4_150 = arith.constant 4 : index
    %c0_151 = arith.constant 0 : index
    %c0_152 = arith.constant 0 : index
    %185 = vector.load %arg9[%c4_150, %c0_151, %c0_152] : memref<9x8x8xbf16, #tpu.memory_space<vmem>>, vector<1x8x8xbf16>
    %186 = vector.shape_cast %185 : vector<1x8x8xbf16> to vector<8x8xbf16>
    %cst_153 = arith.constant dense<0.000000e+00> : vector<32x8xf32>
    %187 = tpu.matmul %184, %186, %cst_153 {dimension_numbers = #tpu.dot_dimension_numbers<[1], [0], [0], [1], [0, 0, 1, 1], [], []>} : vector<32x8xbf16>, vector<8x8xbf16>, vector<32x8xf32> -> vector<32x8xf32>
    %188 = arith.addf %180, %187 : vector<32x8xf32>
    %c5_154 = arith.constant 5 : index
    %c0_155 = arith.constant 0 : index
    %c0_156 = arith.constant 0 : index
    %189 = vector.load %arg8[%c5_154, %c0_155, %c0_156] : memref<9x32x32xbf16, #tpu.memory_space<vmem>>, vector<1x32x32xbf16>
    %190 = vector.shape_cast %189 : vector<1x32x32xbf16> to vector<32x32xbf16>
    %cst_157 = arith.constant dense<0.000000e+00> : vector<32x8xf32>
    %191 = tpu.matmul %190, %148, %cst_157 {dimension_numbers = #tpu.dot_dimension_numbers<[1], [0], [0], [1], [0, 0, 1, 1], [], []>} : vector<32x32xbf16>, vector<32x8xbf16>, vector<32x8xf32> -> vector<32x8xf32>
    %192 = arith.truncf %191 : vector<32x8xf32> to vector<32x8xbf16>
    %c5_158 = arith.constant 5 : index
    %c0_159 = arith.constant 0 : index
    %c0_160 = arith.constant 0 : index
    %193 = vector.load %arg9[%c5_158, %c0_159, %c0_160] : memref<9x8x8xbf16, #tpu.memory_space<vmem>>, vector<1x8x8xbf16>
    %194 = vector.shape_cast %193 : vector<1x8x8xbf16> to vector<8x8xbf16>
    %cst_161 = arith.constant dense<0.000000e+00> : vector<32x8xf32>
    %195 = tpu.matmul %192, %194, %cst_161 {dimension_numbers = #tpu.dot_dimension_numbers<[1], [0], [0], [1], [0, 0, 1, 1], [], []>} : vector<32x8xbf16>, vector<8x8xbf16>, vector<32x8xf32> -> vector<32x8xf32>
    %196 = arith.addf %188, %195 : vector<32x8xf32>
    %c6_162 = arith.constant 6 : index
    %c0_163 = arith.constant 0 : index
    %c0_164 = arith.constant 0 : index
    %197 = vector.load %arg8[%c6_162, %c0_163, %c0_164] : memref<9x32x32xbf16, #tpu.memory_space<vmem>>, vector<1x32x32xbf16>
    %198 = vector.shape_cast %197 : vector<1x32x32xbf16> to vector<32x32xbf16>
    %cst_165 = arith.constant dense<0.000000e+00> : vector<32x8xf32>
    %199 = tpu.matmul %198, %148, %cst_165 {dimension_numbers = #tpu.dot_dimension_numbers<[1], [0], [0], [1], [0, 0, 1, 1], [], []>} : vector<32x32xbf16>, vector<32x8xbf16>, vector<32x8xf32> -> vector<32x8xf32>
    %200 = arith.truncf %199 : vector<32x8xf32> to vector<32x8xbf16>
    %c6_166 = arith.constant 6 : index
    %c0_167 = arith.constant 0 : index
    %c0_168 = arith.constant 0 : index
    %201 = vector.load %arg9[%c6_166, %c0_167, %c0_168] : memref<9x8x8xbf16, #tpu.memory_space<vmem>>, vector<1x8x8xbf16>
    %202 = vector.shape_cast %201 : vector<1x8x8xbf16> to vector<8x8xbf16>
    %cst_169 = arith.constant dense<0.000000e+00> : vector<32x8xf32>
    %203 = tpu.matmul %200, %202, %cst_169 {dimension_numbers = #tpu.dot_dimension_numbers<[1], [0], [0], [1], [0, 0, 1, 1], [], []>} : vector<32x8xbf16>, vector<8x8xbf16>, vector<32x8xf32> -> vector<32x8xf32>
    %204 = arith.addf %196, %203 : vector<32x8xf32>
    %c7_170 = arith.constant 7 : index
    %c0_171 = arith.constant 0 : index
    %c0_172 = arith.constant 0 : index
    %205 = vector.load %arg8[%c7_170, %c0_171, %c0_172] : memref<9x32x32xbf16, #tpu.memory_space<vmem>>, vector<1x32x32xbf16>
    %206 = vector.shape_cast %205 : vector<1x32x32xbf16> to vector<32x32xbf16>
    %cst_173 = arith.constant dense<0.000000e+00> : vector<32x8xf32>
    %207 = tpu.matmul %206, %148, %cst_173 {dimension_numbers = #tpu.dot_dimension_numbers<[1], [0], [0], [1], [0, 0, 1, 1], [], []>} : vector<32x32xbf16>, vector<32x8xbf16>, vector<32x8xf32> -> vector<32x8xf32>
    %208 = arith.truncf %207 : vector<32x8xf32> to vector<32x8xbf16>
    %c7_174 = arith.constant 7 : index
    %c0_175 = arith.constant 0 : index
    %c0_176 = arith.constant 0 : index
    %209 = vector.load %arg9[%c7_174, %c0_175, %c0_176] : memref<9x8x8xbf16, #tpu.memory_space<vmem>>, vector<1x8x8xbf16>
    %210 = vector.shape_cast %209 : vector<1x8x8xbf16> to vector<8x8xbf16>
    %cst_177 = arith.constant dense<0.000000e+00> : vector<32x8xf32>
    %211 = tpu.matmul %208, %210, %cst_177 {dimension_numbers = #tpu.dot_dimension_numbers<[1], [0], [0], [1], [0, 0, 1, 1], [], []>} : vector<32x8xbf16>, vector<8x8xbf16>, vector<32x8xf32> -> vector<32x8xf32>
    %212 = arith.addf %204, %211 : vector<32x8xf32>
    %c8_178 = arith.constant 8 : index
    %c0_179 = arith.constant 0 : index
    %c0_180 = arith.constant 0 : index
    %213 = vector.load %arg8[%c8_178, %c0_179, %c0_180] : memref<9x32x32xbf16, #tpu.memory_space<vmem>>, vector<1x32x32xbf16>
    %214 = vector.shape_cast %213 : vector<1x32x32xbf16> to vector<32x32xbf16>
    %cst_181 = arith.constant dense<0.000000e+00> : vector<32x8xf32>
    %215 = tpu.matmul %214, %148, %cst_181 {dimension_numbers = #tpu.dot_dimension_numbers<[1], [0], [0], [1], [0, 0, 1, 1], [], []>} : vector<32x32xbf16>, vector<32x8xbf16>, vector<32x8xf32> -> vector<32x8xf32>
    %216 = arith.truncf %215 : vector<32x8xf32> to vector<32x8xbf16>
    %c8_182 = arith.constant 8 : index
    %c0_183 = arith.constant 0 : index
    %c0_184 = arith.constant 0 : index
    %217 = vector.load %arg9[%c8_182, %c0_183, %c0_184] : memref<9x8x8xbf16, #tpu.memory_space<vmem>>, vector<1x8x8xbf16>
    %218 = vector.shape_cast %217 : vector<1x8x8xbf16> to vector<8x8xbf16>
    %cst_185 = arith.constant dense<0.000000e+00> : vector<32x8xf32>
    %219 = tpu.matmul %216, %218, %cst_185 {dimension_numbers = #tpu.dot_dimension_numbers<[1], [0], [0], [1], [0, 0, 1, 1], [], []>} : vector<32x8xbf16>, vector<8x8xbf16>, vector<32x8xf32> -> vector<32x8xf32>
    %220 = arith.addf %212, %219 : vector<32x8xf32>
    %c0_186 = arith.constant 0 : index
    %c0_187 = arith.constant 0 : index
    %221 = vector.load %arg10[%c0_186, %c0_187] : memref<1x8xf32, #tpu.memory_space<vmem>>, vector<1x8xf32>
    %222 = vector.broadcast %221 : vector<1x8xf32> to vector<32x8xf32>
    %223 = arith.addf %220, %222 : vector<32x8xf32>
    %cst_188 = arith.constant dense<0.000000e+00> : vector<8xf32>
    %224 = vector.multi_reduction <add>, %223, %cst_188 [0] : vector<32x8xf32> to vector<8xf32>
    %225 = vector.shape_cast %224 : vector<8xf32> to vector<1x8xf32>
    %cst_189 = arith.constant 3.200000e+01 : f32
    %226 = vector.broadcast %cst_189 : f32 to vector<1x8xf32>
    %227 = arith.divf %225, %226 : vector<1x8xf32>
    %228 = vector.broadcast %227 : vector<1x8xf32> to vector<32x8xf32>
    %229 = arith.subf %223, %228 : vector<32x8xf32>
    %230 = arith.mulf %229, %229 : vector<32x8xf32>
    %cst_190 = arith.constant dense<0.000000e+00> : vector<8xf32>
    %231 = vector.multi_reduction <add>, %230, %cst_190 [0] : vector<32x8xf32> to vector<8xf32>
    %232 = vector.shape_cast %231 : vector<8xf32> to vector<1x8xf32>
    %cst_191 = arith.constant 3.200000e+01 : f32
    %233 = vector.broadcast %cst_191 : f32 to vector<1x8xf32>
    %234 = arith.divf %232, %233 : vector<1x8xf32>
    %cst_192 = arith.constant 9.99999974E-6 : f32
    %235 = vector.broadcast %cst_192 : f32 to vector<1x8xf32>
    %236 = arith.addf %234, %235 : vector<1x8xf32>
    %237 = math.rsqrt %236 : vector<1x8xf32>
    %238 = vector.broadcast %237 : vector<1x8xf32> to vector<32x8xf32>
    %239 = arith.mulf %229, %238 : vector<32x8xf32>
    %cst_193 = arith.constant 0.000000e+00 : f32
    %240 = vector.broadcast %cst_193 : f32 to vector<32x8xf32>
    %241 = arith.maximumf %239, %240 : vector<32x8xf32>
    %cst_194 = arith.constant 0.000000e+00 : f32
    %242 = vector.broadcast %cst_194 : f32 to vector<32x4xf32>
    %243 = arith.truncf %241 : vector<32x8xf32> to vector<32x8xbf16>
    %c0_195 = arith.constant 0 : index
    %c0_196 = arith.constant 0 : index
    %c0_197 = arith.constant 0 : index
    %244 = vector.load %arg8[%c0_195, %c0_196, %c0_197] : memref<9x32x32xbf16, #tpu.memory_space<vmem>>, vector<1x32x32xbf16>
    %245 = vector.shape_cast %244 : vector<1x32x32xbf16> to vector<32x32xbf16>
    %cst_198 = arith.constant dense<0.000000e+00> : vector<32x8xf32>
    %246 = tpu.matmul %245, %243, %cst_198 {dimension_numbers = #tpu.dot_dimension_numbers<[1], [0], [0], [1], [0, 0, 1, 1], [], []>} : vector<32x32xbf16>, vector<32x8xbf16>, vector<32x8xf32> -> vector<32x8xf32>
    %247 = arith.truncf %246 : vector<32x8xf32> to vector<32x8xbf16>
    %c0_199 = arith.constant 0 : index
    %c0_200 = arith.constant 0 : index
    %c0_201 = arith.constant 0 : index
    %248 = vector.load %arg11[%c0_199, %c0_200, %c0_201] : memref<9x8x4xbf16, #tpu.memory_space<vmem>>, vector<1x8x4xbf16>
    %249 = vector.shape_cast %248 : vector<1x8x4xbf16> to vector<8x4xbf16>
    %cst_202 = arith.constant dense<0.000000e+00> : vector<32x4xf32>
    %250 = tpu.matmul %247, %249, %cst_202 {dimension_numbers = #tpu.dot_dimension_numbers<[1], [0], [0], [1], [0, 0, 1, 1], [], []>} : vector<32x8xbf16>, vector<8x4xbf16>, vector<32x4xf32> -> vector<32x4xf32>
    %251 = arith.addf %242, %250 : vector<32x4xf32>
    %c1_203 = arith.constant 1 : index
    %c0_204 = arith.constant 0 : index
    %c0_205 = arith.constant 0 : index
    %252 = vector.load %arg8[%c1_203, %c0_204, %c0_205] : memref<9x32x32xbf16, #tpu.memory_space<vmem>>, vector<1x32x32xbf16>
    %253 = vector.shape_cast %252 : vector<1x32x32xbf16> to vector<32x32xbf16>
    %cst_206 = arith.constant dense<0.000000e+00> : vector<32x8xf32>
    %254 = tpu.matmul %253, %243, %cst_206 {dimension_numbers = #tpu.dot_dimension_numbers<[1], [0], [0], [1], [0, 0, 1, 1], [], []>} : vector<32x32xbf16>, vector<32x8xbf16>, vector<32x8xf32> -> vector<32x8xf32>
    %255 = arith.truncf %254 : vector<32x8xf32> to vector<32x8xbf16>
    %c1_207 = arith.constant 1 : index
    %c0_208 = arith.constant 0 : index
    %c0_209 = arith.constant 0 : index
    %256 = vector.load %arg11[%c1_207, %c0_208, %c0_209] : memref<9x8x4xbf16, #tpu.memory_space<vmem>>, vector<1x8x4xbf16>
    %257 = vector.shape_cast %256 : vector<1x8x4xbf16> to vector<8x4xbf16>
    %cst_210 = arith.constant dense<0.000000e+00> : vector<32x4xf32>
    %258 = tpu.matmul %255, %257, %cst_210 {dimension_numbers = #tpu.dot_dimension_numbers<[1], [0], [0], [1], [0, 0, 1, 1], [], []>} : vector<32x8xbf16>, vector<8x4xbf16>, vector<32x4xf32> -> vector<32x4xf32>
    %259 = arith.addf %251, %258 : vector<32x4xf32>
    %c2_211 = arith.constant 2 : index
    %c0_212 = arith.constant 0 : index
    %c0_213 = arith.constant 0 : index
    %260 = vector.load %arg8[%c2_211, %c0_212, %c0_213] : memref<9x32x32xbf16, #tpu.memory_space<vmem>>, vector<1x32x32xbf16>
    %261 = vector.shape_cast %260 : vector<1x32x32xbf16> to vector<32x32xbf16>
    %cst_214 = arith.constant dense<0.000000e+00> : vector<32x8xf32>
    %262 = tpu.matmul %261, %243, %cst_214 {dimension_numbers = #tpu.dot_dimension_numbers<[1], [0], [0], [1], [0, 0, 1, 1], [], []>} : vector<32x32xbf16>, vector<32x8xbf16>, vector<32x8xf32> -> vector<32x8xf32>
    %263 = arith.truncf %262 : vector<32x8xf32> to vector<32x8xbf16>
    %c2_215 = arith.constant 2 : index
    %c0_216 = arith.constant 0 : index
    %c0_217 = arith.constant 0 : index
    %264 = vector.load %arg11[%c2_215, %c0_216, %c0_217] : memref<9x8x4xbf16, #tpu.memory_space<vmem>>, vector<1x8x4xbf16>
    %265 = vector.shape_cast %264 : vector<1x8x4xbf16> to vector<8x4xbf16>
    %cst_218 = arith.constant dense<0.000000e+00> : vector<32x4xf32>
    %266 = tpu.matmul %263, %265, %cst_218 {dimension_numbers = #tpu.dot_dimension_numbers<[1], [0], [0], [1], [0, 0, 1, 1], [], []>} : vector<32x8xbf16>, vector<8x4xbf16>, vector<32x4xf32> -> vector<32x4xf32>
    %267 = arith.addf %259, %266 : vector<32x4xf32>
    %c3_219 = arith.constant 3 : index
    %c0_220 = arith.constant 0 : index
    %c0_221 = arith.constant 0 : index
    %268 = vector.load %arg8[%c3_219, %c0_220, %c0_221] : memref<9x32x32xbf16, #tpu.memory_space<vmem>>, vector<1x32x32xbf16>
    %269 = vector.shape_cast %268 : vector<1x32x32xbf16> to vector<32x32xbf16>
    %cst_222 = arith.constant dense<0.000000e+00> : vector<32x8xf32>
    %270 = tpu.matmul %269, %243, %cst_222 {dimension_numbers = #tpu.dot_dimension_numbers<[1], [0], [0], [1], [0, 0, 1, 1], [], []>} : vector<32x32xbf16>, vector<32x8xbf16>, vector<32x8xf32> -> vector<32x8xf32>
    %271 = arith.truncf %270 : vector<32x8xf32> to vector<32x8xbf16>
    %c3_223 = arith.constant 3 : index
    %c0_224 = arith.constant 0 : index
    %c0_225 = arith.constant 0 : index
    %272 = vector.load %arg11[%c3_223, %c0_224, %c0_225] : memref<9x8x4xbf16, #tpu.memory_space<vmem>>, vector<1x8x4xbf16>
    %273 = vector.shape_cast %272 : vector<1x8x4xbf16> to vector<8x4xbf16>
    %cst_226 = arith.constant dense<0.000000e+00> : vector<32x4xf32>
    %274 = tpu.matmul %271, %273, %cst_226 {dimension_numbers = #tpu.dot_dimension_numbers<[1], [0], [0], [1], [0, 0, 1, 1], [], []>} : vector<32x8xbf16>, vector<8x4xbf16>, vector<32x4xf32> -> vector<32x4xf32>
    %275 = arith.addf %267, %274 : vector<32x4xf32>
    %c4_227 = arith.constant 4 : index
    %c0_228 = arith.constant 0 : index
    %c0_229 = arith.constant 0 : index
    %276 = vector.load %arg8[%c4_227, %c0_228, %c0_229] : memref<9x32x32xbf16, #tpu.memory_space<vmem>>, vector<1x32x32xbf16>
    %277 = vector.shape_cast %276 : vector<1x32x32xbf16> to vector<32x32xbf16>
    %cst_230 = arith.constant dense<0.000000e+00> : vector<32x8xf32>
    %278 = tpu.matmul %277, %243, %cst_230 {dimension_numbers = #tpu.dot_dimension_numbers<[1], [0], [0], [1], [0, 0, 1, 1], [], []>} : vector<32x32xbf16>, vector<32x8xbf16>, vector<32x8xf32> -> vector<32x8xf32>
    %279 = arith.truncf %278 : vector<32x8xf32> to vector<32x8xbf16>
    %c4_231 = arith.constant 4 : index
    %c0_232 = arith.constant 0 : index
    %c0_233 = arith.constant 0 : index
    %280 = vector.load %arg11[%c4_231, %c0_232, %c0_233] : memref<9x8x4xbf16, #tpu.memory_space<vmem>>, vector<1x8x4xbf16>
    %281 = vector.shape_cast %280 : vector<1x8x4xbf16> to vector<8x4xbf16>
    %cst_234 = arith.constant dense<0.000000e+00> : vector<32x4xf32>
    %282 = tpu.matmul %279, %281, %cst_234 {dimension_numbers = #tpu.dot_dimension_numbers<[1], [0], [0], [1], [0, 0, 1, 1], [], []>} : vector<32x8xbf16>, vector<8x4xbf16>, vector<32x4xf32> -> vector<32x4xf32>
    %283 = arith.addf %275, %282 : vector<32x4xf32>
    %c5_235 = arith.constant 5 : index
    %c0_236 = arith.constant 0 : index
    %c0_237 = arith.constant 0 : index
    %284 = vector.load %arg8[%c5_235, %c0_236, %c0_237] : memref<9x32x32xbf16, #tpu.memory_space<vmem>>, vector<1x32x32xbf16>
    %285 = vector.shape_cast %284 : vector<1x32x32xbf16> to vector<32x32xbf16>
    %cst_238 = arith.constant dense<0.000000e+00> : vector<32x8xf32>
    %286 = tpu.matmul %285, %243, %cst_238 {dimension_numbers = #tpu.dot_dimension_numbers<[1], [0], [0], [1], [0, 0, 1, 1], [], []>} : vector<32x32xbf16>, vector<32x8xbf16>, vector<32x8xf32> -> vector<32x8xf32>
    %287 = arith.truncf %286 : vector<32x8xf32> to vector<32x8xbf16>
    %c5_239 = arith.constant 5 : index
    %c0_240 = arith.constant 0 : index
    %c0_241 = arith.constant 0 : index
    %288 = vector.load %arg11[%c5_239, %c0_240, %c0_241] : memref<9x8x4xbf16, #tpu.memory_space<vmem>>, vector<1x8x4xbf16>
    %289 = vector.shape_cast %288 : vector<1x8x4xbf16> to vector<8x4xbf16>
    %cst_242 = arith.constant dense<0.000000e+00> : vector<32x4xf32>
    %290 = tpu.matmul %287, %289, %cst_242 {dimension_numbers = #tpu.dot_dimension_numbers<[1], [0], [0], [1], [0, 0, 1, 1], [], []>} : vector<32x8xbf16>, vector<8x4xbf16>, vector<32x4xf32> -> vector<32x4xf32>
    %291 = arith.addf %283, %290 : vector<32x4xf32>
    %c6_243 = arith.constant 6 : index
    %c0_244 = arith.constant 0 : index
    %c0_245 = arith.constant 0 : index
    %292 = vector.load %arg8[%c6_243, %c0_244, %c0_245] : memref<9x32x32xbf16, #tpu.memory_space<vmem>>, vector<1x32x32xbf16>
    %293 = vector.shape_cast %292 : vector<1x32x32xbf16> to vector<32x32xbf16>
    %cst_246 = arith.constant dense<0.000000e+00> : vector<32x8xf32>
    %294 = tpu.matmul %293, %243, %cst_246 {dimension_numbers = #tpu.dot_dimension_numbers<[1], [0], [0], [1], [0, 0, 1, 1], [], []>} : vector<32x32xbf16>, vector<32x8xbf16>, vector<32x8xf32> -> vector<32x8xf32>
    %295 = arith.truncf %294 : vector<32x8xf32> to vector<32x8xbf16>
    %c6_247 = arith.constant 6 : index
    %c0_248 = arith.constant 0 : index
    %c0_249 = arith.constant 0 : index
    %296 = vector.load %arg11[%c6_247, %c0_248, %c0_249] : memref<9x8x4xbf16, #tpu.memory_space<vmem>>, vector<1x8x4xbf16>
    %297 = vector.shape_cast %296 : vector<1x8x4xbf16> to vector<8x4xbf16>
    %cst_250 = arith.constant dense<0.000000e+00> : vector<32x4xf32>
    %298 = tpu.matmul %295, %297, %cst_250 {dimension_numbers = #tpu.dot_dimension_numbers<[1], [0], [0], [1], [0, 0, 1, 1], [], []>} : vector<32x8xbf16>, vector<8x4xbf16>, vector<32x4xf32> -> vector<32x4xf32>
    %299 = arith.addf %291, %298 : vector<32x4xf32>
    %c7_251 = arith.constant 7 : index
    %c0_252 = arith.constant 0 : index
    %c0_253 = arith.constant 0 : index
    %300 = vector.load %arg8[%c7_251, %c0_252, %c0_253] : memref<9x32x32xbf16, #tpu.memory_space<vmem>>, vector<1x32x32xbf16>
    %301 = vector.shape_cast %300 : vector<1x32x32xbf16> to vector<32x32xbf16>
    %cst_254 = arith.constant dense<0.000000e+00> : vector<32x8xf32>
    %302 = tpu.matmul %301, %243, %cst_254 {dimension_numbers = #tpu.dot_dimension_numbers<[1], [0], [0], [1], [0, 0, 1, 1], [], []>} : vector<32x32xbf16>, vector<32x8xbf16>, vector<32x8xf32> -> vector<32x8xf32>
    %303 = arith.truncf %302 : vector<32x8xf32> to vector<32x8xbf16>
    %c7_255 = arith.constant 7 : index
    %c0_256 = arith.constant 0 : index
    %c0_257 = arith.constant 0 : index
    %304 = vector.load %arg11[%c7_255, %c0_256, %c0_257] : memref<9x8x4xbf16, #tpu.memory_space<vmem>>, vector<1x8x4xbf16>
    %305 = vector.shape_cast %304 : vector<1x8x4xbf16> to vector<8x4xbf16>
    %cst_258 = arith.constant dense<0.000000e+00> : vector<32x4xf32>
    %306 = tpu.matmul %303, %305, %cst_258 {dimension_numbers = #tpu.dot_dimension_numbers<[1], [0], [0], [1], [0, 0, 1, 1], [], []>} : vector<32x8xbf16>, vector<8x4xbf16>, vector<32x4xf32> -> vector<32x4xf32>
    %307 = arith.addf %299, %306 : vector<32x4xf32>
    %c8_259 = arith.constant 8 : index
    %c0_260 = arith.constant 0 : index
    %c0_261 = arith.constant 0 : index
    %308 = vector.load %arg8[%c8_259, %c0_260, %c0_261] : memref<9x32x32xbf16, #tpu.memory_space<vmem>>, vector<1x32x32xbf16>
    %309 = vector.shape_cast %308 : vector<1x32x32xbf16> to vector<32x32xbf16>
    %cst_262 = arith.constant dense<0.000000e+00> : vector<32x8xf32>
    %310 = tpu.matmul %309, %243, %cst_262 {dimension_numbers = #tpu.dot_dimension_numbers<[1], [0], [0], [1], [0, 0, 1, 1], [], []>} : vector<32x32xbf16>, vector<32x8xbf16>, vector<32x8xf32> -> vector<32x8xf32>
    %311 = arith.truncf %310 : vector<32x8xf32> to vector<32x8xbf16>
    %c8_263 = arith.constant 8 : index
    %c0_264 = arith.constant 0 : index
    %c0_265 = arith.constant 0 : index
    %312 = vector.load %arg11[%c8_263, %c0_264, %c0_265] : memref<9x8x4xbf16, #tpu.memory_space<vmem>>, vector<1x8x4xbf16>
    %313 = vector.shape_cast %312 : vector<1x8x4xbf16> to vector<8x4xbf16>
    %cst_266 = arith.constant dense<0.000000e+00> : vector<32x4xf32>
    %314 = tpu.matmul %311, %313, %cst_266 {dimension_numbers = #tpu.dot_dimension_numbers<[1], [0], [0], [1], [0, 0, 1, 1], [], []>} : vector<32x8xbf16>, vector<8x4xbf16>, vector<32x4xf32> -> vector<32x4xf32>
    %315 = arith.addf %307, %314 : vector<32x4xf32>
    %316 = arith.truncf %146 : vector<32x8xf32> to vector<32x8xbf16>
    %c0_267 = arith.constant 0 : index
    %c0_268 = arith.constant 0 : index
    %c0_269 = arith.constant 0 : index
    %317 = vector.load %arg8[%c0_267, %c0_268, %c0_269] : memref<9x32x32xbf16, #tpu.memory_space<vmem>>, vector<1x32x32xbf16>
    %318 = vector.shape_cast %317 : vector<1x32x32xbf16> to vector<32x32xbf16>
    %cst_270 = arith.constant dense<0.000000e+00> : vector<32x8xf32>
    %319 = tpu.matmul %318, %316, %cst_270 {dimension_numbers = #tpu.dot_dimension_numbers<[1], [0], [0], [1], [0, 0, 1, 1], [], []>} : vector<32x32xbf16>, vector<32x8xbf16>, vector<32x8xf32> -> vector<32x8xf32>
    %320 = arith.truncf %319 : vector<32x8xf32> to vector<32x8xbf16>
    %c0_271 = arith.constant 0 : index
    %c0_272 = arith.constant 0 : index
    %c0_273 = arith.constant 0 : index
    %321 = vector.load %arg12[%c0_271, %c0_272, %c0_273] : memref<9x8x4xbf16, #tpu.memory_space<vmem>>, vector<1x8x4xbf16>
    %322 = vector.shape_cast %321 : vector<1x8x4xbf16> to vector<8x4xbf16>
    %cst_274 = arith.constant dense<0.000000e+00> : vector<32x4xf32>
    %323 = tpu.matmul %320, %322, %cst_274 {dimension_numbers = #tpu.dot_dimension_numbers<[1], [0], [0], [1], [0, 0, 1, 1], [], []>} : vector<32x8xbf16>, vector<8x4xbf16>, vector<32x4xf32> -> vector<32x4xf32>
    %324 = arith.addf %315, %323 : vector<32x4xf32>
    %c1_275 = arith.constant 1 : index
    %c0_276 = arith.constant 0 : index
    %c0_277 = arith.constant 0 : index
    %325 = vector.load %arg8[%c1_275, %c0_276, %c0_277] : memref<9x32x32xbf16, #tpu.memory_space<vmem>>, vector<1x32x32xbf16>
    %326 = vector.shape_cast %325 : vector<1x32x32xbf16> to vector<32x32xbf16>
    %cst_278 = arith.constant dense<0.000000e+00> : vector<32x8xf32>
    %327 = tpu.matmul %326, %316, %cst_278 {dimension_numbers = #tpu.dot_dimension_numbers<[1], [0], [0], [1], [0, 0, 1, 1], [], []>} : vector<32x32xbf16>, vector<32x8xbf16>, vector<32x8xf32> -> vector<32x8xf32>
    %328 = arith.truncf %327 : vector<32x8xf32> to vector<32x8xbf16>
    %c1_279 = arith.constant 1 : index
    %c0_280 = arith.constant 0 : index
    %c0_281 = arith.constant 0 : index
    %329 = vector.load %arg12[%c1_279, %c0_280, %c0_281] : memref<9x8x4xbf16, #tpu.memory_space<vmem>>, vector<1x8x4xbf16>
    %330 = vector.shape_cast %329 : vector<1x8x4xbf16> to vector<8x4xbf16>
    %cst_282 = arith.constant dense<0.000000e+00> : vector<32x4xf32>
    %331 = tpu.matmul %328, %330, %cst_282 {dimension_numbers = #tpu.dot_dimension_numbers<[1], [0], [0], [1], [0, 0, 1, 1], [], []>} : vector<32x8xbf16>, vector<8x4xbf16>, vector<32x4xf32> -> vector<32x4xf32>
    %332 = arith.addf %324, %331 : vector<32x4xf32>
    %c2_283 = arith.constant 2 : index
    %c0_284 = arith.constant 0 : index
    %c0_285 = arith.constant 0 : index
    %333 = vector.load %arg8[%c2_283, %c0_284, %c0_285] : memref<9x32x32xbf16, #tpu.memory_space<vmem>>, vector<1x32x32xbf16>
    %334 = vector.shape_cast %333 : vector<1x32x32xbf16> to vector<32x32xbf16>
    %cst_286 = arith.constant dense<0.000000e+00> : vector<32x8xf32>
    %335 = tpu.matmul %334, %316, %cst_286 {dimension_numbers = #tpu.dot_dimension_numbers<[1], [0], [0], [1], [0, 0, 1, 1], [], []>} : vector<32x32xbf16>, vector<32x8xbf16>, vector<32x8xf32> -> vector<32x8xf32>
    %336 = arith.truncf %335 : vector<32x8xf32> to vector<32x8xbf16>
    %c2_287 = arith.constant 2 : index
    %c0_288 = arith.constant 0 : index
    %c0_289 = arith.constant 0 : index
    %337 = vector.load %arg12[%c2_287, %c0_288, %c0_289] : memref<9x8x4xbf16, #tpu.memory_space<vmem>>, vector<1x8x4xbf16>
    %338 = vector.shape_cast %337 : vector<1x8x4xbf16> to vector<8x4xbf16>
    %cst_290 = arith.constant dense<0.000000e+00> : vector<32x4xf32>
    %339 = tpu.matmul %336, %338, %cst_290 {dimension_numbers = #tpu.dot_dimension_numbers<[1], [0], [0], [1], [0, 0, 1, 1], [], []>} : vector<32x8xbf16>, vector<8x4xbf16>, vector<32x4xf32> -> vector<32x4xf32>
    %340 = arith.addf %332, %339 : vector<32x4xf32>
    %c3_291 = arith.constant 3 : index
    %c0_292 = arith.constant 0 : index
    %c0_293 = arith.constant 0 : index
    %341 = vector.load %arg8[%c3_291, %c0_292, %c0_293] : memref<9x32x32xbf16, #tpu.memory_space<vmem>>, vector<1x32x32xbf16>
    %342 = vector.shape_cast %341 : vector<1x32x32xbf16> to vector<32x32xbf16>
    %cst_294 = arith.constant dense<0.000000e+00> : vector<32x8xf32>
    %343 = tpu.matmul %342, %316, %cst_294 {dimension_numbers = #tpu.dot_dimension_numbers<[1], [0], [0], [1], [0, 0, 1, 1], [], []>} : vector<32x32xbf16>, vector<32x8xbf16>, vector<32x8xf32> -> vector<32x8xf32>
    %344 = arith.truncf %343 : vector<32x8xf32> to vector<32x8xbf16>
    %c3_295 = arith.constant 3 : index
    %c0_296 = arith.constant 0 : index
    %c0_297 = arith.constant 0 : index
    %345 = vector.load %arg12[%c3_295, %c0_296, %c0_297] : memref<9x8x4xbf16, #tpu.memory_space<vmem>>, vector<1x8x4xbf16>
    %346 = vector.shape_cast %345 : vector<1x8x4xbf16> to vector<8x4xbf16>
    %cst_298 = arith.constant dense<0.000000e+00> : vector<32x4xf32>
    %347 = tpu.matmul %344, %346, %cst_298 {dimension_numbers = #tpu.dot_dimension_numbers<[1], [0], [0], [1], [0, 0, 1, 1], [], []>} : vector<32x8xbf16>, vector<8x4xbf16>, vector<32x4xf32> -> vector<32x4xf32>
    %348 = arith.addf %340, %347 : vector<32x4xf32>
    %c4_299 = arith.constant 4 : index
    %c0_300 = arith.constant 0 : index
    %c0_301 = arith.constant 0 : index
    %349 = vector.load %arg8[%c4_299, %c0_300, %c0_301] : memref<9x32x32xbf16, #tpu.memory_space<vmem>>, vector<1x32x32xbf16>
    %350 = vector.shape_cast %349 : vector<1x32x32xbf16> to vector<32x32xbf16>
    %cst_302 = arith.constant dense<0.000000e+00> : vector<32x8xf32>
    %351 = tpu.matmul %350, %316, %cst_302 {dimension_numbers = #tpu.dot_dimension_numbers<[1], [0], [0], [1], [0, 0, 1, 1], [], []>} : vector<32x32xbf16>, vector<32x8xbf16>, vector<32x8xf32> -> vector<32x8xf32>
    %352 = arith.truncf %351 : vector<32x8xf32> to vector<32x8xbf16>
    %c4_303 = arith.constant 4 : index
    %c0_304 = arith.constant 0 : index
    %c0_305 = arith.constant 0 : index
    %353 = vector.load %arg12[%c4_303, %c0_304, %c0_305] : memref<9x8x4xbf16, #tpu.memory_space<vmem>>, vector<1x8x4xbf16>
    %354 = vector.shape_cast %353 : vector<1x8x4xbf16> to vector<8x4xbf16>
    %cst_306 = arith.constant dense<0.000000e+00> : vector<32x4xf32>
    %355 = tpu.matmul %352, %354, %cst_306 {dimension_numbers = #tpu.dot_dimension_numbers<[1], [0], [0], [1], [0, 0, 1, 1], [], []>} : vector<32x8xbf16>, vector<8x4xbf16>, vector<32x4xf32> -> vector<32x4xf32>
    %356 = arith.addf %348, %355 : vector<32x4xf32>
    %c5_307 = arith.constant 5 : index
    %c0_308 = arith.constant 0 : index
    %c0_309 = arith.constant 0 : index
    %357 = vector.load %arg8[%c5_307, %c0_308, %c0_309] : memref<9x32x32xbf16, #tpu.memory_space<vmem>>, vector<1x32x32xbf16>
    %358 = vector.shape_cast %357 : vector<1x32x32xbf16> to vector<32x32xbf16>
    %cst_310 = arith.constant dense<0.000000e+00> : vector<32x8xf32>
    %359 = tpu.matmul %358, %316, %cst_310 {dimension_numbers = #tpu.dot_dimension_numbers<[1], [0], [0], [1], [0, 0, 1, 1], [], []>} : vector<32x32xbf16>, vector<32x8xbf16>, vector<32x8xf32> -> vector<32x8xf32>
    %360 = arith.truncf %359 : vector<32x8xf32> to vector<32x8xbf16>
    %c5_311 = arith.constant 5 : index
    %c0_312 = arith.constant 0 : index
    %c0_313 = arith.constant 0 : index
    %361 = vector.load %arg12[%c5_311, %c0_312, %c0_313] : memref<9x8x4xbf16, #tpu.memory_space<vmem>>, vector<1x8x4xbf16>
    %362 = vector.shape_cast %361 : vector<1x8x4xbf16> to vector<8x4xbf16>
    %cst_314 = arith.constant dense<0.000000e+00> : vector<32x4xf32>
    %363 = tpu.matmul %360, %362, %cst_314 {dimension_numbers = #tpu.dot_dimension_numbers<[1], [0], [0], [1], [0, 0, 1, 1], [], []>} : vector<32x8xbf16>, vector<8x4xbf16>, vector<32x4xf32> -> vector<32x4xf32>
    %364 = arith.addf %356, %363 : vector<32x4xf32>
    %c6_315 = arith.constant 6 : index
    %c0_316 = arith.constant 0 : index
    %c0_317 = arith.constant 0 : index
    %365 = vector.load %arg8[%c6_315, %c0_316, %c0_317] : memref<9x32x32xbf16, #tpu.memory_space<vmem>>, vector<1x32x32xbf16>
    %366 = vector.shape_cast %365 : vector<1x32x32xbf16> to vector<32x32xbf16>
    %cst_318 = arith.constant dense<0.000000e+00> : vector<32x8xf32>
    %367 = tpu.matmul %366, %316, %cst_318 {dimension_numbers = #tpu.dot_dimension_numbers<[1], [0], [0], [1], [0, 0, 1, 1], [], []>} : vector<32x32xbf16>, vector<32x8xbf16>, vector<32x8xf32> -> vector<32x8xf32>
    %368 = arith.truncf %367 : vector<32x8xf32> to vector<32x8xbf16>
    %c6_319 = arith.constant 6 : index
    %c0_320 = arith.constant 0 : index
    %c0_321 = arith.constant 0 : index
    %369 = vector.load %arg12[%c6_319, %c0_320, %c0_321] : memref<9x8x4xbf16, #tpu.memory_space<vmem>>, vector<1x8x4xbf16>
    %370 = vector.shape_cast %369 : vector<1x8x4xbf16> to vector<8x4xbf16>
    %cst_322 = arith.constant dense<0.000000e+00> : vector<32x4xf32>
    %371 = tpu.matmul %368, %370, %cst_322 {dimension_numbers = #tpu.dot_dimension_numbers<[1], [0], [0], [1], [0, 0, 1, 1], [], []>} : vector<32x8xbf16>, vector<8x4xbf16>, vector<32x4xf32> -> vector<32x4xf32>
    %372 = arith.addf %364, %371 : vector<32x4xf32>
    %c7_323 = arith.constant 7 : index
    %c0_324 = arith.constant 0 : index
    %c0_325 = arith.constant 0 : index
    %373 = vector.load %arg8[%c7_323, %c0_324, %c0_325] : memref<9x32x32xbf16, #tpu.memory_space<vmem>>, vector<1x32x32xbf16>
    %374 = vector.shape_cast %373 : vector<1x32x32xbf16> to vector<32x32xbf16>
    %cst_326 = arith.constant dense<0.000000e+00> : vector<32x8xf32>
    %375 = tpu.matmul %374, %316, %cst_326 {dimension_numbers = #tpu.dot_dimension_numbers<[1], [0], [0], [1], [0, 0, 1, 1], [], []>} : vector<32x32xbf16>, vector<32x8xbf16>, vector<32x8xf32> -> vector<32x8xf32>
    %376 = arith.truncf %375 : vector<32x8xf32> to vector<32x8xbf16>
    %c7_327 = arith.constant 7 : index
    %c0_328 = arith.constant 0 : index
    %c0_329 = arith.constant 0 : index
    %377 = vector.load %arg12[%c7_327, %c0_328, %c0_329] : memref<9x8x4xbf16, #tpu.memory_space<vmem>>, vector<1x8x4xbf16>
    %378 = vector.shape_cast %377 : vector<1x8x4xbf16> to vector<8x4xbf16>
    %cst_330 = arith.constant dense<0.000000e+00> : vector<32x4xf32>
    %379 = tpu.matmul %376, %378, %cst_330 {dimension_numbers = #tpu.dot_dimension_numbers<[1], [0], [0], [1], [0, 0, 1, 1], [], []>} : vector<32x8xbf16>, vector<8x4xbf16>, vector<32x4xf32> -> vector<32x4xf32>
    %380 = arith.addf %372, %379 : vector<32x4xf32>
    %c8_331 = arith.constant 8 : index
    %c0_332 = arith.constant 0 : index
    %c0_333 = arith.constant 0 : index
    %381 = vector.load %arg8[%c8_331, %c0_332, %c0_333] : memref<9x32x32xbf16, #tpu.memory_space<vmem>>, vector<1x32x32xbf16>
    %382 = vector.shape_cast %381 : vector<1x32x32xbf16> to vector<32x32xbf16>
    %cst_334 = arith.constant dense<0.000000e+00> : vector<32x8xf32>
    %383 = tpu.matmul %382, %316, %cst_334 {dimension_numbers = #tpu.dot_dimension_numbers<[1], [0], [0], [1], [0, 0, 1, 1], [], []>} : vector<32x32xbf16>, vector<32x8xbf16>, vector<32x8xf32> -> vector<32x8xf32>
    %384 = arith.truncf %383 : vector<32x8xf32> to vector<32x8xbf16>
    %c8_335 = arith.constant 8 : index
    %c0_336 = arith.constant 0 : index
    %c0_337 = arith.constant 0 : index
    %385 = vector.load %arg12[%c8_335, %c0_336, %c0_337] : memref<9x8x4xbf16, #tpu.memory_space<vmem>>, vector<1x8x4xbf16>
    %386 = vector.shape_cast %385 : vector<1x8x4xbf16> to vector<8x4xbf16>
    %cst_338 = arith.constant dense<0.000000e+00> : vector<32x4xf32>
    %387 = tpu.matmul %384, %386, %cst_338 {dimension_numbers = #tpu.dot_dimension_numbers<[1], [0], [0], [1], [0, 0, 1, 1], [], []>} : vector<32x8xbf16>, vector<8x4xbf16>, vector<32x4xf32> -> vector<32x4xf32>
    %388 = arith.addf %380, %387 : vector<32x4xf32>
    %c0_339 = arith.constant 0 : index
    %c0_340 = arith.constant 0 : index
    %389 = vector.load %arg13[%c0_339, %c0_340] : memref<1x4xf32, #tpu.memory_space<vmem>>, vector<1x4xf32>
    %390 = vector.broadcast %389 : vector<1x4xf32> to vector<32x4xf32>
    %391 = arith.addf %388, %390 : vector<32x4xf32>
    %cst_341 = arith.constant dense<0.000000e+00> : vector<4xf32>
    %392 = vector.multi_reduction <add>, %391, %cst_341 [0] : vector<32x4xf32> to vector<4xf32>
    %393 = vector.shape_cast %392 : vector<4xf32> to vector<1x4xf32>
    %cst_342 = arith.constant 3.200000e+01 : f32
    %394 = vector.broadcast %cst_342 : f32 to vector<1x4xf32>
    %395 = arith.divf %393, %394 : vector<1x4xf32>
    %396 = vector.broadcast %395 : vector<1x4xf32> to vector<32x4xf32>
    %397 = arith.subf %391, %396 : vector<32x4xf32>
    %398 = arith.mulf %397, %397 : vector<32x4xf32>
    %cst_343 = arith.constant dense<0.000000e+00> : vector<4xf32>
    %399 = vector.multi_reduction <add>, %398, %cst_343 [0] : vector<32x4xf32> to vector<4xf32>
    %400 = vector.shape_cast %399 : vector<4xf32> to vector<1x4xf32>
    %cst_344 = arith.constant 3.200000e+01 : f32
    %401 = vector.broadcast %cst_344 : f32 to vector<1x4xf32>
    %402 = arith.divf %400, %401 : vector<1x4xf32>
    %cst_345 = arith.constant 9.99999974E-6 : f32
    %403 = vector.broadcast %cst_345 : f32 to vector<1x4xf32>
    %404 = arith.addf %402, %403 : vector<1x4xf32>
    %405 = math.rsqrt %404 : vector<1x4xf32>
    %406 = vector.broadcast %405 : vector<1x4xf32> to vector<32x4xf32>
    %407 = arith.mulf %397, %406 : vector<32x4xf32>
    %cst_346 = arith.constant 0.000000e+00 : f32
    %408 = vector.broadcast %cst_346 : f32 to vector<32x4xf32>
    %409 = arith.maximumf %407, %408 : vector<32x4xf32>
    %cst_347 = arith.constant 0.000000e+00 : f32
    %410 = vector.broadcast %cst_347 : f32 to vector<128x3xf32>
    %411 = arith.truncf %409 : vector<32x4xf32> to vector<32x4xbf16>
    %c0_348 = arith.constant 0 : index
    %c0_349 = arith.constant 0 : index
    %c0_350 = arith.constant 0 : index
    %412 = vector.load %arg14[%c0_348, %c0_349, %c0_350] : memref<9x128x32xbf16, #tpu.memory_space<vmem>>, vector<1x128x32xbf16>
    %413 = vector.shape_cast %412 : vector<1x128x32xbf16> to vector<128x32xbf16>
    %cst_351 = arith.constant dense<0.000000e+00> : vector<128x4xf32>
    %414 = tpu.matmul %413, %411, %cst_351 {dimension_numbers = #tpu.dot_dimension_numbers<[1], [0], [0], [1], [0, 0, 1, 1], [], []>} : vector<128x32xbf16>, vector<32x4xbf16>, vector<128x4xf32> -> vector<128x4xf32>
    %415 = arith.truncf %414 : vector<128x4xf32> to vector<128x4xbf16>
    %c0_352 = arith.constant 0 : index
    %c0_353 = arith.constant 0 : index
    %c0_354 = arith.constant 0 : index
    %416 = vector.load %arg15[%c0_352, %c0_353, %c0_354] : memref<9x4x3xbf16, #tpu.memory_space<vmem>>, vector<1x4x3xbf16>
    %417 = vector.shape_cast %416 : vector<1x4x3xbf16> to vector<4x3xbf16>
    %cst_355 = arith.constant dense<0.000000e+00> : vector<128x3xf32>
    %418 = tpu.matmul %415, %417, %cst_355 {dimension_numbers = #tpu.dot_dimension_numbers<[1], [0], [0], [1], [0, 0, 1, 1], [], []>} : vector<128x4xbf16>, vector<4x3xbf16>, vector<128x3xf32> -> vector<128x3xf32>
    %419 = arith.addf %410, %418 : vector<128x3xf32>
    %c1_356 = arith.constant 1 : index
    %c0_357 = arith.constant 0 : index
    %c0_358 = arith.constant 0 : index
    %420 = vector.load %arg14[%c1_356, %c0_357, %c0_358] : memref<9x128x32xbf16, #tpu.memory_space<vmem>>, vector<1x128x32xbf16>
    %421 = vector.shape_cast %420 : vector<1x128x32xbf16> to vector<128x32xbf16>
    %cst_359 = arith.constant dense<0.000000e+00> : vector<128x4xf32>
    %422 = tpu.matmul %421, %411, %cst_359 {dimension_numbers = #tpu.dot_dimension_numbers<[1], [0], [0], [1], [0, 0, 1, 1], [], []>} : vector<128x32xbf16>, vector<32x4xbf16>, vector<128x4xf32> -> vector<128x4xf32>
    %423 = arith.truncf %422 : vector<128x4xf32> to vector<128x4xbf16>
    %c1_360 = arith.constant 1 : index
    %c0_361 = arith.constant 0 : index
    %c0_362 = arith.constant 0 : index
    %424 = vector.load %arg15[%c1_360, %c0_361, %c0_362] : memref<9x4x3xbf16, #tpu.memory_space<vmem>>, vector<1x4x3xbf16>
    %425 = vector.shape_cast %424 : vector<1x4x3xbf16> to vector<4x3xbf16>
    %cst_363 = arith.constant dense<0.000000e+00> : vector<128x3xf32>
    %426 = tpu.matmul %423, %425, %cst_363 {dimension_numbers = #tpu.dot_dimension_numbers<[1], [0], [0], [1], [0, 0, 1, 1], [], []>} : vector<128x4xbf16>, vector<4x3xbf16>, vector<128x3xf32> -> vector<128x3xf32>
    %427 = arith.addf %419, %426 : vector<128x3xf32>
    %c2_364 = arith.constant 2 : index
    %c0_365 = arith.constant 0 : index
    %c0_366 = arith.constant 0 : index
    %428 = vector.load %arg14[%c2_364, %c0_365, %c0_366] : memref<9x128x32xbf16, #tpu.memory_space<vmem>>, vector<1x128x32xbf16>
    %429 = vector.shape_cast %428 : vector<1x128x32xbf16> to vector<128x32xbf16>
    %cst_367 = arith.constant dense<0.000000e+00> : vector<128x4xf32>
    %430 = tpu.matmul %429, %411, %cst_367 {dimension_numbers = #tpu.dot_dimension_numbers<[1], [0], [0], [1], [0, 0, 1, 1], [], []>} : vector<128x32xbf16>, vector<32x4xbf16>, vector<128x4xf32> -> vector<128x4xf32>
    %431 = arith.truncf %430 : vector<128x4xf32> to vector<128x4xbf16>
    %c2_368 = arith.constant 2 : index
    %c0_369 = arith.constant 0 : index
    %c0_370 = arith.constant 0 : index
    %432 = vector.load %arg15[%c2_368, %c0_369, %c0_370] : memref<9x4x3xbf16, #tpu.memory_space<vmem>>, vector<1x4x3xbf16>
    %433 = vector.shape_cast %432 : vector<1x4x3xbf16> to vector<4x3xbf16>
    %cst_371 = arith.constant dense<0.000000e+00> : vector<128x3xf32>
    %434 = tpu.matmul %431, %433, %cst_371 {dimension_numbers = #tpu.dot_dimension_numbers<[1], [0], [0], [1], [0, 0, 1, 1], [], []>} : vector<128x4xbf16>, vector<4x3xbf16>, vector<128x3xf32> -> vector<128x3xf32>
    %435 = arith.addf %427, %434 : vector<128x3xf32>
    %c3_372 = arith.constant 3 : index
    %c0_373 = arith.constant 0 : index
    %c0_374 = arith.constant 0 : index
    %436 = vector.load %arg14[%c3_372, %c0_373, %c0_374] : memref<9x128x32xbf16, #tpu.memory_space<vmem>>, vector<1x128x32xbf16>
    %437 = vector.shape_cast %436 : vector<1x128x32xbf16> to vector<128x32xbf16>
    %cst_375 = arith.constant dense<0.000000e+00> : vector<128x4xf32>
    %438 = tpu.matmul %437, %411, %cst_375 {dimension_numbers = #tpu.dot_dimension_numbers<[1], [0], [0], [1], [0, 0, 1, 1], [], []>} : vector<128x32xbf16>, vector<32x4xbf16>, vector<128x4xf32> -> vector<128x4xf32>
    %439 = arith.truncf %438 : vector<128x4xf32> to vector<128x4xbf16>
    %c3_376 = arith.constant 3 : index
    %c0_377 = arith.constant 0 : index
    %c0_378 = arith.constant 0 : index
    %440 = vector.load %arg15[%c3_376, %c0_377, %c0_378] : memref<9x4x3xbf16, #tpu.memory_space<vmem>>, vector<1x4x3xbf16>
    %441 = vector.shape_cast %440 : vector<1x4x3xbf16> to vector<4x3xbf16>
    %cst_379 = arith.constant dense<0.000000e+00> : vector<128x3xf32>
    %442 = tpu.matmul %439, %441, %cst_379 {dimension_numbers = #tpu.dot_dimension_numbers<[1], [0], [0], [1], [0, 0, 1, 1], [], []>} : vector<128x4xbf16>, vector<4x3xbf16>, vector<128x3xf32> -> vector<128x3xf32>
    %443 = arith.addf %435, %442 : vector<128x3xf32>
    %c4_380 = arith.constant 4 : index
    %c0_381 = arith.constant 0 : index
    %c0_382 = arith.constant 0 : index
    %444 = vector.load %arg14[%c4_380, %c0_381, %c0_382] : memref<9x128x32xbf16, #tpu.memory_space<vmem>>, vector<1x128x32xbf16>
    %445 = vector.shape_cast %444 : vector<1x128x32xbf16> to vector<128x32xbf16>
    %cst_383 = arith.constant dense<0.000000e+00> : vector<128x4xf32>
    %446 = tpu.matmul %445, %411, %cst_383 {dimension_numbers = #tpu.dot_dimension_numbers<[1], [0], [0], [1], [0, 0, 1, 1], [], []>} : vector<128x32xbf16>, vector<32x4xbf16>, vector<128x4xf32> -> vector<128x4xf32>
    %447 = arith.truncf %446 : vector<128x4xf32> to vector<128x4xbf16>
    %c4_384 = arith.constant 4 : index
    %c0_385 = arith.constant 0 : index
    %c0_386 = arith.constant 0 : index
    %448 = vector.load %arg15[%c4_384, %c0_385, %c0_386] : memref<9x4x3xbf16, #tpu.memory_space<vmem>>, vector<1x4x3xbf16>
    %449 = vector.shape_cast %448 : vector<1x4x3xbf16> to vector<4x3xbf16>
    %cst_387 = arith.constant dense<0.000000e+00> : vector<128x3xf32>
    %450 = tpu.matmul %447, %449, %cst_387 {dimension_numbers = #tpu.dot_dimension_numbers<[1], [0], [0], [1], [0, 0, 1, 1], [], []>} : vector<128x4xbf16>, vector<4x3xbf16>, vector<128x3xf32> -> vector<128x3xf32>
    %451 = arith.addf %443, %450 : vector<128x3xf32>
    %c5_388 = arith.constant 5 : index
    %c0_389 = arith.constant 0 : index
    %c0_390 = arith.constant 0 : index
    %452 = vector.load %arg14[%c5_388, %c0_389, %c0_390] : memref<9x128x32xbf16, #tpu.memory_space<vmem>>, vector<1x128x32xbf16>
    %453 = vector.shape_cast %452 : vector<1x128x32xbf16> to vector<128x32xbf16>
    %cst_391 = arith.constant dense<0.000000e+00> : vector<128x4xf32>
    %454 = tpu.matmul %453, %411, %cst_391 {dimension_numbers = #tpu.dot_dimension_numbers<[1], [0], [0], [1], [0, 0, 1, 1], [], []>} : vector<128x32xbf16>, vector<32x4xbf16>, vector<128x4xf32> -> vector<128x4xf32>
    %455 = arith.truncf %454 : vector<128x4xf32> to vector<128x4xbf16>
    %c5_392 = arith.constant 5 : index
    %c0_393 = arith.constant 0 : index
    %c0_394 = arith.constant 0 : index
    %456 = vector.load %arg15[%c5_392, %c0_393, %c0_394] : memref<9x4x3xbf16, #tpu.memory_space<vmem>>, vector<1x4x3xbf16>
    %457 = vector.shape_cast %456 : vector<1x4x3xbf16> to vector<4x3xbf16>
    %cst_395 = arith.constant dense<0.000000e+00> : vector<128x3xf32>
    %458 = tpu.matmul %455, %457, %cst_395 {dimension_numbers = #tpu.dot_dimension_numbers<[1], [0], [0], [1], [0, 0, 1, 1], [], []>} : vector<128x4xbf16>, vector<4x3xbf16>, vector<128x3xf32> -> vector<128x3xf32>
    %459 = arith.addf %451, %458 : vector<128x3xf32>
    %c6_396 = arith.constant 6 : index
    %c0_397 = arith.constant 0 : index
    %c0_398 = arith.constant 0 : index
    %460 = vector.load %arg14[%c6_396, %c0_397, %c0_398] : memref<9x128x32xbf16, #tpu.memory_space<vmem>>, vector<1x128x32xbf16>
    %461 = vector.shape_cast %460 : vector<1x128x32xbf16> to vector<128x32xbf16>
    %cst_399 = arith.constant dense<0.000000e+00> : vector<128x4xf32>
    %462 = tpu.matmul %461, %411, %cst_399 {dimension_numbers = #tpu.dot_dimension_numbers<[1], [0], [0], [1], [0, 0, 1, 1], [], []>} : vector<128x32xbf16>, vector<32x4xbf16>, vector<128x4xf32> -> vector<128x4xf32>
    %463 = arith.truncf %462 : vector<128x4xf32> to vector<128x4xbf16>
    %c6_400 = arith.constant 6 : index
    %c0_401 = arith.constant 0 : index
    %c0_402 = arith.constant 0 : index
    %464 = vector.load %arg15[%c6_400, %c0_401, %c0_402] : memref<9x4x3xbf16, #tpu.memory_space<vmem>>, vector<1x4x3xbf16>
    %465 = vector.shape_cast %464 : vector<1x4x3xbf16> to vector<4x3xbf16>
    %cst_403 = arith.constant dense<0.000000e+00> : vector<128x3xf32>
    %466 = tpu.matmul %463, %465, %cst_403 {dimension_numbers = #tpu.dot_dimension_numbers<[1], [0], [0], [1], [0, 0, 1, 1], [], []>} : vector<128x4xbf16>, vector<4x3xbf16>, vector<128x3xf32> -> vector<128x3xf32>
    %467 = arith.addf %459, %466 : vector<128x3xf32>
    %c7_404 = arith.constant 7 : index
    %c0_405 = arith.constant 0 : index
    %c0_406 = arith.constant 0 : index
    %468 = vector.load %arg14[%c7_404, %c0_405, %c0_406] : memref<9x128x32xbf16, #tpu.memory_space<vmem>>, vector<1x128x32xbf16>
    %469 = vector.shape_cast %468 : vector<1x128x32xbf16> to vector<128x32xbf16>
    %cst_407 = arith.constant dense<0.000000e+00> : vector<128x4xf32>
    %470 = tpu.matmul %469, %411, %cst_407 {dimension_numbers = #tpu.dot_dimension_numbers<[1], [0], [0], [1], [0, 0, 1, 1], [], []>} : vector<128x32xbf16>, vector<32x4xbf16>, vector<128x4xf32> -> vector<128x4xf32>
    %471 = arith.truncf %470 : vector<128x4xf32> to vector<128x4xbf16>
    %c7_408 = arith.constant 7 : index
    %c0_409 = arith.constant 0 : index
    %c0_410 = arith.constant 0 : index
    %472 = vector.load %arg15[%c7_408, %c0_409, %c0_410] : memref<9x4x3xbf16, #tpu.memory_space<vmem>>, vector<1x4x3xbf16>
    %473 = vector.shape_cast %472 : vector<1x4x3xbf16> to vector<4x3xbf16>
    %cst_411 = arith.constant dense<0.000000e+00> : vector<128x3xf32>
    %474 = tpu.matmul %471, %473, %cst_411 {dimension_numbers = #tpu.dot_dimension_numbers<[1], [0], [0], [1], [0, 0, 1, 1], [], []>} : vector<128x4xbf16>, vector<4x3xbf16>, vector<128x3xf32> -> vector<128x3xf32>
    %475 = arith.addf %467, %474 : vector<128x3xf32>
    %c8_412 = arith.constant 8 : index
    %c0_413 = arith.constant 0 : index
    %c0_414 = arith.constant 0 : index
    %476 = vector.load %arg14[%c8_412, %c0_413, %c0_414] : memref<9x128x32xbf16, #tpu.memory_space<vmem>>, vector<1x128x32xbf16>
    %477 = vector.shape_cast %476 : vector<1x128x32xbf16> to vector<128x32xbf16>
    %cst_415 = arith.constant dense<0.000000e+00> : vector<128x4xf32>
    %478 = tpu.matmul %477, %411, %cst_415 {dimension_numbers = #tpu.dot_dimension_numbers<[1], [0], [0], [1], [0, 0, 1, 1], [], []>} : vector<128x32xbf16>, vector<32x4xbf16>, vector<128x4xf32> -> vector<128x4xf32>
    %479 = arith.truncf %478 : vector<128x4xf32> to vector<128x4xbf16>
    %c8_416 = arith.constant 8 : index
    %c0_417 = arith.constant 0 : index
    %c0_418 = arith.constant 0 : index
    %480 = vector.load %arg15[%c8_416, %c0_417, %c0_418] : memref<9x4x3xbf16, #tpu.memory_space<vmem>>, vector<1x4x3xbf16>
    %481 = vector.shape_cast %480 : vector<1x4x3xbf16> to vector<4x3xbf16>
    %cst_419 = arith.constant dense<0.000000e+00> : vector<128x3xf32>
    %482 = tpu.matmul %479, %481, %cst_419 {dimension_numbers = #tpu.dot_dimension_numbers<[1], [0], [0], [1], [0, 0, 1, 1], [], []>} : vector<128x4xbf16>, vector<4x3xbf16>, vector<128x3xf32> -> vector<128x3xf32>
    %483 = arith.addf %475, %482 : vector<128x3xf32>
    %484 = arith.truncf %36 : vector<128x4xf32> to vector<128x4xbf16>
    %c0_420 = arith.constant 0 : index
    %c0_421 = arith.constant 0 : index
    %c0_422 = arith.constant 0 : index
    %485 = vector.load %arg4[%c0_420, %c0_421, %c0_422] : memref<9x128x128xbf16, #tpu.memory_space<vmem>>, vector<1x128x128xbf16>
    %486 = vector.shape_cast %485 : vector<1x128x128xbf16> to vector<128x128xbf16>
    %cst_423 = arith.constant dense<0.000000e+00> : vector<128x4xf32>
    %487 = tpu.matmul %486, %484, %cst_423 {dimension_numbers = #tpu.dot_dimension_numbers<[1], [0], [0], [1], [0, 0, 1, 1], [], []>} : vector<128x128xbf16>, vector<128x4xbf16>, vector<128x4xf32> -> vector<128x4xf32>
    %488 = arith.truncf %487 : vector<128x4xf32> to vector<128x4xbf16>
    %c0_424 = arith.constant 0 : index
    %c0_425 = arith.constant 0 : index
    %c0_426 = arith.constant 0 : index
    %489 = vector.load %arg16[%c0_424, %c0_425, %c0_426] : memref<9x4x3xbf16, #tpu.memory_space<vmem>>, vector<1x4x3xbf16>
    %490 = vector.shape_cast %489 : vector<1x4x3xbf16> to vector<4x3xbf16>
    %cst_427 = arith.constant dense<0.000000e+00> : vector<128x3xf32>
    %491 = tpu.matmul %488, %490, %cst_427 {dimension_numbers = #tpu.dot_dimension_numbers<[1], [0], [0], [1], [0, 0, 1, 1], [], []>} : vector<128x4xbf16>, vector<4x3xbf16>, vector<128x3xf32> -> vector<128x3xf32>
    %492 = arith.addf %483, %491 : vector<128x3xf32>
    %c1_428 = arith.constant 1 : index
    %c0_429 = arith.constant 0 : index
    %c0_430 = arith.constant 0 : index
    %493 = vector.load %arg4[%c1_428, %c0_429, %c0_430] : memref<9x128x128xbf16, #tpu.memory_space<vmem>>, vector<1x128x128xbf16>
    %494 = vector.shape_cast %493 : vector<1x128x128xbf16> to vector<128x128xbf16>
    %cst_431 = arith.constant dense<0.000000e+00> : vector<128x4xf32>
    %495 = tpu.matmul %494, %484, %cst_431 {dimension_numbers = #tpu.dot_dimension_numbers<[1], [0], [0], [1], [0, 0, 1, 1], [], []>} : vector<128x128xbf16>, vector<128x4xbf16>, vector<128x4xf32> -> vector<128x4xf32>
    %496 = arith.truncf %495 : vector<128x4xf32> to vector<128x4xbf16>
    %c1_432 = arith.constant 1 : index
    %c0_433 = arith.constant 0 : index
    %c0_434 = arith.constant 0 : index
    %497 = vector.load %arg16[%c1_432, %c0_433, %c0_434] : memref<9x4x3xbf16, #tpu.memory_space<vmem>>, vector<1x4x3xbf16>
    %498 = vector.shape_cast %497 : vector<1x4x3xbf16> to vector<4x3xbf16>
    %cst_435 = arith.constant dense<0.000000e+00> : vector<128x3xf32>
    %499 = tpu.matmul %496, %498, %cst_435 {dimension_numbers = #tpu.dot_dimension_numbers<[1], [0], [0], [1], [0, 0, 1, 1], [], []>} : vector<128x4xbf16>, vector<4x3xbf16>, vector<128x3xf32> -> vector<128x3xf32>
    %500 = arith.addf %492, %499 : vector<128x3xf32>
    %c2_436 = arith.constant 2 : index
    %c0_437 = arith.constant 0 : index
    %c0_438 = arith.constant 0 : index
    %501 = vector.load %arg4[%c2_436, %c0_437, %c0_438] : memref<9x128x128xbf16, #tpu.memory_space<vmem>>, vector<1x128x128xbf16>
    %502 = vector.shape_cast %501 : vector<1x128x128xbf16> to vector<128x128xbf16>
    %cst_439 = arith.constant dense<0.000000e+00> : vector<128x4xf32>
    %503 = tpu.matmul %502, %484, %cst_439 {dimension_numbers = #tpu.dot_dimension_numbers<[1], [0], [0], [1], [0, 0, 1, 1], [], []>} : vector<128x128xbf16>, vector<128x4xbf16>, vector<128x4xf32> -> vector<128x4xf32>
    %504 = arith.truncf %503 : vector<128x4xf32> to vector<128x4xbf16>
    %c2_440 = arith.constant 2 : index
    %c0_441 = arith.constant 0 : index
    %c0_442 = arith.constant 0 : index
    %505 = vector.load %arg16[%c2_440, %c0_441, %c0_442] : memref<9x4x3xbf16, #tpu.memory_space<vmem>>, vector<1x4x3xbf16>
    %506 = vector.shape_cast %505 : vector<1x4x3xbf16> to vector<4x3xbf16>
    %cst_443 = arith.constant dense<0.000000e+00> : vector<128x3xf32>
    %507 = tpu.matmul %504, %506, %cst_443 {dimension_numbers = #tpu.dot_dimension_numbers<[1], [0], [0], [1], [0, 0, 1, 1], [], []>} : vector<128x4xbf16>, vector<4x3xbf16>, vector<128x3xf32> -> vector<128x3xf32>
    %508 = arith.addf %500, %507 : vector<128x3xf32>
    %c3_444 = arith.constant 3 : index
    %c0_445 = arith.constant 0 : index
    %c0_446 = arith.constant 0 : index
    %509 = vector.load %arg4[%c3_444, %c0_445, %c0_446] : memref<9x128x128xbf16, #tpu.memory_space<vmem>>, vector<1x128x128xbf16>
    %510 = vector.shape_cast %509 : vector<1x128x128xbf16> to vector<128x128xbf16>
    %cst_447 = arith.constant dense<0.000000e+00> : vector<128x4xf32>
    %511 = tpu.matmul %510, %484, %cst_447 {dimension_numbers = #tpu.dot_dimension_numbers<[1], [0], [0], [1], [0, 0, 1, 1], [], []>} : vector<128x128xbf16>, vector<128x4xbf16>, vector<128x4xf32> -> vector<128x4xf32>
    %512 = arith.truncf %511 : vector<128x4xf32> to vector<128x4xbf16>
    %c3_448 = arith.constant 3 : index
    %c0_449 = arith.constant 0 : index
    %c0_450 = arith.constant 0 : index
    %513 = vector.load %arg16[%c3_448, %c0_449, %c0_450] : memref<9x4x3xbf16, #tpu.memory_space<vmem>>, vector<1x4x3xbf16>
    %514 = vector.shape_cast %513 : vector<1x4x3xbf16> to vector<4x3xbf16>
    %cst_451 = arith.constant dense<0.000000e+00> : vector<128x3xf32>
    %515 = tpu.matmul %512, %514, %cst_451 {dimension_numbers = #tpu.dot_dimension_numbers<[1], [0], [0], [1], [0, 0, 1, 1], [], []>} : vector<128x4xbf16>, vector<4x3xbf16>, vector<128x3xf32> -> vector<128x3xf32>
    %516 = arith.addf %508, %515 : vector<128x3xf32>
    %c4_452 = arith.constant 4 : index
    %c0_453 = arith.constant 0 : index
    %c0_454 = arith.constant 0 : index
    %517 = vector.load %arg4[%c4_452, %c0_453, %c0_454] : memref<9x128x128xbf16, #tpu.memory_space<vmem>>, vector<1x128x128xbf16>
    %518 = vector.shape_cast %517 : vector<1x128x128xbf16> to vector<128x128xbf16>
    %cst_455 = arith.constant dense<0.000000e+00> : vector<128x4xf32>
    %519 = tpu.matmul %518, %484, %cst_455 {dimension_numbers = #tpu.dot_dimension_numbers<[1], [0], [0], [1], [0, 0, 1, 1], [], []>} : vector<128x128xbf16>, vector<128x4xbf16>, vector<128x4xf32> -> vector<128x4xf32>
    %520 = arith.truncf %519 : vector<128x4xf32> to vector<128x4xbf16>
    %c4_456 = arith.constant 4 : index
    %c0_457 = arith.constant 0 : index
    %c0_458 = arith.constant 0 : index
    %521 = vector.load %arg16[%c4_456, %c0_457, %c0_458] : memref<9x4x3xbf16, #tpu.memory_space<vmem>>, vector<1x4x3xbf16>
    %522 = vector.shape_cast %521 : vector<1x4x3xbf16> to vector<4x3xbf16>
    %cst_459 = arith.constant dense<0.000000e+00> : vector<128x3xf32>
    %523 = tpu.matmul %520, %522, %cst_459 {dimension_numbers = #tpu.dot_dimension_numbers<[1], [0], [0], [1], [0, 0, 1, 1], [], []>} : vector<128x4xbf16>, vector<4x3xbf16>, vector<128x3xf32> -> vector<128x3xf32>
    %524 = arith.addf %516, %523 : vector<128x3xf32>
    %c5_460 = arith.constant 5 : index
    %c0_461 = arith.constant 0 : index
    %c0_462 = arith.constant 0 : index
    %525 = vector.load %arg4[%c5_460, %c0_461, %c0_462] : memref<9x128x128xbf16, #tpu.memory_space<vmem>>, vector<1x128x128xbf16>
    %526 = vector.shape_cast %525 : vector<1x128x128xbf16> to vector<128x128xbf16>
    %cst_463 = arith.constant dense<0.000000e+00> : vector<128x4xf32>
    %527 = tpu.matmul %526, %484, %cst_463 {dimension_numbers = #tpu.dot_dimension_numbers<[1], [0], [0], [1], [0, 0, 1, 1], [], []>} : vector<128x128xbf16>, vector<128x4xbf16>, vector<128x4xf32> -> vector<128x4xf32>
    %528 = arith.truncf %527 : vector<128x4xf32> to vector<128x4xbf16>
    %c5_464 = arith.constant 5 : index
    %c0_465 = arith.constant 0 : index
    %c0_466 = arith.constant 0 : index
    %529 = vector.load %arg16[%c5_464, %c0_465, %c0_466] : memref<9x4x3xbf16, #tpu.memory_space<vmem>>, vector<1x4x3xbf16>
    %530 = vector.shape_cast %529 : vector<1x4x3xbf16> to vector<4x3xbf16>
    %cst_467 = arith.constant dense<0.000000e+00> : vector<128x3xf32>
    %531 = tpu.matmul %528, %530, %cst_467 {dimension_numbers = #tpu.dot_dimension_numbers<[1], [0], [0], [1], [0, 0, 1, 1], [], []>} : vector<128x4xbf16>, vector<4x3xbf16>, vector<128x3xf32> -> vector<128x3xf32>
    %532 = arith.addf %524, %531 : vector<128x3xf32>
    %c6_468 = arith.constant 6 : index
    %c0_469 = arith.constant 0 : index
    %c0_470 = arith.constant 0 : index
    %533 = vector.load %arg4[%c6_468, %c0_469, %c0_470] : memref<9x128x128xbf16, #tpu.memory_space<vmem>>, vector<1x128x128xbf16>
    %534 = vector.shape_cast %533 : vector<1x128x128xbf16> to vector<128x128xbf16>
    %cst_471 = arith.constant dense<0.000000e+00> : vector<128x4xf32>
    %535 = tpu.matmul %534, %484, %cst_471 {dimension_numbers = #tpu.dot_dimension_numbers<[1], [0], [0], [1], [0, 0, 1, 1], [], []>} : vector<128x128xbf16>, vector<128x4xbf16>, vector<128x4xf32> -> vector<128x4xf32>
    %536 = arith.truncf %535 : vector<128x4xf32> to vector<128x4xbf16>
    %c6_472 = arith.constant 6 : index
    %c0_473 = arith.constant 0 : index
    %c0_474 = arith.constant 0 : index
    %537 = vector.load %arg16[%c6_472, %c0_473, %c0_474] : memref<9x4x3xbf16, #tpu.memory_space<vmem>>, vector<1x4x3xbf16>
    %538 = vector.shape_cast %537 : vector<1x4x3xbf16> to vector<4x3xbf16>
    %cst_475 = arith.constant dense<0.000000e+00> : vector<128x3xf32>
    %539 = tpu.matmul %536, %538, %cst_475 {dimension_numbers = #tpu.dot_dimension_numbers<[1], [0], [0], [1], [0, 0, 1, 1], [], []>} : vector<128x4xbf16>, vector<4x3xbf16>, vector<128x3xf32> -> vector<128x3xf32>
    %540 = arith.addf %532, %539 : vector<128x3xf32>
    %c7_476 = arith.constant 7 : index
    %c0_477 = arith.constant 0 : index
    %c0_478 = arith.constant 0 : index
    %541 = vector.load %arg4[%c7_476, %c0_477, %c0_478] : memref<9x128x128xbf16, #tpu.memory_space<vmem>>, vector<1x128x128xbf16>
    %542 = vector.shape_cast %541 : vector<1x128x128xbf16> to vector<128x128xbf16>
    %cst_479 = arith.constant dense<0.000000e+00> : vector<128x4xf32>
    %543 = tpu.matmul %542, %484, %cst_479 {dimension_numbers = #tpu.dot_dimension_numbers<[1], [0], [0], [1], [0, 0, 1, 1], [], []>} : vector<128x128xbf16>, vector<128x4xbf16>, vector<128x4xf32> -> vector<128x4xf32>
    %544 = arith.truncf %543 : vector<128x4xf32> to vector<128x4xbf16>
    %c7_480 = arith.constant 7 : index
    %c0_481 = arith.constant 0 : index
    %c0_482 = arith.constant 0 : index
    %545 = vector.load %arg16[%c7_480, %c0_481, %c0_482] : memref<9x4x3xbf16, #tpu.memory_space<vmem>>, vector<1x4x3xbf16>
    %546 = vector.shape_cast %545 : vector<1x4x3xbf16> to vector<4x3xbf16>
    %cst_483 = arith.constant dense<0.000000e+00> : vector<128x3xf32>
    %547 = tpu.matmul %544, %546, %cst_483 {dimension_numbers = #tpu.dot_dimension_numbers<[1], [0], [0], [1], [0, 0, 1, 1], [], []>} : vector<128x4xbf16>, vector<4x3xbf16>, vector<128x3xf32> -> vector<128x3xf32>
    %548 = arith.addf %540, %547 : vector<128x3xf32>
    %c8_484 = arith.constant 8 : index
    %c0_485 = arith.constant 0 : index
    %c0_486 = arith.constant 0 : index
    %549 = vector.load %arg4[%c8_484, %c0_485, %c0_486] : memref<9x128x128xbf16, #tpu.memory_space<vmem>>, vector<1x128x128xbf16>
    %550 = vector.shape_cast %549 : vector<1x128x128xbf16> to vector<128x128xbf16>
    %cst_487 = arith.constant dense<0.000000e+00> : vector<128x4xf32>
    %551 = tpu.matmul %550, %484, %cst_487 {dimension_numbers = #tpu.dot_dimension_numbers<[1], [0], [0], [1], [0, 0, 1, 1], [], []>} : vector<128x128xbf16>, vector<128x4xbf16>, vector<128x4xf32> -> vector<128x4xf32>
    %552 = arith.truncf %551 : vector<128x4xf32> to vector<128x4xbf16>
    %c8_488 = arith.constant 8 : index
    %c0_489 = arith.constant 0 : index
    %c0_490 = arith.constant 0 : index
    %553 = vector.load %arg16[%c8_488, %c0_489, %c0_490] : memref<9x4x3xbf16, #tpu.memory_space<vmem>>, vector<1x4x3xbf16>
    %554 = vector.shape_cast %553 : vector<1x4x3xbf16> to vector<4x3xbf16>
    %cst_491 = arith.constant dense<0.000000e+00> : vector<128x3xf32>
    %555 = tpu.matmul %552, %554, %cst_491 {dimension_numbers = #tpu.dot_dimension_numbers<[1], [0], [0], [1], [0, 0, 1, 1], [], []>} : vector<128x4xbf16>, vector<4x3xbf16>, vector<128x3xf32> -> vector<128x3xf32>
    %556 = arith.addf %548, %555 : vector<128x3xf32>
    %c0_492 = arith.constant 0 : index
    %c0_493 = arith.constant 0 : index
    %557 = vector.load %arg17[%c0_492, %c0_493] : memref<1x3xf32, #tpu.memory_space<vmem>>, vector<1x3xf32>
    %558 = vector.broadcast %557 : vector<1x3xf32> to vector<128x3xf32>
    %559 = arith.addf %556, %558 : vector<128x3xf32>
    %cst_494 = arith.constant dense<0.000000e+00> : vector<3xf32>
    %560 = vector.multi_reduction <add>, %559, %cst_494 [0] : vector<128x3xf32> to vector<3xf32>
    %561 = vector.shape_cast %560 : vector<3xf32> to vector<1x3xf32>
    %cst_495 = arith.constant 1.280000e+02 : f32
    %562 = vector.broadcast %cst_495 : f32 to vector<1x3xf32>
    %563 = arith.divf %561, %562 : vector<1x3xf32>
    %564 = vector.broadcast %563 : vector<1x3xf32> to vector<128x3xf32>
    %565 = arith.subf %559, %564 : vector<128x3xf32>
    %566 = arith.mulf %565, %565 : vector<128x3xf32>
    %cst_496 = arith.constant dense<0.000000e+00> : vector<3xf32>
    %567 = vector.multi_reduction <add>, %566, %cst_496 [0] : vector<128x3xf32> to vector<3xf32>
    %568 = vector.shape_cast %567 : vector<3xf32> to vector<1x3xf32>
    %cst_497 = arith.constant 1.280000e+02 : f32
    %569 = vector.broadcast %cst_497 : f32 to vector<1x3xf32>
    %570 = arith.divf %568, %569 : vector<1x3xf32>
    %cst_498 = arith.constant 9.99999974E-6 : f32
    %571 = vector.broadcast %cst_498 : f32 to vector<1x3xf32>
    %572 = arith.addf %570, %571 : vector<1x3xf32>
    %573 = math.rsqrt %572 : vector<1x3xf32>
    %574 = vector.broadcast %573 : vector<1x3xf32> to vector<128x3xf32>
    %575 = arith.mulf %565, %574 : vector<128x3xf32>
    %cst_499 = arith.constant 0.000000e+00 : f32
    %576 = vector.broadcast %cst_499 : f32 to vector<128x3xf32>
    %577 = arith.maximumf %575, %576 : vector<128x3xf32>
    %cst_500 = arith.constant 0.000000e+00 : f32
    %578 = vector.broadcast %cst_500 : f32 to vector<512x3xf32>
    %579 = arith.truncf %577 : vector<128x3xf32> to vector<128x3xbf16>
    %c0_501 = arith.constant 0 : index
    %c0_502 = arith.constant 0 : index
    %c0_503 = arith.constant 0 : index
    %580 = vector.load %arg18[%c0_501, %c0_502, %c0_503] : memref<9x512x128xbf16, #tpu.memory_space<vmem>>, vector<1x512x128xbf16>
    %581 = vector.shape_cast %580 : vector<1x512x128xbf16> to vector<512x128xbf16>
    %cst_504 = arith.constant dense<0.000000e+00> : vector<512x3xf32>
    %582 = tpu.matmul %581, %579, %cst_504 {dimension_numbers = #tpu.dot_dimension_numbers<[1], [0], [0], [1], [0, 0, 1, 1], [], []>} : vector<512x128xbf16>, vector<128x3xbf16>, vector<512x3xf32> -> vector<512x3xf32>
    %583 = arith.truncf %582 : vector<512x3xf32> to vector<512x3xbf16>
    %c0_505 = arith.constant 0 : index
    %c0_506 = arith.constant 0 : index
    %c0_507 = arith.constant 0 : index
    %584 = vector.load %arg19[%c0_505, %c0_506, %c0_507] : memref<9x3x3xbf16, #tpu.memory_space<vmem>>, vector<1x3x3xbf16>
    %585 = vector.shape_cast %584 : vector<1x3x3xbf16> to vector<3x3xbf16>
    %cst_508 = arith.constant dense<0.000000e+00> : vector<512x3xf32>
    %586 = tpu.matmul %583, %585, %cst_508 {dimension_numbers = #tpu.dot_dimension_numbers<[1], [0], [0], [1], [0, 0, 1, 1], [], []>} : vector<512x3xbf16>, vector<3x3xbf16>, vector<512x3xf32> -> vector<512x3xf32>
    %587 = arith.addf %578, %586 : vector<512x3xf32>
    %c1_509 = arith.constant 1 : index
    %c0_510 = arith.constant 0 : index
    %c0_511 = arith.constant 0 : index
    %588 = vector.load %arg18[%c1_509, %c0_510, %c0_511] : memref<9x512x128xbf16, #tpu.memory_space<vmem>>, vector<1x512x128xbf16>
    %589 = vector.shape_cast %588 : vector<1x512x128xbf16> to vector<512x128xbf16>
    %cst_512 = arith.constant dense<0.000000e+00> : vector<512x3xf32>
    %590 = tpu.matmul %589, %579, %cst_512 {dimension_numbers = #tpu.dot_dimension_numbers<[1], [0], [0], [1], [0, 0, 1, 1], [], []>} : vector<512x128xbf16>, vector<128x3xbf16>, vector<512x3xf32> -> vector<512x3xf32>
    %591 = arith.truncf %590 : vector<512x3xf32> to vector<512x3xbf16>
    %c1_513 = arith.constant 1 : index
    %c0_514 = arith.constant 0 : index
    %c0_515 = arith.constant 0 : index
    %592 = vector.load %arg19[%c1_513, %c0_514, %c0_515] : memref<9x3x3xbf16, #tpu.memory_space<vmem>>, vector<1x3x3xbf16>
    %593 = vector.shape_cast %592 : vector<1x3x3xbf16> to vector<3x3xbf16>
    %cst_516 = arith.constant dense<0.000000e+00> : vector<512x3xf32>
    %594 = tpu.matmul %591, %593, %cst_516 {dimension_numbers = #tpu.dot_dimension_numbers<[1], [0], [0], [1], [0, 0, 1, 1], [], []>} : vector<512x3xbf16>, vector<3x3xbf16>, vector<512x3xf32> -> vector<512x3xf32>
    %595 = arith.addf %587, %594 : vector<512x3xf32>
    %c2_517 = arith.constant 2 : index
    %c0_518 = arith.constant 0 : index
    %c0_519 = arith.constant 0 : index
    %596 = vector.load %arg18[%c2_517, %c0_518, %c0_519] : memref<9x512x128xbf16, #tpu.memory_space<vmem>>, vector<1x512x128xbf16>
    %597 = vector.shape_cast %596 : vector<1x512x128xbf16> to vector<512x128xbf16>
    %cst_520 = arith.constant dense<0.000000e+00> : vector<512x3xf32>
    %598 = tpu.matmul %597, %579, %cst_520 {dimension_numbers = #tpu.dot_dimension_numbers<[1], [0], [0], [1], [0, 0, 1, 1], [], []>} : vector<512x128xbf16>, vector<128x3xbf16>, vector<512x3xf32> -> vector<512x3xf32>
    %599 = arith.truncf %598 : vector<512x3xf32> to vector<512x3xbf16>
    %c2_521 = arith.constant 2 : index
    %c0_522 = arith.constant 0 : index
    %c0_523 = arith.constant 0 : index
    %600 = vector.load %arg19[%c2_521, %c0_522, %c0_523] : memref<9x3x3xbf16, #tpu.memory_space<vmem>>, vector<1x3x3xbf16>
    %601 = vector.shape_cast %600 : vector<1x3x3xbf16> to vector<3x3xbf16>
    %cst_524 = arith.constant dense<0.000000e+00> : vector<512x3xf32>
    %602 = tpu.matmul %599, %601, %cst_524 {dimension_numbers = #tpu.dot_dimension_numbers<[1], [0], [0], [1], [0, 0, 1, 1], [], []>} : vector<512x3xbf16>, vector<3x3xbf16>, vector<512x3xf32> -> vector<512x3xf32>
    %603 = arith.addf %595, %602 : vector<512x3xf32>
    %c3_525 = arith.constant 3 : index
    %c0_526 = arith.constant 0 : index
    %c0_527 = arith.constant 0 : index
    %604 = vector.load %arg18[%c3_525, %c0_526, %c0_527] : memref<9x512x128xbf16, #tpu.memory_space<vmem>>, vector<1x512x128xbf16>
    %605 = vector.shape_cast %604 : vector<1x512x128xbf16> to vector<512x128xbf16>
    %cst_528 = arith.constant dense<0.000000e+00> : vector<512x3xf32>
    %606 = tpu.matmul %605, %579, %cst_528 {dimension_numbers = #tpu.dot_dimension_numbers<[1], [0], [0], [1], [0, 0, 1, 1], [], []>} : vector<512x128xbf16>, vector<128x3xbf16>, vector<512x3xf32> -> vector<512x3xf32>
    %607 = arith.truncf %606 : vector<512x3xf32> to vector<512x3xbf16>
    %c3_529 = arith.constant 3 : index
    %c0_530 = arith.constant 0 : index
    %c0_531 = arith.constant 0 : index
    %608 = vector.load %arg19[%c3_529, %c0_530, %c0_531] : memref<9x3x3xbf16, #tpu.memory_space<vmem>>, vector<1x3x3xbf16>
    %609 = vector.shape_cast %608 : vector<1x3x3xbf16> to vector<3x3xbf16>
    %cst_532 = arith.constant dense<0.000000e+00> : vector<512x3xf32>
    %610 = tpu.matmul %607, %609, %cst_532 {dimension_numbers = #tpu.dot_dimension_numbers<[1], [0], [0], [1], [0, 0, 1, 1], [], []>} : vector<512x3xbf16>, vector<3x3xbf16>, vector<512x3xf32> -> vector<512x3xf32>
    %611 = arith.addf %603, %610 : vector<512x3xf32>
    %c4_533 = arith.constant 4 : index
    %c0_534 = arith.constant 0 : index
    %c0_535 = arith.constant 0 : index
    %612 = vector.load %arg18[%c4_533, %c0_534, %c0_535] : memref<9x512x128xbf16, #tpu.memory_space<vmem>>, vector<1x512x128xbf16>
    %613 = vector.shape_cast %612 : vector<1x512x128xbf16> to vector<512x128xbf16>
    %cst_536 = arith.constant dense<0.000000e+00> : vector<512x3xf32>
    %614 = tpu.matmul %613, %579, %cst_536 {dimension_numbers = #tpu.dot_dimension_numbers<[1], [0], [0], [1], [0, 0, 1, 1], [], []>} : vector<512x128xbf16>, vector<128x3xbf16>, vector<512x3xf32> -> vector<512x3xf32>
    %615 = arith.truncf %614 : vector<512x3xf32> to vector<512x3xbf16>
    %c4_537 = arith.constant 4 : index
    %c0_538 = arith.constant 0 : index
    %c0_539 = arith.constant 0 : index
    %616 = vector.load %arg19[%c4_537, %c0_538, %c0_539] : memref<9x3x3xbf16, #tpu.memory_space<vmem>>, vector<1x3x3xbf16>
    %617 = vector.shape_cast %616 : vector<1x3x3xbf16> to vector<3x3xbf16>
    %cst_540 = arith.constant dense<0.000000e+00> : vector<512x3xf32>
    %618 = tpu.matmul %615, %617, %cst_540 {dimension_numbers = #tpu.dot_dimension_numbers<[1], [0], [0], [1], [0, 0, 1, 1], [], []>} : vector<512x3xbf16>, vector<3x3xbf16>, vector<512x3xf32> -> vector<512x3xf32>
    %619 = arith.addf %611, %618 : vector<512x3xf32>
    %c5_541 = arith.constant 5 : index
    %c0_542 = arith.constant 0 : index
    %c0_543 = arith.constant 0 : index
    %620 = vector.load %arg18[%c5_541, %c0_542, %c0_543] : memref<9x512x128xbf16, #tpu.memory_space<vmem>>, vector<1x512x128xbf16>
    %621 = vector.shape_cast %620 : vector<1x512x128xbf16> to vector<512x128xbf16>
    %cst_544 = arith.constant dense<0.000000e+00> : vector<512x3xf32>
    %622 = tpu.matmul %621, %579, %cst_544 {dimension_numbers = #tpu.dot_dimension_numbers<[1], [0], [0], [1], [0, 0, 1, 1], [], []>} : vector<512x128xbf16>, vector<128x3xbf16>, vector<512x3xf32> -> vector<512x3xf32>
    %623 = arith.truncf %622 : vector<512x3xf32> to vector<512x3xbf16>
    %c5_545 = arith.constant 5 : index
    %c0_546 = arith.constant 0 : index
    %c0_547 = arith.constant 0 : index
    %624 = vector.load %arg19[%c5_545, %c0_546, %c0_547] : memref<9x3x3xbf16, #tpu.memory_space<vmem>>, vector<1x3x3xbf16>
    %625 = vector.shape_cast %624 : vector<1x3x3xbf16> to vector<3x3xbf16>
    %cst_548 = arith.constant dense<0.000000e+00> : vector<512x3xf32>
    %626 = tpu.matmul %623, %625, %cst_548 {dimension_numbers = #tpu.dot_dimension_numbers<[1], [0], [0], [1], [0, 0, 1, 1], [], []>} : vector<512x3xbf16>, vector<3x3xbf16>, vector<512x3xf32> -> vector<512x3xf32>
    %627 = arith.addf %619, %626 : vector<512x3xf32>
    %c6_549 = arith.constant 6 : index
    %c0_550 = arith.constant 0 : index
    %c0_551 = arith.constant 0 : index
    %628 = vector.load %arg18[%c6_549, %c0_550, %c0_551] : memref<9x512x128xbf16, #tpu.memory_space<vmem>>, vector<1x512x128xbf16>
    %629 = vector.shape_cast %628 : vector<1x512x128xbf16> to vector<512x128xbf16>
    %cst_552 = arith.constant dense<0.000000e+00> : vector<512x3xf32>
    %630 = tpu.matmul %629, %579, %cst_552 {dimension_numbers = #tpu.dot_dimension_numbers<[1], [0], [0], [1], [0, 0, 1, 1], [], []>} : vector<512x128xbf16>, vector<128x3xbf16>, vector<512x3xf32> -> vector<512x3xf32>
    %631 = arith.truncf %630 : vector<512x3xf32> to vector<512x3xbf16>
    %c6_553 = arith.constant 6 : index
    %c0_554 = arith.constant 0 : index
    %c0_555 = arith.constant 0 : index
    %632 = vector.load %arg19[%c6_553, %c0_554, %c0_555] : memref<9x3x3xbf16, #tpu.memory_space<vmem>>, vector<1x3x3xbf16>
    %633 = vector.shape_cast %632 : vector<1x3x3xbf16> to vector<3x3xbf16>
    %cst_556 = arith.constant dense<0.000000e+00> : vector<512x3xf32>
    %634 = tpu.matmul %631, %633, %cst_556 {dimension_numbers = #tpu.dot_dimension_numbers<[1], [0], [0], [1], [0, 0, 1, 1], [], []>} : vector<512x3xbf16>, vector<3x3xbf16>, vector<512x3xf32> -> vector<512x3xf32>
    %635 = arith.addf %627, %634 : vector<512x3xf32>
    %c7_557 = arith.constant 7 : index
    %c0_558 = arith.constant 0 : index
    %c0_559 = arith.constant 0 : index
    %636 = vector.load %arg18[%c7_557, %c0_558, %c0_559] : memref<9x512x128xbf16, #tpu.memory_space<vmem>>, vector<1x512x128xbf16>
    %637 = vector.shape_cast %636 : vector<1x512x128xbf16> to vector<512x128xbf16>
    %cst_560 = arith.constant dense<0.000000e+00> : vector<512x3xf32>
    %638 = tpu.matmul %637, %579, %cst_560 {dimension_numbers = #tpu.dot_dimension_numbers<[1], [0], [0], [1], [0, 0, 1, 1], [], []>} : vector<512x128xbf16>, vector<128x3xbf16>, vector<512x3xf32> -> vector<512x3xf32>
    %639 = arith.truncf %638 : vector<512x3xf32> to vector<512x3xbf16>
    %c7_561 = arith.constant 7 : index
    %c0_562 = arith.constant 0 : index
    %c0_563 = arith.constant 0 : index
    %640 = vector.load %arg19[%c7_561, %c0_562, %c0_563] : memref<9x3x3xbf16, #tpu.memory_space<vmem>>, vector<1x3x3xbf16>
    %641 = vector.shape_cast %640 : vector<1x3x3xbf16> to vector<3x3xbf16>
    %cst_564 = arith.constant dense<0.000000e+00> : vector<512x3xf32>
    %642 = tpu.matmul %639, %641, %cst_564 {dimension_numbers = #tpu.dot_dimension_numbers<[1], [0], [0], [1], [0, 0, 1, 1], [], []>} : vector<512x3xbf16>, vector<3x3xbf16>, vector<512x3xf32> -> vector<512x3xf32>
    %643 = arith.addf %635, %642 : vector<512x3xf32>
    %c8_565 = arith.constant 8 : index
    %c0_566 = arith.constant 0 : index
    %c0_567 = arith.constant 0 : index
    %644 = vector.load %arg18[%c8_565, %c0_566, %c0_567] : memref<9x512x128xbf16, #tpu.memory_space<vmem>>, vector<1x512x128xbf16>
    %645 = vector.shape_cast %644 : vector<1x512x128xbf16> to vector<512x128xbf16>
    %cst_568 = arith.constant dense<0.000000e+00> : vector<512x3xf32>
    %646 = tpu.matmul %645, %579, %cst_568 {dimension_numbers = #tpu.dot_dimension_numbers<[1], [0], [0], [1], [0, 0, 1, 1], [], []>} : vector<512x128xbf16>, vector<128x3xbf16>, vector<512x3xf32> -> vector<512x3xf32>
    %647 = arith.truncf %646 : vector<512x3xf32> to vector<512x3xbf16>
    %c8_569 = arith.constant 8 : index
    %c0_570 = arith.constant 0 : index
    %c0_571 = arith.constant 0 : index
    %648 = vector.load %arg19[%c8_569, %c0_570, %c0_571] : memref<9x3x3xbf16, #tpu.memory_space<vmem>>, vector<1x3x3xbf16>
    %649 = vector.shape_cast %648 : vector<1x3x3xbf16> to vector<3x3xbf16>
    %cst_572 = arith.constant dense<0.000000e+00> : vector<512x3xf32>
    %650 = tpu.matmul %647, %649, %cst_572 {dimension_numbers = #tpu.dot_dimension_numbers<[1], [0], [0], [1], [0, 0, 1, 1], [], []>} : vector<512x3xbf16>, vector<3x3xbf16>, vector<512x3xf32> -> vector<512x3xf32>
    %651 = arith.addf %643, %650 : vector<512x3xf32>
    %c0_573 = arith.constant 0 : index
    %c0_574 = arith.constant 0 : index
    %652 = vector.load %arg21[%c0_573, %c0_574] : memref<1x3xf32, #tpu.memory_space<vmem>>, vector<1x3xf32>
    %653 = vector.broadcast %652 : vector<1x3xf32> to vector<512x3xf32>
    %654 = arith.addf %651, %653 : vector<512x3xf32>
    %c0_575 = arith.constant 0 : index
    %c0_576 = arith.constant 0 : index
    %655 = vector.load %arg1[%c0_575, %c0_576] : memref<512x9xbf16, #tpu.memory_space<vmem>>, vector<512x9xbf16>
    %c0_577 = arith.constant 0 : index
    %c0_578 = arith.constant 0 : index
    %656 = vector.load %arg20[%c0_577, %c0_578] : memref<9x3xbf16, #tpu.memory_space<vmem>>, vector<9x3xbf16>
    %cst_579 = arith.constant dense<0.000000e+00> : vector<512x3xf32>
    %657 = tpu.matmul %655, %656, %cst_579 {dimension_numbers = #tpu.dot_dimension_numbers<[1], [0], [0], [1], [0, 0, 1, 1], [], []>} : vector<512x9xbf16>, vector<9x3xbf16>, vector<512x3xf32> -> vector<512x3xf32>
    %658 = arith.addf %654, %657 : vector<512x3xf32>
    %c0_580 = arith.constant 0 : index
    %c0_581 = arith.constant 0 : index
    %659 = vector.load %arg22[%c0_580, %c0_581] : memref<512x3xf32, #tpu.memory_space<vmem>>, vector<512x3xf32>
    tpu.vector_store %arg22[%c0_580, %c0_581], %658 {strides = array<i32>} : memref<512x3xf32, #tpu.memory_space<vmem>>, vector<512x3xf32>,
    return
  }
}

</mosaic_0001>

<bundles_post_ra>
// kernel: _lambda_.1
= control target key start
LH: loop header
LB: loop body
LE: loop exit
PB: predicated region body
PF: predicated region fallthrough
CT: control target
= control target key end

     0   :  { %vm160_vm0 = vcmask 1043456   ;;  %vm161_vm1 = vcmask 1044480   ;;  %vm135_vm2 = vcmask 72704   ;;  %v36711_v1 = vmov 65535   ;;  %s36684_s2 = inlined_call_operand.vmem [shape: bf16[9,4], index: 2, kind: input, shape index: {}]   ;;  %s36685_s0 = inlined_call_operand.vmem [shape: bf16[4,128,9], index: 0, kind: input, shape index: {}]   ;;  %s36686_s3 = inlined_call_operand.vmem [shape: f32[1,4], index: 3, kind: input, shape index: {}]   ;;  %s36687_s4 = inlined_call_operand.vmem [shape: bf16[9,128,128], index: 4, kind: input, shape index: {}]   ;;  %s36688_s5 = inlined_call_operand.vmem [shape: bf16[9,4,8], index: 5, kind: input, shape index: {}]   ;;  %s36689_s7 = inlined_call_operand.vmem [shape: f32[4,32,128], index: 7, kind: input, shape index: {}]   ;;  %s36690_s6 = inlined_call_operand.vmem [shape: f32[1,8], index: 6, kind: input, shape index: {}]   ;;  %s36691_s8 = inlined_call_operand.vmem [shape: bf16[9,32,32], index: 8, kind: input, shape index: {}]   ;;  %s36692_s9 = inlined_call_operand.vmem [shape: bf16[9,8,8], index: 9, kind: input, shape index: {}]   ;;  %s36693_s10 = inlined_call_operand.vmem [shape: f32[1,8], index: 10, kind: input, shape index: {}]   ;;  %s36694_s11 = inlined_call_operand.vmem [shape: bf16[9,8,4], index: 11, kind: input, shape index: {}]   ;;  %s36695_s12 = inlined_call_operand.vmem [shape: bf16[9,8,4], index: 12, kind: input, shape index: {}]   ;;  %s36696_s14 = inlined_call_operand.vmem [shape: bf16[9,128,32], index: 14, kind: input, shape index: {}]   ;;  %s36697_s13 = inlined_call_operand.vmem [shape: f32[1,4], index: 13, kind: input, shape index: {}]   ;;  %s36698_s15 = inlined_call_operand.vmem [shape: bf16[9,4,3], index: 15, kind: input, shape index: {}]   ;;  %s36699_s16 = inlined_call_operand.vmem [shape: bf16[9,4,3], index: 16, kind: input, shape index: {}]   ;;  %s36700_s17 = inlined_call_operand.vmem [shape: f32[1,3], index: 17, kind: input, shape index: {}]   ;;  %s36701_s18 = inlined_call_operand.vmem [shape: bf16[9,512,128], index: 18, kind: input, shape index: {}]   ;;  %s36702_s19 = inlined_call_operand.vmem [shape: bf16[9,3,3], index: 19, kind: input, shape index: {}]   ;;  %s36703_s20 = inlined_call_operand.vmem [shape: bf16[9,3], index: 20, kind: input, shape index: {}]   ;;  %s36704_s1 = inlined_call_operand.vmem [shape: bf16[512,9], index: 1, kind: input, shape index: {}]   ;;  %s36705_s21 = inlined_call_operand.vmem [shape: f32[1,3], index: 21, kind: input, shape index: {}]   ;;  %s36706_s22 = inlined_call_operand.vmem [shape: f32[512,3], index: 22, kind: output, shape index: {}]  }
   0x1   :  { %36908 = sst [smem:[#allocation71_spill]] %s36684_s2  ;;  %v162_v2 = vsel %vm160_vm0, 4294967295, %v36711_v1  ;;  %vm869_vm3 = vcmask 31744   ;;  %vm1387_vm4 = vcmask 1041408   ;;  %vm4254_vm5 = vcmask 261120  }
   0x2   :  { %36909 = sst [smem:[#allocation72_spill]] %s36685_s0  ;;  %s36915_s29 = sld [smem:[#allocation71_spill]]  ;;  %v29697_v4 = vsel %vm161_vm1, %v162_v2, 0  ;;  %vm4190_vm6 = vcmask 64512   ;;  %vm11122_vm7 = vcmask 23552   ;;  %vm12527_vm8 = vcmask 1040384  }
   0x3   :  { %36910 = sst [smem:[#allocation73_spill]] %s36686_s3  ;;  %s36916_s2 = sld [smem:[#allocation72_spill]]  ;;  %36917 = vst [vmem:[#allocation2_spill] sm:$0xff] %v29697_v4 }
   0x4   :  { %36911 = sst [smem:[#allocation74_spill]] %s36687_s4  ;;  %s36918_s3 = sld [smem:[#allocation73_spill]] }
   0x5   :  { %36912 = sst [smem:[#allocation75_spill]] %s36688_s5  ;;  %s36919_s28 = sld [smem:[#allocation74_spill]] }
   0x6   :  { %36913 = sst [smem:[#allocation76_spill]] %s36689_s7  ;;  %s36920_s25 = sld [smem:[#allocation75_spill]] }
   0x7   :  { %36914 = sst [smem:[#allocation77_spill]] %s36690_s6  ;;  %s36989_s30 = sld [smem:[#allocation76_spill]] }
   0x8   :  { %v29047_v0 = vld [vmem:[%s36915_s29] sm:$0x1f]   ;;  %s36990_s7 = sld [smem:[#allocation77_spill]] }
   0x9   :  { %v29048_v3 = vld [vmem:[%s36916_s2] sm:$0xff]   ;;  %v165_v5 = vand.u32 %v29047_v0, %v29697_v4  ;;  %v29049_v6 = vld [vmem:[%s36916_s2 + $0x8] sm:$0xff]   ;;  %v29050_v7 = vld [vmem:[%s36916_s2 + $0x10] sm:$0xff]  }
   0xa   :  { %24862 = vmatprep.mubr.msk.bf16.mxu1 %vm135_vm2, %v29048_v3  ;;  %v29058_v8 = vld [vmem:[%s36916_s2 + $0x80] sm:$0xff]   ;;  %v29059_v9 = vld [vmem:[%s36916_s2 + $0x88] sm:$0xff]   ;;  %v29051_v10 = vld [vmem:[%s36916_s2 + $0x18] sm:$0xff]  }
   0xb   :  { %24860 = vmatprep.subr.bf16.mxu1 %v165_v5  ;;  %24896 = vmatprep.subr.bf16.mxu0 %v165_v5  ;;  %v29052_v11 = vld [vmem:[%s36916_s2 + $0x20] sm:$0xff]   ;;  %v29062_v12 = vld [vmem:[%s36916_s2 + $0x90] sm:$0xff]   ;;  %v29063_v13 = vld [vmem:[%s36916_s2 + $0x98] sm:$0xff]  }
   0xc   :  { %24861 = vmatpush3.bf16.msra.mxu1 %v165_v5  ;;  %24897 = vmatpush3.bf16.msra.mxu0 %v165_v5  ;;  %v29066_v14 = vld [vmem:[%s36916_s2 + $0xa0] sm:$0xff]   ;;  %v29053_v15 = vld [vmem:[%s36916_s2 + $0x28] sm:$0xff]   ;;  %v29054_v16 = vld [vmem:[%s36916_s2 + $0x30] sm:$0xff]  }
   0xd   :  { %24878 = vmatprep.subr.bf16.mxu1 %v165_v5  ;;  %24898 = vmatprep.mubr.msk.bf16.mxu0 %vm135_vm2, %v29058_v8  ;;  %v29067_v17 = vld [vmem:[%s36916_s2 + $0xa8] sm:$0xff]   ;;  %v29070_v18 = vld [vmem:[%s36916_s2 + $0xb0] sm:$0xff]   ;;  %v29055_v19 = vld [vmem:[%s36916_s2 + $0x38] sm:$0xff]  }
   0xe   :  { %v29056_v20 = vld [vmem:[%s36916_s2 + $0x40] sm:$0xff]   ;;  %v29071_v21 = vld [vmem:[%s36916_s2 + $0xb8] sm:$0xff]   ;;  %v29057_v22 = vld [vmem:[%s36916_s2 + $0x48] sm:$0xff]  }
   0xf   :  { %24863 = vmatmul.mubr.msk.bf16.vlgmr.msra.gmra.mrb[0].mxu1 %vm135_vm2, %v29049_v6  ;;  %24899 = vmatmul.mubr.msk.bf16.vlgmr.msra.gmra.mrb[0].mxu0 %vm135_vm2, %v29059_v9  ;;  %v29060_v23 = vld [vmem:[%s36916_s2 + $0x50] sm:$0xff]   ;;  %v29061_v24 = vld [vmem:[%s36916_s2 + $0x58] sm:$0xff]   ;;  %v29064_v25 = vld [vmem:[%s36916_s2 + $0x60] sm:$0xff]  }
  0x10   :  { %24879 = vmatpush3.bf16.msra.mxu1 %v165_v5  ;;  %24866 = vmatprep.mubr.msk.bf16.mxu1 %vm135_vm2, %v29050_v7  ;;  %v29065_v26 = vld [vmem:[%s36916_s2 + $0x68] sm:$0xff]   ;;  %v29068_v27 = vld [vmem:[%s36916_s2 + $0x70] sm:$0xff]   ;;  %v29069_v28 = vld [vmem:[%s36916_s2 + $0x78] sm:$0xff]  }
  0x11   :  { %24914 = vmatprep.subr.bf16.mxu1 %v165_v5  ;;  %24902 = vmatprep.mubr.msk.bf16.mxu0 %vm135_vm2, %v29062_v12  ;;  %v29072_v29 = vld [vmem:[%s36916_s2 + $0xc0] sm:$0xff]   ;;  %v29073_v30 = vld [vmem:[%s36916_s2 + $0xc8] sm:$0xff]   ;;  %v29074_v31 = vld [vmem:[%s36916_s2 + $0xd0] sm:$0xff]  }
  0x12   :  { %v29075_v32 = vld [vmem:[%s36916_s2 + $0xd8] sm:$0xff]   ;;  %v29076_v33 = vld [vmem:[%s36916_s2 + $0xe0] sm:$0xff]   ;;  %v29077_v34 = vld [vmem:[%s36916_s2 + $0xe8] sm:$0xff]  }
  0x13   :  { %v29078_v35 = vld [vmem:[%s36916_s2 + $0xf0] sm:$0xff]   ;;  %v29079_v36 = vld [vmem:[%s36916_s2 + $0xf8] sm:$0xff]  }
  0x17   :  { %24867 = vmatmul.mubr.msk.bf16.gmra.mrb[4].mxu1 %vm135_vm2, %v29051_v10  ;;  %24903 = vmatmul.mubr.msk.bf16.gmra.mrb[4].mxu0 %vm135_vm2, %v29063_v13 }
  0x18   :  { %24870 = vmatprep.mubr.msk.bf16.mxu1 %vm135_vm2, %v29052_v11  ;;  %24906 = vmatprep.mubr.msk.bf16.mxu0 %vm135_vm2, %v29066_v14 }
  0x1f   :  { %24871 = vmatmul.mubr.msk.bf16.gmra.mrb[8].mxu1 %vm135_vm2, %v29053_v15  ;;  %24907 = vmatmul.mubr.msk.bf16.gmra.mrb[8].mxu0 %vm135_vm2, %v29067_v17 }
  0x20   :  { %24874 = vmatprep.mubr.msk.bf16.mxu1 %vm135_vm2, %v29054_v16  ;;  %24910 = vmatprep.mubr.msk.bf16.mxu0 %vm135_vm2, %v29070_v18 }
  0x27   :  { %24875 = vmatmul.mubr.msk.bf16.gmra.mrb[12].mxu1 %vm135_vm2, %v29055_v19  ;;  %24911 = vmatmul.mubr.msk.bf16.gmra.mrb[12].mxu0 %vm135_vm2, %v29071_v21 }
  0x28   :  { %24880 = vmatprep.mubr.msk.bf16.mxu1 %vm135_vm2, %v29056_v20 }
  0x2f   :  { %24881 = vmatmul.mubr.msk.bf16.vlgmr.msra.gmra.mrb[16].mxu1 %vm135_vm2, %v29057_v22 }
  0x30   :  { %24915 = vmatpush3.bf16.msra.mxu1 %v165_v5  ;;  %24884 = vmatprep.mubr.msk.bf16.mxu1 %vm135_vm2, %v29060_v23 }
  0x37   :  { %24885 = vmatmul.mubr.msk.bf16.gmra.mrb[20].mxu1 %vm135_vm2, %v29061_v24 }
  0x38   :  { %24888 = vmatprep.mubr.msk.bf16.mxu1 %vm135_vm2, %v29064_v25 }
  0x3f   :  { %24889 = vmatmul.mubr.msk.bf16.gmra.mrb[24].mxu1 %vm135_vm2, %v29065_v26 }
  0x40   :  { %24892 = vmatprep.mubr.msk.bf16.mxu1 %vm135_vm2, %v29068_v27 }
  0x47   :  { %24893 = vmatmul.mubr.msk.bf16.gmra.mrb[28].mxu1 %vm135_vm2, %v29069_v28 }
  0x48   :  { %24916 = vmatprep.mubr.msk.bf16.mxu1 %vm135_vm2, %v29072_v29 }
  0x4f   :  { %24917 = vmatmul.mubr.msk.bf16.vlgmr.msra.gmra.mrb[32].mxu1 %vm135_vm2, %v29073_v30 }
  0x50   :  { %24920 = vmatprep.mubr.msk.bf16.mxu1 %vm135_vm2, %v29074_v31 }
  0x57   :  { %24921 = vmatmul.mubr.msk.bf16.gmra.mrb[36].mxu1 %vm135_vm2, %v29075_v32 }
  0x58   :  { %24924 = vmatprep.mubr.msk.bf16.mxu1 %vm135_vm2, %v29076_v33 }
  0x5f   :  { %24925 = vmatmul.mubr.msk.bf16.gmra.mrb[40].mxu1 %vm135_vm2, %v29077_v34 }
  0x60   :  { %24928 = vmatprep.mubr.msk.bf16.mxu1 %vm135_vm2, %v29078_v35 }
  0x67   :  { %24929 = vmatmul.mubr.msk.bf16.gmra.mrb[44].mxu1 %vm135_vm2, %v29079_v36 }
  0xe2   :  { %v24864_v37 = vpop.f32.mrb[0].mxu1  ;;  %v24900_v41 = vpop.f32.mrb[0].mxu0 }
  0xe3   :  { %v201_v38 = vpop.f32.mrb[1].mxu1  ;;  %v573_v42 = vpop.f32.mrb[1].mxu0 }
  0xe4   :  { %v24865_v39 = vpop.f32.mrb[2].mxu1  ;;  %v24901_v43 = vpop.f32.mrb[2].mxu0 }
  0xe5   :  { %v204_v40 = vpop.f32.mrb[3].mxu1  ;;  %v576_v45 = vpop.f32.mrb[3].mxu0 }
  0xea   :  { %v24868_v44 = vpop.f32.mrb[4].mxu1  ;;  %v24904_v49 = vpop.f32.mrb[4].mxu0 }
  0xeb   :  { %v217_v46 = vpop.f32.mrb[5].mxu1  ;;  %v589_v50 = vpop.f32.mrb[5].mxu0 }
  0xec   :  { %v24869_v47 = vpop.f32.mrb[6].mxu1  ;;  %v24905_v51 = vpop.f32.mrb[6].mxu0 }
  0xed   :  { %v220_v48 = vpop.f32.mrb[7].mxu1  ;;  %v592_v53 = vpop.f32.mrb[7].mxu0 }
  0xf2   :  { %v24872_v52 = vpop.f32.mrb[8].mxu1  ;;  %v24908_v57 = vpop.f32.mrb[8].mxu0 }
  0xf3   :  { %v233_v54 = vpop.f32.mrb[9].mxu1  ;;  %v605_v58 = vpop.f32.mrb[9].mxu0 }
  0xf4   :  { %v24873_v55 = vpop.f32.mrb[10].mxu1  ;;  %v24909_v59 = vpop.f32.mrb[10].mxu0 }
  0xf5   :  { %v236_v56 = vpop.f32.mrb[11].mxu1  ;;  %v608_v61 = vpop.f32.mrb[11].mxu0 }
  0xfa   :  { %v24876_v60 = vpop.f32.mrb[12].mxu1  ;;  %v24912_v2 = vpop.f32.mrb[12].mxu0 }
  0xfb   :  { %v249_v62 = vpop.f32.mrb[13].mxu1  ;;  %v621_v3 = vpop.f32.mrb[13].mxu0 }
  0xfc   :  { %v24877_v63 = vpop.f32.mrb[14].mxu1  ;;  %v24913_v5 = vpop.f32.mrb[14].mxu0 }
  0xfd   :  { %v252_v0 = vpop.f32.mrb[15].mxu1  ;;  %v624_v7 = vpop.f32.mrb[15].mxu0 }
 0x102   :  { %v24882_v6 = vpop.f32.mrb[16].mxu1 }
 0x103   :  { %v444_v8 = vmax.f32 %v24864_v37, %v24882_v6  ;;  %v379_v9 = vpop.f32.mrb[17].mxu1 }
 0x104   :  { %v442_v10 = vmax.f32 %v201_v38, %v379_v9  ;;  %v24883_v11 = vpop.f32.mrb[18].mxu1 }
 0x105   :  { %v445_v12 = vmax.f32 %v24865_v39, %v24883_v11  ;;  %v638_v13 = vmax.f32 %v444_v8, %v24900_v41  ;;  %v382_v14 = vpop.f32.mrb[19].mxu1 }
 0x106   :  { %v443_v15 = vmax.f32 %v204_v40, %v382_v14  ;;  %v636_v16 = vmax.f32 %v442_v10, %v573_v42 }
 0x107   :  { %v639_v17 = vmax.f32 %v445_v12, %v24901_v43 }
 0x108   :  { %v637_v18 = vmax.f32 %v443_v15, %v576_v45 }
 0x10a   :  { %v24886_v19 = vpop.f32.mrb[20].mxu1 }
 0x10b   :  { %v448_v20 = vmax.f32 %v24868_v44, %v24886_v19  ;;  %v395_v21 = vpop.f32.mrb[21].mxu1 }
 0x10c   :  { %v446_v22 = vmax.f32 %v217_v46, %v395_v21  ;;  %v24887_v23 = vpop.f32.mrb[22].mxu1 }
 0x10d   :  { %v449_v24 = vmax.f32 %v24869_v47, %v24887_v23  ;;  %v642_v25 = vmax.f32 %v448_v20, %v24904_v49  ;;  %v398_v26 = vpop.f32.mrb[23].mxu1 }
 0x10e   :  { %v447_v27 = vmax.f32 %v220_v48, %v398_v26  ;;  %v640_v28 = vmax.f32 %v446_v22, %v589_v50 }
 0x10f   :  { %v643_v29 = vmax.f32 %v449_v24, %v24905_v51 }
 0x110   :  { %v641_v30 = vmax.f32 %v447_v27, %v592_v53 }
 0x112   :  { %v24890_v31 = vpop.f32.mrb[24].mxu1 }
 0x113   :  { %v452_v32 = vmax.f32 %v24872_v52, %v24890_v31  ;;  %v411_v33 = vpop.f32.mrb[25].mxu1 }
 0x114   :  { %v450_v34 = vmax.f32 %v233_v54, %v411_v33  ;;  %v24891_v35 = vpop.f32.mrb[26].mxu1 }
 0x115   :  { %v453_v36 = vmax.f32 %v24873_v55, %v24891_v35  ;;  %v29825_v37 = vmax.f32 %v452_v32, %v24908_v57  ;;  %v414_v38 = vpop.f32.mrb[27].mxu1  ;;  %v29844_v57 = vld [vmem:[%s36918_s3] ss:$0 sm:$0xff] }
 0x116   :  { %v451_v39 = vmax.f32 %v236_v56, %v414_v38  ;;  %v29827_v40 = vmax.f32 %v450_v34, %v605_v58 }
 0x117   :  { %v29829_v41 = vmax.f32 %v453_v36, %v24909_v59 }
 0x118   :  { %v29831_v42 = vmax.f32 %v451_v39, %v608_v61 }
 0x11a   :  { %v24894_v43 = vpop.f32.mrb[28].mxu1 }
 0x11b   :  { %v456_v44 = vmax.f32 %v24876_v60, %v24894_v43  ;;  %v427_v45 = vpop.f32.mrb[29].mxu1 }
 0x11c   :  { %v454_v46 = vmax.f32 %v249_v62, %v427_v45  ;;  %v24895_v47 = vpop.f32.mrb[30].mxu1 }
 0x11d   :  { %v457_v48 = vmax.f32 %v24877_v63, %v24895_v47  ;;  %v29833_v49 = vmax.f32 %v456_v44, %v24912_v2  ;;  %v430_v50 = vpop.f32.mrb[31].mxu1 }
 0x11e   :  { %v455_v51 = vmax.f32 %v252_v0, %v430_v50  ;;  %v29835_v52 = vmax.f32 %v454_v46, %v621_v3 }
 0x11f   :  { %v29837_v53 = vmax.f32 %v457_v48, %v24913_v5 }
 0x120   :  { %v29839_v54 = vmax.f32 %v455_v51, %v624_v7 }
 0x122   :  { %v24918_v55 = vpop.f32.mrb[32].mxu1 }
 0x123   :  { %v832_v56 = vmax.f32 %v638_v13, %v24918_v55  ;;  %v767_v58 = vpop.f32.mrb[33].mxu1 }
 0x124   :  { %v830_v59 = vmax.f32 %v636_v16, %v767_v58  ;;  %v24919_v60 = vpop.f32.mrb[34].mxu1 }
 0x125   :  { %v833_v61 = vmax.f32 %v639_v17, %v24919_v60  ;;  %v770_v62 = vpop.f32.mrb[35].mxu1  ;;  %v29850_v2 = vadd.f32 %v29844_v57, %v832_v56 }
 0x126   :  { %v29847_v63 = vadd.f32 %v29844_v57, %v830_v59  ;;  %v831_v0 = vmax.f32 %v637_v18, %v770_v62 }
 0x127   :  { %v29858_v6 = vadd.f32 %v29844_v57, %v833_v61  ;;  %v873_v12 = vsel %vm869_vm3, %v29850_v2, 0.0 }
 0x128   :  { %v29853_v3 = vadd.f32 %v29844_v57, %v831_v0  ;;  %v870_v5 = vsel %vm869_vm3, %v29847_v63, 0.0 }
 0x129   :  { %v875_v18 = vsel %vm869_vm3, %v29858_v6, 0.0 }
 0x12a   :  { %v871_v7 = vsel %vm869_vm3, %v29853_v3, 0.0  ;;  %v24922_v8 = vpop.f32.mrb[36].mxu1 }
 0x12b   :  { %v872_v9 = vadd.f32 %v871_v7, %v870_v5  ;;  %v836_v10 = vmax.f32 %v642_v25, %v24922_v8  ;;  %v783_v11 = vpop.f32.mrb[37].mxu1 }
 0x12c   :  { %v834_v13 = vmax.f32 %v640_v28, %v783_v11  ;;  %v24923_v14 = vpop.f32.mrb[38].mxu1 }
 0x12d   :  { %v874_v15 = vadd.f32 %v873_v12, %v872_v9  ;;  %v837_v16 = vmax.f32 %v643_v29, %v24923_v14  ;;  %v786_v17 = vpop.f32.mrb[39].mxu1  ;;  %v29870_v22 = vadd.f32 %v29844_v57, %v836_v10 }
 0x12e   :  { %v29867_v19 = vadd.f32 %v29844_v57, %v834_v13  ;;  %v835_v20 = vmax.f32 %v641_v30, %v786_v17 }
 0x12f   :  { %v876_v21 = vadd.f32 %v875_v18, %v874_v15  ;;  %v29878_v26 = vadd.f32 %v29844_v57, %v837_v16  ;;  %v881_v32 = vsel %vm869_vm3, %v29870_v22, 0.0 }
 0x130   :  { %v877_v23 = vsel %vm869_vm3, %v29867_v19, 0.0  ;;  %v29875_v24 = vadd.f32 %v29844_v57, %v835_v20 }
 0x131   :  { %v878_v25 = vadd.f32 %v877_v23, %v876_v21  ;;  %v883_v39 = vsel %vm869_vm3, %v29878_v26, 0.0 }
 0x132   :  { %v879_v27 = vsel %vm869_vm3, %v29875_v24, 0.0  ;;  %v24926_v28 = vpop.f32.mrb[40].mxu1 }
 0x133   :  { %v880_v29 = vadd.f32 %v879_v27, %v878_v25  ;;  %v840_v30 = vmax.f32 %v29825_v37, %v24926_v28  ;;  %v799_v31 = vpop.f32.mrb[41].mxu1 }
 0x134   :  { %v838_v33 = vmax.f32 %v29827_v40, %v799_v31  ;;  %v24927_v34 = vpop.f32.mrb[42].mxu1 }
 0x135   :  { %v882_v35 = vadd.f32 %v881_v32, %v880_v29  ;;  %v841_v36 = vmax.f32 %v29829_v41, %v24927_v34  ;;  %v802_v38 = vpop.f32.mrb[43].mxu1  ;;  %v863_v37 = vadd.f32 %v29844_v57, %v840_v30 }
 0x136   :  { %v861_v43 = vadd.f32 %v29844_v57, %v838_v33  ;;  %v839_v44 = vmax.f32 %v29831_v42, %v802_v38 }
 0x137   :  { %v884_v45 = vadd.f32 %v883_v39, %v882_v35  ;;  %v864_v48 = vadd.f32 %v29844_v57, %v841_v36  ;;  %v889_v58 = vsel %vm869_vm3, %v863_v37, 0.0  ;;  %v29088_v39 = vld [vmem:[%s36919_s28] sm:$0xff]  }
 0x138   :  { %v885_v46 = vsel %vm869_vm3, %v861_v43, 0.0  ;;  %v862_v47 = vadd.f32 %v29844_v57, %v839_v44  ;;  %24948 = vmatprep.mubr.bf16.mxu0 %v29088_v39 }
 0x139   :  { %v886_v40 = vadd.f32 %v885_v46, %v884_v45  ;;  %v891_v5 = vsel %vm869_vm3, %v864_v48, 0.0 }
 0x13a   :  { %v887_v41 = vsel %vm869_vm3, %v862_v47, 0.0  ;;  %v24930_v50 = vpop.f32.mrb[44].mxu1 }
 0x13b   :  { %v888_v51 = vadd.f32 %v887_v41, %v886_v40  ;;  %v844_v55 = vmax.f32 %v29833_v49, %v24930_v50  ;;  %v815_v56 = vpop.f32.mrb[45].mxu1 }
 0x13c   :  { %v842_v42 = vmax.f32 %v29835_v52, %v815_v56  ;;  %v24931_v59 = vpop.f32.mrb[46].mxu1 }
 0x13d   :  { %v890_v60 = vadd.f32 %v889_v58, %v888_v51  ;;  %v867_v61 = vadd.f32 %v29844_v57, %v844_v55  ;;  %v845_v62 = vmax.f32 %v29837_v53, %v24931_v59  ;;  %v818_v0 = vpop.f32.mrb[47].mxu1  ;;  %v29080_v53 = vld [vmem:[%s36919_s28 + $0x40] sm:$0xff]  }
 0x13e   :  { %v865_v7 = vadd.f32 %v29844_v57, %v842_v42  ;;  %v843_v8 = vmax.f32 %v29839_v54, %v818_v0  ;;  %24980 = vmatprep.mubr.bf16.mxu1 %v29080_v53 }
 0x13f   :  { %v892_v9 = vadd.f32 %v891_v5, %v890_v60  ;;  %v868_v49 = vadd.f32 %v29844_v57, %v845_v62  ;;  %v897_v11 = vsel %vm869_vm3, %v867_v61, 0.0 }
 0x140   :  { %v893_v10 = vsel %vm869_vm3, %v865_v7, 0.0  ;;  %v866_v52 = vadd.f32 %v29844_v57, %v843_v8 }
 0x141   :  { %v894_v12 = vadd.f32 %v893_v10, %v892_v9  ;;  %v899_v13 = vsel %vm869_vm3, %v868_v49, 0.0 }
 0x142   :  { %v895_v14 = vsel %vm869_vm3, %v866_v52, 0.0 }
 0x143   :  { %v896_v15 = vadd.f32 %v895_v14, %v894_v12 }
 0x145   :  { %v898_v54 = vadd.f32 %v897_v11, %v896_v15 }
 0x147   :  { %v900_v16 = vadd.f32 %v899_v13, %v898_v54 }
 0x149   :  { %v901_v17 = vrot.slane %v900_v16, 4 }
 0x14b   :  { %v902_v18 = vadd.f32 %v901_v17, %v900_v16 }
 0x14d   :  { %v903_v20 = vrot.slane %v902_v18, 2 }
 0x14f   :  { %v904_v21 = vadd.f32 %v903_v20, %v902_v18 }
 0x151   :  { %v905_v57 = vrot.slane %v904_v21, 1 }
 0x153   :  { %v906_v23 = vadd.f32 %v905_v57, %v904_v21 }
 0x155   :  { %v908_v25 = vmul.f32 0.0078125, %v906_v23 }
 0x157   :  { %v29914_v27 = vsub.f32 %v29847_v63, %v908_v25  ;;  %v29917_v28 = vsub.f32 %v29853_v3, %v908_v25  ;;  %v29920_v29 = vsub.f32 %v29850_v2, %v908_v25  ;;  %v29923_v30 = vsub.f32 %v29858_v6, %v908_v25 }
 0x158   :  { %v29926_v31 = vsub.f32 %v29867_v19, %v908_v25  ;;  %v29929_v32 = vsub.f32 %v29875_v24, %v908_v25  ;;  %v29932_v33 = vsub.f32 %v29870_v22, %v908_v25  ;;  %v29935_v63 = vsub.f32 %v29878_v26, %v908_v25 }
 0x159   :  { %v29937_v3 = vsub.f32 %v861_v43, %v908_v25  ;;  %v29939_v34 = vsub.f32 %v862_v47, %v908_v25  ;;  %v29941_v2 = vsub.f32 %v863_v37, %v908_v25  ;;  %v29943_v6 = vsub.f32 %v864_v48, %v908_v25 }
 0x15a   :  { %v29945_v35 = vsub.f32 %v865_v7, %v908_v25  ;;  %v29947_v19 = vsub.f32 %v866_v52, %v908_v25  ;;  %v29949_v24 = vsub.f32 %v867_v61, %v908_v25  ;;  %v29951_v36 = vsub.f32 %v868_v49, %v908_v25 }
 0x15b   :  { %v925_v22 = vmul.f32 %v29914_v27, %v29914_v27  ;;  %v926_v26 = vmul.f32 %v29917_v28, %v29917_v28  ;;  %v927_v38 = vmul.f32 %v29920_v29, %v29920_v29  ;;  %v928_v43 = vmul.f32 %v29923_v30, %v29923_v30 }
 0x15c   :  { %v929_v46 = vmul.f32 %v29926_v31, %v29926_v31  ;;  %v930_v47 = vmul.f32 %v29929_v32, %v29929_v32  ;;  %v931_v51 = vmul.f32 %v29932_v33, %v29932_v33  ;;  %v932_v55 = vmul.f32 %v29935_v63, %v29935_v63 }
 0x15d   :  { %v941_v44 = vsel %vm869_vm3, %v925_v22, 0.0  ;;  %v942_v45 = vsel %vm869_vm3, %v926_v26, 0.0  ;;  %v944_v40 = vsel %vm869_vm3, %v927_v38, 0.0  ;;  %v946_v41 = vsel %vm869_vm3, %v928_v43, 0.0 }
 0x15e   :  { %v943_v37 = vadd.f32 %v942_v45, %v941_v44  ;;  %v948_v56 = vsel %vm869_vm3, %v929_v46, 0.0  ;;  %v950_v58 = vsel %vm869_vm3, %v930_v47, 0.0  ;;  %v933_v60 = vmul.f32 %v29937_v3, %v29937_v3 }
 0x15f   :  { %v934_v61 = vmul.f32 %v29939_v34, %v29939_v34  ;;  %v952_v62 = vsel %vm869_vm3, %v931_v51, 0.0  ;;  %v954_v0 = vsel %vm869_vm3, %v932_v55, 0.0  ;;  %v935_v8 = vmul.f32 %v29941_v2, %v29941_v2 }
 0x160   :  { %v945_v48 = vadd.f32 %v944_v40, %v943_v37  ;;  %v936_v9 = vmul.f32 %v29943_v6, %v29943_v6  ;;  %v956_v49 = vsel %vm869_vm3, %v933_v60, 0.0  ;;  %v937_v12 = vmul.f32 %v29945_v35, %v29945_v35 }
 0x161   :  { %v958_v10 = vsel %vm869_vm3, %v934_v61, 0.0  ;;  %v938_v53 = vmul.f32 %v29947_v19, %v29947_v19  ;;  %v960_v13 = vsel %vm869_vm3, %v935_v8, 0.0  ;;  %v939_v16 = vmul.f32 %v29949_v24, %v29949_v24 }
 0x162   :  { %v947_v50 = vadd.f32 %v946_v41, %v945_v48  ;;  %v962_v14 = vsel %vm869_vm3, %v936_v9, 0.0  ;;  %v940_v17 = vmul.f32 %v29951_v36, %v29951_v36  ;;  %v964_v18 = vsel %vm869_vm3, %v937_v12, 0.0 }
 0x163   :  { %v966_v20 = vsel %vm869_vm3, %v938_v53, 0.0  ;;  %v968_v23 = vsel %vm869_vm3, %v939_v16, 0.0  ;;  %v29092_v16 = vld [vmem:[%s36919_s28 + $0x10] sm:$0xff]  }
 0x164   :  { %v949_v42 = vadd.f32 %v948_v56, %v947_v50  ;;  %v970_v25 = vsel %vm869_vm3, %v940_v17, 0.0  ;;  %v29083_v17 = vld [vmem:[%s36919_s28 + $0x58] sm:$0xff]  }
 0x166   :  { %v951_v59 = vadd.f32 %v950_v58, %v949_v42 }
 0x168   :  { %v953_v5 = vadd.f32 %v952_v62, %v951_v59 }
 0x16a   :  { %v955_v7 = vadd.f32 %v954_v0, %v953_v5 }
 0x16c   :  { %v957_v52 = vadd.f32 %v956_v49, %v955_v7 }
 0x16e   :  { %v959_v11 = vadd.f32 %v958_v10, %v957_v52 }
 0x170   :  { %v961_v15 = vadd.f32 %v960_v13, %v959_v11 }
 0x172   :  { %v963_v54 = vadd.f32 %v962_v14, %v961_v15  ;;  %v29081_v14 = vld [vmem:[%s36919_s28 + $0x48] sm:$0xff]  }
 0x173   :  { %v29089_v15 = vld [vmem:[%s36919_s28 + $0x8] sm:$0xff]  }
 0x174   :  { %v965_v21 = vadd.f32 %v964_v18, %v963_v54  ;;  %v29082_v54 = vld [vmem:[%s36919_s28 + $0x50] sm:$0xff]   ;;  %v29093_v18 = vld [vmem:[%s36919_s28 + $0x18] sm:$0xff]  }
 0x176   :  { %v967_v57 = vadd.f32 %v966_v20, %v965_v21  ;;  %v29084_v20 = vld [vmem:[%s36919_s28 + $0x60] sm:$0xff]  }
 0x177   :  { %v29096_v21 = vld [vmem:[%s36919_s28 + $0x20] sm:$0xff]  }
 0x178   :  { %v969_v22 = vadd.f32 %v968_v23, %v967_v57  ;;  %v29085_v57 = vld [vmem:[%s36919_s28 + $0x68] sm:$0xff]  }
 0x179   :  { %v29097_v23 = vld [vmem:[%s36919_s28 + $0x28] sm:$0xff]  }
 0x17a   :  { %v971_v26 = vadd.f32 %v970_v25, %v969_v22  ;;  %v29086_v25 = vld [vmem:[%s36919_s28 + $0x70] sm:$0xff]  }
 0x17b   :  { %v29100_v22 = vld [vmem:[%s36919_s28 + $0x30] sm:$0xff]  }
 0x17c   :  { %v972_v38 = vrot.slane %v971_v26, 4 }
 0x17e   :  { %v973_v39 = vadd.f32 %v972_v38, %v971_v26  ;;  %v29087_v26 = vld [vmem:[%s36919_s28 + $0x78] sm:$0xff]  }
 0x17f   :  { %v29101_v38 = vld [vmem:[%s36919_s28 + $0x38] sm:$0xff]  }
 0x180   :  { %v974_v43 = vrot.slane %v973_v39, 2 }
 0x182   :  { %v975_v44 = vadd.f32 %v974_v43, %v973_v39  ;;  %v29090_v39 = vld [vmem:[%s36919_s28 + $0x80] sm:$0xff]   ;;  %v29091_v43 = vld [vmem:[%s36919_s28 + $0x88] sm:$0xff]  }
 0x184   :  { %v976_v45 = vrot.slane %v975_v44, 1 }
 0x186   :  { %v977_v37 = vadd.f32 %v976_v45, %v975_v44  ;;  %v29094_v44 = vld [vmem:[%s36919_s28 + $0x90] sm:$0xff]   ;;  %v29095_v45 = vld [vmem:[%s36919_s28 + $0x98] sm:$0xff]  }
 0x188   :  { %v978_v46 = vmul.f32 0.0078125, %v977_v37  ;;  %v29098_v37 = vld [vmem:[%s36919_s28 + $0xa0] sm:$0xff]  }
 0x18a   :  { %v979_v47 = vadd.f32 1e-05, %v978_v46  ;;  %v29099_v46 = vld [vmem:[%s36919_s28 + $0xa8] sm:$0xff]  }
 0x18c   :  { %29563 = vrsqrt.f32 %v979_v47  ;;  %v29102_v47 = vld [vmem:[%s36919_s28 + $0xb0] sm:$0xff]  }
 0x196   :  { %v29564_v40 = vpop.eup %29563 }
 0x197   :  { %v981_v48 = vmul.f32 %v29564_v40, %v29914_v27  ;;  %v982_v41 = vmul.f32 %v29564_v40, %v29917_v28  ;;  %v983_v50 = vmul.f32 %v29564_v40, %v29920_v29  ;;  %v984_v51 = vmul.f32 %v29564_v40, %v29923_v30 }
 0x198   :  { %v985_v55 = vmul.f32 %v29564_v40, %v29926_v31  ;;  %v986_v56 = vmul.f32 %v29564_v40, %v29929_v32  ;;  %v987_v58 = vmul.f32 %v29564_v40, %v29932_v33  ;;  %v988_v42 = vmul.f32 %v29564_v40, %v29935_v63 }
 0x199   :  { %v989_v59 = vmul.f32 %v29564_v40, %v29937_v3  ;;  %v990_v60 = vmul.f32 %v29564_v40, %v29939_v34  ;;  %v991_v27 = vmul.f32 %v29564_v40, %v29941_v2  ;;  %v992_v28 = vmul.f32 %v29564_v40, %v29943_v6 }
 0x19a   :  { %v993_v29 = vmul.f32 %v29564_v40, %v29945_v35  ;;  %v994_v30 = vmul.f32 %v29564_v40, %v29947_v19  ;;  %v995_v31 = vmul.f32 %v29564_v40, %v29949_v24  ;;  %v996_v32 = vmul.f32 %v29564_v40, %v29951_v36  ;;  %v29103_v40 = vld [vmem:[%s36919_s28 + $0xb8] sm:$0xff]  }
 0x19b   :  { %v997_v61 = vmax.f32 %v981_v48, 0.0  ;;  %v998_v33 = vmax.f32 %v982_v41, 0.0  ;;  %v999_v62 = vmax.f32 %v983_v50, 0.0  ;;  %v1000_v63 = vmax.f32 %v984_v51, 0.0  ;;  %v29104_v48 = vld [vmem:[%s36919_s28 + $0xc0] sm:$0xff]   ;;  %v29105_v51 = vld [vmem:[%s36919_s28 + $0xc8] sm:$0xff]  }
 0x19c   :  { %v1001_v0 = vmax.f32 %v985_v55, 0.0  ;;  %v1002_v3 = vmax.f32 %v986_v56, 0.0  ;;  %v1003_v5 = vmax.f32 %v987_v58, 0.0  ;;  %v1004_v34 = vmax.f32 %v988_v42, 0.0  ;;  %v21402_v41 = vld [vmem:[%s36920_s25 + $0x2] sm:$0x3] }
 0x19d   :  { %v1005_v7 = vmax.f32 %v989_v59, 0.0  ;;  %v1006_v2 = vmax.f32 %v990_v60, 0.0  ;;  %v1007_v8 = vmax.f32 %v991_v27, 0.0  ;;  %v1008_v6 = vmax.f32 %v992_v28, 0.0  ;;  %v29106_v55 = vld [vmem:[%s36919_s28 + $0xd0] sm:$0xff]   ;;  %v29107_v56 = vld [vmem:[%s36919_s28 + $0xd8] sm:$0xff]  }
 0x19e   :  { %v1009_v9 = vmax.f32 %v993_v29, 0.0  ;;  %v1010_v35 = vmax.f32 %v994_v30, 0.0  ;;  %v1011_v49 = vmax.f32 %v995_v31, 0.0  ;;  %v1012_v19 = vmax.f32 %v996_v32, 0.0  ;;  %v29108_v58 = vld [vmem:[%s36919_s28 + $0xe0] sm:$0xff]   ;;  %v29109_v42 = vld [vmem:[%s36919_s28 + $0xe8] sm:$0xff]  }
 0x19f   :  { %v30020_v10 = vpack.c.bf16 %v998_v33, %v997_v61  ;;  %v30022_v24 = vpack.c.bf16 %v1000_v63, %v999_v62  ;;  %v30024_v36 = vpack.c.bf16 %v1002_v3, %v1001_v0  ;;  %v30026_v52 = vpack.c.bf16 %v1004_v34, %v1003_v5  ;;  %v29110_v59 = vld [vmem:[%s36919_s28 + $0xf0] sm:$0xff]   ;;  %v29111_v60 = vld [vmem:[%s36919_s28 + $0xf8] sm:$0xff]   ;;  %v29112_v27 = vld [vmem:[%s36919_s28 + $0x100] sm:$0xff]  }
 0x1a0   :  { %v30028_v11 = vpack.c.bf16 %v1006_v2, %v1005_v7  ;;  %v30030_v12 = vpack.c.bf16 %v1008_v6, %v1007_v8  ;;  %v30032_v53 = vpack.c.bf16 %v1010_v35, %v1009_v9  ;;  %v30034_v13 = vpack.c.bf16 %v1012_v19, %v1011_v49  ;;  %v30216_v28 = vld [vmem:[%s36920_s25] sm:$0x3]  ;;  %v29113_v29 = vld [vmem:[%s36919_s28 + $0x108] sm:$0xff]   ;;  %v29114_v30 = vld [vmem:[%s36919_s28 + $0x110] sm:$0xff]  }
 0x1a1   :  { %24932 = vmatprep.subr.bf16.mxu0 %v30020_v10  ;;  %24964 = vmatprep.subr.bf16.mxu1 %v30020_v10  ;;  %v1389_v50 = vsel %vm1387_vm4, %v21402_v41, 0  ;;  %v29115_v31 = vld [vmem:[%s36919_s28 + $0x118] sm:$0xff]   ;;  %v29116_v32 = vld [vmem:[%s36919_s28 + $0x120] sm:$0xff]   ;;  %v29117_v61 = vld [vmem:[%s36919_s28 + $0x128] sm:$0xff]  }
 0x1a2   :  { %24933 = vmatpush3.bf16.msra.mxu0 %v30020_v10  ;;  %24965 = vmatpush3.bf16.msra.mxu1 %v30020_v10  ;;  %v29118_v33 = vld [vmem:[%s36919_s28 + $0x130] sm:$0xff]   ;;  %v29119_v62 = vld [vmem:[%s36919_s28 + $0x138] sm:$0xff]   ;;  %v29120_v63 = vld [vmem:[%s36919_s28 + $0x140] sm:$0xff]  }
 0x1a3   :  { %24934 = vmatprep.subr.bf16.mxu0 %v30022_v24  ;;  %24966 = vmatprep.subr.bf16.mxu1 %v30022_v24  ;;  %v29121_v0 = vld [vmem:[%s36919_s28 + $0x148] sm:$0xff]   ;;  %v29122_v3 = vld [vmem:[%s36919_s28 + $0x150] sm:$0xff]   ;;  %v29123_v5 = vld [vmem:[%s36919_s28 + $0x158] sm:$0xff]  }
 0x1a4   :  { %v29124_v34 = vld [vmem:[%s36919_s28 + $0x160] sm:$0xff]   ;;  %v29125_v7 = vld [vmem:[%s36919_s28 + $0x168] sm:$0xff]   ;;  %v29126_v2 = vld [vmem:[%s36919_s28 + $0x170] sm:$0xff]  }
 0x1a5   :  { %v29127_v8 = vld [vmem:[%s36919_s28 + $0x178] sm:$0xff]   ;;  %v29128_v6 = vld [vmem:[%s36919_s28 + $0x180] sm:$0xff]   ;;  %v29129_v9 = vld [vmem:[%s36919_s28 + $0x188] sm:$0xff]  }
 0x1a6   :  { %24935 = vmatpush3.bf16.msra.mxu0 %v30022_v24  ;;  %24967 = vmatpush3.bf16.msra.mxu1 %v30022_v24  ;;  %v29130_v35 = vld [vmem:[%s36919_s28 + $0x190] sm:$0xff]   ;;  %v29131_v49 = vld [vmem:[%s36919_s28 + $0x198] sm:$0xff]   ;;  %v29132_v19 = vld [vmem:[%s36919_s28 + $0x1a0] sm:$0xff]  }
 0x1a7   :  { %24936 = vmatprep.subr.bf16.mxu0 %v30024_v36  ;;  %24968 = vmatprep.subr.bf16.mxu1 %v30024_v36 }
 0x1aa   :  { %24937 = vmatpush3.bf16.msra.mxu0 %v30024_v36  ;;  %24969 = vmatpush3.bf16.msra.mxu1 %v30024_v36 }
 0x1ab   :  { %24938 = vmatprep.subr.bf16.mxu0 %v30026_v52  ;;  %24970 = vmatprep.subr.bf16.mxu1 %v30026_v52 }
 0x1ae   :  { %24939 = vmatpush3.bf16.msra.mxu0 %v30026_v52  ;;  %24971 = vmatpush3.bf16.msra.mxu1 %v30026_v52 }
 0x1af   :  { %24940 = vmatprep.subr.bf16.mxu0 %v30028_v11  ;;  %24972 = vmatprep.subr.bf16.mxu1 %v30028_v11 }
 0x1b2   :  { %24941 = vmatpush3.bf16.msra.mxu0 %v30028_v11  ;;  %24973 = vmatpush3.bf16.msra.mxu1 %v30028_v11 }
 0x1b3   :  { %24942 = vmatprep.subr.bf16.mxu0 %v30030_v12  ;;  %24974 = vmatprep.subr.bf16.mxu1 %v30030_v12 }
 0x1b6   :  { %24943 = vmatpush3.bf16.msra.mxu0 %v30030_v12  ;;  %24975 = vmatpush3.bf16.msra.mxu1 %v30030_v12 }
 0x1b7   :  { %24944 = vmatprep.subr.bf16.mxu0 %v30032_v53  ;;  %24976 = vmatprep.subr.bf16.mxu1 %v30032_v53 }
 0x1ba   :  { %24945 = vmatpush3.bf16.msra.mxu0 %v30032_v53  ;;  %24977 = vmatpush3.bf16.msra.mxu1 %v30032_v53 }
 0x1bb   :  { %24946 = vmatprep.subr.bf16.mxu0 %v30034_v13  ;;  %24978 = vmatprep.subr.bf16.mxu1 %v30034_v13 }
 0x1be   :  { %24947 = vmatpush3.bf16.msra.mxu0 %v30034_v13  ;;  %24979 = vmatpush3.bf16.msra.mxu1 %v30034_v13 }
 0x1bf   :  { %25032 = vmatprep.subr.bf16.mxu1 %v30020_v10  ;;  %28992 = vmatprep.subr.msk.bf16.mxu0 %vm1387_vm4, %v21402_v41 }
 0x1c1   :  { %24981 = vmatmul.mubr.bf16.vlgmr.msra.gmra.mrb[48].mxu1 %v29081_v14  ;;  %24949 = vmatmul.mubr.bf16.vlgmr.msra.gmra.mrb[16].mxu0 %v29089_v15  ;;  %v29133_v14 = vld [vmem:[%s36919_s28 + $0x1a8] sm:$0xff]   ;;  %v29134_v15 = vld [vmem:[%s36919_s28 + $0x1b0] sm:$0xff]  }
 0x1c2   :  { %25033 = vmatpush3.bf16.msra.mxu1 %v30020_v10  ;;  %24984 = vmatprep.mubr.bf16.mxu1 %v29082_v54  ;;  %v29135_v54 = vld [vmem:[%s36919_s28 + $0x1b8] sm:$0xff]  }
 0x1c3   :  { %25034 = vmatprep.subr.bf16.mxu1 %v30022_v24  ;;  %24952 = vmatprep.mubr.bf16.mxu0 %v29092_v16  ;;  %v29136_v16 = vld [vmem:[%s36919_s28 + $0x1c0] sm:$0xff]  }
 0x1c4   :  { %24997 = vmatpush3.bf16.msra.mxu0 %v1389_v50 }
 0x1c5   :  { %28993 = vmatprep.subr.msk.bf16.mxu0 %vm1387_vm4, %v30216_v28 }
 0x1c6   :  { %25035 = vmatpush3.bf16.msra.mxu1 %v30022_v24 }
 0x1c7   :  { %25036 = vmatprep.subr.bf16.mxu1 %v30024_v36 }
 0x1c9   :  { %24985 = vmatmul.mubr.bf16.gmra.mrb[52].mxu1 %v29083_v17  ;;  %24953 = vmatmul.mubr.bf16.gmra.mrb[20].mxu0 %v29093_v18  ;;  %v29137_v17 = vld [vmem:[%s36919_s28 + $0x1c8] sm:$0xff]   ;;  %v29138_v18 = vld [vmem:[%s36919_s28 + $0x1d0] sm:$0xff]  }
 0x1ca   :  { %25037 = vmatpush3.bf16.msra.mxu1 %v30024_v36  ;;  %24988 = vmatprep.mubr.bf16.mxu1 %v29084_v20  ;;  %v29139_v20 = vld [vmem:[%s36919_s28 + $0x1d8] sm:$0xff]  }
 0x1cb   :  { %25038 = vmatprep.subr.bf16.mxu1 %v30026_v52  ;;  %24956 = vmatprep.mubr.bf16.mxu0 %v29096_v21  ;;  %v29140_v21 = vld [vmem:[%s36919_s28 + $0x1e0] sm:$0xff]  }
 0x1ce   :  { %25039 = vmatpush3.bf16.msra.mxu1 %v30026_v52 }
 0x1cf   :  { %25040 = vmatprep.subr.bf16.mxu1 %v30028_v11 }
 0x1d1   :  { %24989 = vmatmul.mubr.bf16.gmra.mrb[56].mxu1 %v29085_v57  ;;  %24957 = vmatmul.mubr.bf16.gmra.mrb[24].mxu0 %v29097_v23 }
 0x1d2   :  { %25041 = vmatpush3.bf16.msra.mxu1 %v30028_v11  ;;  %24992 = vmatprep.mubr.bf16.mxu1 %v29086_v25 }
 0x1d3   :  { %25042 = vmatprep.subr.bf16.mxu1 %v30030_v12  ;;  %24960 = vmatprep.mubr.bf16.mxu0 %v29100_v22 }
 0x1d6   :  { %25043 = vmatpush3.bf16.msra.mxu1 %v30030_v12 }
 0x1d7   :  { %25044 = vmatprep.subr.bf16.mxu1 %v30032_v53 }
 0x1d9   :  { %24993 = vmatmul.mubr.bf16.gmra.mrb[60].mxu1 %v29087_v26  ;;  %24961 = vmatmul.mubr.bf16.gmra.mrb[28].mxu0 %v29101_v38 }
 0x1da   :  { %25045 = vmatpush3.bf16.msra.mxu1 %v30032_v53  ;;  %25048 = vmatprep.mubr.bf16.mxu1 %v29090_v39 }
 0x1db   :  { %25046 = vmatprep.subr.bf16.mxu1 %v30034_v13 }
 0x1de   :  { %25047 = vmatpush3.bf16.msra.mxu1 %v30034_v13 }
 0x1df   :  { %25082 = vmatprep.subr.bf16.mxu1 %v30020_v10 }
 0x1e1   :  { %25049 = vmatmul.mubr.bf16.vlgmr.msra.gmra.mrb[64].mxu1 %v29091_v43 }
 0x1e2   :  { %25083 = vmatpush3.bf16.msra.mxu1 %v30020_v10  ;;  %25052 = vmatprep.mubr.bf16.mxu1 %v29094_v44 }
 0x1e3   :  { %25084 = vmatprep.subr.bf16.mxu1 %v30022_v24 }
 0x1e6   :  { %25085 = vmatpush3.bf16.msra.mxu1 %v30022_v24 }
 0x1e7   :  { %25086 = vmatprep.subr.bf16.mxu1 %v30024_v36 }
 0x1e9   :  { %25053 = vmatmul.mubr.bf16.gmra.mrb[68].mxu1 %v29095_v45 }
 0x1ea   :  { %25087 = vmatpush3.bf16.msra.mxu1 %v30024_v36  ;;  %25056 = vmatprep.mubr.bf16.mxu1 %v29098_v37  ;;  %v29144_v37 = vld [vmem:[%s36919_s28 + $0x200] sm:$0xff]  }
 0x1eb   :  { %25088 = vmatprep.subr.bf16.mxu1 %v30026_v52 }
 0x1ee   :  { %25089 = vmatpush3.bf16.msra.mxu1 %v30026_v52 }
 0x1ef   :  { %25090 = vmatprep.subr.bf16.mxu1 %v30028_v11 }
 0x1f1   :  { %25057 = vmatmul.mubr.bf16.gmra.mrb[72].mxu1 %v29099_v46  ;;  %v30394_v46 = vld [vmem:[%s36920_s25 + $0x4] sm:$0x3] }
 0x1f2   :  { %25091 = vmatpush3.bf16.msra.mxu1 %v30028_v11  ;;  %25060 = vmatprep.mubr.bf16.mxu1 %v29102_v47 }
 0x1f3   :  { %25092 = vmatprep.subr.bf16.mxu1 %v30030_v12 }
 0x1f6   :  { %25093 = vmatpush3.bf16.msra.mxu1 %v30030_v12 }
 0x1f7   :  { %25094 = vmatprep.subr.bf16.mxu1 %v30032_v53 }
 0x1f9   :  { %25061 = vmatmul.mubr.bf16.gmra.mrb[76].mxu1 %v29103_v40 }
 0x1fa   :  { %25095 = vmatpush3.bf16.msra.mxu1 %v30032_v53  ;;  %25098 = vmatprep.mubr.bf16.mxu1 %v29104_v48 }
 0x1fb   :  { %25096 = vmatprep.subr.bf16.mxu1 %v30034_v13 }
 0x1fe   :  { %25097 = vmatpush3.bf16.msra.mxu1 %v30034_v13 }
 0x1ff   :  { %25132 = vmatprep.subr.bf16.mxu1 %v30020_v10 }
 0x201   :  { %25099 = vmatmul.mubr.bf16.vlgmr.msra.gmra.mrb[80].mxu1 %v29105_v51 }
 0x202   :  { %25133 = vmatpush3.bf16.msra.mxu1 %v30020_v10  ;;  %25102 = vmatprep.mubr.bf16.mxu1 %v29106_v55  ;;  %v29146_v55 = vld [vmem:[%s36919_s28 + $0x210] sm:$0xff]  }
 0x203   :  { %25134 = vmatprep.subr.bf16.mxu1 %v30022_v24 }
 0x206   :  { %25135 = vmatpush3.bf16.msra.mxu1 %v30022_v24 }
 0x207   :  { %25136 = vmatprep.subr.bf16.mxu1 %v30024_v36 }
 0x209   :  { %25103 = vmatmul.mubr.bf16.gmra.mrb[84].mxu1 %v29107_v56 }
 0x20a   :  { %25137 = vmatpush3.bf16.msra.mxu1 %v30024_v36  ;;  %25106 = vmatprep.mubr.bf16.mxu1 %v29108_v58 }
 0x20b   :  { %25138 = vmatprep.subr.bf16.mxu1 %v30026_v52 }
 0x20e   :  { %25139 = vmatpush3.bf16.msra.mxu1 %v30026_v52 }
 0x20f   :  { %25140 = vmatprep.subr.bf16.mxu1 %v30028_v11 }
 0x211   :  { %25107 = vmatmul.mubr.bf16.gmra.mrb[88].mxu1 %v29109_v42 }
 0x212   :  { %25141 = vmatpush3.bf16.msra.mxu1 %v30028_v11  ;;  %25110 = vmatprep.mubr.bf16.mxu1 %v29110_v59 }
 0x213   :  { %25142 = vmatprep.subr.bf16.mxu1 %v30030_v12 }
 0x216   :  { %25143 = vmatpush3.bf16.msra.mxu1 %v30030_v12 }
 0x217   :  { %25144 = vmatprep.subr.bf16.mxu1 %v30032_v53 }
 0x219   :  { %25111 = vmatmul.mubr.bf16.gmra.mrb[92].mxu1 %v29111_v60 }
 0x21a   :  { %25145 = vmatpush3.bf16.msra.mxu1 %v30032_v53  ;;  %25148 = vmatprep.mubr.bf16.mxu1 %v29112_v27 }
 0x21b   :  { %25146 = vmatprep.subr.bf16.mxu1 %v30034_v13 }
 0x21e   :  { %25147 = vmatpush3.bf16.msra.mxu1 %v30034_v13 }
 0x21f   :  { %25182 = vmatprep.subr.bf16.mxu1 %v30020_v10 }
 0x221   :  { %25149 = vmatmul.mubr.bf16.vlgmr.msra.gmra.mrb[96].mxu1 %v29113_v29 }
 0x222   :  { %25183 = vmatpush3.bf16.msra.mxu1 %v30020_v10  ;;  %25152 = vmatprep.mubr.bf16.mxu1 %v29114_v30 }
 0x223   :  { %25184 = vmatprep.subr.bf16.mxu1 %v30022_v24 }
 0x226   :  { %25185 = vmatpush3.bf16.msra.mxu1 %v30022_v24 }
 0x227   :  { %25186 = vmatprep.subr.bf16.mxu1 %v30024_v36 }
 0x229   :  { %25153 = vmatmul.mubr.bf16.gmra.mrb[100].mxu1 %v29115_v31  ;;  %v29147_v31 = vld [vmem:[%s36919_s28 + $0x218] sm:$0xff]  }
 0x22a   :  { %25187 = vmatpush3.bf16.msra.mxu1 %v30024_v36  ;;  %25156 = vmatprep.mubr.bf16.mxu1 %v29116_v32 }
 0x22b   :  { %25188 = vmatprep.subr.bf16.mxu1 %v30026_v52 }
 0x22e   :  { %25189 = vmatpush3.bf16.msra.mxu1 %v30026_v52 }
 0x22f   :  { %25190 = vmatprep.subr.bf16.mxu1 %v30028_v11 }
 0x231   :  { %25157 = vmatmul.mubr.bf16.gmra.mrb[104].mxu1 %v29117_v61 }
 0x232   :  { %25191 = vmatpush3.bf16.msra.mxu1 %v30028_v11  ;;  %25160 = vmatprep.mubr.bf16.mxu1 %v29118_v33  ;;  %v29148_v33 = vld [vmem:[%s36919_s28 + $0x220] sm:$0xff]  }
 0x233   :  { %25192 = vmatprep.subr.bf16.mxu1 %v30030_v12 }
 0x236   :  { %25193 = vmatpush3.bf16.msra.mxu1 %v30030_v12 }
 0x237   :  { %25194 = vmatprep.subr.bf16.mxu1 %v30032_v53 }
 0x239   :  { %25161 = vmatmul.mubr.bf16.gmra.mrb[108].mxu1 %v29119_v62 }
 0x23a   :  { %25195 = vmatpush3.bf16.msra.mxu1 %v30032_v53  ;;  %25198 = vmatprep.mubr.bf16.mxu1 %v29120_v63 }
 0x23b   :  { %25196 = vmatprep.subr.bf16.mxu1 %v30034_v13 }
 0x23e   :  { %25197 = vmatpush3.bf16.msra.mxu1 %v30034_v13 }
 0x23f   :  { %25232 = vmatprep.subr.bf16.mxu1 %v30020_v10 }
 0x241   :  { %25199 = vmatmul.mubr.bf16.vlgmr.msra.gmra.mrb[112].mxu1 %v29121_v0 }
 0x242   :  { %25233 = vmatpush3.bf16.msra.mxu1 %v30020_v10  ;;  %25202 = vmatprep.mubr.bf16.mxu1 %v29122_v3 }
 0x243   :  { %25234 = vmatprep.subr.bf16.mxu1 %v30022_v24 }
 0x246   :  { %25235 = vmatpush3.bf16.msra.mxu1 %v30022_v24 }
 0x247   :  { %25236 = vmatprep.subr.bf16.mxu1 %v30024_v36 }
 0x249   :  { %25203 = vmatmul.mubr.bf16.gmra.mrb[116].mxu1 %v29123_v5 }
 0x24a   :  { %25237 = vmatpush3.bf16.msra.mxu1 %v30024_v36  ;;  %25206 = vmatprep.mubr.bf16.mxu1 %v29124_v34 }
 0x24b   :  { %25238 = vmatprep.subr.bf16.mxu1 %v30026_v52 }
 0x24e   :  { %25239 = vmatpush3.bf16.msra.mxu1 %v30026_v52 }
 0x24f   :  { %25240 = vmatprep.subr.bf16.mxu1 %v30028_v11 }
 0x251   :  { %25207 = vmatmul.mubr.bf16.gmra.mrb[120].mxu1 %v29125_v7 }
 0x252   :  { %25241 = vmatpush3.bf16.msra.mxu1 %v30028_v11  ;;  %25210 = vmatprep.mubr.bf16.mxu1 %v29126_v2 }
 0x253   :  { %25242 = vmatprep.subr.bf16.mxu1 %v30030_v12 }
 0x256   :  { %25243 = vmatpush3.bf16.msra.mxu1 %v30030_v12 }
 0x257   :  { %25244 = vmatprep.subr.bf16.mxu1 %v30032_v53 }
 0x259   :  { %25211 = vmatmul.mubr.bf16.gmra.mrb[124].mxu1 %v29127_v8 }
 0x25a   :  { %25245 = vmatpush3.bf16.msra.mxu1 %v30032_v53  ;;  %25248 = vmatprep.mubr.bf16.mxu1 %v29128_v6 }
 0x25b   :  { %25246 = vmatprep.subr.bf16.mxu1 %v30034_v13 }
 0x25e   :  { %25247 = vmatpush3.bf16.msra.mxu1 %v30034_v13 }
 0x25f   :  { %25282 = vmatprep.subr.bf16.mxu1 %v30020_v10 }
 0x261   :  { %25249 = vmatmul.mubr.bf16.vlgmr.msra.gmra.mrb[128].mxu1 %v29129_v9  ;;  %v29149_v9 = vld [vmem:[%s36919_s28 + $0x228] sm:$0xff]  }
 0x262   :  { %25283 = vmatpush3.bf16.msra.mxu1 %v30020_v10  ;;  %25252 = vmatprep.mubr.bf16.mxu1 %v29130_v35 }
 0x263   :  { %25284 = vmatprep.subr.bf16.mxu1 %v30022_v24 }
 0x266   :  { %25285 = vmatpush3.bf16.msra.mxu1 %v30022_v24 }
 0x267   :  { %25286 = vmatprep.subr.bf16.mxu1 %v30024_v36 }
 0x269   :  { %25253 = vmatmul.mubr.bf16.gmra.mrb[132].mxu1 %v29131_v49 }
 0x26a   :  { %25287 = vmatpush3.bf16.msra.mxu1 %v30024_v36  ;;  %25256 = vmatprep.mubr.bf16.mxu1 %v29132_v19  ;;  %v29150_v19 = vld [vmem:[%s36919_s28 + $0x230] sm:$0xff]  }
 0x26b   :  { %25288 = vmatprep.subr.bf16.mxu1 %v30026_v52 }
 0x26e   :  { %25289 = vmatpush3.bf16.msra.mxu1 %v30026_v52 }
 0x26f   :  { %25290 = vmatprep.subr.bf16.mxu1 %v30028_v11 }
 0x271   :  { %25257 = vmatmul.mubr.bf16.gmra.mrb[136].mxu1 %v29133_v14 }
 0x272   :  { %25291 = vmatpush3.bf16.msra.mxu1 %v30028_v11  ;;  %25260 = vmatprep.mubr.bf16.mxu1 %v29134_v15 }
 0x273   :  { %25292 = vmatprep.subr.bf16.mxu1 %v30030_v12 }
 0x276   :  { %25293 = vmatpush3.bf16.msra.mxu1 %v30030_v12 }
 0x277   :  { %25294 = vmatprep.subr.bf16.mxu1 %v30032_v53 }
 0x279   :  { %25261 = vmatmul.mubr.bf16.gmra.mrb[140].mxu1 %v29135_v54 }
 0x27a   :  { %25295 = vmatpush3.bf16.msra.mxu1 %v30032_v53  ;;  %25298 = vmatprep.mubr.bf16.mxu1 %v29136_v16 }
 0x27b   :  { %25296 = vmatprep.subr.bf16.mxu1 %v30034_v13 }
 0x27e   :  { %25297 = vmatpush3.bf16.msra.mxu1 %v30034_v13 }
 0x27f   :  { %25332 = vmatprep.subr.bf16.mxu1 %v30020_v10 }
 0x281   :  { %25299 = vmatmul.mubr.bf16.vlgmr.msra.gmra.mrb[144].mxu1 %v29137_v17 }
 0x282   :  { %25333 = vmatpush3.bf16.msra.mxu1 %v30020_v10  ;;  %25302 = vmatprep.mubr.bf16.mxu1 %v29138_v18  ;;  %v29141_v10 = vld [vmem:[%s36919_s28 + $0x1e8] sm:$0xff]  }
 0x283   :  { %25334 = vmatprep.subr.bf16.mxu1 %v30022_v24 }
 0x286   :  { %25335 = vmatpush3.bf16.msra.mxu1 %v30022_v24  ;;  %v29142_v24 = vld [vmem:[%s36919_s28 + $0x1f0] sm:$0xff]  }
 0x287   :  { %25336 = vmatprep.subr.bf16.mxu1 %v30024_v36 }
 0x289   :  { %25303 = vmatmul.mubr.bf16.gmra.mrb[148].mxu1 %v29139_v20 }
 0x28a   :  { %25337 = vmatpush3.bf16.msra.mxu1 %v30024_v36  ;;  %25306 = vmatprep.mubr.bf16.mxu1 %v29140_v21 }
 0x28b   :  { %25338 = vmatprep.subr.bf16.mxu1 %v30026_v52 }
 0x28e   :  { %25339 = vmatpush3.bf16.msra.mxu1 %v30026_v52  ;;  %v29143_v52 = vld [vmem:[%s36919_s28 + $0x1f8] sm:$0xff]  }
 0x28f   :  { %25340 = vmatprep.subr.bf16.mxu1 %v30028_v11 }
 0x291   :  { %25307 = vmatmul.mubr.bf16.gmra.mrb[152].mxu1 %v29141_v10  ;;  %v29151_v10 = vld [vmem:[%s36919_s28 + $0x238] sm:$0xff]  }
 0x292   :  { %25341 = vmatpush3.bf16.msra.mxu1 %v30028_v11  ;;  %25310 = vmatprep.mubr.bf16.mxu1 %v29142_v24 }
 0x293   :  { %25342 = vmatprep.subr.bf16.mxu1 %v30030_v12 }
 0x294   :  { %v24982_v36 = vpop.f32.mrb[48].mxu1  ;;  %v24950_v57 = vpop.f32.mrb[16].mxu0 }
 0x295   :  { %v1290_v23 = vpop.f32.mrb[49].mxu1  ;;  %v1119_v25 = vpop.f32.mrb[17].mxu0 }
 0x296   :  { %v24983_v22 = vpop.f32.mrb[50].mxu1  ;;  %25343 = vmatpush3.bf16.msra.mxu1 %v30030_v12  ;;  %v24951_v26 = vpop.f32.mrb[18].mxu0  ;;  %v1513_v12 = vsel %vm1387_vm4, %v30216_v28, 0 }
 0x297   :  { %v30374_v38 = vpack.c.bf16 %v24983_v22, %v24982_v36  ;;  %v1293_v39 = vpop.f32.mrb[51].mxu1  ;;  %25344 = vmatprep.subr.bf16.mxu1 %v30032_v53  ;;  %v1122_v11 = vpop.f32.mrb[19].mxu0  ;;  %v30377_v43 = vpack.c.bf16 %v24951_v26, %v24950_v57 }
 0x298   :  { %v30379_v44 = vpack.c.bf16 %v1293_v39, %v1290_v23  ;;  %v30381_v45 = vpack.c.bf16 %v1122_v11, %v1119_v25  ;;  %v1809_v25 = vsel %vm1387_vm4, %v30394_v46, 0 }
 0x299   :  { %36921 = vst [vmem:[#allocation3_spill] sm:$0xff] %v30374_v38  ;;  %25311 = vmatmul.mubr.bf16.gmra.mrb[156].mxu1 %v29143_v52  ;;  %v21476_v52 = vld [vmem:[%s36920_s25 + $0x6] sm:$0x3] }
 0x29a   :  { %36922 = vst [vmem:[#allocation4_spill] sm:$0xff] %v30379_v44  ;;  %24998 = vmatprep.mubr.msk.bf16.mxu0 %vm869_vm3, %v30379_v44  ;;  %25345 = vmatpush3.bf16.msra.mxu1 %v30032_v53  ;;  %v29145_v53 = vld [vmem:[%s36919_s28 + $0x208] sm:$0xff]  }
 0x29b   :  { %24999 = vmatmul.mubr.msk.bf16.vlgmr.msra.gmra.mrb[32].mxu0 %vm869_vm3, %v30374_v38  ;;  %25346 = vmatprep.subr.bf16.mxu1 %v30034_v13 }
 0x29c   :  { %v24986_v47 = vpop.f32.mrb[52].mxu1  ;;  %25015 = vmatpush3.bf16.msra.mxu0 %v1513_v12  ;;  %v24954_v40 = vpop.f32.mrb[20].mxu0  ;;  %25348 = vmatprep.mubr.bf16.mxu1 %v29144_v37 }
 0x29d   :  { %v1306_v48 = vpop.f32.mrb[53].mxu1  ;;  %v1135_v41 = vpop.f32.mrb[21].mxu0  ;;  %28994 = vmatprep.subr.msk.bf16.mxu0 %vm1387_vm4, %v30394_v46 }
 0x29e   :  { %v24987_v50 = vpop.f32.mrb[54].mxu1  ;;  %25347 = vmatpush3.bf16.msra.mxu1 %v30034_v13  ;;  %v24955_v51 = vpop.f32.mrb[22].mxu0 }
 0x29f   :  { %v30408_v56 = vpack.c.bf16 %v24987_v50, %v24986_v47  ;;  %v1309_v58 = vpop.f32.mrb[55].mxu1  ;;  %v1138_v42 = vpop.f32.mrb[23].mxu0  ;;  %v30410_v59 = vpack.c.bf16 %v24955_v51, %v24954_v40 }
 0x2a0   :  { %v30412_v60 = vpack.c.bf16 %v1309_v58, %v1306_v48  ;;  %v30414_v27 = vpack.c.bf16 %v1138_v42, %v1135_v41 }
 0x2a1   :  { %36923 = vst [vmem:[#allocation5_spill] sm:$0xff] %v30408_v56  ;;  %25349 = vmatmul.mubr.bf16.vlgmr.msra.gmra.mrb[160].mxu1 %v29145_v53 }
 0x2a2   :  { %36924 = vst [vmem:[#allocation6_spill] sm:$0xff] %v30412_v60  ;;  %25002 = vmatprep.mubr.msk.bf16.mxu0 %vm869_vm3, %v30412_v60  ;;  %25352 = vmatprep.mubr.bf16.mxu1 %v29146_v55 }
 0x2a3   :  { %25003 = vmatmul.mubr.msk.bf16.gmra.mrb[36].mxu0 %vm869_vm3, %v30408_v56 }
 0x2a4   :  { %v24990_v13 = vpop.f32.mrb[56].mxu1  ;;  %v24958_v28 = vpop.f32.mrb[24].mxu0 }
 0x2a5   :  { %v1322_v29 = vpop.f32.mrb[57].mxu1  ;;  %v1151_v30 = vpop.f32.mrb[25].mxu0 }
 0x2a6   :  { %v24991_v32 = vpop.f32.mrb[58].mxu1  ;;  %v24959_v61 = vpop.f32.mrb[26].mxu0 }
 0x2a7   :  { %v30426_v62 = vpack.c.bf16 %v24991_v32, %v24990_v13  ;;  %v1325_v63 = vpop.f32.mrb[59].mxu1  ;;  %v1154_v0 = vpop.f32.mrb[27].mxu0  ;;  %v30428_v3 = vpack.c.bf16 %v24959_v61, %v24958_v28 }
 0x2a8   :  { %v30430_v5 = vpack.c.bf16 %v1325_v63, %v1322_v29  ;;  %v30432_v34 = vpack.c.bf16 %v1154_v0, %v1151_v30  ;;  %v21509_v63 = vld [vmem:[%s36920_s25 + $0x8] sm:$0x3] }
 0x2a9   :  { %36925 = vst [vmem:[#allocation7_spill] sm:$0xff] %v30426_v62  ;;  %36926 = vst [vmem:[#allocation8_spill] sm:$0xff] %v30428_v3  ;;  %25353 = vmatmul.mubr.bf16.gmra.mrb[164].mxu1 %v29147_v31 }
 0x2aa   :  { %36927 = vst [vmem:[#allocation9_spill] sm:$0xff] %v30430_v5  ;;  %36928 = vst [vmem:[#allocation10_spill] sm:$0xff] %v30432_v34  ;;  %25006 = vmatprep.mubr.msk.bf16.mxu0 %vm869_vm3, %v30430_v5  ;;  %25356 = vmatprep.mubr.bf16.mxu1 %v29148_v33  ;;  %v2121_v33 = vsel %vm1387_vm4, %v21476_v52, 0 }
 0x2ab   :  { %25007 = vmatmul.mubr.msk.bf16.gmra.mrb[40].mxu0 %vm869_vm3, %v30426_v62 }
 0x2ac   :  { %v24994_v7 = vpop.f32.mrb[60].mxu1  ;;  %v24962_v2 = vpop.f32.mrb[28].mxu0 }
 0x2ad   :  { %v1338_v8 = vpop.f32.mrb[61].mxu1  ;;  %v1167_v6 = vpop.f32.mrb[29].mxu0 }
 0x2ae   :  { %v24995_v35 = vpop.f32.mrb[62].mxu1  ;;  %v24963_v49 = vpop.f32.mrb[30].mxu0 }
 0x2af   :  { %v30444_v14 = vpack.c.bf16 %v24995_v35, %v24994_v7  ;;  %v1341_v15 = vpop.f32.mrb[63].mxu1  ;;  %v1170_v54 = vpop.f32.mrb[31].mxu0  ;;  %v30446_v16 = vpack.c.bf16 %v24963_v49, %v24962_v2 }
 0x2b0   :  { %v30448_v17 = vpack.c.bf16 %v1341_v15, %v1338_v8  ;;  %v30450_v18 = vpack.c.bf16 %v1170_v54, %v1167_v6 }
 0x2b1   :  { %36929 = vst [vmem:[#allocation11_spill] sm:$0xff] %v30444_v14  ;;  %36930 = vst [vmem:[#allocation12_spill] sm:$0xff] %v30446_v16  ;;  %25357 = vmatmul.mubr.bf16.gmra.mrb[168].mxu1 %v29149_v9 }
 0x2b2   :  { %36931 = vst [vmem:[#allocation13_spill] sm:$0xff] %v30448_v17  ;;  %36932 = vst [vmem:[#allocation14_spill] sm:$0xff] %v30450_v18  ;;  %25010 = vmatprep.mubr.msk.bf16.mxu0 %vm869_vm3, %v30448_v17  ;;  %25360 = vmatprep.mubr.bf16.mxu1 %v29150_v19 }
 0x2b3   :  { %25011 = vmatmul.mubr.msk.bf16.gmra.mrb[44].mxu0 %vm869_vm3, %v30444_v14 }
 0x2b4   :  { %25016 = vmatprep.mubr.msk.bf16.mxu0 %vm869_vm3, %v30381_v45  ;;  %v25050_v20 = vpop.f32.mrb[64].mxu1 }
 0x2b5   :  { %v1711_v21 = vpop.f32.mrb[65].mxu1 }
 0x2b6   :  { %v25051_v24 = vpop.f32.mrb[66].mxu1 }
 0x2b7   :  { %v30461_v36 = vpack.c.bf16 %v25051_v24, %v25050_v20  ;;  %v1714_v57 = vpop.f32.mrb[67].mxu1 }
 0x2b8   :  { %v30463_v23 = vpack.c.bf16 %v1714_v57, %v1711_v21 }
 0x2b9   :  { %36933 = vst [vmem:[#allocation15_spill] sm:$0xff] %v30461_v36  ;;  %25361 = vmatmul.mubr.bf16.gmra.mrb[172].mxu1 %v29151_v10 }
 0x2ba   :  { %36934 = vst [vmem:[#allocation16_spill] sm:$0xff] %v30463_v23 }
 0x2bb   :  { %25017 = vmatmul.mubr.msk.bf16.vlgmr.msra.gmra.mrb[32].mxu0 %vm869_vm3, %v30377_v43 }
 0x2bc   :  { %25065 = vmatpush3.bf16.msra.mxu0 %v1809_v25  ;;  %25020 = vmatprep.mubr.msk.bf16.mxu0 %vm869_vm3, %v30414_v27  ;;  %v25054_v22 = vpop.f32.mrb[68].mxu1 }
 0x2bd   :  { %v1727_v26 = vpop.f32.mrb[69].mxu1  ;;  %28995 = vmatprep.subr.msk.bf16.mxu0 %vm1387_vm4, %v21476_v52 }
 0x2be   :  { %v25055_v39 = vpop.f32.mrb[70].mxu1 }
 0x2bf   :  { %v30475_v11 = vpack.c.bf16 %v25055_v39, %v25054_v22  ;;  %v1730_v37 = vpop.f32.mrb[71].mxu1 }
 0x2c0   :  { %v30477_v12 = vpack.c.bf16 %v1730_v37, %v1727_v26 }
 0x2c1   :  { %36935 = vst [vmem:[#allocation17_spill] sm:$0xff] %v30475_v11 }
 0x2c2   :  { %36936 = vst [vmem:[#allocation18_spill] sm:$0xff] %v30477_v12 }
 0x2c3   :  { %25021 = vmatmul.mubr.msk.bf16.gmra.mrb[36].mxu0 %vm869_vm3, %v30410_v59 }
 0x2c4   :  { %25024 = vmatprep.mubr.msk.bf16.mxu0 %vm869_vm3, %v30432_v34  ;;  %v25058_v46 = vpop.f32.mrb[72].mxu1 }
 0x2c5   :  { %v1743_v47 = vpop.f32.mrb[73].mxu1 }
 0x2c6   :  { %v25059_v40 = vpop.f32.mrb[74].mxu1 }
 0x2c7   :  { %v30483_v48 = vpack.c.bf16 %v25059_v40, %v25058_v46  ;;  %v1746_v41 = vpop.f32.mrb[75].mxu1  ;;  %v2433_v40 = vsel %vm1387_vm4, %v21509_v63, 0 }
 0x2c8   :  { %v30485_v53 = vpack.c.bf16 %v1746_v41, %v1743_v47  ;;  %v21542_v41 = vld [vmem:[%s36920_s25 + $0xa] sm:$0x3] }
 0x2c9   :  { %36937 = vst [vmem:[#allocation19_spill] sm:$0xff] %v30483_v48 }
 0x2ca   :  { %36938 = vst [vmem:[#allocation20_spill] sm:$0xff] %v30485_v53 }
 0x2cb   :  { %25025 = vmatmul.mubr.msk.bf16.gmra.mrb[40].mxu0 %vm869_vm3, %v30428_v3 }
 0x2cc   :  { %25028 = vmatprep.mubr.msk.bf16.mxu0 %vm869_vm3, %v30450_v18  ;;  %v25062_v50 = vpop.f32.mrb[76].mxu1 }
 0x2cd   :  { %v1759_v51 = vpop.f32.mrb[77].mxu1 }
 0x2ce   :  { %v25063_v55 = vpop.f32.mrb[78].mxu1 }
 0x2cf   :  { %v30491_v58 = vpack.c.bf16 %v25063_v55, %v25062_v50  ;;  %v1762_v42 = vpop.f32.mrb[79].mxu1 }
 0x2d0   :  { %v30493_v13 = vpack.c.bf16 %v1762_v42, %v1759_v51 }
 0x2d1   :  { %36939 = vst [vmem:[#allocation21_spill] sm:$0xff] %v30491_v58 }
 0x2d2   :  { %36940 = vst [vmem:[#allocation22_spill] sm:$0xff] %v30493_v13 }
 0x2d3   :  { %25029 = vmatmul.mubr.msk.bf16.gmra.mrb[44].mxu0 %vm869_vm3, %v30446_v16 }
 0x2d4   :  { %25066 = vmatprep.mubr.msk.bf16.mxu0 %vm869_vm3, %v30463_v23  ;;  %v25100_v28 = vpop.f32.mrb[80].mxu1 }
 0x2d5   :  { %v2023_v29 = vpop.f32.mrb[81].mxu1 }
 0x2d6   :  { %v25101_v30 = vpop.f32.mrb[82].mxu1 }
 0x2d7   :  { %v30499_v31 = vpack.c.bf16 %v25101_v30, %v25100_v28  ;;  %v2026_v32 = vpop.f32.mrb[83].mxu1 }
 0x2d8   :  { %v30501_v61 = vpack.c.bf16 %v2026_v32, %v2023_v29 }
 0x2d9   :  { %36941 = vst [vmem:[#allocation23_spill] sm:$0xff] %v30499_v31 }
 0x2da   :  { %36942 = vst [vmem:[#allocation24_spill] sm:$0xff] %v30501_v61 }
 0x2db   :  { %25067 = vmatmul.mubr.msk.bf16.vlgmr.msra.gmra.mrb[32].mxu0 %vm869_vm3, %v30461_v36 }
 0x2dc   :  { %25115 = vmatpush3.bf16.msra.mxu0 %v2121_v33  ;;  %25070 = vmatprep.mubr.msk.bf16.mxu0 %vm869_vm3, %v30477_v12  ;;  %v25104_v0 = vpop.f32.mrb[84].mxu1 }
 0x2dd   :  { %v2039_v7 = vpop.f32.mrb[85].mxu1  ;;  %28996 = vmatprep.subr.msk.bf16.mxu0 %vm1387_vm4, %v21509_v63 }
 0x2de   :  { %v25105_v2 = vpop.f32.mrb[86].mxu1 }
 0x2df   :  { %v30512_v8 = vpack.c.bf16 %v25105_v2, %v25104_v0  ;;  %v2042_v6 = vpop.f32.mrb[87].mxu1 }
 0x2e0   :  { %v30514_v9 = vpack.c.bf16 %v2042_v6, %v2039_v7 }
 0x2e1   :  { %36943 = vst [vmem:[#allocation25_spill] sm:$0xff] %v30512_v8 }
 0x2e2   :  { %36944 = vst [vmem:[#allocation26_spill] sm:$0xff] %v30514_v9 }
 0x2e3   :  { %25071 = vmatmul.mubr.msk.bf16.gmra.mrb[36].mxu0 %vm869_vm3, %v30475_v11 }
 0x2e4   :  { %25074 = vmatprep.mubr.msk.bf16.mxu0 %vm869_vm3, %v30485_v53  ;;  %v25108_v35 = vpop.f32.mrb[88].mxu1 }
 0x2e5   :  { %v2055_v49 = vpop.f32.mrb[89].mxu1 }
 0x2e6   :  { %v25109_v19 = vpop.f32.mrb[90].mxu1 }
 0x2e7   :  { %v30520_v15 = vpack.c.bf16 %v25109_v19, %v25108_v35  ;;  %v2058_v54 = vpop.f32.mrb[91].mxu1 }
 0x2e8   :  { %v30522_v20 = vpack.c.bf16 %v2058_v54, %v2055_v49 }
 0x2e9   :  { %36945 = vst [vmem:[#allocation27_spill] sm:$0xff] %v30520_v15 }
 0x2ea   :  { %36946 = vst [vmem:[#allocation28_spill] sm:$0xff] %v30522_v20 }
 0x2eb   :  { %25075 = vmatmul.mubr.msk.bf16.gmra.mrb[40].mxu0 %vm869_vm3, %v30483_v48 }
 0x2ec   :  { %25078 = vmatprep.mubr.msk.bf16.mxu0 %vm869_vm3, %v30493_v13  ;;  %v25112_v21 = vpop.f32.mrb[92].mxu1 }
 0x2ed   :  { %v2071_v10 = vpop.f32.mrb[93].mxu1 }
 0x2ee   :  { %v25113_v24 = vpop.f32.mrb[94].mxu1 }
 0x2ef   :  { %v30528_v57 = vpack.c.bf16 %v25113_v24, %v25112_v21  ;;  %v2074_v25 = vpop.f32.mrb[95].mxu1 }
 0x2f0   :  { %v30530_v52 = vpack.c.bf16 %v2074_v25, %v2071_v10 }
 0x2f1   :  { %36947 = vst [vmem:[#allocation29_spill] sm:$0xff] %v30528_v57 }
 0x2f2   :  { %36948 = vst [vmem:[#allocation30_spill] sm:$0xff] %v30530_v52 }
 0x2f3   :  { %25079 = vmatmul.mubr.msk.bf16.gmra.mrb[44].mxu0 %vm869_vm3, %v30491_v58 }
 0x2f4   :  { %25116 = vmatprep.mubr.msk.bf16.mxu0 %vm869_vm3, %v30501_v61  ;;  %v25150_v22 = vpop.f32.mrb[96].mxu1 }
 0x2f5   :  { %v2335_v26 = vpop.f32.mrb[97].mxu1 }
 0x2f6   :  { %v25151_v39 = vpop.f32.mrb[98].mxu1 }
 0x2f7   :  { %v30536_v37 = vpack.c.bf16 %v25151_v39, %v25150_v22  ;;  %v2338_v46 = vpop.f32.mrb[99].mxu1  ;;  %v2745_v39 = vsel %vm1387_vm4, %v21542_v41, 0 }
 0x2f8   :  { %v30538_v47 = vpack.c.bf16 %v2338_v46, %v2335_v26  ;;  %v21575_v46 = vld [vmem:[%s36920_s25 + $0xc] sm:$0x3] }
 0x2f9   :  { %36949 = vst [vmem:[#allocation31_spill] sm:$0xff] %v30536_v37 }
 0x2fa   :  { %36950 = vst [vmem:[#allocation32_spill] sm:$0xff] %v30538_v47 }
 0x2fb   :  { %25117 = vmatmul.mubr.msk.bf16.vlgmr.msra.gmra.mrb[32].mxu0 %vm869_vm3, %v30499_v31 }
 0x2fc   :  { %25165 = vmatpush3.bf16.msra.mxu0 %v2433_v40  ;;  %25120 = vmatprep.mubr.msk.bf16.mxu0 %vm869_vm3, %v30514_v9  ;;  %v25154_v50 = vpop.f32.mrb[100].mxu1 }
 0x2fd   :  { %v2351_v51 = vpop.f32.mrb[101].mxu1  ;;  %28997 = vmatprep.subr.msk.bf16.mxu0 %vm1387_vm4, %v21542_v41 }
 0x2fe   :  { %v25155_v55 = vpop.f32.mrb[102].mxu1 }
 0x2ff   :  { %v30549_v42 = vpack.c.bf16 %v25155_v55, %v25154_v50  ;;  %v2354_v28 = vpop.f32.mrb[103].mxu1 }
 0x300   :  { %v30551_v29 = vpack.c.bf16 %v2354_v28, %v2351_v51 }
 0x301   :  { %36951 = vst [vmem:[#allocation33_spill] sm:$0xff] %v30549_v42 }
 0x302   :  { %36952 = vst [vmem:[#allocation34_spill] sm:$0xff] %v30551_v29 }
 0x303   :  { %25121 = vmatmul.mubr.msk.bf16.gmra.mrb[36].mxu0 %vm869_vm3, %v30512_v8 }
 0x304   :  { %25124 = vmatprep.mubr.msk.bf16.mxu0 %vm869_vm3, %v30522_v20  ;;  %v25158_v30 = vpop.f32.mrb[104].mxu1 }
 0x305   :  { %v2367_v32 = vpop.f32.mrb[105].mxu1 }
 0x306   :  { %v25159_v33 = vpop.f32.mrb[106].mxu1 }
 0x307   :  { %v30557_v63 = vpack.c.bf16 %v25159_v33, %v25158_v30  ;;  %v2370_v0 = vpop.f32.mrb[107].mxu1 }
 0x308   :  { %v30559_v7 = vpack.c.bf16 %v2370_v0, %v2367_v32 }
 0x309   :  { %36953 = vst [vmem:[#allocation35_spill] sm:$0xff] %v30557_v63 }
 0x30a   :  { %36954 = vst [vmem:[#allocation36_spill] sm:$0xff] %v30559_v7 }
 0x30b   :  { %25125 = vmatmul.mubr.msk.bf16.gmra.mrb[40].mxu0 %vm869_vm3, %v30520_v15 }
 0x30c   :  { %25128 = vmatprep.mubr.msk.bf16.mxu0 %vm869_vm3, %v30530_v52  ;;  %v25162_v2 = vpop.f32.mrb[108].mxu1 }
 0x30d   :  { %v2383_v6 = vpop.f32.mrb[109].mxu1 }
 0x30e   :  { %v25163_v35 = vpop.f32.mrb[110].mxu1 }
 0x30f   :  { %v30565_v49 = vpack.c.bf16 %v25163_v35, %v25162_v2  ;;  %v2386_v19 = vpop.f32.mrb[111].mxu1 }
 0x310   :  { %v30567_v54 = vpack.c.bf16 %v2386_v19, %v2383_v6 }
 0x311   :  { %36955 = vst [vmem:[#allocation37_spill] sm:$0xff] %v30565_v49 }
 0x312   :  { %36956 = vst [vmem:[#allocation38_spill] sm:$0xff] %v30567_v54 }
 0x313   :  { %25129 = vmatmul.mubr.msk.bf16.gmra.mrb[44].mxu0 %vm869_vm3, %v30528_v57 }
 0x314   :  { %25166 = vmatprep.mubr.msk.bf16.mxu0 %vm869_vm3, %v30538_v47  ;;  %v25200_v21 = vpop.f32.mrb[112].mxu1  ;;  %v21688_v47 = vld [vmem:[%s36692_s9 + $0x8] sm:$0xf] }
 0x315   :  { %v2647_v10 = vpop.f32.mrb[113].mxu1 }
 0x316   :  { %v25201_v24 = vpop.f32.mrb[114].mxu1 }
 0x317   :  { %v30573_v25 = vpack.c.bf16 %v25201_v24, %v25200_v21  ;;  %v2650_v22 = vpop.f32.mrb[115].mxu1 }
 0x318   :  { %v30575_v26 = vpack.c.bf16 %v2650_v22, %v2647_v10 }
 0x319   :  { %36957 = vst [vmem:[#allocation39_spill] sm:$0xff] %v30573_v25 }
 0x31a   :  { %36958 = vst [vmem:[#allocation40_spill] sm:$0xff] %v30575_v26 }
 0x31b   :  { %25167 = vmatmul.mubr.msk.bf16.vlgmr.msra.gmra.mrb[32].mxu0 %vm869_vm3, %v30536_v37 }
 0x31c   :  { %25215 = vmatpush3.bf16.msra.mxu0 %v2745_v39  ;;  %25170 = vmatprep.mubr.msk.bf16.mxu0 %vm869_vm3, %v30551_v29  ;;  %v25204_v40 = vpop.f32.mrb[116].mxu1 }
 0x31d   :  { %v2663_v50 = vpop.f32.mrb[117].mxu1  ;;  %28998 = vmatprep.subr.msk.bf16.mxu0 %vm1387_vm4, %v21575_v46 }
 0x31e   :  { %v25205_v51 = vpop.f32.mrb[118].mxu1 }
 0x31f   :  { %v30586_v55 = vpack.c.bf16 %v25205_v51, %v25204_v40  ;;  %v2666_v28 = vpop.f32.mrb[119].mxu1 }
 0x320   :  { %v30588_v41 = vpack.c.bf16 %v2666_v28, %v2663_v50 }
 0x321   :  { %36959 = vst [vmem:[#allocation41_spill] sm:$0xff] %v30586_v55 }
 0x322   :  { %36960 = vst [vmem:[#allocation42_spill] sm:$0xff] %v30588_v41 }
 0x323   :  { %25171 = vmatmul.mubr.msk.bf16.gmra.mrb[36].mxu0 %vm869_vm3, %v30549_v42 }
 0x324   :  { %25174 = vmatprep.mubr.msk.bf16.mxu0 %vm869_vm3, %v30559_v7  ;;  %v25208_v30 = vpop.f32.mrb[120].mxu1 }
 0x325   :  { %v2679_v32 = vpop.f32.mrb[121].mxu1 }
 0x326   :  { %v25209_v33 = vpop.f32.mrb[122].mxu1 }
 0x327   :  { %v30594_v0 = vpack.c.bf16 %v25209_v33, %v25208_v30  ;;  %v2682_v2 = vpop.f32.mrb[123].mxu1  ;;  %v21608_v33 = vld [vmem:[%s36920_s25 + $0xe] sm:$0x3] }
 0x328   :  { %v30596_v6 = vpack.c.bf16 %v2682_v2, %v2679_v32  ;;  %v3057_v32 = vsel %vm1387_vm4, %v21575_v46, 0 }
 0x329   :  { %36961 = vst [vmem:[#allocation43_spill] sm:$0xff] %v30594_v0 }
 0x32a   :  { %36962 = vst [vmem:[#allocation44_spill] sm:$0xff] %v30596_v6 }
 0x32b   :  { %25175 = vmatmul.mubr.msk.bf16.gmra.mrb[40].mxu0 %vm869_vm3, %v30557_v63 }
 0x32c   :  { %25178 = vmatprep.mubr.msk.bf16.mxu0 %vm869_vm3, %v30567_v54  ;;  %v25212_v35 = vpop.f32.mrb[124].mxu1 }
 0x32d   :  { %v2695_v19 = vpop.f32.mrb[125].mxu1 }
 0x32e   :  { %v25213_v21 = vpop.f32.mrb[126].mxu1 }
 0x32f   :  { %v30602_v10 = vpack.c.bf16 %v25213_v21, %v25212_v35  ;;  %v2698_v24 = vpop.f32.mrb[127].mxu1 }
 0x330   :  { %v30604_v22 = vpack.c.bf16 %v2698_v24, %v2695_v19 }
 0x331   :  { %36963 = vst [vmem:[#allocation45_spill] sm:$0xff] %v30602_v10 }
 0x332   :  { %36964 = vst [vmem:[#allocation46_spill] sm:$0xff] %v30604_v22 }
 0x333   :  { %25179 = vmatmul.mubr.msk.bf16.gmra.mrb[44].mxu0 %vm869_vm3, %v30565_v49 }
 0x334   :  { %25216 = vmatprep.mubr.msk.bf16.mxu0 %vm869_vm3, %v30575_v26  ;;  %v25250_v39 = vpop.f32.mrb[128].mxu1 }
 0x335   :  { %v2959_v40 = vpop.f32.mrb[129].mxu1 }
 0x336   :  { %v25251_v50 = vpop.f32.mrb[130].mxu1 }
 0x337   :  { %v30610_v51 = vpack.c.bf16 %v25251_v50, %v25250_v39  ;;  %v2962_v28 = vpop.f32.mrb[131].mxu1 }
 0x338   :  { %v30612_v30 = vpack.c.bf16 %v2962_v28, %v2959_v40 }
 0x339   :  { %36965 = vst [vmem:[#allocation47_spill] sm:$0xff] %v30610_v51 }
 0x33a   :  { %36966 = vst [vmem:[#allocation48_spill] sm:$0xff] %v30612_v30 }
 0x33b   :  { %25217 = vmatmul.mubr.msk.bf16.vlgmr.msra.gmra.mrb[32].mxu0 %vm869_vm3, %v30573_v25 }
 0x33c   :  { %25265 = vmatpush3.bf16.msra.mxu0 %v3057_v32  ;;  %25220 = vmatprep.mubr.msk.bf16.mxu0 %vm869_vm3, %v30588_v41  ;;  %v25254_v2 = vpop.f32.mrb[132].mxu1 }
 0x33d   :  { %v2975_v35 = vpop.f32.mrb[133].mxu1  ;;  %28999 = vmatprep.subr.msk.bf16.mxu0 %vm1387_vm4, %v21608_v33 }
 0x33e   :  { %v25255_v19 = vpop.f32.mrb[134].mxu1 }
 0x33f   :  { %v30623_v21 = vpack.c.bf16 %v25255_v19, %v25254_v2  ;;  %v2978_v24 = vpop.f32.mrb[135].mxu1 }
 0x340   :  { %v30625_v46 = vpack.c.bf16 %v2978_v24, %v2975_v35 }
 0x341   :  { %36967 = vst [vmem:[#allocation49_spill] sm:$0xff] %v30623_v21 }
 0x342   :  { %36968 = vst [vmem:[#allocation50_spill] sm:$0xff] %v30625_v46 }
 0x343   :  { %25221 = vmatmul.mubr.msk.bf16.gmra.mrb[36].mxu0 %vm869_vm3, %v30586_v55 }
 0x344   :  { %25224 = vmatprep.mubr.msk.bf16.mxu0 %vm869_vm3, %v30596_v6  ;;  %v25258_v39 = vpop.f32.mrb[136].mxu1 }
 0x345   :  { %v2991_v40 = vpop.f32.mrb[137].mxu1 }
 0x346   :  { %v25259_v50 = vpop.f32.mrb[138].mxu1 }
 0x347   :  { %v30631_v28 = vpack.c.bf16 %v25259_v50, %v25258_v39  ;;  %v2994_v32 = vpop.f32.mrb[139].mxu1 }
 0x348   :  { %v30633_v1 = vpack.c.bf16 %v2994_v32, %v2991_v40 }
 0x349   :  { %36969 = vst [vmem:[#allocation51_spill] sm:$0xff] %v30631_v28 }
 0x34a   :  { %36970 = vst [vmem:[#allocation52_spill] sm:$0xff] %v30633_v1 }
 0x34b   :  { %25225 = vmatmul.mubr.msk.bf16.gmra.mrb[40].mxu0 %vm869_vm3, %v30594_v0 }
 0x34c   :  { %25228 = vmatprep.mubr.msk.bf16.mxu0 %vm869_vm3, %v30604_v22  ;;  %v25262_v2 = vpop.f32.mrb[140].mxu1 }
 0x34d   :  { %v3007_v35 = vpop.f32.mrb[141].mxu1 }
 0x34e   :  { %v25263_v19 = vpop.f32.mrb[142].mxu1 }
 0x34f   :  { %v30639_v24 = vpack.c.bf16 %v25263_v19, %v25262_v2  ;;  %v3010_v4 = vpop.f32.mrb[143].mxu1  ;;  %v3369_v2 = vsel %vm1387_vm4, %v21608_v33, 0 }
 0x350   :  { %v30641_v6 = vpack.c.bf16 %v3010_v4, %v3007_v35  ;;  %v21641_v4 = vld [vmem:[%s36920_s25 + $0x10] sm:$0x3] }
 0x351   :  { %36971 = vst [vmem:[#allocation53_spill] sm:$0xff] %v30639_v24 }
 0x352   :  { %36972 = vst [vmem:[#allocation54_spill] sm:$0xff] %v30641_v6 }
 0x353   :  { %25229 = vmatmul.mubr.msk.bf16.gmra.mrb[44].mxu0 %vm869_vm3, %v30602_v10 }
 0x354   :  { %25266 = vmatprep.mubr.msk.bf16.mxu0 %vm869_vm3, %v30612_v30  ;;  %v25300_v39 = vpop.f32.mrb[144].mxu1 }
 0x355   :  { %v3271_v40 = vpop.f32.mrb[145].mxu1 }
 0x356   :  { %v25301_v50 = vpop.f32.mrb[146].mxu1 }
 0x357   :  { %v30647_v32 = vpack.c.bf16 %v25301_v50, %v25300_v39  ;;  %v3274_v22 = vpop.f32.mrb[147].mxu1 }
 0x358   :  { %v30649_v0 = vpack.c.bf16 %v3274_v22, %v3271_v40 }
 0x359   :  { %36973 = vst [vmem:[#allocation55_spill] sm:$0xff] %v30647_v32 }
 0x35a   :  { %36974 = vst [vmem:[#allocation56_spill] sm:$0xff] %v30649_v0 }
 0x35b   :  { %25267 = vmatmul.mubr.msk.bf16.vlgmr.msra.gmra.mrb[32].mxu0 %vm869_vm3, %v30610_v51 }
 0x35c   :  { %25315 = vmatpush3.bf16.msra.mxu0 %v3369_v2  ;;  %25270 = vmatprep.mubr.msk.bf16.mxu0 %vm869_vm3, %v30625_v46  ;;  %v25304_v35 = vpop.f32.mrb[148].mxu1 }
 0x35d   :  { %v3287_v19 = vpop.f32.mrb[149].mxu1  ;;  %29000 = vmatprep.subr.msk.bf16.mxu0 %vm1387_vm4, %v21641_v4 }
 0x35e   :  { %v25305_v39 = vpop.f32.mrb[150].mxu1 }
 0x35f   :  { %v30660_v22 = vpack.c.bf16 %v25305_v39, %v25304_v35  ;;  %v3290_v40 = vpop.f32.mrb[151].mxu1 }
 0x360   :  { %v30662_v33 = vpack.c.bf16 %v3290_v40, %v3287_v19 }
 0x361   :  { %36975 = vst [vmem:[#allocation57_spill] sm:$0xff] %v30660_v22 }
 0x362   :  { %36976 = vst [vmem:[#allocation58_spill] sm:$0xff] %v30662_v33 }
 0x363   :  { %25271 = vmatmul.mubr.msk.bf16.gmra.mrb[36].mxu0 %vm869_vm3, %v30623_v21 }
 0x364   :  { %25274 = vmatprep.mubr.msk.bf16.mxu0 %vm869_vm3, %v30633_v1  ;;  %v25308_v50 = vpop.f32.mrb[152].mxu1 }
 0x365   :  { %v3303_v2 = vpop.f32.mrb[153].mxu1 }
 0x366   :  { %v25309_v51 = vpop.f32.mrb[154].mxu1 }
 0x367   :  { %v30668_v46 = vpack.c.bf16 %v25309_v51, %v25308_v50  ;;  %v3306_v30 = vpop.f32.mrb[155].mxu1 }
 0x368   :  { %v30670_v10 = vpack.c.bf16 %v3306_v30, %v3303_v2 }
 0x369   :  { %36977 = vst [vmem:[#allocation59_spill] sm:$0xff] %v30668_v46 }
 0x36a   :  { %36978 = vst [vmem:[#allocation60_spill] sm:$0xff] %v30670_v10 }
 0x36b   :  { %25275 = vmatmul.mubr.msk.bf16.gmra.mrb[40].mxu0 %vm869_vm3, %v30631_v28 }
 0x36c   :  { %25278 = vmatprep.mubr.msk.bf16.mxu0 %vm869_vm3, %v30641_v6  ;;  %v25312_v35 = vpop.f32.mrb[156].mxu1 }
 0x36d   :  { %v3319_v19 = vpop.f32.mrb[157].mxu1 }
 0x36e   :  { %v25313_v39 = vpop.f32.mrb[158].mxu1 }
 0x36f   :  { %v30676_v40 = vpack.c.bf16 %v25313_v39, %v25312_v35  ;;  %v3322_v1 = vpop.f32.mrb[159].mxu1  ;;  %v3681_v35 = vsel %vm1387_vm4, %v21641_v4, 0 }
 0x370   :  { %v30678_v21 = vpack.c.bf16 %v3322_v1, %v3319_v19 }
 0x371   :  { %36979 = vst [vmem:[#allocation61_spill] sm:$0xff] %v30676_v40 }
 0x372   :  { %36980 = vst [vmem:[#allocation62_spill] sm:$0xff] %v30678_v21 }
 0x373   :  { %25279 = vmatmul.mubr.msk.bf16.gmra.mrb[44].mxu0 %vm869_vm3, %v30639_v24 }
 0x374   :  { %25316 = vmatprep.mubr.msk.bf16.mxu0 %vm869_vm3, %v30649_v0  ;;  %v25350_v51 = vpop.f32.mrb[160].mxu1 }
 0x375   :  { %v3583_v30 = vpop.f32.mrb[161].mxu1 }
 0x376   :  { %v25351_v50 = vpop.f32.mrb[162].mxu1 }
 0x377   :  { %v30684_v2 = vpack.c.bf16 %v25351_v50, %v25350_v51  ;;  %v3586_v6 = vpop.f32.mrb[163].mxu1 }
 0x378   :  { %v30686_v28 = vpack.c.bf16 %v3586_v6, %v3583_v30 }
 0x379   :  { %36981 = vst [vmem:[#allocation63_spill] sm:$0xff] %v30684_v2 }
 0x37a   :  { %36982 = vst [vmem:[#allocation64_spill] sm:$0xff] %v30686_v28 }
 0x37b   :  { %25317 = vmatmul.mubr.msk.bf16.vlgmr.msra.gmra.mrb[32].mxu0 %vm869_vm3, %v30647_v32 }
 0x37c   :  { %25365 = vmatpush3.bf16.msra.mxu0 %v3681_v35  ;;  %25320 = vmatprep.mubr.msk.bf16.mxu0 %vm869_vm3, %v30662_v33  ;;  %v25354_v1 = vpop.f32.mrb[164].mxu1 }
 0x37d   :  { %v3599_v19 = vpop.f32.mrb[165].mxu1 }
 0x37e   :  { %v25355_v39 = vpop.f32.mrb[166].mxu1 }
 0x37f   :  { %v30693_v0 = vpack.c.bf16 %v25355_v39, %v25354_v1  ;;  %v3602_v24 = vpop.f32.mrb[167].mxu1 }
 0x380   :  { %v30695_v51 = vpack.c.bf16 %v3602_v24, %v3599_v19 }
 0x381   :  { %36983 = vst [vmem:[#allocation65_spill] sm:$0xff] %v30693_v0 }
 0x382   :  { %36984 = vst [vmem:[#allocation66_spill] sm:$0xff] %v30695_v51 }
 0x383   :  { %25321 = vmatmul.mubr.msk.bf16.gmra.mrb[36].mxu0 %vm869_vm3, %v30660_v22 }
 0x384   :  { %25324 = vmatprep.mubr.msk.bf16.mxu0 %vm869_vm3, %v30670_v10  ;;  %v25358_v6 = vpop.f32.mrb[168].mxu1 }
 0x385   :  { %v3615_v4 = vpop.f32.mrb[169].mxu1 }
 0x386   :  { %v25359_v30 = vpop.f32.mrb[170].mxu1 }
 0x387   :  { %v30701_v50 = vpack.c.bf16 %v25359_v30, %v25358_v6  ;;  %v3618_v35 = vpop.f32.mrb[171].mxu1  ;;  %v21655_v6 = vld [vmem:[%s36989_s30 + $0x40] sm:$0xff] }
 0x388   :  { %v30703_v33 = vpack.c.bf16 %v3618_v35, %v3615_v4  ;;  %v21650_v30 = vld [vmem:[%s36990_s7] ss:$0 sm:$0xff] }
 0x389   :  { %36985 = vst [vmem:[#allocation67_spill] sm:$0xff] %v30701_v50 }
 0x38a   :  { %36986 = vst [vmem:[#allocation68_spill] sm:$0xff] %v30703_v33 }
 0x38b   :  { %25325 = vmatmul.mubr.msk.bf16.gmra.mrb[40].mxu0 %vm869_vm3, %v30668_v46 }
 0x38c   :  { %25328 = vmatprep.mubr.msk.bf16.mxu0 %vm869_vm3, %v30678_v21  ;;  %v25362_v24 = vpop.f32.mrb[172].mxu1 }
 0x38d   :  { %v3631_v1 = vpop.f32.mrb[173].mxu1 }
 0x38e   :  { %v25363_v19 = vpop.f32.mrb[174].mxu1 }
 0x38f   :  { %v30709_v39 = vpack.c.bf16 %v25363_v19, %v25362_v24  ;;  %v3634_v10 = vpop.f32.mrb[175].mxu1 }
 0x390   :  { %v30711_v22 = vpack.c.bf16 %v3634_v10, %v3631_v1  ;;  %v3819_v10 = vld [vmem:[%s36989_s30] sm:$0xff] }
 0x391   :  { %36987 = vst [vmem:[#allocation69_spill] sm:$0xff] %v30709_v39  ;;  %25414 = vmatprep.mubr.f32.mxu1 %v3819_v10 }
 0x392   :  { %36988 = vst [vmem:[#allocation70_spill] sm:$0xff] %v30711_v22 }
 0x393   :  { %25329 = vmatmul.mubr.msk.bf16.gmra.mrb[44].mxu0 %vm869_vm3, %v30676_v40 }
 0x394   :  { %25366 = vmatprep.mubr.msk.bf16.mxu0 %vm869_vm3, %v30686_v28 }
 0x39b   :  { %25367 = vmatmul.mubr.msk.bf16.vlgmr.msra.gmra.mrb[32].mxu0 %vm869_vm3, %v30684_v2 }
 0x39c   :  { %25370 = vmatprep.mubr.msk.bf16.mxu0 %vm869_vm3, %v30695_v51 }
 0x3a3   :  { %25371 = vmatmul.mubr.msk.bf16.gmra.mrb[36].mxu0 %vm869_vm3, %v30693_v0 }
 0x3a4   :  { %25374 = vmatprep.mubr.msk.bf16.mxu0 %vm869_vm3, %v30703_v33 }
 0x3ab   :  { %25375 = vmatmul.mubr.msk.bf16.gmra.mrb[40].mxu0 %vm869_vm3, %v30701_v50 }
 0x3ac   :  { %25378 = vmatprep.mubr.msk.bf16.mxu0 %vm869_vm3, %v30711_v22 }
 0x3b3   :  { %25379 = vmatmul.mubr.msk.bf16.gmra.mrb[44].mxu0 %vm869_vm3, %v30709_v39 }
 0x3b4   :  { %25490 = vmatprep.mubr.f32.mxu0 %v21655_v6 }
 0x46e   :  { %v25368_v4 = vpop.f32.mrb[32].mxu0 }
 0x46f   :  { %v3717_v35 = vpop.f32.mrb[33].mxu0  ;;  %v3805_v19 = vadd.f32 %v25368_v4, %v21650_v30 }
 0x470   :  { %v25369_v24 = vpop.f32.mrb[34].mxu0  ;;  %v3803_v22 = vadd.f32 %v21650_v30, %v3717_v35 }
 0x471   :  { %v3720_v1 = vpop.f32.mrb[35].mxu0  ;;  %v3806_v39 = vadd.f32 %v25369_v24, %v21650_v30 }
 0x472   :  { %v3804_v50 = vadd.f32 %v21650_v30, %v3720_v1 }
 0x473   :  { %v30740_v33 = vpack.c.bf16 %v3806_v39, %v3805_v19 }
 0x474   :  { %v30742_v10 = vpack.c.bf16 %v3804_v50, %v3803_v22 }
 0x476   :  { %v25372_v0 = vpop.f32.mrb[36].mxu0  ;;  %27725 = vmatprep.subr.bf16.mxu1 %v30742_v10  ;;  %27789 = vmatprep.subr.bf16.mxu0 %v30742_v10 }
 0x477   :  { %v3733_v6 = vpop.f32.mrb[37].mxu0  ;;  %27727 = vmatpush3.bf16.msra.mxu1 %v30742_v10  ;;  %27791 = vmatpush3.bf16.msra.mxu0 %v30742_v10  ;;  %v3809_v39 = vadd.f32 %v25372_v0, %v21650_v30 }
 0x478   :  { %v25373_v51 = vpop.f32.mrb[38].mxu0  ;;  %27729 = vmatprep.subr.bf16.mxu1 %v30740_v33  ;;  %27793 = vmatprep.subr.bf16.mxu0 %v30740_v33  ;;  %v3807_v22 = vadd.f32 %v21650_v30, %v3733_v6 }
 0x479   :  { %v3736_v4 = vpop.f32.mrb[39].mxu0  ;;  %v3810_v35 = vadd.f32 %v25373_v51, %v21650_v30 }
 0x47a   :  { %v3808_v50 = vadd.f32 %v21650_v30, %v3736_v4 }
 0x47b   :  { %27731 = vmatpush3.bf16.msra.mxu1 %v30740_v33  ;;  %27795 = vmatpush3.bf16.msra.mxu0 %v30740_v33  ;;  %v30752_v24 = vpack.c.bf16 %v3810_v35, %v3809_v39 }
 0x47c   :  { %v30754_v1 = vpack.c.bf16 %v3808_v50, %v3807_v22 }
 0x47e   :  { %v25376_v19 = vpop.f32.mrb[40].mxu0  ;;  %27733 = vmatprep.subr.bf16.mxu1 %v30754_v1  ;;  %27797 = vmatprep.subr.bf16.mxu0 %v30754_v1 }
 0x47f   :  { %v3749_v2 = vpop.f32.mrb[41].mxu0  ;;  %27735 = vmatpush3.bf16.msra.mxu1 %v30754_v1  ;;  %27799 = vmatpush3.bf16.msra.mxu0 %v30754_v1  ;;  %v3813_v6 = vadd.f32 %v25376_v19, %v21650_v30 }
 0x480   :  { %v25377_v0 = vpop.f32.mrb[42].mxu0  ;;  %27737 = vmatprep.subr.bf16.mxu1 %v30752_v24  ;;  %27801 = vmatprep.subr.bf16.mxu0 %v30752_v24  ;;  %v3811_v39 = vadd.f32 %v21650_v30, %v3749_v2 }
 0x481   :  { %v3752_v51 = vpop.f32.mrb[43].mxu0  ;;  %v3814_v4 = vadd.f32 %v25377_v0, %v21650_v30 }
 0x482   :  { %v3812_v35 = vadd.f32 %v21650_v30, %v3752_v51 }
 0x483   :  { %27739 = vmatpush3.bf16.msra.mxu1 %v30752_v24  ;;  %27803 = vmatpush3.bf16.msra.mxu0 %v30752_v24  ;;  %v30764_v22 = vpack.c.bf16 %v3814_v4, %v3813_v6 }
 0x484   :  { %v30766_v50 = vpack.c.bf16 %v3812_v35, %v3811_v39 }
 0x486   :  { %v25380_v28 = vpop.f32.mrb[44].mxu0  ;;  %27741 = vmatprep.subr.bf16.mxu1 %v30766_v50  ;;  %27805 = vmatprep.subr.bf16.mxu0 %v30766_v50 }
 0x487   :  { %v3765_v40 = vpop.f32.mrb[45].mxu0  ;;  %27743 = vmatpush3.bf16.msra.mxu1 %v30766_v50  ;;  %27807 = vmatpush3.bf16.msra.mxu0 %v30766_v50  ;;  %v3817_v0 = vadd.f32 %v25380_v28, %v21650_v30  ;;  %v3820_v28 = vld [vmem:[%s36989_s30 + $0x8] sm:$0xff] }
 0x488   :  { %v25381_v2 = vpop.f32.mrb[46].mxu0  ;;  %27745 = vmatprep.subr.bf16.mxu1 %v30764_v22  ;;  %27809 = vmatprep.subr.bf16.mxu0 %v30764_v22  ;;  %v3815_v6 = vadd.f32 %v21650_v30, %v3765_v40  ;;  %v21656_v40 = vld [vmem:[%s36989_s30 + $0x48] sm:$0xff] }
 0x489   :  { %v3768_v19 = vpop.f32.mrb[47].mxu0  ;;  %v3818_v51 = vadd.f32 %v25381_v2, %v21650_v30  ;;  %v21657_v2 = vld [vmem:[%s36989_s30 + $0x50] sm:$0xff] }
 0x48a   :  { %v3816_v4 = vadd.f32 %v21650_v30, %v3768_v19  ;;  %v3821_v30 = vld [vmem:[%s36989_s30 + $0x10] sm:$0xff]  ;;  %v3822_v19 = vld [vmem:[%s36989_s30 + $0x18] sm:$0xff] }
 0x48b   :  { %27747 = vmatpush3.bf16.msra.mxu1 %v30764_v22  ;;  %27811 = vmatpush3.bf16.msra.mxu0 %v30764_v22  ;;  %v27752_v39 = vpack.c.bf16 %v3818_v51, %v3817_v0  ;;  %v21658_v0 = vld [vmem:[%s36989_s30 + $0x58] sm:$0xff]  ;;  %v21651_v51 = vld [vmem:[%s36989_s30 + $0x20] sm:$0xff] }
 0x48c   :  { %v27748_v35 = vpack.c.bf16 %v3816_v4, %v3815_v6  ;;  %v21652_v6 = vld [vmem:[%s36989_s30 + $0x28] sm:$0xff]  ;;  %v21653_v4 = vld [vmem:[%s36989_s30 + $0x30] sm:$0xff] }
 0x48e   :  { %27749 = vmatprep.subr.bf16.mxu1 %v27748_v35  ;;  %27813 = vmatprep.subr.bf16.mxu0 %v27748_v35 }
 0x48f   :  { %27751 = vmatpush3.bf16.msra.mxu1 %v27748_v35  ;;  %27815 = vmatpush3.bf16.msra.mxu0 %v27748_v35 }
 0x490   :  { %27753 = vmatprep.subr.bf16.mxu1 %v27752_v39  ;;  %27817 = vmatprep.subr.bf16.mxu0 %v27752_v39 }
 0x493   :  { %27755 = vmatpush3.bf16.msra.mxu1 %v27752_v39  ;;  %27819 = vmatpush3.bf16.msra.mxu0 %v27752_v39 }
 0x494   :  { %27757 = vmatprep.subr.bf16.mxu1 %v30742_v10 }
 0x496   :  { %25415 = vmatmul.mubr.f32.vlgmr.msra.gmra.mrb[176].mxu1 %v3820_v28  ;;  %25491 = vmatmul.mubr.f32.vlgmr.msra.gmra.mrb[48].mxu0 %v21656_v40  ;;  %v21654_v28 = vld [vmem:[%s36989_s30 + $0x38] sm:$0xff]  ;;  %v21659_v40 = vld [vmem:[%s36989_s30 + $0x60] sm:$0xff] }
 0x497   :  { %27759 = vmatpush3.bf16.msra.mxu1 %v30742_v10  ;;  %25417 = vmatprep.mubr.f32.mxu1 %v3821_v30 }
 0x498   :  { %27761 = vmatprep.subr.bf16.mxu1 %v30740_v33  ;;  %25493 = vmatprep.mubr.f32.mxu0 %v21657_v2 }
 0x49a   :  { %25418 = vmatmul.mubr.f32.gmra.mrb[178].mxu1 %v3822_v19  ;;  %25494 = vmatmul.mubr.f32.gmra.mrb[50].mxu0 %v21658_v0  ;;  %v30845_v0 = vld [vmem:[%s36691_s8 + $0x10] sm:$0xff]  }
 0x49b   :  { %27763 = vmatpush3.bf16.msra.mxu1 %v30740_v33  ;;  %25452 = vmatprep.mubr.f32.mxu1 %v21651_v51  ;;  %v30852_v51 = vld [vmem:[%s36691_s8] sm:$0xff]  }
 0x49c   :  { %27765 = vmatprep.subr.bf16.mxu1 %v30754_v1  ;;  %25538 = vmatprep.mubr.msk.bf16.mxu0 %vm4254_vm5, %v30852_v51 }
 0x49f   :  { %27767 = vmatpush3.bf16.msra.mxu1 %v30754_v1 }
 0x4a0   :  { %27769 = vmatprep.subr.bf16.mxu1 %v30752_v24 }
 0x4a3   :  { %27771 = vmatpush3.bf16.msra.mxu1 %v30752_v24 }
 0x4a4   :  { %27773 = vmatprep.subr.bf16.mxu1 %v30766_v50 }
 0x4a7   :  { %27775 = vmatpush3.bf16.msra.mxu1 %v30766_v50 }
 0x4a8   :  { %27777 = vmatprep.subr.bf16.mxu1 %v30764_v22 }
 0x4ab   :  { %27779 = vmatpush3.bf16.msra.mxu1 %v30764_v22 }
 0x4ac   :  { %27781 = vmatprep.subr.bf16.mxu1 %v27748_v35 }
 0x4af   :  { %27783 = vmatpush3.bf16.msra.mxu1 %v27748_v35 }
 0x4b0   :  { %27785 = vmatprep.subr.bf16.mxu1 %v27752_v39 }
 0x4b3   :  { %27787 = vmatpush3.bf16.msra.mxu1 %v27752_v39 }
 0x4b4   :  { %27821 = vmatprep.subr.bf16.mxu1 %v30742_v10 }
 0x4b6   :  { %25453 = vmatmul.mubr.f32.vlgmr.msra.gmra.mrb[180].mxu1 %v21652_v6 }
 0x4b7   :  { %27823 = vmatpush3.bf16.msra.mxu1 %v30742_v10  ;;  %25455 = vmatprep.mubr.f32.mxu1 %v21653_v4  ;;  %v21661_v10 = vld [vmem:[%s36989_s30 + $0x70] sm:$0xff] }
 0x4b8   :  { %27825 = vmatprep.subr.bf16.mxu1 %v30740_v33 }
 0x4ba   :  { %25456 = vmatmul.mubr.f32.gmra.mrb[182].mxu1 %v21654_v28 }
 0x4bb   :  { %27827 = vmatpush3.bf16.msra.mxu1 %v30740_v33  ;;  %25528 = vmatprep.mubr.f32.mxu1 %v21659_v40  ;;  %v21660_v33 = vld [vmem:[%s36989_s30 + $0x68] sm:$0xff] }
 0x4bc   :  { %27829 = vmatprep.subr.bf16.mxu1 %v30754_v1 }
 0x4bf   :  { %27831 = vmatpush3.bf16.msra.mxu1 %v30754_v1 }
 0x4c0   :  { %27833 = vmatprep.subr.bf16.mxu1 %v30752_v24 }
 0x4c3   :  { %27835 = vmatpush3.bf16.msra.mxu1 %v30752_v24  ;;  %v21662_v24 = vld [vmem:[%s36989_s30 + $0x78] sm:$0xff] }
 0x4c4   :  { %27837 = vmatprep.subr.bf16.mxu1 %v30766_v50 }
 0x4c7   :  { %27839 = vmatpush3.bf16.msra.mxu1 %v30766_v50 }
 0x4c8   :  { %27841 = vmatprep.subr.bf16.mxu1 %v30764_v22 }
 0x4cb   :  { %27843 = vmatpush3.bf16.msra.mxu1 %v30764_v22 }
 0x4cc   :  { %27845 = vmatprep.subr.bf16.mxu1 %v27748_v35 }
 0x4cf   :  { %27847 = vmatpush3.bf16.msra.mxu1 %v27748_v35 }
 0x4d0   :  { %27849 = vmatprep.subr.bf16.mxu1 %v27752_v39 }
 0x4d3   :  { %27851 = vmatpush3.bf16.msra.mxu1 %v27752_v39 }
 0x4d6   :  { %25529 = vmatmul.mubr.f32.vlgmr.msra.gmra.mrb[184].mxu1 %v21660_v33 }
 0x4d7   :  { %25531 = vmatprep.mubr.f32.mxu1 %v21661_v10 }
 0x4da   :  { %25532 = vmatmul.mubr.f32.gmra.mrb[186].mxu1 %v21662_v24 }
 0x4db   :  { %25546 = vmatprep.mubr.msk.bf16.mxu1 %vm4254_vm5, %v30845_v0 }
 0x569   :  { %v25416_v1 = vpop.f32.mrb[176].mxu1  ;;  %v25492_v22 = vpop.f32.mrb[48].mxu0 }
 0x56a   :  { %v3889_v50 = vpop.f32.mrb[177].mxu1  ;;  %v4073_v35 = vpop.f32.mrb[49].mxu0 }
 0x56d   :  { %v25419_v39 = vpop.f32.mrb[178].mxu1  ;;  %v25495_v30 = vpop.f32.mrb[50].mxu0 }
 0x56e   :  { %v3899_v2 = vpop.f32.mrb[179].mxu1  ;;  %v4083_v19 = vpop.f32.mrb[51].mxu0 }
 0x589   :  { %v25454_v6 = vpop.f32.mrb[180].mxu1 }
 0x58a   :  { %v3979_v4 = vpop.f32.mrb[181].mxu1  ;;  %v3999_v28 = vmax.f32 %v25416_v1, %v25454_v6 }
 0x58b   :  { %v3998_v40 = vmax.f32 %v3889_v50, %v3979_v4 }
 0x58c   :  { %v4093_v33 = vmax.f32 %v3999_v28, %v25492_v22 }
 0x58d   :  { %v4092_v10 = vmax.f32 %v3998_v40, %v4073_v35  ;;  %v25457_v24 = vpop.f32.mrb[182].mxu1 }
 0x58e   :  { %v3989_v21 = vpop.f32.mrb[183].mxu1  ;;  %v4001_v46 = vmax.f32 %v25419_v39, %v25457_v24 }
 0x58f   :  { %v4000_v32 = vmax.f32 %v3899_v2, %v3989_v21 }
 0x590   :  { %v4095_v55 = vmax.f32 %v4001_v46, %v25495_v30 }
 0x591   :  { %v4094_v41 = vmax.f32 %v4000_v32, %v4083_v19 }
 0x5a9   :  { %v25530_v25 = vpop.f32.mrb[184].mxu1 }
 0x5aa   :  { %v4187_v26 = vmax.f32 %v4093_v33, %v25530_v25  ;;  %v4167_v49 = vpop.f32.mrb[185].mxu1 }
 0x5ab   :  { %v4186_v54 = vmax.f32 %v4092_v10, %v4167_v49 }
 0x5ac   :  { %v4192_v63 = vsel %vm4190_vm6, %v4187_v26, 0.0 }
 0x5ad   :  { %v4191_v7 = vsel %vm4190_vm6, %v4186_v54, 0.0  ;;  %v25533_v42 = vpop.f32.mrb[186].mxu1 }
 0x5ae   :  { %v4193_v1 = vadd.f32 %v4192_v63, %v4191_v7  ;;  %v4189_v50 = vmax.f32 %v4095_v55, %v25533_v42  ;;  %v4177_v22 = vpop.f32.mrb[187].mxu1 }
 0x5af   :  { %v4188_v35 = vmax.f32 %v4094_v41, %v4177_v22 }
 0x5b0   :  { %v4196_v21 = vsel %vm4190_vm6, %v4189_v50, 0.0 }
 0x5b1   :  { %v4194_v6 = vsel %vm4190_vm6, %v4188_v35, 0.0 }
 0x5b2   :  { %v4195_v39 = vadd.f32 %v4194_v6, %v4193_v1 }
 0x5b4   :  { %v4197_v46 = vadd.f32 %v4196_v21, %v4195_v39 }
 0x5b6   :  { %v4198_v32 = vrot.slane %v4197_v46, 4 }
 0x5b8   :  { %v4199_v30 = vadd.f32 %v4198_v32, %v4197_v46 }
 0x5ba   :  { %v4200_v25 = vrot.slane %v4199_v30, 2 }
 0x5bc   :  { %v4201_v2 = vadd.f32 %v4200_v25, %v4199_v30 }
 0x5be   :  { %v4202_v49 = vrot.slane %v4201_v2, 1 }
 0x5c0   :  { %v4203_v19 = vadd.f32 %v4202_v49, %v4201_v2 }
 0x5c2   :  { %v4205_v4 = vmul.f32 0.03125, %v4203_v19 }
 0x5c4   :  { %v4206_v28 = vsub.f32 %v4186_v54, %v4205_v4  ;;  %v4207_v40 = vsub.f32 %v4187_v26, %v4205_v4  ;;  %v4208_v33 = vsub.f32 %v4188_v35, %v4205_v4  ;;  %v4209_v63 = vsub.f32 %v4189_v50, %v4205_v4 }
 0x5c6   :  { %v4210_v42 = vmul.f32 %v4206_v28, %v4206_v28  ;;  %v4211_v7 = vmul.f32 %v4207_v40, %v4207_v40  ;;  %v4212_v55 = vmul.f32 %v4208_v33, %v4208_v33  ;;  %v4213_v41 = vmul.f32 %v4209_v63, %v4209_v63 }
 0x5c8   :  { %v4214_v10 = vsel %vm4190_vm6, %v4210_v42, 0.0  ;;  %v4215_v24 = vsel %vm4190_vm6, %v4211_v7, 0.0  ;;  %v4217_v22 = vsel %vm4190_vm6, %v4212_v55, 0.0  ;;  %v4219_v39 = vsel %vm4190_vm6, %v4213_v41, 0.0 }
 0x5c9   :  { %v4216_v1 = vadd.f32 %v4215_v24, %v4214_v10 }
 0x5cb   :  { %v4218_v6 = vadd.f32 %v4217_v22, %v4216_v1  ;;  %v30910_v22 = vld [vmem:[%s36691_s8 + $0x28] sm:$0xff]  }
 0x5cd   :  { %v4220_v21 = vadd.f32 %v4219_v39, %v4218_v6  ;;  %v30916_v6 = vld [vmem:[%s36691_s8 + $0x30] sm:$0xff]   ;;  %v30928_v39 = vld [vmem:[%s36691_s8 + $0x38] sm:$0xff]  }
 0x5cf   :  { %v4221_v46 = vrot.slane %v4220_v21, 4 }
 0x5d1   :  { %v4222_v54 = vadd.f32 %v4221_v46, %v4220_v21  ;;  %v30934_v21 = vld [vmem:[%s36691_s8 + $0x40] sm:$0xff]   ;;  %v30946_v46 = vld [vmem:[%s36691_s8 + $0x48] sm:$0xff]  }
 0x5d3   :  { %v4223_v26 = vrot.slane %v4222_v54, 2 }
 0x5d5   :  { %v4224_v35 = vadd.f32 %v4223_v26, %v4222_v54  ;;  %v30952_v54 = vld [vmem:[%s36691_s8 + $0x50] sm:$0xff]   ;;  %v30964_v26 = vld [vmem:[%s36691_s8 + $0x58] sm:$0xff]  }
 0x5d7   :  { %v4225_v50 = vrot.slane %v4224_v35, 1 }
 0x5d9   :  { %v4226_v32 = vadd.f32 %v4225_v50, %v4224_v35  ;;  %v30970_v35 = vld [vmem:[%s36691_s8 + $0x60] sm:$0xff]   ;;  %v30982_v50 = vld [vmem:[%s36691_s8 + $0x68] sm:$0xff]  }
 0x5db   :  { %v4227_v30 = vmul.f32 0.03125, %v4226_v32  ;;  %v30988_v32 = vld [vmem:[%s36691_s8 + $0x70] sm:$0xff]  }
 0x5dd   :  { %v4228_v25 = vadd.f32 1e-05, %v4227_v30  ;;  %v31000_v30 = vld [vmem:[%s36691_s8 + $0x78] sm:$0xff]  }
 0x5df   :  { %29565 = vrsqrt.f32 %v4228_v25  ;;  %v31006_v25 = vld [vmem:[%s36691_s8 + $0x80] sm:$0xff]  }
 0x5e9   :  { %v29566_v2 = vpop.eup %29565 }
 0x5ea   :  { %v4230_v49 = vmul.f32 %v29566_v2, %v4206_v28  ;;  %v4231_v19 = vmul.f32 %v29566_v2, %v4207_v40  ;;  %v4232_v4 = vmul.f32 %v29566_v2, %v4208_v33  ;;  %v4233_v42 = vmul.f32 %v29566_v2, %v4209_v63  ;;  %v30877_v28 = vld [vmem:[%s36692_s9 + $0x4] sm:$0xf]  ;;  %v30882_v40 = vld [vmem:[%s36691_s8 + $0x18] sm:$0xff]   ;;  %v30887_v33 = vld [vmem:[%s36691_s8 + $0x8] sm:$0xff]  }
 0x5eb   :  { %v30894_v63 = vld [vmem:[%s36691_s8 + $0x20] sm:$0xff]   ;;  %v31018_v2 = vld [vmem:[%s36691_s8 + $0x88] sm:$0xff]  }
 0x5ec   :  { %v4234_v7 = vmax.f32 %v4230_v49, 0.0  ;;  %v4235_v55 = vmax.f32 %v4231_v19, 0.0  ;;  %v4236_v10 = vmax.f32 %v4232_v4, 0.0  ;;  %v4237_v24 = vmax.f32 %v4233_v42, 0.0  ;;  %v4312_v19 = vld [vmem:[%s36692_s9] sm:$0xf] }
 0x5ed   :  { %v4394_v49 = vsel %vm160_vm0, %v30877_v28, 0  ;;  %v4452_v37 = vsel %vm160_vm0, %v4312_v19, 0 }
 0x5ee   :  { %v30864_v41 = vpack.c.bf16 %v4235_v55, %v4234_v7  ;;  %v30866_v1 = vpack.c.bf16 %v4237_v24, %v4236_v10 }
 0x5f0   :  { %25534 = vmatprep.subr.bf16.mxu0 %v30864_v41  ;;  %25542 = vmatprep.subr.bf16.mxu1 %v30864_v41 }
 0x5f1   :  { %25535 = vmatpush3.bf16.msra.mxu0 %v30864_v41  ;;  %25543 = vmatpush3.bf16.msra.mxu1 %v30864_v41 }
 0x5f2   :  { %25536 = vmatprep.subr.bf16.mxu0 %v30866_v1  ;;  %25544 = vmatprep.subr.bf16.mxu1 %v30866_v1 }
 0x5f5   :  { %25537 = vmatpush3.bf16.msra.mxu0 %v30866_v1  ;;  %25545 = vmatpush3.bf16.msra.mxu1 %v30866_v1 }
 0x5f6   :  { %25562 = vmatprep.subr.bf16.mxu1 %v30864_v41  ;;  %29001 = vmatprep.subr.msk.bf16.mxu0 %vm160_vm0, %v30877_v28 }
 0x5f8   :  { %25547 = vmatmul.mubr.msk.bf16.vlgmr.msra.gmra.mrb[188].mxu1 %vm4254_vm5, %v30882_v40  ;;  %25539 = vmatmul.mubr.msk.bf16.vlgmr.msra.gmra.mrb[52].mxu0 %vm4254_vm5, %v30887_v33 }
 0x5f9   :  { %25563 = vmatpush3.bf16.msra.mxu1 %v30864_v41  ;;  %25566 = vmatprep.mubr.msk.bf16.mxu1 %vm4254_vm5, %v30894_v63 }
 0x5fa   :  { %25564 = vmatprep.subr.bf16.mxu1 %v30866_v1  ;;  %25551 = vmatpush3.bf16.msra.mxu0 %v4394_v49 }
 0x5fb   :  { %29002 = vmatprep.subr.msk.bf16.mxu0 %vm160_vm0, %v4312_v19 }
 0x5fd   :  { %25565 = vmatpush3.bf16.msra.mxu1 %v30866_v1 }
 0x5fe   :  { %25576 = vmatprep.subr.bf16.mxu1 %v30864_v41 }
 0x600   :  { %25567 = vmatmul.mubr.msk.bf16.vlgmr.msra.gmra.mrb[192].mxu1 %vm4254_vm5, %v30910_v22 }
 0x601   :  { %25577 = vmatpush3.bf16.msra.mxu1 %v30864_v41  ;;  %25580 = vmatprep.mubr.msk.bf16.mxu1 %vm4254_vm5, %v30916_v6 }
 0x602   :  { %25578 = vmatprep.subr.bf16.mxu1 %v30866_v1 }
 0x605   :  { %25579 = vmatpush3.bf16.msra.mxu1 %v30866_v1 }
 0x606   :  { %25590 = vmatprep.subr.bf16.mxu1 %v30864_v41 }
 0x608   :  { %25581 = vmatmul.mubr.msk.bf16.vlgmr.msra.gmra.mrb[196].mxu1 %vm4254_vm5, %v30928_v39 }
 0x609   :  { %25591 = vmatpush3.bf16.msra.mxu1 %v30864_v41  ;;  %25594 = vmatprep.mubr.msk.bf16.mxu1 %vm4254_vm5, %v30934_v21 }
 0x60a   :  { %25592 = vmatprep.subr.bf16.mxu1 %v30866_v1 }
 0x60d   :  { %25593 = vmatpush3.bf16.msra.mxu1 %v30866_v1 }
 0x60e   :  { %25604 = vmatprep.subr.bf16.mxu1 %v30864_v41 }
 0x610   :  { %25595 = vmatmul.mubr.msk.bf16.vlgmr.msra.gmra.mrb[200].mxu1 %vm4254_vm5, %v30946_v46 }
 0x611   :  { %25605 = vmatpush3.bf16.msra.mxu1 %v30864_v41  ;;  %25608 = vmatprep.mubr.msk.bf16.mxu1 %vm4254_vm5, %v30952_v54 }
 0x612   :  { %25606 = vmatprep.subr.bf16.mxu1 %v30866_v1 }
 0x615   :  { %25607 = vmatpush3.bf16.msra.mxu1 %v30866_v1 }
 0x616   :  { %25618 = vmatprep.subr.bf16.mxu1 %v30864_v41 }
 0x618   :  { %25609 = vmatmul.mubr.msk.bf16.vlgmr.msra.gmra.mrb[204].mxu1 %vm4254_vm5, %v30964_v26 }
 0x619   :  { %25619 = vmatpush3.bf16.msra.mxu1 %v30864_v41  ;;  %25622 = vmatprep.mubr.msk.bf16.mxu1 %vm4254_vm5, %v30970_v35 }
 0x61a   :  { %25620 = vmatprep.subr.bf16.mxu1 %v30866_v1 }
 0x61d   :  { %25621 = vmatpush3.bf16.msra.mxu1 %v30866_v1 }
 0x61e   :  { %25632 = vmatprep.subr.bf16.mxu1 %v30864_v41 }
 0x620   :  { %25623 = vmatmul.mubr.msk.bf16.vlgmr.msra.gmra.mrb[208].mxu1 %vm4254_vm5, %v30982_v50 }
 0x621   :  { %25633 = vmatpush3.bf16.msra.mxu1 %v30864_v41  ;;  %25636 = vmatprep.mubr.msk.bf16.mxu1 %vm4254_vm5, %v30988_v32 }
 0x622   :  { %25634 = vmatprep.subr.bf16.mxu1 %v30866_v1 }
 0x625   :  { %25635 = vmatpush3.bf16.msra.mxu1 %v30866_v1 }
 0x626   :  { %25646 = vmatprep.subr.bf16.mxu1 %v30864_v41 }
 0x628   :  { %25637 = vmatmul.mubr.msk.bf16.vlgmr.msra.gmra.mrb[212].mxu1 %vm4254_vm5, %v31000_v30 }
 0x629   :  { %25647 = vmatpush3.bf16.msra.mxu1 %v30864_v41  ;;  %25650 = vmatprep.mubr.msk.bf16.mxu1 %vm4254_vm5, %v31006_v25 }
 0x62a   :  { %25648 = vmatprep.subr.bf16.mxu1 %v30866_v1 }
 0x62d   :  { %25649 = vmatpush3.bf16.msra.mxu1 %v30866_v1 }
 0x630   :  { %25651 = vmatmul.mubr.msk.bf16.vlgmr.msra.gmra.mrb[216].mxu1 %vm4254_vm5, %v31018_v2 }
 0x631   :  { %25664 = vmatprep.mubr.msk.bf16.mxu1 %vm4254_vm5, %v30852_v51 }
 0x6cb   :  { %v25548_v4 = vpop.f32.mrb[188].mxu1  ;;  %v25540_v42 = vpop.f32.mrb[52].mxu0 }
 0x6cc   :  { %v4368_v7 = vpop.f32.mrb[189].mxu1  ;;  %v4295_v55 = vpop.f32.mrb[53].mxu0 }
 0x6cd   :  { %v25549_v10 = vpop.f32.mrb[190].mxu1  ;;  %v25541_v24 = vpop.f32.mrb[54].mxu0 }
 0x6ce   :  { %v31031_v41 = vpack.c.bf16 %v25549_v10, %v25548_v4  ;;  %v4371_v1 = vpop.f32.mrb[191].mxu1  ;;  %v31033_v51 = vpack.c.bf16 %v25541_v24, %v25540_v42  ;;  %v4298_v29 = vpop.f32.mrb[55].mxu0  ;;  %v4584_v24 = vsel %vm160_vm0, %v21688_v47, 0 }
 0x6cf   :  { %v31035_v28 = vpack.c.bf16 %v4371_v1, %v4368_v7  ;;  %v31037_v49 = vpack.c.bf16 %v4298_v29, %v4295_v55 }
 0x6d1   :  { %25552 = vmatprep.mubr.msk.bf16.mxu0 %vm4190_vm6, %v31035_v28 }
 0x6d2   :  { %25553 = vmatmul.mubr.msk.bf16.vlgmr.msra.gmra.mrb[56].mxu0 %vm4190_vm6, %v31031_v41 }
 0x6d3   :  { %25557 = vmatpush3.bf16.msra.mxu0 %v4452_v37  ;;  %25558 = vmatprep.mubr.msk.bf16.mxu0 %vm4190_vm6, %v31037_v49  ;;  %v25568_v4 = vpop.f32.mrb[192].mxu1  ;;  %v21699_v37 = vld [vmem:[%s36692_s9 + $0xc] sm:$0xf] }
 0x6d4   :  { %29003 = vmatprep.subr.msk.bf16.mxu0 %vm160_vm0, %v21688_v47  ;;  %v4558_v29 = vpop.f32.mrb[193].mxu1 }
 0x6d5   :  { %v25569_v42 = vpop.f32.mrb[194].mxu1 }
 0x6d6   :  { %v31050_v19 = vpack.c.bf16 %v25569_v42, %v25568_v4  ;;  %v4561_v7 = vpop.f32.mrb[195].mxu1 }
 0x6d7   :  { %v31052_v55 = vpack.c.bf16 %v4561_v7, %v4558_v29 }
 0x6db   :  { %v25582_v10 = vpop.f32.mrb[196].mxu1 }
 0x6dc   :  { %v4694_v1 = vpop.f32.mrb[197].mxu1 }
 0x6dd   :  { %v25583_v57 = vpop.f32.mrb[198].mxu1 }
 0x6de   :  { %25559 = vmatmul.mubr.msk.bf16.vlgmr.msra.gmra.mrb[56].mxu0 %vm4190_vm6, %v31033_v51  ;;  %v31060_v52 = vpack.c.bf16 %v25583_v57, %v25582_v10  ;;  %v4697_v15 = vpop.f32.mrb[199].mxu1  ;;  %v4720_v57 = vsel %vm160_vm0, %v21699_v37, 0  ;;  %v21710_v10 = vld [vmem:[%s36692_s9 + $0x10] sm:$0xf] }
 0x6df   :  { %25571 = vmatpush3.bf16.msra.mxu0 %v4584_v24  ;;  %25572 = vmatprep.mubr.msk.bf16.mxu0 %vm4190_vm6, %v31052_v55  ;;  %v31064_v4 = vpack.c.bf16 %v4697_v15, %v4694_v1 }
 0x6e0   :  { %29004 = vmatprep.subr.msk.bf16.mxu0 %vm160_vm0, %v21699_v37 }
 0x6e3   :  { %v25596_v47 = vpop.f32.mrb[200].mxu1 }
 0x6e4   :  { %v4830_v29 = vpop.f32.mrb[201].mxu1 }
 0x6e5   :  { %v25597_v42 = vpop.f32.mrb[202].mxu1 }
 0x6e6   :  { %v31067_v7 = vpack.c.bf16 %v25597_v42, %v25596_v47  ;;  %v4833_v20 = vpop.f32.mrb[203].mxu1  ;;  %v4856_v42 = vsel %vm160_vm0, %v21710_v10, 0 }
 0x6e7   :  { %v31069_v8 = vpack.c.bf16 %v4833_v20, %v4830_v29 }
 0x6ea   :  { %25573 = vmatmul.mubr.msk.bf16.vlgmr.msra.gmra.mrb[56].mxu0 %vm4190_vm6, %v31050_v19 }
 0x6eb   :  { %25585 = vmatpush3.bf16.msra.mxu0 %v4720_v57  ;;  %25586 = vmatprep.mubr.msk.bf16.mxu0 %vm4190_vm6, %v31064_v4  ;;  %v25610_v15 = vpop.f32.mrb[204].mxu1  ;;  %v21721_v57 = vld [vmem:[%s36692_s9 + $0x14] sm:$0xf] }
 0x6ec   :  { %29005 = vmatprep.subr.msk.bf16.mxu0 %vm160_vm0, %v21710_v10  ;;  %v4966_v24 = vpop.f32.mrb[205].mxu1 }
 0x6ed   :  { %v25611_v1 = vpop.f32.mrb[206].mxu1 }
 0x6ee   :  { %v31080_v20 = vpack.c.bf16 %v25611_v1, %v25610_v15  ;;  %v4969_v47 = vpop.f32.mrb[207].mxu1 }
 0x6ef   :  { %v31082_v37 = vpack.c.bf16 %v4969_v47, %v4966_v24 }
 0x6f3   :  { %v25624_v29 = vpop.f32.mrb[208].mxu1 }
 0x6f4   :  { %v5102_v9 = vpop.f32.mrb[209].mxu1 }
 0x6f5   :  { %v25625_v31 = vpop.f32.mrb[210].mxu1 }
 0x6f6   :  { %25587 = vmatmul.mubr.msk.bf16.vlgmr.msra.gmra.mrb[56].mxu0 %vm4190_vm6, %v31060_v52  ;;  %v31090_v61 = vpack.c.bf16 %v25625_v31, %v25624_v29  ;;  %v5105_v58 = vpop.f32.mrb[211].mxu1  ;;  %v4992_v31 = vsel %vm160_vm0, %v21721_v57, 0  ;;  %v21732_v29 = vld [vmem:[%s36692_s9 + $0x18] sm:$0xf] }
 0x6f7   :  { %25599 = vmatpush3.bf16.msra.mxu0 %v4856_v42  ;;  %25600 = vmatprep.mubr.msk.bf16.mxu0 %vm4190_vm6, %v31069_v8  ;;  %v31094_v15 = vpack.c.bf16 %v5105_v58, %v5102_v9 }
 0x6f8   :  { %29006 = vmatprep.subr.msk.bf16.mxu0 %vm160_vm0, %v21721_v57 }
 0x6fb   :  { %v25638_v10 = vpop.f32.mrb[212].mxu1 }
 0x6fc   :  { %v5238_v24 = vpop.f32.mrb[213].mxu1 }
 0x6fd   :  { %v25639_v1 = vpop.f32.mrb[214].mxu1 }
 0x6fe   :  { %v31097_v47 = vpack.c.bf16 %v25639_v1, %v25638_v10  ;;  %v5241_v13 = vpop.f32.mrb[215].mxu1  ;;  %v21743_v1 = vld [vmem:[%s36692_s9 + $0x1c] sm:$0xf] }
 0x6ff   :  { %v31099_v48 = vpack.c.bf16 %v5241_v13, %v5238_v24  ;;  %v5128_v24 = vsel %vm160_vm0, %v21732_v29, 0 }
 0x702   :  { %25601 = vmatmul.mubr.msk.bf16.vlgmr.msra.gmra.mrb[56].mxu0 %vm4190_vm6, %v31067_v7 }
 0x703   :  { %25613 = vmatpush3.bf16.msra.mxu0 %v4992_v31  ;;  %25614 = vmatprep.mubr.msk.bf16.mxu0 %vm4190_vm6, %v31082_v37  ;;  %v25652_v58 = vpop.f32.mrb[216].mxu1  ;;  %v5264_v31 = vsel %vm160_vm0, %v21743_v1, 0 }
 0x704   :  { %29007 = vmatprep.subr.msk.bf16.mxu0 %vm160_vm0, %v21732_v29  ;;  %v5374_v9 = vpop.f32.mrb[217].mxu1 }
 0x705   :  { %v25653_v42 = vpop.f32.mrb[218].mxu1 }
 0x706   :  { %v31110_v13 = vpack.c.bf16 %v25653_v42, %v25652_v58  ;;  %v5377_v10 = vpop.f32.mrb[219].mxu1  ;;  %v21754_v58 = vld [vmem:[%s36692_s9 + $0x20] sm:$0xf] }
 0x707   :  { %v31112_v57 = vpack.c.bf16 %v5377_v10, %v5374_v9  ;;  %v5400_v29 = vsel %vm160_vm0, %v21754_v58, 0  ;;  %v21757_v9 = vld [vmem:[%s36693_s10] ss:$0 sm:$0xff] }
 0x70e   :  { %25615 = vmatmul.mubr.msk.bf16.vlgmr.msra.gmra.mrb[56].mxu0 %vm4190_vm6, %v31080_v20 }
 0x70f   :  { %25627 = vmatpush3.bf16.msra.mxu0 %v5128_v24  ;;  %25628 = vmatprep.mubr.msk.bf16.mxu0 %vm4190_vm6, %v31094_v15 }
 0x710   :  { %29008 = vmatprep.subr.msk.bf16.mxu0 %vm160_vm0, %v21743_v1 }
 0x71a   :  { %25629 = vmatmul.mubr.msk.bf16.vlgmr.msra.gmra.mrb[56].mxu0 %vm4190_vm6, %v31090_v61 }
 0x71b   :  { %25641 = vmatpush3.bf16.msra.mxu0 %v5264_v31  ;;  %25642 = vmatprep.mubr.msk.bf16.mxu0 %vm4190_vm6, %v31099_v48 }
 0x71c   :  { %29009 = vmatprep.subr.msk.bf16.mxu0 %vm160_vm0, %v21754_v58 }
 0x726   :  { %25643 = vmatmul.mubr.msk.bf16.vlgmr.msra.gmra.mrb[56].mxu0 %vm4190_vm6, %v31097_v47 }
 0x727   :  { %25655 = vmatpush3.bf16.msra.mxu0 %v5400_v29  ;;  %25656 = vmatprep.mubr.msk.bf16.mxu0 %vm4190_vm6, %v31112_v57 }
 0x732   :  { %25657 = vmatmul.mubr.msk.bf16.vlgmr.msra.gmra.mrb[56].mxu0 %vm4190_vm6, %v31110_v13 }
 0x805   :  { %v25658_v42 = vpop.f32.mrb[56].mxu0 }
 0x806   :  { %v5436_v10 = vpop.f32.mrb[57].mxu0  ;;  %v5464_v58 = vadd.f32 %v25658_v42, %v21757_v9 }
 0x807   :  { %v5462_v24 = vadd.f32 %v21757_v9, %v5436_v10  ;;  %v25659_v1 = vpop.f32.mrb[58].mxu0 }
 0x808   :  { %v5439_v31 = vpop.f32.mrb[59].mxu0  ;;  %v5465_v29 = vadd.f32 %v25659_v1, %v21757_v9  ;;  %v5469_v23 = vsel %vm4190_vm6, %v5464_v58, 0.0 }
 0x809   :  { %v5463_v53 = vadd.f32 %v21757_v9, %v5439_v31  ;;  %v5466_v11 = vsel %vm4190_vm6, %v5462_v24, 0.0 }
 0x80a   :  { %v5471_v17 = vsel %vm4190_vm6, %v5465_v29, 0.0 }
 0x80b   :  { %v5467_v12 = vsel %vm4190_vm6, %v5463_v53, 0.0 }
 0x80c   :  { %v5468_v36 = vadd.f32 %v5467_v12, %v5466_v11 }
 0x80e   :  { %v5470_v14 = vadd.f32 %v5469_v23, %v5468_v36 }
 0x810   :  { %v5472_v62 = vadd.f32 %v5471_v17, %v5470_v14 }
 0x812   :  { %v5473_v5 = vrot.slane %v5472_v62, 4 }
 0x814   :  { %v5474_v56 = vadd.f32 %v5473_v5, %v5472_v62 }
 0x816   :  { %v5475_v60 = vrot.slane %v5474_v56, 2 }
 0x818   :  { %v5476_v10 = vadd.f32 %v5475_v60, %v5474_v56 }
 0x81a   :  { %v5477_v38 = vrot.slane %v5476_v10, 1 }
 0x81c   :  { %v5478_v44 = vadd.f32 %v5477_v38, %v5476_v10 }
 0x81e   :  { %v5479_v42 = vmul.f32 0.03125, %v5478_v44 }
 0x820   :  { %v5480_v31 = vsub.f32 %v5462_v24, %v5479_v42  ;;  %v5481_v16 = vsub.f32 %v5463_v53, %v5479_v42  ;;  %v5482_v18 = vsub.f32 %v5464_v58, %v5479_v42  ;;  %v5483_v9 = vsub.f32 %v5465_v29, %v5479_v42 }
 0x822   :  { %v5484_v1 = vmul.f32 %v5480_v31, %v5480_v31  ;;  %v5485_v3 = vmul.f32 %v5481_v16, %v5481_v16  ;;  %v5486_v11 = vmul.f32 %v5482_v18, %v5482_v18  ;;  %v5487_v12 = vmul.f32 %v5483_v9, %v5483_v9 }
 0x824   :  { %v5488_v36 = vsel %vm4190_vm6, %v5484_v1, 0.0  ;;  %v5489_v23 = vsel %vm4190_vm6, %v5485_v3, 0.0  ;;  %v5491_v62 = vsel %vm4190_vm6, %v5486_v11, 0.0  ;;  %v5493_v56 = vsel %vm4190_vm6, %v5487_v12, 0.0 }
 0x825   :  { %v5490_v14 = vadd.f32 %v5489_v23, %v5488_v36 }
 0x827   :  { %v5492_v5 = vadd.f32 %v5491_v62, %v5490_v14 }
 0x829   :  { %v5494_v38 = vadd.f32 %v5493_v56, %v5492_v5 }
 0x82b   :  { %v5495_v44 = vrot.slane %v5494_v38, 4 }
 0x82d   :  { %v5496_v60 = vadd.f32 %v5495_v44, %v5494_v38 }
 0x82f   :  { %v5497_v17 = vrot.slane %v5496_v60, 2 }
 0x831   :  { %v5498_v53 = vadd.f32 %v5497_v17, %v5496_v60  ;;  %v21774_v17 = vld [vmem:[%s36694_s11 + $0xc] sm:$0xf] }
 0x833   :  { %v5499_v24 = vrot.slane %v5498_v53, 1 }
 0x835   :  { %v5500_v58 = vadd.f32 %v5499_v24, %v5498_v53 }
 0x837   :  { %v5501_v29 = vmul.f32 0.03125, %v5500_v58 }
 0x839   :  { %v5502_v10 = vadd.f32 1e-05, %v5501_v29 }
 0x83b   :  { %29567 = vrsqrt.f32 %v5502_v10 }
 0x845   :  { %v29568_v42 = vpop.eup %29567 }
 0x846   :  { %v5504_v1 = vmul.f32 %v29568_v42, %v5480_v31  ;;  %v5505_v34 = vmul.f32 %v29568_v42, %v5481_v16  ;;  %v5506_v3 = vmul.f32 %v29568_v42, %v5482_v18  ;;  %v5507_v36 = vmul.f32 %v29568_v42, %v5483_v9  ;;  %v5565_v18 = vld [vmem:[%s36694_s11] sm:$0xf] }
 0x848   :  { %v5508_v23 = vmax.f32 %v5504_v1, 0.0  ;;  %v5509_v11 = vmax.f32 %v5505_v34, 0.0  ;;  %v5510_v14 = vmax.f32 %v5506_v3, 0.0  ;;  %v5511_v62 = vmax.f32 %v5507_v36, 0.0  ;;  %v21762_v34 = vld [vmem:[%s36694_s11 + $0x4] sm:$0xf] }
 0x849   :  { %29010 = vmatprep.subr.msk.bf16.mxu0 %vm160_vm0, %v21762_v34  ;;  %v5626_v16 = vsel %vm160_vm0, %v21762_v34, 0 }
 0x84a   :  { %v5512_v12 = vpack.c.bf16 %v5509_v11, %v5508_v23  ;;  %v5513_v5 = vpack.c.bf16 %v5511_v62, %v5510_v14  ;;  %25677 = vmatpush3.bf16.msra.mxu0 %v5626_v16  ;;  %v5910_v11 = vsel %vm160_vm0, %v21774_v17, 0  ;;  %v21779_v14 = vld [vmem:[%s36694_s11 + $0x10] sm:$0xf] }
 0x84b   :  { %29011 = vmatprep.subr.msk.bf16.mxu0 %vm160_vm0, %v5565_v18 }
 0x84c   :  { %25660 = vmatprep.subr.bf16.mxu1 %v5512_v12 }
 0x84d   :  { %25661 = vmatpush3.bf16.msra.mxu1 %v5512_v12 }
 0x84e   :  { %25662 = vmatprep.subr.bf16.mxu1 %v5513_v5 }
 0x851   :  { %25663 = vmatpush3.bf16.msra.mxu1 %v5513_v5 }
 0x852   :  { %25668 = vmatprep.subr.bf16.mxu1 %v5512_v12 }
 0x854   :  { %25665 = vmatmul.mubr.msk.bf16.vlgmr.msra.gmra.mrb[220].mxu1 %vm4254_vm5, %v30887_v33 }
 0x855   :  { %25669 = vmatpush3.bf16.msra.mxu1 %v5512_v12  ;;  %25672 = vmatprep.mubr.msk.bf16.mxu1 %vm4254_vm5, %v30845_v0 }
 0x856   :  { %25670 = vmatprep.subr.bf16.mxu1 %v5513_v5 }
 0x859   :  { %25671 = vmatpush3.bf16.msra.mxu1 %v5513_v5 }
 0x85a   :  { %25688 = vmatprep.subr.bf16.mxu1 %v5512_v12 }
 0x85c   :  { %25673 = vmatmul.mubr.msk.bf16.vlgmr.msra.gmra.mrb[224].mxu1 %vm4254_vm5, %v30882_v40 }
 0x85d   :  { %25689 = vmatpush3.bf16.msra.mxu1 %v5512_v12  ;;  %25692 = vmatprep.mubr.msk.bf16.mxu1 %vm4254_vm5, %v30894_v63 }
 0x85e   :  { %25690 = vmatprep.subr.bf16.mxu1 %v5513_v5 }
 0x861   :  { %25691 = vmatpush3.bf16.msra.mxu1 %v5513_v5 }
 0x862   :  { %25702 = vmatprep.subr.bf16.mxu1 %v5512_v12 }
 0x864   :  { %25693 = vmatmul.mubr.msk.bf16.vlgmr.msra.gmra.mrb[228].mxu1 %vm4254_vm5, %v30910_v22 }
 0x865   :  { %25703 = vmatpush3.bf16.msra.mxu1 %v5512_v12  ;;  %25706 = vmatprep.mubr.msk.bf16.mxu1 %vm4254_vm5, %v30916_v6 }
 0x866   :  { %25704 = vmatprep.subr.bf16.mxu1 %v5513_v5 }
 0x869   :  { %25705 = vmatpush3.bf16.msra.mxu1 %v5513_v5 }
 0x86a   :  { %25716 = vmatprep.subr.bf16.mxu1 %v5512_v12 }
 0x86c   :  { %25707 = vmatmul.mubr.msk.bf16.vlgmr.msra.gmra.mrb[232].mxu1 %vm4254_vm5, %v30928_v39 }
 0x86d   :  { %25717 = vmatpush3.bf16.msra.mxu1 %v5512_v12  ;;  %25720 = vmatprep.mubr.msk.bf16.mxu1 %vm4254_vm5, %v30934_v21 }
 0x86e   :  { %25718 = vmatprep.subr.bf16.mxu1 %v5513_v5 }
 0x871   :  { %25719 = vmatpush3.bf16.msra.mxu1 %v5513_v5 }
 0x872   :  { %25730 = vmatprep.subr.bf16.mxu1 %v5512_v12 }
 0x874   :  { %25721 = vmatmul.mubr.msk.bf16.vlgmr.msra.gmra.mrb[236].mxu1 %vm4254_vm5, %v30946_v46 }
 0x875   :  { %25731 = vmatpush3.bf16.msra.mxu1 %v5512_v12  ;;  %25734 = vmatprep.mubr.msk.bf16.mxu1 %vm4254_vm5, %v30952_v54 }
 0x876   :  { %25732 = vmatprep.subr.bf16.mxu1 %v5513_v5 }
 0x879   :  { %25733 = vmatpush3.bf16.msra.mxu1 %v5513_v5 }
 0x87a   :  { %25744 = vmatprep.subr.bf16.mxu1 %v5512_v12 }
 0x87c   :  { %25735 = vmatmul.mubr.msk.bf16.vlgmr.msra.gmra.mrb[240].mxu1 %vm4254_vm5, %v30964_v26 }
 0x87d   :  { %25745 = vmatpush3.bf16.msra.mxu1 %v5512_v12  ;;  %25748 = vmatprep.mubr.msk.bf16.mxu1 %vm4254_vm5, %v30970_v35 }
 0x87e   :  { %25746 = vmatprep.subr.bf16.mxu1 %v5513_v5 }
 0x881   :  { %25747 = vmatpush3.bf16.msra.mxu1 %v5513_v5 }
 0x882   :  { %25758 = vmatprep.subr.bf16.mxu1 %v5512_v12 }
 0x884   :  { %25749 = vmatmul.mubr.msk.bf16.vlgmr.msra.gmra.mrb[244].mxu1 %vm4254_vm5, %v30982_v50  ;;  %v5684_v50 = vsel %vm160_vm0, %v5565_v18, 0 }
 0x885   :  { %25759 = vmatpush3.bf16.msra.mxu1 %v5512_v12  ;;  %25762 = vmatprep.mubr.msk.bf16.mxu1 %vm4254_vm5, %v30988_v32  ;;  %v21769_v32 = vld [vmem:[%s36694_s11 + $0x8] sm:$0xf] }
 0x886   :  { %25760 = vmatprep.subr.bf16.mxu1 %v5513_v5  ;;  %v5795_v44 = vsel %vm160_vm0, %v21769_v32, 0 }
 0x889   :  { %25761 = vmatpush3.bf16.msra.mxu1 %v5513_v5 }
 0x88a   :  { %25772 = vmatprep.subr.bf16.mxu1 %v5512_v12 }
 0x88c   :  { %25763 = vmatmul.mubr.msk.bf16.vlgmr.msra.gmra.mrb[248].mxu1 %vm4254_vm5, %v31000_v30 }
 0x88d   :  { %25773 = vmatpush3.bf16.msra.mxu1 %v5512_v12  ;;  %25776 = vmatprep.mubr.msk.bf16.mxu1 %vm4254_vm5, %v31006_v25 }
 0x88e   :  { %25774 = vmatprep.subr.bf16.mxu1 %v5513_v5 }
 0x891   :  { %25775 = vmatpush3.bf16.msra.mxu1 %v5513_v5 }
 0x894   :  { %25777 = vmatmul.mubr.msk.bf16.vlgmr.msra.gmra.mrb[252].mxu1 %vm4254_vm5, %v31018_v2 }
 0x927   :  { %v25666_v0 = vpop.f32.mrb[220].mxu1 }
 0x928   :  { %v5548_v40 = vpop.f32.mrb[221].mxu1 }
 0x929   :  { %v25667_v33 = vpop.f32.mrb[222].mxu1 }
 0x92a   :  { %v5564_v63 = vpack.c.bf16 %v25667_v33, %v25666_v0  ;;  %v5551_v22 = vpop.f32.mrb[223].mxu1 }
 0x92b   :  { %v5563_v6 = vpack.c.bf16 %v5551_v22, %v5548_v40  ;;  %v6025_v40 = vsel %vm160_vm0, %v21779_v14, 0 }
 0x92f   :  { %v25674_v39 = vpop.f32.mrb[224].mxu1 }
 0x930   :  { %v5600_v21 = vpop.f32.mrb[225].mxu1 }
 0x931   :  { %v25675_v46 = vpop.f32.mrb[226].mxu1 }
 0x932   :  { %v5616_v54 = vpack.c.bf16 %v25675_v46, %v25674_v39  ;;  %v5603_v26 = vpop.f32.mrb[227].mxu1 }
 0x933   :  { %v5615_v35 = vpack.c.bf16 %v5603_v26, %v5600_v21 }
 0x935   :  { %25678 = vmatprep.mubr.msk.bf16.mxu0 %vm4190_vm6, %v5615_v35 }
 0x936   :  { %25679 = vmatmul.mubr.msk.bf16.vlgmr.msra.gmra.mrb[60].mxu0 %vm4190_vm6, %v5616_v54 }
 0x937   :  { %25683 = vmatpush3.bf16.msra.mxu0 %v5684_v50  ;;  %25684 = vmatprep.mubr.msk.bf16.mxu0 %vm4190_vm6, %v5563_v6  ;;  %v25694_v30 = vpop.f32.mrb[228].mxu1 }
 0x938   :  { %29012 = vmatprep.subr.msk.bf16.mxu0 %vm160_vm0, %v21769_v32  ;;  %v5769_v25 = vpop.f32.mrb[229].mxu1 }
 0x939   :  { %v25695_v2 = vpop.f32.mrb[230].mxu1 }
 0x93a   :  { %v5785_v31 = vpack.c.bf16 %v25695_v2, %v25694_v30  ;;  %v5772_v9 = vpop.f32.mrb[231].mxu1 }
 0x93b   :  { %v5784_v56 = vpack.c.bf16 %v5772_v9, %v5769_v25  ;;  %v21789_v25 = vld [vmem:[%s36694_s11 + $0x18] sm:$0xf] }
 0x93f   :  { %v25708_v38 = vpop.f32.mrb[232].mxu1 }
 0x940   :  { %v5884_v60 = vpop.f32.mrb[233].mxu1 }
 0x941   :  { %v25709_v53 = vpop.f32.mrb[234].mxu1 }
 0x942   :  { %25685 = vmatmul.mubr.msk.bf16.vlgmr.msra.gmra.mrb[60].mxu0 %vm4190_vm6, %v5564_v63  ;;  %v5900_v24 = vpack.c.bf16 %v25709_v53, %v25708_v38  ;;  %v5887_v58 = vpop.f32.mrb[235].mxu1  ;;  %v21784_v63 = vld [vmem:[%s36694_s11 + $0x14] sm:$0xf] }
 0x943   :  { %25697 = vmatpush3.bf16.msra.mxu0 %v5795_v44  ;;  %25698 = vmatprep.mubr.msk.bf16.mxu0 %vm4190_vm6, %v5784_v56  ;;  %v5899_v29 = vpack.c.bf16 %v5887_v58, %v5884_v60  ;;  %v6140_v30 = vsel %vm160_vm0, %v21784_v63, 0  ;;  %v6255_v60 = vsel %vm160_vm0, %v21789_v25, 0 }
 0x944   :  { %29013 = vmatprep.subr.msk.bf16.mxu0 %vm160_vm0, %v21774_v17  ;;  %v21794_v17 = vld [vmem:[%s36694_s11 + $0x1c] sm:$0xf] }
 0x945   :  { %v6370_v53 = vsel %vm160_vm0, %v21794_v17, 0 }
 0x947   :  { %v25722_v10 = vpop.f32.mrb[236].mxu1 }
 0x948   :  { %v5999_v42 = vpop.f32.mrb[237].mxu1 }
 0x949   :  { %v25723_v1 = vpop.f32.mrb[238].mxu1 }
 0x94a   :  { %v6015_v3 = vpack.c.bf16 %v25723_v1, %v25722_v10  ;;  %v6002_v36 = vpop.f32.mrb[239].mxu1 }
 0x94b   :  { %v6014_v23 = vpack.c.bf16 %v6002_v36, %v5999_v42  ;;  %v21804_v42 = vld [vmem:[%s36695_s12 + $0x4] sm:$0xf] }
 0x94c   :  { %v6600_v1 = vsel %vm160_vm0, %v21804_v42, 0 }
 0x94e   :  { %25699 = vmatmul.mubr.msk.bf16.vlgmr.msra.gmra.mrb[60].mxu0 %vm4190_vm6, %v5785_v31 }
 0x94f   :  { %25711 = vmatpush3.bf16.msra.mxu0 %v5910_v11  ;;  %25712 = vmatprep.mubr.msk.bf16.mxu0 %vm4190_vm6, %v5899_v29  ;;  %v25736_v62 = vpop.f32.mrb[240].mxu1  ;;  %v6540_v29 = vld [vmem:[%s36695_s12] sm:$0xf] }
 0x950   :  { %29014 = vmatprep.subr.msk.bf16.mxu0 %vm160_vm0, %v21779_v14  ;;  %v6114_v12 = vpop.f32.mrb[241].mxu1  ;;  %v6542_v10 = vsel %vm160_vm0, %v6540_v29, 0 }
 0x951   :  { %v25737_v5 = vpop.f32.mrb[242].mxu1 }
 0x952   :  { %v6130_v34 = vpack.c.bf16 %v25737_v5, %v25736_v62  ;;  %v6117_v16 = vpop.f32.mrb[243].mxu1 }
 0x953   :  { %v6129_v18 = vpack.c.bf16 %v6117_v16, %v6114_v12 }
 0x957   :  { %v25750_v0 = vpop.f32.mrb[244].mxu1 }
 0x958   :  { %v6229_v33 = vpop.f32.mrb[245].mxu1 }
 0x959   :  { %v25751_v22 = vpop.f32.mrb[246].mxu1 }
 0x95a   :  { %25713 = vmatmul.mubr.msk.bf16.vlgmr.msra.gmra.mrb[60].mxu0 %vm4190_vm6, %v5900_v24  ;;  %v6245_v6 = vpack.c.bf16 %v25751_v22, %v25750_v0  ;;  %v6232_v39 = vpop.f32.mrb[247].mxu1  ;;  %v21799_v24 = vld [vmem:[%s36694_s11 + $0x20] sm:$0xf] }
 0x95b   :  { %25725 = vmatpush3.bf16.msra.mxu0 %v6025_v40  ;;  %25726 = vmatprep.mubr.msk.bf16.mxu0 %vm4190_vm6, %v6014_v23  ;;  %v6244_v21 = vpack.c.bf16 %v6232_v39, %v6229_v33  ;;  %v6485_v58 = vsel %vm160_vm0, %v21799_v24, 0 }
 0x95c   :  { %29015 = vmatprep.subr.msk.bf16.mxu0 %vm160_vm0, %v21784_v63 }
 0x95f   :  { %v25764_v46 = vpop.f32.mrb[248].mxu1 }
 0x960   :  { %v6344_v54 = vpop.f32.mrb[249].mxu1 }
 0x961   :  { %v25765_v26 = vpop.f32.mrb[250].mxu1 }
 0x962   :  { %v6360_v35 = vpack.c.bf16 %v25765_v26, %v25764_v46  ;;  %v6347_v50 = vpop.f32.mrb[251].mxu1 }
 0x963   :  { %v6359_v32 = vpack.c.bf16 %v6347_v50, %v6344_v54 }
 0x966   :  { %25727 = vmatmul.mubr.msk.bf16.vlgmr.msra.gmra.mrb[60].mxu0 %vm4190_vm6, %v6015_v3  ;;  %v21807_v3 = vld [vmem:[%s36695_s12 + $0x8] sm:$0xf] }
 0x967   :  { %25739 = vmatpush3.bf16.msra.mxu0 %v6140_v30  ;;  %25740 = vmatprep.mubr.msk.bf16.mxu0 %vm4190_vm6, %v6129_v18  ;;  %v25778_v2 = vpop.f32.mrb[252].mxu1  ;;  %v6658_v36 = vsel %vm160_vm0, %v21807_v3, 0 }
 0x968   :  { %29016 = vmatprep.subr.msk.bf16.mxu0 %vm160_vm0, %v21789_v25  ;;  %v6459_v31 = vpop.f32.mrb[253].mxu1 }
 0x969   :  { %v25779_v9 = vpop.f32.mrb[254].mxu1 }
 0x96a   :  { %v6475_v56 = vpack.c.bf16 %v25779_v9, %v25778_v2  ;;  %v6462_v38 = vpop.f32.mrb[255].mxu1 }
 0x96b   :  { %v6474_v44 = vpack.c.bf16 %v6462_v38, %v6459_v31 }
 0x972   :  { %25741 = vmatmul.mubr.msk.bf16.vlgmr.msra.gmra.mrb[60].mxu0 %vm4190_vm6, %v6130_v34 }
 0x973   :  { %25753 = vmatpush3.bf16.msra.mxu0 %v6255_v60  ;;  %25754 = vmatprep.mubr.msk.bf16.mxu0 %vm4190_vm6, %v6244_v21 }
 0x974   :  { %29017 = vmatprep.subr.msk.bf16.mxu0 %vm160_vm0, %v21794_v17 }
 0x97e   :  { %25755 = vmatmul.mubr.msk.bf16.vlgmr.msra.gmra.mrb[60].mxu0 %vm4190_vm6, %v6245_v6 }
 0x97f   :  { %25767 = vmatpush3.bf16.msra.mxu0 %v6370_v53  ;;  %25768 = vmatprep.mubr.msk.bf16.mxu0 %vm4190_vm6, %v6359_v32 }
 0x980   :  { %29018 = vmatprep.subr.msk.bf16.mxu0 %vm160_vm0, %v21799_v24 }
 0x98a   :  { %25769 = vmatmul.mubr.msk.bf16.vlgmr.msra.gmra.mrb[60].mxu0 %vm4190_vm6, %v6360_v35 }
 0x98b   :  { %25781 = vmatpush3.bf16.msra.mxu0 %v6485_v58  ;;  %25782 = vmatprep.mubr.msk.bf16.mxu0 %vm4190_vm6, %v6474_v44 }
 0x98c   :  { %29019 = vmatprep.subr.msk.bf16.mxu0 %vm160_vm0, %v6540_v29 }
 0x996   :  { %25783 = vmatmul.mubr.msk.bf16.vlgmr.msra.gmra.mrb[60].mxu0 %vm4190_vm6, %v6475_v56 }
 0x997   :  { %25787 = vmatpush3.bf16.msra.mxu0 %v6542_v10  ;;  %25788 = vmatprep.mubr.msk.bf16.mxu0 %vm4190_vm6, %v31037_v49  ;;  %v21810_v49 = vld [vmem:[%s36695_s12 + $0xc] sm:$0xf] }
 0x998   :  { %29020 = vmatprep.subr.msk.bf16.mxu0 %vm160_vm0, %v21804_v42 }
 0x9a2   :  { %25789 = vmatmul.mubr.msk.bf16.vlgmr.msra.gmra.mrb[60].mxu0 %vm4190_vm6, %v31033_v51  ;;  %v6716_v51 = vsel %vm160_vm0, %v21810_v49, 0 }
 0x9a3   :  { %25793 = vmatpush3.bf16.msra.mxu0 %v6600_v1  ;;  %25794 = vmatprep.mubr.msk.bf16.mxu0 %vm4190_vm6, %v31035_v28  ;;  %v21813_v28 = vld [vmem:[%s36695_s12 + $0x10] sm:$0xf] }
 0x9a4   :  { %29021 = vmatprep.subr.msk.bf16.mxu0 %vm160_vm0, %v21807_v3 }
 0x9ae   :  { %25795 = vmatmul.mubr.msk.bf16.vlgmr.msra.gmra.mrb[60].mxu0 %vm4190_vm6, %v31031_v41  ;;  %v6774_v41 = vsel %vm160_vm0, %v21813_v28, 0 }
 0x9af   :  { %25799 = vmatpush3.bf16.msra.mxu0 %v6658_v36  ;;  %25800 = vmatprep.mubr.msk.bf16.mxu0 %vm4190_vm6, %v31052_v55  ;;  %v21816_v55 = vld [vmem:[%s36695_s12 + $0x14] sm:$0xf] }
 0x9b0   :  { %29022 = vmatprep.subr.msk.bf16.mxu0 %vm160_vm0, %v21810_v49 }
 0x9ba   :  { %25801 = vmatmul.mubr.msk.bf16.vlgmr.msra.gmra.mrb[60].mxu0 %vm4190_vm6, %v31050_v19  ;;  %v6832_v19 = vsel %vm160_vm0, %v21816_v55, 0 }
 0x9bb   :  { %25805 = vmatpush3.bf16.msra.mxu0 %v6716_v51  ;;  %25806 = vmatprep.mubr.msk.bf16.mxu0 %vm4190_vm6, %v31064_v4  ;;  %v21819_v4 = vld [vmem:[%s36695_s12 + $0x18] sm:$0xf] }
 0x9bc   :  { %29023 = vmatprep.subr.msk.bf16.mxu0 %vm160_vm0, %v21813_v28 }
 0x9c6   :  { %25807 = vmatmul.mubr.msk.bf16.vlgmr.msra.gmra.mrb[60].mxu0 %vm4190_vm6, %v31060_v52  ;;  %v6890_v52 = vsel %vm160_vm0, %v21819_v4, 0 }
 0x9c7   :  { %25811 = vmatpush3.bf16.msra.mxu0 %v6774_v41  ;;  %25812 = vmatprep.mubr.msk.bf16.mxu0 %vm4190_vm6, %v31069_v8  ;;  %v21822_v8 = vld [vmem:[%s36695_s12 + $0x1c] sm:$0xf] }
 0x9c8   :  { %29024 = vmatprep.subr.msk.bf16.mxu0 %vm160_vm0, %v21816_v55 }
 0x9d2   :  { %25813 = vmatmul.mubr.msk.bf16.vlgmr.msra.gmra.mrb[60].mxu0 %vm4190_vm6, %v31067_v7  ;;  %v6948_v7 = vsel %vm160_vm0, %v21822_v8, 0 }
 0x9d3   :  { %25817 = vmatpush3.bf16.msra.mxu0 %v6832_v19  ;;  %25818 = vmatprep.mubr.msk.bf16.mxu0 %vm4190_vm6, %v31082_v37  ;;  %v21825_v37 = vld [vmem:[%s36695_s12 + $0x20] sm:$0xf] }
 0x9d4   :  { %29025 = vmatprep.subr.msk.bf16.mxu0 %vm160_vm0, %v21819_v4 }
 0x9de   :  { %25819 = vmatmul.mubr.msk.bf16.vlgmr.msra.gmra.mrb[60].mxu0 %vm4190_vm6, %v31080_v20  ;;  %v7006_v20 = vsel %vm160_vm0, %v21825_v37, 0 }
 0x9df   :  { %25823 = vmatpush3.bf16.msra.mxu0 %v6890_v52  ;;  %25824 = vmatprep.mubr.msk.bf16.mxu0 %vm4190_vm6, %v31094_v15  ;;  %v21828_v15 = vld [vmem:[%s36697_s13] ss:$0 sm:$0xff] }
 0x9e0   :  { %29026 = vmatprep.subr.msk.bf16.mxu0 %vm160_vm0, %v21822_v8 }
 0x9ea   :  { %25825 = vmatmul.mubr.msk.bf16.vlgmr.msra.gmra.mrb[60].mxu0 %vm4190_vm6, %v31090_v61  ;;  %v29170_v61 = vld [vmem:[%s36696_s14] sm:$0xff]  }
 0x9eb   :  { %25829 = vmatpush3.bf16.msra.mxu0 %v6948_v7  ;;  %25830 = vmatprep.mubr.msk.bf16.mxu0 %vm4190_vm6, %v31099_v48  ;;  %v29171_v48 = vld [vmem:[%s36696_s14 + $0x80] sm:$0xff]  }
 0x9ec   :  { %29027 = vmatprep.subr.msk.bf16.mxu0 %vm160_vm0, %v21825_v37  ;;  %25844 = vmatprep.mubr.msk.bf16.mxu1 %vm4254_vm5, %v29170_v61  ;;  %v29173_v61 = vld [vmem:[%s36696_s14 + $0x88] sm:$0xff]  }
 0x9f6   :  { %25831 = vmatmul.mubr.msk.bf16.vlgmr.msra.gmra.mrb[60].mxu0 %vm4190_vm6, %v31097_v47 }
 0x9f7   :  { %25835 = vmatpush3.bf16.msra.mxu0 %v7006_v20  ;;  %25836 = vmatprep.mubr.msk.bf16.mxu0 %vm4190_vm6, %v31112_v57  ;;  %v29172_v20 = vld [vmem:[%s36696_s14 + $0x8] sm:$0xff]  }
 0xa02   :  { %25837 = vmatmul.mubr.msk.bf16.vlgmr.msra.gmra.mrb[60].mxu0 %vm4190_vm6, %v31110_v13 }
 0xa03   :  { %25920 = vmatprep.mubr.msk.bf16.mxu0 %vm4254_vm5, %v29171_v48  ;;  %v29174_v48 = vld [vmem:[%s36696_s14 + $0x10] sm:$0xff]  }
 0xad5   :  { %v25838_v47 = vpop.f32.mrb[60].mxu0 }
 0xad6   :  { %v7042_v57 = vpop.f32.mrb[61].mxu0  ;;  %v7070_v14 = vadd.f32 %v25838_v47, %v21828_v15  ;;  %v29176_v47 = vld [vmem:[%s36696_s14 + $0x18] sm:$0xff]  }
 0xad7   :  { %v7068_v23 = vadd.f32 %v21828_v15, %v7042_v57  ;;  %v25839_v13 = vpop.f32.mrb[62].mxu0  ;;  %v29177_v57 = vld [vmem:[%s36696_s14 + $0x98] sm:$0xff]  }
 0xad8   :  { %v7045_v11 = vpop.f32.mrb[63].mxu0  ;;  %v7071_v5 = vadd.f32 %v25839_v13, %v21828_v15  ;;  %v7075_v18 = vsel %vm869_vm3, %v7070_v14, 0.0  ;;  %v29179_v13 = vld [vmem:[%s36696_s14 + $0xa0] sm:$0xff]  }
 0xad9   :  { %v7069_v62 = vadd.f32 %v21828_v15, %v7045_v11  ;;  %v7072_v12 = vsel %vm869_vm3, %v7068_v23, 0.0  ;;  %v29175_v15 = vld [vmem:[%s36696_s14 + $0x90] sm:$0xff]   ;;  %v29180_v11 = vld [vmem:[%s36696_s14 + $0x28] sm:$0xff]  }
 0xada   :  { %v7077_v40 = vsel %vm869_vm3, %v7071_v5, 0.0 }
 0xadb   :  { %v7073_v34 = vsel %vm869_vm3, %v7069_v62, 0.0 }
 0xadc   :  { %v7074_v16 = vadd.f32 %v7073_v34, %v7072_v12  ;;  %v29183_v12 = vld [vmem:[%s36696_s14 + $0xb0] sm:$0xff]   ;;  %v29185_v34 = vld [vmem:[%s36696_s14 + $0xb8] sm:$0xff]  }
 0xade   :  { %v7076_v0 = vadd.f32 %v7075_v18, %v7074_v16  ;;  %v29186_v16 = vld [vmem:[%s36696_s14 + $0x40] sm:$0xff]  }
 0xadf   :  { %v29187_v18 = vld [vmem:[%s36696_s14 + $0xc0] sm:$0xff]  }
 0xae0   :  { %v7078_v33 = vadd.f32 %v7077_v40, %v7076_v0  ;;  %v29188_v0 = vld [vmem:[%s36696_s14 + $0x48] sm:$0xff]  }
 0xae1   :  { %v29189_v40 = vld [vmem:[%s36696_s14 + $0xc8] sm:$0xff]  }
 0xae2   :  { %v7079_v63 = vrot.slane %v7078_v33, 4 }
 0xae4   :  { %v7080_v22 = vadd.f32 %v7079_v63, %v7078_v33  ;;  %v29190_v33 = vld [vmem:[%s36696_s14 + $0x50] sm:$0xff]  }
 0xae5   :  { %v29191_v63 = vld [vmem:[%s36696_s14 + $0xd0] sm:$0xff]  }
 0xae6   :  { %v7081_v6 = vrot.slane %v7080_v22, 2 }
 0xae8   :  { %v7082_v39 = vadd.f32 %v7081_v6, %v7080_v22  ;;  %v29192_v22 = vld [vmem:[%s36696_s14 + $0x58] sm:$0xff]  }
 0xae9   :  { %v29193_v6 = vld [vmem:[%s36696_s14 + $0xd8] sm:$0xff]  }
 0xaea   :  { %v7083_v21 = vrot.slane %v7082_v39, 1 }
 0xaec   :  { %v7084_v46 = vadd.f32 %v7083_v21, %v7082_v39  ;;  %v29194_v39 = vld [vmem:[%s36696_s14 + $0x60] sm:$0xff]  }
 0xaed   :  { %v29195_v21 = vld [vmem:[%s36696_s14 + $0xe0] sm:$0xff]  }
 0xaee   :  { %v7085_v54 = vmul.f32 0.03125, %v7084_v46  ;;  %v29196_v46 = vld [vmem:[%s36696_s14 + $0x68] sm:$0xff]  }
 0xaf0   :  { %v7086_v26 = vsub.f32 %v7068_v23, %v7085_v54  ;;  %v7087_v35 = vsub.f32 %v7069_v62, %v7085_v54  ;;  %v7088_v50 = vsub.f32 %v7070_v14, %v7085_v54  ;;  %v7089_v32 = vsub.f32 %v7071_v5, %v7085_v54  ;;  %v29178_v23 = vld [vmem:[%s36696_s14 + $0x20] sm:$0xff]   ;;  %v29181_v14 = vld [vmem:[%s36696_s14 + $0xa8] sm:$0xff]   ;;  %v29182_v62 = vld [vmem:[%s36696_s14 + $0x30] sm:$0xff]  }
 0xaf1   :  { %v29184_v5 = vld [vmem:[%s36696_s14 + $0x38] sm:$0xff]   ;;  %v29197_v54 = vld [vmem:[%s36696_s14 + $0xe8] sm:$0xff]  }
 0xaf2   :  { %v7090_v30 = vmul.f32 %v7086_v26, %v7086_v26  ;;  %v7091_v25 = vmul.f32 %v7087_v35, %v7087_v35  ;;  %v7092_v2 = vmul.f32 %v7088_v50, %v7088_v50  ;;  %v7093_v31 = vmul.f32 %v7089_v32, %v7089_v32 }
 0xaf4   :  { %v7094_v9 = vsel %vm869_vm3, %v7090_v30, 0.0  ;;  %v7095_v56 = vsel %vm869_vm3, %v7091_v25, 0.0  ;;  %v7097_v44 = vsel %vm869_vm3, %v7092_v2, 0.0  ;;  %v7099_v17 = vsel %vm869_vm3, %v7093_v31, 0.0  ;;  %v29202_v30 = vld [vmem:[%s36696_s14 + $0x100] sm:$0xff]   ;;  %v29203_v25 = vld [vmem:[%s36696_s14 + $0x108] sm:$0xff]  }
 0xaf5   :  { %v7096_v38 = vadd.f32 %v7095_v56, %v7094_v9  ;;  %v29204_v2 = vld [vmem:[%s36696_s14 + $0x110] sm:$0xff]   ;;  %v29205_v31 = vld [vmem:[%s36696_s14 + $0x118] sm:$0xff]   ;;  %v29206_v9 = vld [vmem:[%s36696_s14 + $0x120] sm:$0xff]  }
 0xaf6   :  { %v29207_v56 = vld [vmem:[%s36696_s14 + $0x128] sm:$0xff]  }
 0xaf7   :  { %v7098_v60 = vadd.f32 %v7097_v44, %v7096_v38  ;;  %v29208_v38 = vld [vmem:[%s36696_s14 + $0x130] sm:$0xff]   ;;  %v29209_v44 = vld [vmem:[%s36696_s14 + $0x138] sm:$0xff]  }
 0xaf9   :  { %v7100_v53 = vadd.f32 %v7099_v17, %v7098_v60  ;;  %v29210_v60 = vld [vmem:[%s36696_s14 + $0x140] sm:$0xff]  }
 0xafa   :  { %v21877_v17 = vld [vmem:[%s36698_s15 + $0x2] sm:$0x3] }
 0xafb   :  { %v7101_v24 = vrot.slane %v7100_v53, 4 }
 0xafd   :  { %v7102_v58 = vadd.f32 %v7101_v24, %v7100_v53  ;;  %v7519_v53 = vsel %vm1387_vm4, %v21877_v17, 0  ;;  %v29211_v24 = vld [vmem:[%s36696_s14 + $0x148] sm:$0xff]  }
 0xaff   :  { %v7103_v29 = vrot.slane %v7102_v58, 2 }
 0xb01   :  { %v7104_v10 = vadd.f32 %v7103_v29, %v7102_v58  ;;  %v29212_v58 = vld [vmem:[%s36696_s14 + $0x150] sm:$0xff]   ;;  %v29213_v29 = vld [vmem:[%s36696_s14 + $0x158] sm:$0xff]  }
 0xb03   :  { %v7105_v42 = vrot.slane %v7104_v10, 1 }
 0xb05   :  { %v7106_v1 = vadd.f32 %v7105_v42, %v7104_v10  ;;  %v29214_v10 = vld [vmem:[%s36696_s14 + $0x160] sm:$0xff]   ;;  %v29215_v42 = vld [vmem:[%s36696_s14 + $0x168] sm:$0xff]  }
 0xb07   :  { %v7107_v3 = vmul.f32 0.03125, %v7106_v1  ;;  %v29216_v1 = vld [vmem:[%s36696_s14 + $0x170] sm:$0xff]  }
 0xb09   :  { %v7108_v36 = vadd.f32 1e-05, %v7107_v3  ;;  %v29217_v3 = vld [vmem:[%s36696_s14 + $0x178] sm:$0xff]  }
 0xb0b   :  { %29569 = vrsqrt.f32 %v7108_v36  ;;  %v29218_v36 = vld [vmem:[%s36696_s14 + $0x180] sm:$0xff]  }
 0xb15   :  { %v29570_v49 = vpop.eup %29569 }
 0xb16   :  { %v7110_v51 = vmul.f32 %v29570_v49, %v7086_v26  ;;  %v7111_v28 = vmul.f32 %v29570_v49, %v7087_v35  ;;  %v7112_v41 = vmul.f32 %v29570_v49, %v7088_v50  ;;  %v7113_v55 = vmul.f32 %v29570_v49, %v7089_v32  ;;  %v29198_v26 = vld [vmem:[%s36696_s14 + $0x70] sm:$0xff]   ;;  %v29200_v50 = vld [vmem:[%s36696_s14 + $0x78] sm:$0xff]   ;;  %v31576_v49 = vld [vmem:[%s36698_s15] sm:$0x3] }
 0xb17   :  { %v29199_v35 = vld [vmem:[%s36696_s14 + $0xf0] sm:$0xff]   ;;  %v29201_v32 = vld [vmem:[%s36696_s14 + $0xf8] sm:$0xff]  }
 0xb18   :  { %v7114_v19 = vmax.f32 %v7110_v51, 0.0  ;;  %v7115_v4 = vmax.f32 %v7111_v28, 0.0  ;;  %v7116_v52 = vmax.f32 %v7112_v41, 0.0  ;;  %v7117_v8 = vmax.f32 %v7113_v55, 0.0  ;;  %v29219_v51 = vld [vmem:[%s36696_s14 + $0x188] sm:$0xff]   ;;  %v29220_v28 = vld [vmem:[%s36696_s14 + $0x190] sm:$0xff]  }
 0xb19   :  { %v29221_v41 = vld [vmem:[%s36696_s14 + $0x198] sm:$0xff]   ;;  %v29222_v55 = vld [vmem:[%s36696_s14 + $0x1a0] sm:$0xff]  }
 0xb1a   :  { %v31347_v7 = vpack.c.bf16 %v7115_v4, %v7114_v19  ;;  %v31349_v37 = vpack.c.bf16 %v7117_v8, %v7116_v52  ;;  %v29223_v19 = vld [vmem:[%s36696_s14 + $0x1a8] sm:$0xff]   ;;  %v29224_v4 = vld [vmem:[%s36696_s14 + $0x1b0] sm:$0xff]   ;;  %v29225_v52 = vld [vmem:[%s36696_s14 + $0x1b8] sm:$0xff]  }
 0xb1b   :  { %v29226_v8 = vld [vmem:[%s36696_s14 + $0x1c0] sm:$0xff]  }
 0xb1c   :  { %25840 = vmatprep.subr.bf16.mxu1 %v31347_v7  ;;  %25916 = vmatprep.subr.bf16.mxu0 %v31347_v7 }
 0xb1d   :  { %25841 = vmatpush3.bf16.msra.mxu1 %v31347_v7  ;;  %25917 = vmatpush3.bf16.msra.mxu0 %v31347_v7 }
 0xb1e   :  { %25842 = vmatprep.subr.bf16.mxu1 %v31349_v37  ;;  %25918 = vmatprep.subr.bf16.mxu0 %v31349_v37 }
 0xb21   :  { %25843 = vmatpush3.bf16.msra.mxu1 %v31349_v37  ;;  %25919 = vmatpush3.bf16.msra.mxu0 %v31349_v37 }
 0xb22   :  { %25860 = vmatprep.subr.bf16.mxu1 %v31347_v7  ;;  %25954 = vmatprep.subr.bf16.mxu0 %v31347_v7 }
 0xb24   :  { %25845 = vmatmul.mubr.msk.bf16.vlgmr.msra.gmra.mrb[0].mxu1 %vm4254_vm5, %v29172_v20  ;;  %25921 = vmatmul.mubr.msk.bf16.vlgmr.msra.gmra.mrb[64].mxu0 %vm4254_vm5, %v29173_v61  ;;  %v29227_v20 = vld [vmem:[%s36696_s14 + $0x1c8] sm:$0xff]   ;;  %v29228_v61 = vld [vmem:[%s36696_s14 + $0x1d0] sm:$0xff]  }
 0xb25   :  { %25861 = vmatpush3.bf16.msra.mxu1 %v31347_v7  ;;  %25955 = vmatpush3.bf16.msra.mxu0 %v31347_v7 }
 0xb26   :  { %25862 = vmatprep.subr.bf16.mxu1 %v31349_v37  ;;  %25956 = vmatprep.subr.bf16.mxu0 %v31349_v37 }
 0xb27   :  { %25848 = vmatprep.mubr.msk.bf16.mxu1 %vm4254_vm5, %v29174_v48  ;;  %25924 = vmatprep.mubr.msk.bf16.mxu0 %vm4254_vm5, %v29175_v15  ;;  %v29229_v48 = vld [vmem:[%s36696_s14 + $0x1d8] sm:$0xff]   ;;  %v29230_v15 = vld [vmem:[%s36696_s14 + $0x1e0] sm:$0xff]  }
 0xb29   :  { %25863 = vmatpush3.bf16.msra.mxu1 %v31349_v37  ;;  %25957 = vmatpush3.bf16.msra.mxu0 %v31349_v37 }
 0xb2a   :  { %25992 = vmatprep.subr.bf16.mxu0 %v31347_v7  ;;  %29028 = vmatprep.subr.msk.bf16.mxu1 %vm1387_vm4, %v21877_v17 }
 0xb2c   :  { %25849 = vmatmul.mubr.msk.bf16.gmra.mrb[4].mxu1 %vm4254_vm5, %v29176_v47  ;;  %25925 = vmatmul.mubr.msk.bf16.gmra.mrb[68].mxu0 %vm4254_vm5, %v29177_v57  ;;  %v29232_v47 = vld [vmem:[%s36696_s14 + $0x1f0] sm:$0xff]   ;;  %v29234_v57 = vld [vmem:[%s36696_s14 + $0x200] sm:$0xff]  }
 0xb2d   :  { %25852 = vmatprep.mubr.msk.bf16.mxu1 %vm4254_vm5, %v29178_v23  ;;  %25928 = vmatprep.mubr.msk.bf16.mxu0 %vm4254_vm5, %v29179_v13  ;;  %v29235_v23 = vld [vmem:[%s36696_s14 + $0x208] sm:$0xff]   ;;  %v29236_v13 = vld [vmem:[%s36696_s14 + $0x210] sm:$0xff]  }
 0xb34   :  { %25853 = vmatmul.mubr.msk.bf16.gmra.mrb[8].mxu1 %vm4254_vm5, %v29180_v11  ;;  %25929 = vmatmul.mubr.msk.bf16.gmra.mrb[72].mxu0 %vm4254_vm5, %v29181_v14  ;;  %v29237_v11 = vld [vmem:[%s36696_s14 + $0x218] sm:$0xff]   ;;  %v29238_v14 = vld [vmem:[%s36696_s14 + $0x220] sm:$0xff]  }
 0xb35   :  { %25856 = vmatprep.mubr.msk.bf16.mxu1 %vm4254_vm5, %v29182_v62  ;;  %25932 = vmatprep.mubr.msk.bf16.mxu0 %vm4254_vm5, %v29183_v12  ;;  %v29239_v62 = vld [vmem:[%s36696_s14 + $0x228] sm:$0xff]   ;;  %v29240_v12 = vld [vmem:[%s36696_s14 + $0x230] sm:$0xff]  }
 0xb3c   :  { %25857 = vmatmul.mubr.msk.bf16.gmra.mrb[12].mxu1 %vm4254_vm5, %v29184_v5  ;;  %25933 = vmatmul.mubr.msk.bf16.gmra.mrb[76].mxu0 %vm4254_vm5, %v29185_v34 }
 0xb3d   :  { %25864 = vmatprep.mubr.msk.bf16.mxu1 %vm4254_vm5, %v29186_v16  ;;  %25958 = vmatprep.mubr.msk.bf16.mxu0 %vm4254_vm5, %v29187_v18 }
 0xb44   :  { %25865 = vmatmul.mubr.msk.bf16.vlgmr.msra.gmra.mrb[16].mxu1 %vm4254_vm5, %v29188_v0  ;;  %25959 = vmatmul.mubr.msk.bf16.vlgmr.msra.gmra.mrb[80].mxu0 %vm4254_vm5, %v29189_v40  ;;  %v29241_v0 = vld [vmem:[%s36696_s14 + $0x238] sm:$0xff]  }
 0xb45   :  { %25993 = vmatpush3.bf16.msra.mxu0 %v31347_v7  ;;  %25868 = vmatprep.mubr.msk.bf16.mxu1 %vm4254_vm5, %v29190_v33 }
 0xb46   :  { %25994 = vmatprep.subr.bf16.mxu0 %v31349_v37  ;;  %25962 = vmatprep.mubr.msk.bf16.mxu0 %vm4254_vm5, %v29191_v63 }
 0xb47   :  { %25881 = vmatpush3.bf16.msra.mxu1 %v7519_v53 }
 0xb48   :  { %29029 = vmatprep.subr.msk.bf16.mxu1 %vm1387_vm4, %v31576_v49 }
 0xb49   :  { %25995 = vmatpush3.bf16.msra.mxu0 %v31349_v37 }
 0xb4a   :  { %26030 = vmatprep.subr.bf16.mxu0 %v31347_v7 }
 0xb4c   :  { %25869 = vmatmul.mubr.msk.bf16.gmra.mrb[20].mxu1 %vm4254_vm5, %v29192_v22  ;;  %25963 = vmatmul.mubr.msk.bf16.gmra.mrb[84].mxu0 %vm4254_vm5, %v29193_v6 }
 0xb4d   :  { %25872 = vmatprep.mubr.msk.bf16.mxu1 %vm4254_vm5, %v29194_v39  ;;  %25966 = vmatprep.mubr.msk.bf16.mxu0 %vm4254_vm5, %v29195_v21 }
 0xb54   :  { %25873 = vmatmul.mubr.msk.bf16.gmra.mrb[24].mxu1 %vm4254_vm5, %v29196_v46  ;;  %25967 = vmatmul.mubr.msk.bf16.gmra.mrb[88].mxu0 %vm4254_vm5, %v29197_v54 }
 0xb55   :  { %25876 = vmatprep.mubr.msk.bf16.mxu1 %vm4254_vm5, %v29198_v26  ;;  %25970 = vmatprep.mubr.msk.bf16.mxu0 %vm4254_vm5, %v29199_v35 }
 0xb5c   :  { %25877 = vmatmul.mubr.msk.bf16.gmra.mrb[28].mxu1 %vm4254_vm5, %v29200_v50  ;;  %25971 = vmatmul.mubr.msk.bf16.gmra.mrb[92].mxu0 %vm4254_vm5, %v29201_v32 }
 0xb5d   :  { %25996 = vmatprep.mubr.msk.bf16.mxu0 %vm4254_vm5, %v29202_v30 }
 0xb64   :  { %25997 = vmatmul.mubr.msk.bf16.vlgmr.msra.gmra.mrb[96].mxu0 %vm4254_vm5, %v29203_v25 }
 0xb65   :  { %26031 = vmatpush3.bf16.msra.mxu0 %v31347_v7  ;;  %26000 = vmatprep.mubr.msk.bf16.mxu0 %vm4254_vm5, %v29204_v2 }
 0xb66   :  { %26032 = vmatprep.subr.bf16.mxu0 %v31349_v37 }
 0xb69   :  { %26033 = vmatpush3.bf16.msra.mxu0 %v31349_v37 }
 0xb6a   :  { %26068 = vmatprep.subr.bf16.mxu0 %v31347_v7 }
 0xb6c   :  { %26001 = vmatmul.mubr.msk.bf16.gmra.mrb[100].mxu0 %vm4254_vm5, %v29205_v31 }
 0xb6d   :  { %26004 = vmatprep.mubr.msk.bf16.mxu0 %vm4254_vm5, %v29206_v9 }
 0xb74   :  { %26005 = vmatmul.mubr.msk.bf16.gmra.mrb[104].mxu0 %vm4254_vm5, %v29207_v56 }
 0xb75   :  { %26008 = vmatprep.mubr.msk.bf16.mxu0 %vm4254_vm5, %v29208_v38 }
 0xb7c   :  { %26009 = vmatmul.mubr.msk.bf16.gmra.mrb[108].mxu0 %vm4254_vm5, %v29209_v44 }
 0xb7d   :  { %26034 = vmatprep.mubr.msk.bf16.mxu0 %vm4254_vm5, %v29210_v60 }
 0xb84   :  { %26035 = vmatmul.mubr.msk.bf16.vlgmr.msra.gmra.mrb[112].mxu0 %vm4254_vm5, %v29211_v24 }
 0xb85   :  { %26069 = vmatpush3.bf16.msra.mxu0 %v31347_v7  ;;  %26038 = vmatprep.mubr.msk.bf16.mxu0 %vm4254_vm5, %v29212_v58 }
 0xb86   :  { %26070 = vmatprep.subr.bf16.mxu0 %v31349_v37 }
 0xb89   :  { %26071 = vmatpush3.bf16.msra.mxu0 %v31349_v37 }
 0xb8a   :  { %26106 = vmatprep.subr.bf16.mxu0 %v31347_v7 }
 0xb8c   :  { %26039 = vmatmul.mubr.msk.bf16.gmra.mrb[116].mxu0 %vm4254_vm5, %v29213_v29 }
 0xb8d   :  { %26042 = vmatprep.mubr.msk.bf16.mxu0 %vm4254_vm5, %v29214_v10 }
 0xb94   :  { %26043 = vmatmul.mubr.msk.bf16.gmra.mrb[120].mxu0 %vm4254_vm5, %v29215_v42  ;;  %v21926_v42 = vld [vmem:[%s36698_s15 + $0x4] sm:$0x3] }
 0xb95   :  { %26046 = vmatprep.mubr.msk.bf16.mxu0 %vm4254_vm5, %v29216_v1 }
 0xb9c   :  { %26047 = vmatmul.mubr.msk.bf16.gmra.mrb[124].mxu0 %vm4254_vm5, %v29217_v3 }
 0xb9d   :  { %26072 = vmatprep.mubr.msk.bf16.mxu0 %vm4254_vm5, %v29218_v36 }
 0xba4   :  { %26073 = vmatmul.mubr.msk.bf16.vlgmr.msra.gmra.mrb[128].mxu0 %vm4254_vm5, %v29219_v51 }
 0xba5   :  { %26107 = vmatpush3.bf16.msra.mxu0 %v31347_v7  ;;  %26076 = vmatprep.mubr.msk.bf16.mxu0 %vm4254_vm5, %v29220_v28 }
 0xba6   :  { %26108 = vmatprep.subr.bf16.mxu0 %v31349_v37 }
 0xba9   :  { %26109 = vmatpush3.bf16.msra.mxu0 %v31349_v37 }
 0xbaa   :  { %26144 = vmatprep.subr.bf16.mxu0 %v31347_v7 }
 0xbac   :  { %26077 = vmatmul.mubr.msk.bf16.gmra.mrb[132].mxu0 %vm4254_vm5, %v29221_v41 }
 0xbad   :  { %26080 = vmatprep.mubr.msk.bf16.mxu0 %vm4254_vm5, %v29222_v55 }
 0xbb4   :  { %26081 = vmatmul.mubr.msk.bf16.gmra.mrb[136].mxu0 %vm4254_vm5, %v29223_v19 }
 0xbb5   :  { %26084 = vmatprep.mubr.msk.bf16.mxu0 %vm4254_vm5, %v29224_v4 }
 0xbbc   :  { %26085 = vmatmul.mubr.msk.bf16.gmra.mrb[140].mxu0 %vm4254_vm5, %v29225_v52 }
 0xbbd   :  { %26110 = vmatprep.mubr.msk.bf16.mxu0 %vm4254_vm5, %v29226_v8 }
 0xbc4   :  { %26111 = vmatmul.mubr.msk.bf16.vlgmr.msra.gmra.mrb[144].mxu0 %vm4254_vm5, %v29227_v20 }
 0xbc5   :  { %26145 = vmatpush3.bf16.msra.mxu0 %v31347_v7  ;;  %26114 = vmatprep.mubr.msk.bf16.mxu0 %vm4254_vm5, %v29228_v61  ;;  %v29231_v7 = vld [vmem:[%s36696_s14 + $0x1e8] sm:$0xff]  }
 0xbc6   :  { %26146 = vmatprep.subr.bf16.mxu0 %v31349_v37 }
 0xbc9   :  { %26147 = vmatpush3.bf16.msra.mxu0 %v31349_v37  ;;  %v29233_v37 = vld [vmem:[%s36696_s14 + $0x1f8] sm:$0xff]  }
 0xbcc   :  { %26115 = vmatmul.mubr.msk.bf16.gmra.mrb[148].mxu0 %vm4254_vm5, %v29229_v48 }
 0xbcd   :  { %26118 = vmatprep.mubr.msk.bf16.mxu0 %vm4254_vm5, %v29230_v15  ;;  %v7643_v15 = vsel %vm1387_vm4, %v31576_v49, 0 }
 0xbd4   :  { %26119 = vmatmul.mubr.msk.bf16.gmra.mrb[152].mxu0 %vm4254_vm5, %v29231_v7 }
 0xbd5   :  { %26122 = vmatprep.mubr.msk.bf16.mxu0 %vm4254_vm5, %v29232_v47 }
 0xbdc   :  { %26123 = vmatmul.mubr.msk.bf16.gmra.mrb[156].mxu0 %vm4254_vm5, %v29233_v37 }
 0xbdd   :  { %26148 = vmatprep.mubr.msk.bf16.mxu0 %vm4254_vm5, %v29234_v57 }
 0xbe4   :  { %26149 = vmatmul.mubr.msk.bf16.vlgmr.msra.gmra.mrb[160].mxu0 %vm4254_vm5, %v29235_v23 }
 0xbe5   :  { %26152 = vmatprep.mubr.msk.bf16.mxu0 %vm4254_vm5, %v29236_v13 }
 0xbec   :  { %26153 = vmatmul.mubr.msk.bf16.gmra.mrb[164].mxu0 %vm4254_vm5, %v29237_v11 }
 0xbed   :  { %26156 = vmatprep.mubr.msk.bf16.mxu0 %vm4254_vm5, %v29238_v14 }
 0xbf4   :  { %26157 = vmatmul.mubr.msk.bf16.gmra.mrb[168].mxu0 %vm4254_vm5, %v29239_v62 }
 0xbf5   :  { %26160 = vmatprep.mubr.msk.bf16.mxu0 %vm4254_vm5, %v29240_v12 }
 0xbf7   :  { %v31675_v5 = vpop.f32.mrb[0].mxu1  ;;  %v31677_v34 = vpop.f32.mrb[64].mxu0 }
 0xbf8   :  { %v31679_v16 = vpop.f32.mrb[1].mxu1  ;;  %v31681_v18 = vpop.f32.mrb[65].mxu0 }
 0xbf9   :  { %v31686_v40 = vpop.f32.mrb[2].mxu1  ;;  %v31688_v33 = vpop.f32.mrb[66].mxu0 }
 0xbfa   :  { %v7298_v63 = vpack.c.bf16 %v31686_v40, %v31675_v5  ;;  %v31692_v22 = vpop.f32.mrb[3].mxu1  ;;  %v31696_v39 = vpop.f32.mrb[67].mxu0 }
 0xbfb   :  { %v7297_v21 = vpack.c.bf16 %v31692_v22, %v31679_v16  ;;  %v21967_v16 = vld [vmem:[%s36698_s15 + $0x6] sm:$0x3] }
 0xbfc   :  { %26161 = vmatmul.mubr.msk.bf16.gmra.mrb[172].mxu0 %vm4254_vm5, %v29241_v0 }
 0xbff   :  { %v31703_v54 = vpop.f32.mrb[4].mxu1  ;;  %v31705_v26 = vpop.f32.mrb[68].mxu0 }
 0xc00   :  { %v31707_v35 = vpop.f32.mrb[5].mxu1  ;;  %v31709_v50 = vpop.f32.mrb[69].mxu0 }
 0xc01   :  { %v31711_v32 = vpop.f32.mrb[6].mxu1  ;;  %v31713_v30 = vpop.f32.mrb[70].mxu0 }
 0xc02   :  { %v31717_v2 = vpop.f32.mrb[7].mxu1  ;;  %v31721_v9 = vpop.f32.mrb[71].mxu0 }
 0xc03   :  { %v36991_v22 = vpack.c.bf16 %v31717_v2, %v31707_v35 }
 0xc07   :  { %v31727_v44 = vpop.f32.mrb[8].mxu1  ;;  %v31729_v60 = vpop.f32.mrb[72].mxu0 }
 0xc08   :  { %v31731_v17 = vpop.f32.mrb[9].mxu1  ;;  %v31733_v53 = vpop.f32.mrb[73].mxu0 }
 0xc09   :  { %v31735_v24 = vpop.f32.mrb[10].mxu1  ;;  %v31737_v58 = vpop.f32.mrb[74].mxu0 }
 0xc0a   :  { %v31741_v10 = vpop.f32.mrb[11].mxu1  ;;  %v31745_v1 = vpop.f32.mrb[75].mxu0 }
 0xc0b   :  { %v36993_v35 = vpack.c.bf16 %v31741_v10, %v31731_v17 }
 0xc0f   :  { %v31751_v51 = vpop.f32.mrb[12].mxu1  ;;  %v31753_v28 = vpop.f32.mrb[76].mxu0 }
 0xc10   :  { %v31755_v41 = vpop.f32.mrb[13].mxu1  ;;  %v31757_v55 = vpop.f32.mrb[77].mxu0 }
 0xc11   :  { %v31759_v19 = vpop.f32.mrb[14].mxu1  ;;  %v31761_v4 = vpop.f32.mrb[78].mxu0 }
 0xc12   :  { %v31765_v8 = vpop.f32.mrb[15].mxu1  ;;  %v31769_v61 = vpop.f32.mrb[79].mxu0 }
 0xc13   :  { %v36995_v17 = vpack.c.bf16 %v31765_v8, %v31755_v41  ;;  %v36997_v41 = vpack.c.bf16 %v31696_v39, %v31681_v18  ;;  %v22008_v18 = vld [vmem:[%s36698_s15 + $0x8] sm:$0x3]  ;;  %v36998_v39 = vpack.c.bf16 %v31688_v33, %v31677_v34 }
 0xc17   :  { %v25866_v7 = vpop.f32.mrb[16].mxu1  ;;  %v31775_v47 = vpop.f32.mrb[80].mxu0 }
 0xc18   :  { %v7421_v37 = vpop.f32.mrb[17].mxu1  ;;  %v31777_v57 = vpop.f32.mrb[81].mxu0 }
 0xc19   :  { %v25867_v23 = vpop.f32.mrb[18].mxu1  ;;  %v31779_v13 = vpop.f32.mrb[82].mxu0 }
 0xc1a   :  { %v7485_v11 = vpack.c.bf16 %v25867_v23, %v25866_v7  ;;  %v7424_v14 = vpop.f32.mrb[19].mxu1  ;;  %v31783_v12 = vpop.f32.mrb[83].mxu0 }
 0xc1b   :  { %v7484_v0 = vpack.c.bf16 %v7424_v14, %v7421_v37 }
 0xc1d   :  { %25882 = vmatprep.mubr.msk.bf16.mxu1 %vm869_vm3, %v7484_v0 }
 0xc1e   :  { %25883 = vmatmul.mubr.msk.bf16.vlgmr.msra.gmra.mrb[32].mxu1 %vm869_vm3, %v7485_v11 }
 0xc1f   :  { %v25870_v7 = vpop.f32.mrb[20].mxu1  ;;  %25899 = vmatpush3.bf16.msra.mxu1 %v7643_v15  ;;  %v31794_v23 = vpop.f32.mrb[84].mxu0 }
 0xc20   :  { %v7437_v62 = vpop.f32.mrb[21].mxu1  ;;  %29030 = vmatprep.subr.msk.bf16.mxu1 %vm1387_vm4, %v21926_v42  ;;  %v31797_v37 = vpop.f32.mrb[85].mxu0 }
 0xc21   :  { %v25871_v14 = vpop.f32.mrb[22].mxu1  ;;  %v31799_v20 = vpop.f32.mrb[86].mxu0 }
 0xc22   :  { %v7487_v49 = vpack.c.bf16 %v25871_v14, %v25870_v7  ;;  %v7440_v0 = vpop.f32.mrb[23].mxu1  ;;  %v31803_v31 = vpop.f32.mrb[87].mxu0 }
 0xc23   :  { %v7486_v11 = vpack.c.bf16 %v7440_v0, %v7437_v62 }
 0xc25   :  { %25886 = vmatprep.mubr.msk.bf16.mxu1 %vm869_vm3, %v7486_v11 }
 0xc26   :  { %25887 = vmatmul.mubr.msk.bf16.gmra.mrb[36].mxu1 %vm869_vm3, %v7487_v49 }
 0xc27   :  { %v25874_v38 = vpop.f32.mrb[24].mxu1  ;;  %v31809_v6 = vpop.f32.mrb[88].mxu0 }
 0xc28   :  { %v7453_v46 = vpop.f32.mrb[25].mxu1  ;;  %v31811_v52 = vpop.f32.mrb[89].mxu0 }
 0xc29   :  { %v25875_v7 = vpop.f32.mrb[26].mxu1  ;;  %v31813_v14 = vpop.f32.mrb[90].mxu0 }
 0xc2a   :  { %v7489_v36 = vpack.c.bf16 %v25875_v7, %v25874_v38  ;;  %v7456_v48 = vpop.f32.mrb[27].mxu1  ;;  %v31817_v0 = vpop.f32.mrb[91].mxu0 }
 0xc2b   :  { %v7488_v15 = vpack.c.bf16 %v7456_v48, %v7453_v46 }
 0xc2d   :  { %25890 = vmatprep.mubr.msk.bf16.mxu1 %vm869_vm3, %v7488_v15 }
 0xc2e   :  { %25891 = vmatmul.mubr.msk.bf16.gmra.mrb[40].mxu1 %vm869_vm3, %v7489_v36 }
 0xc2f   :  { %v25878_v11 = vpop.f32.mrb[28].mxu1  ;;  %v31823_v29 = vpop.f32.mrb[92].mxu0 }
 0xc30   :  { %v7469_v3 = vpop.f32.mrb[29].mxu1  ;;  %v31825_v25 = vpop.f32.mrb[93].mxu0 }
 0xc31   :  { %v25879_v38 = vpop.f32.mrb[30].mxu1  ;;  %v31827_v7 = vpop.f32.mrb[94].mxu0 }
 0xc32   :  { %v7491_v62 = vpack.c.bf16 %v25879_v38, %v25878_v11  ;;  %v7472_v56 = vpop.f32.mrb[31].mxu1  ;;  %v8255_v46 = vpack.c.bf16 %v31827_v7, %v31823_v29  ;;  %v31831_v48 = vpop.f32.mrb[95].mxu0 }
 0xc33   :  { %v7490_v49 = vpack.c.bf16 %v7472_v56, %v7469_v3  ;;  %v8254_v36 = vpack.c.bf16 %v31831_v48, %v31825_v25 }
 0xc35   :  { %25894 = vmatprep.mubr.msk.bf16.mxu1 %vm869_vm3, %v7490_v49 }
 0xc36   :  { %25895 = vmatmul.mubr.msk.bf16.gmra.mrb[44].mxu1 %vm869_vm3, %v7491_v62  ;;  %v7955_v62 = vsel %vm1387_vm4, %v21926_v42, 0 }
 0xc37   :  { %25900 = vmatprep.mubr.msk.bf16.mxu1 %vm869_vm3, %v7297_v21  ;;  %v31841_v15 = vpop.f32.mrb[96].mxu0 }
 0xc38   :  { %v31843_v11 = vpop.f32.mrb[97].mxu0 }
 0xc39   :  { %v31845_v38 = vpop.f32.mrb[98].mxu0 }
 0xc3a   :  { %v31849_v3 = vpop.f32.mrb[99].mxu0 }
 0xc3b   :  { %v37011_v25 = vpack.c.bf16 %v31849_v3, %v31843_v11  ;;  %v37012_v11 = vpack.c.bf16 %v31845_v38, %v31841_v15 }
 0xc3e   :  { %25901 = vmatmul.mubr.msk.bf16.vlgmr.msra.gmra.mrb[32].mxu1 %vm869_vm3, %v7298_v63  ;;  %v36992_v63 = vpack.c.bf16 %v31711_v32, %v31703_v54  ;;  %v36994_v32 = vpack.c.bf16 %v31735_v24, %v31727_v44  ;;  %v36996_v24 = vpack.c.bf16 %v31759_v19, %v31751_v51  ;;  %v8283_v19 = vsel %vm1387_vm4, %v21967_v16, 0 }
 0xc3f   :  { %25904 = vmatprep.mubr.msk.bf16.mxu1 %vm869_vm3, %v36991_v22  ;;  %25937 = vmatpush3.bf16.msra.mxu1 %v7955_v62  ;;  %v31865_v21 = vpop.f32.mrb[100].mxu0 }
 0xc40   :  { %29031 = vmatprep.subr.msk.bf16.mxu1 %vm1387_vm4, %v21967_v16  ;;  %v31868_v42 = vpop.f32.mrb[101].mxu0 }
 0xc41   :  { %v31870_v56 = vpop.f32.mrb[102].mxu0 }
 0xc42   :  { %v31874_v5 = vpop.f32.mrb[103].mxu0 }
 0xc43   :  { %v37013_v3 = vpack.c.bf16 %v31874_v5, %v31868_v42  ;;  %v37014_v42 = vpack.c.bf16 %v31870_v56, %v31865_v21 }
 0xc46   :  { %25905 = vmatmul.mubr.msk.bf16.gmra.mrb[36].mxu1 %vm869_vm3, %v36992_v63 }
 0xc47   :  { %25908 = vmatprep.mubr.msk.bf16.mxu1 %vm869_vm3, %v36993_v35  ;;  %v31886_v2 = vpop.f32.mrb[104].mxu0 }
 0xc48   :  { %v31888_v62 = vpop.f32.mrb[105].mxu0 }
 0xc49   :  { %v31890_v22 = vpop.f32.mrb[106].mxu0 }
 0xc4a   :  { %v31894_v40 = vpop.f32.mrb[107].mxu0  ;;  %v37016_v21 = vpack.c.bf16 %v31890_v22, %v31886_v2 }
 0xc4b   :  { %v37015_v5 = vpack.c.bf16 %v31894_v40, %v31888_v62 }
 0xc4e   :  { %25909 = vmatmul.mubr.msk.bf16.gmra.mrb[40].mxu1 %vm869_vm3, %v36994_v32 }
 0xc4f   :  { %25912 = vmatprep.mubr.msk.bf16.mxu1 %vm869_vm3, %v36995_v17  ;;  %v31906_v10 = vpop.f32.mrb[108].mxu0 }
 0xc50   :  { %v31908_v63 = vpop.f32.mrb[109].mxu0 }
 0xc51   :  { %v31910_v35 = vpop.f32.mrb[110].mxu0 }
 0xc52   :  { %v31914_v54 = vpop.f32.mrb[111].mxu0  ;;  %v37018_v22 = vpack.c.bf16 %v31910_v35, %v31906_v10  ;;  %v22131_v10 = vld [vmem:[%s36698_s15 + $0xe] sm:$0x3] }
 0xc53   :  { %v37017_v40 = vpack.c.bf16 %v31914_v54, %v31908_v63 }
 0xc56   :  { %25913 = vmatmul.mubr.msk.bf16.gmra.mrb[44].mxu1 %vm869_vm3, %v36996_v24  ;;  %v36999_v24 = vpack.c.bf16 %v31721_v9, %v31709_v50  ;;  %v37000_v50 = vpack.c.bf16 %v31713_v30, %v31705_v26  ;;  %v37001_v9 = vpack.c.bf16 %v31745_v1, %v31733_v53  ;;  %v37002_v30 = vpack.c.bf16 %v31737_v58, %v31729_v60 }
 0xc57   :  { %25938 = vmatprep.mubr.msk.bf16.mxu1 %vm869_vm3, %v36997_v41  ;;  %v31926_v8 = vpop.f32.mrb[112].mxu0  ;;  %v37003_v53 = vpack.c.bf16 %v31769_v61, %v31757_v55  ;;  %v37004_v58 = vpack.c.bf16 %v31761_v4, %v31753_v28  ;;  %v37005_v55 = vpack.c.bf16 %v31783_v12, %v31777_v57  ;;  %v8611_v4 = vsel %vm1387_vm4, %v22008_v18, 0  ;;  %v22049_v57 = vld [vmem:[%s36698_s15 + $0xa] sm:$0x3] }
 0xc58   :  { %v31928_v32 = vpop.f32.mrb[113].mxu0  ;;  %v37006_v12 = vpack.c.bf16 %v31779_v13, %v31775_v47  ;;  %v8939_v7 = vsel %vm1387_vm4, %v22049_v57, 0 }
 0xc59   :  { %v31930_v17 = vpop.f32.mrb[114].mxu0 }
 0xc5a   :  { %v31934_v44 = vpop.f32.mrb[115].mxu0  ;;  %v37020_v35 = vpack.c.bf16 %v31930_v17, %v31926_v8 }
 0xc5b   :  { %v37019_v54 = vpack.c.bf16 %v31934_v44, %v31928_v32 }
 0xc5e   :  { %25939 = vmatmul.mubr.msk.bf16.vlgmr.msra.gmra.mrb[32].mxu1 %vm869_vm3, %v36998_v39 }
 0xc5f   :  { %25975 = vmatpush3.bf16.msra.mxu1 %v8283_v19  ;;  %25942 = vmatprep.mubr.msk.bf16.mxu1 %vm869_vm3, %v36999_v24  ;;  %v31950_v41 = vpop.f32.mrb[116].mxu0 }
 0xc60   :  { %29032 = vmatprep.subr.msk.bf16.mxu1 %vm1387_vm4, %v22008_v18  ;;  %v31953_v16 = vpop.f32.mrb[117].mxu0 }
 0xc61   :  { %v31955_v49 = vpop.f32.mrb[118].mxu0 }
 0xc62   :  { %v31959_v34 = vpop.f32.mrb[119].mxu0 }
 0xc63   :  { %v37021_v44 = vpack.c.bf16 %v31959_v34, %v31953_v16 }
 0xc66   :  { %25943 = vmatmul.mubr.msk.bf16.gmra.mrb[36].mxu1 %vm869_vm3, %v37000_v50 }
 0xc67   :  { %25946 = vmatprep.mubr.msk.bf16.mxu1 %vm869_vm3, %v37001_v9  ;;  %v31971_v19 = vpop.f32.mrb[120].mxu0 }
 0xc68   :  { %v31973_v39 = vpop.f32.mrb[121].mxu0 }
 0xc69   :  { %v31975_v24 = vpop.f32.mrb[122].mxu0 }
 0xc6a   :  { %v31979_v33 = vpop.f32.mrb[123].mxu0 }
 0xc6b   :  { %v37023_v8 = vpack.c.bf16 %v31979_v33, %v31973_v39 }
 0xc6e   :  { %25947 = vmatmul.mubr.msk.bf16.gmra.mrb[40].mxu1 %vm869_vm3, %v37002_v30 }
 0xc6f   :  { %25950 = vmatprep.mubr.msk.bf16.mxu1 %vm869_vm3, %v37003_v53  ;;  %v31991_v1 = vpop.f32.mrb[124].mxu0 }
 0xc70   :  { %v31993_v50 = vpop.f32.mrb[125].mxu0 }
 0xc71   :  { %v31995_v9 = vpop.f32.mrb[126].mxu0 }
 0xc72   :  { %v31999_v26 = vpop.f32.mrb[127].mxu0 }
 0xc76   :  { %25951 = vmatmul.mubr.msk.bf16.gmra.mrb[44].mxu1 %vm869_vm3, %v37004_v58  ;;  %v37007_v58 = vpack.c.bf16 %v31803_v31, %v31797_v37  ;;  %v37008_v31 = vpack.c.bf16 %v31799_v20, %v31794_v23  ;;  %v37009_v37 = vpack.c.bf16 %v31817_v0, %v31811_v52  ;;  %v37010_v23 = vpack.c.bf16 %v31813_v14, %v31809_v6 }
 0xc77   :  { %25976 = vmatprep.mubr.msk.bf16.mxu1 %vm869_vm3, %v37005_v55  ;;  %v32011_v61 = vpop.f32.mrb[128].mxu0 }
 0xc78   :  { %v32013_v30 = vpop.f32.mrb[129].mxu0 }
 0xc79   :  { %v32015_v53 = vpop.f32.mrb[130].mxu0 }
 0xc7a   :  { %v32019_v60 = vpop.f32.mrb[131].mxu0 }
 0xc7e   :  { %25977 = vmatmul.mubr.msk.bf16.vlgmr.msra.gmra.mrb[32].mxu1 %vm869_vm3, %v37006_v12 }
 0xc7f   :  { %26013 = vmatpush3.bf16.msra.mxu1 %v8611_v4  ;;  %25980 = vmatprep.mubr.msk.bf16.mxu1 %vm869_vm3, %v37007_v58  ;;  %v32035_v55 = vpop.f32.mrb[132].mxu0 }
 0xc80   :  { %29033 = vmatprep.subr.msk.bf16.mxu1 %vm1387_vm4, %v22049_v57  ;;  %v32038_v18 = vpop.f32.mrb[133].mxu0 }
 0xc81   :  { %v32040_v51 = vpop.f32.mrb[134].mxu0 }
 0xc82   :  { %v32044_v47 = vpop.f32.mrb[135].mxu0 }
 0xc86   :  { %25981 = vmatmul.mubr.msk.bf16.gmra.mrb[36].mxu1 %vm869_vm3, %v37008_v31 }
 0xc87   :  { %25984 = vmatprep.mubr.msk.bf16.mxu1 %vm869_vm3, %v37009_v37  ;;  %v32056_v4 = vpop.f32.mrb[136].mxu0 }
 0xc88   :  { %v32058_v12 = vpop.f32.mrb[137].mxu0 }
 0xc89   :  { %v32060_v58 = vpop.f32.mrb[138].mxu0 }
 0xc8a   :  { %v32064_v13 = vpop.f32.mrb[139].mxu0 }
 0xc8e   :  { %25985 = vmatmul.mubr.msk.bf16.gmra.mrb[40].mxu1 %vm869_vm3, %v37010_v23 }
 0xc8f   :  { %25988 = vmatprep.mubr.msk.bf16.mxu1 %vm869_vm3, %v8254_v36  ;;  %v32076_v52 = vpop.f32.mrb[140].mxu0 }
 0xc90   :  { %v32078_v0 = vpop.f32.mrb[141].mxu0 }
 0xc91   :  { %v32080_v31 = vpop.f32.mrb[142].mxu0 }
 0xc92   :  { %v32084_v28 = vpop.f32.mrb[143].mxu0 }
 0xc96   :  { %25989 = vmatmul.mubr.msk.bf16.gmra.mrb[44].mxu1 %vm869_vm3, %v8255_v46  ;;  %v22090_v46 = vld [vmem:[%s36698_s15 + $0xc] sm:$0x3] }
 0xc97   :  { %26014 = vmatprep.mubr.msk.bf16.mxu1 %vm869_vm3, %v37011_v25  ;;  %v32096_v14 = vpop.f32.mrb[144].mxu0 }
 0xc98   :  { %v32098_v48 = vpop.f32.mrb[145].mxu0 }
 0xc99   :  { %v32100_v36 = vpop.f32.mrb[146].mxu0 }
 0xc9a   :  { %v32104_v37 = vpop.f32.mrb[147].mxu0 }
 0xc9e   :  { %26015 = vmatmul.mubr.msk.bf16.vlgmr.msra.gmra.mrb[32].mxu1 %vm869_vm3, %v37012_v11 }
 0xc9f   :  { %26051 = vmatpush3.bf16.msra.mxu1 %v8939_v7  ;;  %26018 = vmatprep.mubr.msk.bf16.mxu1 %vm869_vm3, %v37013_v3  ;;  %v32120_v25 = vpop.f32.mrb[148].mxu0 }
 0xca0   :  { %29034 = vmatprep.subr.msk.bf16.mxu1 %vm1387_vm4, %v22090_v46  ;;  %v32123_v57 = vpop.f32.mrb[149].mxu0 }
 0xca1   :  { %v32125_v23 = vpop.f32.mrb[150].mxu0 }
 0xca2   :  { %v32129_v15 = vpop.f32.mrb[151].mxu0 }
 0xca6   :  { %26019 = vmatmul.mubr.msk.bf16.gmra.mrb[36].mxu1 %vm869_vm3, %v37014_v42 }
 0xca7   :  { %26022 = vmatprep.mubr.msk.bf16.mxu1 %vm869_vm3, %v37015_v5  ;;  %v32141_v7 = vpop.f32.mrb[152].mxu0 }
 0xca8   :  { %v32143_v11 = vpop.f32.mrb[153].mxu0 }
 0xca9   :  { %v32145_v3 = vpop.f32.mrb[154].mxu0 }
 0xcaa   :  { %v32149_v38 = vpop.f32.mrb[155].mxu0 }
 0xcae   :  { %26023 = vmatmul.mubr.msk.bf16.gmra.mrb[40].mxu1 %vm869_vm3, %v37016_v21 }
 0xcaf   :  { %26026 = vmatprep.mubr.msk.bf16.mxu1 %vm869_vm3, %v37017_v40  ;;  %v32161_v62 = vpop.f32.mrb[156].mxu0 }
 0xcb0   :  { %v32163_v42 = vpop.f32.mrb[157].mxu0 }
 0xcb1   :  { %v32165_v5 = vpop.f32.mrb[158].mxu0 }
 0xcb2   :  { %v32169_v56 = vpop.f32.mrb[159].mxu0 }
 0xcb3   :  { %v9566_v2 = vpack.c.bf16 %v32169_v56, %v32163_v42  ;;  %v9267_v56 = vsel %vm1387_vm4, %v22090_v46, 0 }
 0xcb6   :  { %26027 = vmatmul.mubr.msk.bf16.gmra.mrb[44].mxu1 %vm869_vm3, %v37018_v22 }
 0xcb7   :  { %26052 = vmatprep.mubr.msk.bf16.mxu1 %vm869_vm3, %v37019_v54  ;;  %v32181_v63 = vpop.f32.mrb[160].mxu0 }
 0xcb8   :  { %v9825_v21 = vpop.f32.mrb[161].mxu0 }
 0xcb9   :  { %v26151_v40 = vpop.f32.mrb[162].mxu0 }
 0xcba   :  { %v9889_v29 = vpack.c.bf16 %v26151_v40, %v32181_v63  ;;  %v9828_v6 = vpop.f32.mrb[163].mxu0  ;;  %v37022_v63 = vpack.c.bf16 %v31955_v49, %v31950_v41  ;;  %v37025_v49 = vpack.c.bf16 %v31999_v26, %v31993_v50  ;;  %v22172_v26 = vld [vmem:[%s36698_s15 + $0x10] sm:$0x3]  ;;  %v37028_v50 = vpack.c.bf16 %v32015_v53, %v32011_v61 }
 0xcbb   :  { %v9888_v20 = vpack.c.bf16 %v9828_v6, %v9825_v21  ;;  %v37032_v61 = vpack.c.bf16 %v32060_v58, %v32056_v4  ;;  %v37035_v53 = vpack.c.bf16 %v32104_v37, %v32098_v48  ;;  %v37039_v4 = vpack.c.bf16 %v32149_v38, %v32143_v11  ;;  %v37042_v37 = vld [vmem:[#allocation10_spill] sm:$0xff]  ;;  %v37045_v48 = vld [vmem:[#allocation12_spill] sm:$0xff]  ;;  %v37053_v38 = vld [vmem:[#allocation11_spill] sm:$0xff] }
 0xcbc   :  { %v37041_v58 = vpack.c.bf16 %v32165_v5, %v32161_v62  ;;  %v37055_v62 = vld [vmem:[#allocation15_spill] sm:$0xff]  ;;  %v37056_v5 = vld [vmem:[#allocation18_spill] sm:$0xff] }
 0xcbe   :  { %26053 = vmatmul.mubr.msk.bf16.vlgmr.msra.gmra.mrb[32].mxu1 %vm869_vm3, %v37020_v35  ;;  %v37024_v35 = vpack.c.bf16 %v31975_v24, %v31971_v19  ;;  %v37027_v19 = vpack.c.bf16 %v32019_v60, %v32013_v30  ;;  %v9595_v24 = vsel %vm1387_vm4, %v22131_v10, 0  ;;  %v37031_v60 = vpack.c.bf16 %v32064_v13, %v32058_v12 }
 0xcbf   :  { %26089 = vmatpush3.bf16.msra.mxu1 %v9267_v56  ;;  %26056 = vmatprep.mubr.msk.bf16.mxu1 %vm869_vm3, %v37021_v44  ;;  %v26154_v32 = vpop.f32.mrb[164].mxu0  ;;  %v37033_v30 = vpack.c.bf16 %v32084_v28, %v32078_v0  ;;  %v37036_v28 = vpack.c.bf16 %v32100_v36, %v32096_v14  ;;  %v37038_v13 = vpack.c.bf16 %v32125_v23, %v32120_v25  ;;  %v22189_v0 = vld [vmem:[%s36699_s16 + $0x2] sm:$0x3]  ;;  %v37047_v36 = vld [vmem:[#allocation3_spill] sm:$0xff]  ;;  %v37050_v25 = vld [vmem:[#allocation9_spill] sm:$0xff] }
 0xcc0   :  { %29035 = vmatprep.subr.msk.bf16.mxu1 %vm1387_vm4, %v22131_v10  ;;  %v9841_v6 = vpop.f32.mrb[165].mxu0  ;;  %v37040_v12 = vpack.c.bf16 %v32145_v3, %v32141_v7  ;;  %v37044_v14 = vld [vmem:[#allocation14_spill] sm:$0xff]  ;;  %v37054_v7 = vld [vmem:[#allocation16_spill] sm:$0xff]  ;;  %v22216_v3 = vld [vmem:[%s36699_s16 + $0x8] sm:$0x3] }
 0xcc1   :  { %v26155_v46 = vpop.f32.mrb[166].mxu0  ;;  %v37048_v23 = vld [vmem:[#allocation6_spill] sm:$0xff]  ;;  %v37058_v10 = vld [vmem:[#allocation20_spill] sm:$0xff] }
 0xcc2   :  { %v9891_v42 = vpack.c.bf16 %v26155_v46, %v26154_v32  ;;  %v9844_v22 = vpop.f32.mrb[167].mxu0  ;;  %v37026_v46 = vpack.c.bf16 %v31995_v9, %v31991_v1  ;;  %v37029_v1 = vpack.c.bf16 %v32044_v47, %v32038_v18  ;;  %v37030_v9 = vpack.c.bf16 %v32040_v51, %v32035_v55  ;;  %v10038_v18 = vld [vmem:[%s36699_s16] sm:$0x3] }
 0xcc3   :  { %v9890_v54 = vpack.c.bf16 %v9844_v22, %v9841_v6  ;;  %v37034_v51 = vpack.c.bf16 %v32080_v31, %v32076_v52  ;;  %v9923_v55 = vsel %vm1387_vm4, %v22172_v26, 0  ;;  %v37037_v47 = vpack.c.bf16 %v32129_v15, %v32123_v57  ;;  %v22198_v31 = vld [vmem:[%s36699_s16 + $0x4] sm:$0x3]  ;;  %v37051_v57 = vld [vmem:[#allocation7_spill] sm:$0xff]  ;;  %v37052_v15 = vld [vmem:[#allocation13_spill] sm:$0xff] }
 0xcc4   :  { %v10040_v52 = vsel %vm1387_vm4, %v10038_v18, 0  ;;  %v37060_v22 = vld [vmem:[#allocation22_spill] sm:$0xff] }
 0xcc6   :  { %26057 = vmatmul.mubr.msk.bf16.gmra.mrb[36].mxu1 %vm869_vm3, %v37022_v63  ;;  %v37062_v63 = vld [vmem:[#allocation24_spill] sm:$0xff] }
 0xcc7   :  { %26060 = vmatprep.mubr.msk.bf16.mxu1 %vm869_vm3, %v37023_v8  ;;  %v26158_v17 = vpop.f32.mrb[168].mxu0  ;;  %v10512_v8 = vsel %vm1387_vm4, %v22216_v3, 0 }
 0xcc8   :  { %v9857_v16 = vpop.f32.mrb[169].mxu0 }
 0xcc9   :  { %v26159_v34 = vpop.f32.mrb[170].mxu0 }
 0xcca   :  { %v9893_v21 = vpack.c.bf16 %v26159_v34, %v26158_v17  ;;  %v9860_v40 = vpop.f32.mrb[171].mxu0  ;;  %v22225_v17 = vld [vmem:[%s36699_s16 + $0xa] sm:$0x3]  ;;  %v37064_v34 = vld [vmem:[#allocation26_spill] sm:$0xff] }
 0xccb   :  { %v9892_v56 = vpack.c.bf16 %v9860_v40, %v9857_v16  ;;  %v37063_v16 = vld [vmem:[#allocation23_spill] sm:$0xff]  ;;  %v37066_v40 = vld [vmem:[#allocation28_spill] sm:$0xff] }
 0xcce   :  { %26061 = vmatmul.mubr.msk.bf16.gmra.mrb[40].mxu1 %vm869_vm3, %v37024_v35  ;;  %v37068_v35 = vld [vmem:[#allocation30_spill] sm:$0xff] }
 0xccf   :  { %26064 = vmatprep.mubr.msk.bf16.mxu1 %vm869_vm3, %v37025_v49  ;;  %v26162_v41 = vpop.f32.mrb[172].mxu0  ;;  %v37069_v49 = vld [vmem:[#allocation29_spill] sm:$0xff] }
 0xcd0   :  { %v9873_v33 = vpop.f32.mrb[173].mxu0 }
 0xcd1   :  { %v26163_v39 = vpop.f32.mrb[174].mxu0 }
 0xcd2   :  { %v9895_v44 = vpack.c.bf16 %v26163_v39, %v26162_v41  ;;  %v9876_v32 = vpop.f32.mrb[175].mxu0  ;;  %v37070_v41 = vld [vmem:[#allocation32_spill] sm:$0xff]  ;;  %v22234_v39 = vld [vmem:[%s36699_s16 + $0xc] sm:$0x3] }
 0xcd3   :  { %v9894_v6 = vpack.c.bf16 %v9876_v32, %v9873_v33  ;;  %v10630_v33 = vsel %vm1387_vm4, %v22225_v17, 0  ;;  %v37072_v32 = vld [vmem:[#allocation34_spill] sm:$0xff] }
 0xcd6   :  { %26065 = vmatmul.mubr.msk.bf16.gmra.mrb[44].mxu1 %vm869_vm3, %v37026_v46  ;;  %v37074_v46 = vld [vmem:[#allocation36_spill] sm:$0xff] }
 0xcd7   :  { %26090 = vmatprep.mubr.msk.bf16.mxu1 %vm869_vm3, %v37027_v19  ;;  %v37075_v19 = vld [vmem:[#allocation35_spill] sm:$0xff] }
 0xcde   :  { %26091 = vmatmul.mubr.msk.bf16.vlgmr.msra.gmra.mrb[32].mxu1 %vm869_vm3, %v37028_v50  ;;  %v37078_v50 = vld [vmem:[#allocation40_spill] sm:$0xff] }
 0xcdf   :  { %26127 = vmatpush3.bf16.msra.mxu1 %v9595_v24  ;;  %26094 = vmatprep.mubr.msk.bf16.mxu1 %vm869_vm3, %v37029_v1  ;;  %v37076_v24 = vld [vmem:[#allocation38_spill] sm:$0xff]  ;;  %v10748_v1 = vsel %vm1387_vm4, %v22234_v39, 0 }
 0xce0   :  { %29036 = vmatprep.subr.msk.bf16.mxu1 %vm1387_vm4, %v22172_v26  ;;  %v37077_v26 = vld [vmem:[#allocation37_spill] sm:$0xff] }
 0xce6   :  { %26095 = vmatmul.mubr.msk.bf16.gmra.mrb[36].mxu1 %vm869_vm3, %v37030_v9  ;;  %v22243_v9 = vld [vmem:[%s36699_s16 + $0xe] sm:$0x3] }
 0xce7   :  { %26098 = vmatprep.mubr.msk.bf16.mxu1 %vm869_vm3, %v37031_v60  ;;  %v37079_v60 = vld [vmem:[#allocation39_spill] sm:$0xff] }
 0xcee   :  { %26099 = vmatmul.mubr.msk.bf16.gmra.mrb[40].mxu1 %vm869_vm3, %v37032_v61  ;;  %v37080_v61 = vld [vmem:[#allocation42_spill] sm:$0xff] }
 0xcef   :  { %26102 = vmatprep.mubr.msk.bf16.mxu1 %vm869_vm3, %v37033_v30  ;;  %v37081_v30 = vld [vmem:[#allocation41_spill] sm:$0xff] }
 0xcf6   :  { %26103 = vmatmul.mubr.msk.bf16.gmra.mrb[44].mxu1 %vm869_vm3, %v37034_v51  ;;  %v37082_v51 = vld [vmem:[#allocation44_spill] sm:$0xff] }
 0xcf7   :  { %26128 = vmatprep.mubr.msk.bf16.mxu1 %vm869_vm3, %v37035_v53  ;;  %v37083_v53 = vld [vmem:[#allocation43_spill] sm:$0xff] }
 0xcfe   :  { %26129 = vmatmul.mubr.msk.bf16.vlgmr.msra.gmra.mrb[32].mxu1 %vm869_vm3, %v37036_v28  ;;  %v37086_v28 = vld [vmem:[#allocation48_spill] sm:$0xff] }
 0xcff   :  { %26165 = vmatpush3.bf16.msra.mxu1 %v9923_v55  ;;  %26132 = vmatprep.mubr.msk.bf16.mxu1 %vm869_vm3, %v37037_v47  ;;  %v37084_v55 = vld [vmem:[#allocation46_spill] sm:$0xff]  ;;  %v10866_v47 = vsel %vm1387_vm4, %v22243_v9, 0 }
 0xd00   :  { %29037 = vmatprep.subr.msk.bf16.mxu1 %vm1387_vm4, %v10038_v18  ;;  %v37085_v18 = vld [vmem:[#allocation45_spill] sm:$0xff] }
 0xd06   :  { %26133 = vmatmul.mubr.msk.bf16.gmra.mrb[36].mxu1 %vm869_vm3, %v37038_v13  ;;  %v22252_v13 = vld [vmem:[%s36699_s16 + $0x10] sm:$0x3] }
 0xd07   :  { %26136 = vmatprep.mubr.msk.bf16.mxu1 %vm869_vm3, %v37039_v4  ;;  %v37087_v4 = vld [vmem:[#allocation47_spill] sm:$0xff] }
 0xd0e   :  { %26137 = vmatmul.mubr.msk.bf16.gmra.mrb[40].mxu1 %vm869_vm3, %v37040_v12  ;;  %v37088_v12 = vld [vmem:[#allocation50_spill] sm:$0xff] }
 0xd0f   :  { %26140 = vmatprep.mubr.msk.bf16.mxu1 %vm869_vm3, %v9566_v2  ;;  %v37057_v2 = vld [vmem:[#allocation17_spill] sm:$0xff] }
 0xd16   :  { %26141 = vmatmul.mubr.msk.bf16.gmra.mrb[44].mxu1 %vm869_vm3, %v37041_v58  ;;  %v37089_v58 = vld [vmem:[#allocation49_spill] sm:$0xff] }
 0xd17   :  { %26166 = vmatprep.mubr.msk.bf16.mxu1 %vm869_vm3, %v9888_v20  ;;  %v10158_v20 = vsel %vm1387_vm4, %v22189_v0, 0 }
 0xd1e   :  { %26167 = vmatmul.mubr.msk.bf16.vlgmr.msra.gmra.mrb[32].mxu1 %vm869_vm3, %v9889_v29  ;;  %v37049_v29 = vld [vmem:[#allocation5_spill] sm:$0xff] }
 0xd1f   :  { %26183 = vmatpush3.bf16.msra.mxu1 %v10040_v52  ;;  %26170 = vmatprep.mubr.msk.bf16.mxu1 %vm869_vm3, %v9890_v54  ;;  %v37061_v54 = vld [vmem:[#allocation21_spill] sm:$0xff]  ;;  %v37090_v52 = vld [vmem:[#allocation52_spill] sm:$0xff] }
 0xd20   :  { %29038 = vmatprep.subr.msk.bf16.mxu1 %vm1387_vm4, %v22189_v0  ;;  %v37091_v0 = vld [vmem:[#allocation51_spill] sm:$0xff] }
 0xd26   :  { %26171 = vmatmul.mubr.msk.bf16.gmra.mrb[36].mxu1 %vm869_vm3, %v9891_v42  ;;  %v37059_v42 = vld [vmem:[#allocation19_spill] sm:$0xff] }
 0xd27   :  { %26174 = vmatprep.mubr.msk.bf16.mxu1 %vm869_vm3, %v9892_v56  ;;  %v37067_v56 = vld [vmem:[#allocation27_spill] sm:$0xff] }
 0xd2e   :  { %26175 = vmatmul.mubr.msk.bf16.gmra.mrb[40].mxu1 %vm869_vm3, %v9893_v21  ;;  %v37065_v21 = vld [vmem:[#allocation25_spill] sm:$0xff] }
 0xd2f   :  { %26178 = vmatprep.mubr.msk.bf16.mxu1 %vm869_vm3, %v9894_v6  ;;  %v37073_v6 = vld [vmem:[#allocation33_spill] sm:$0xff] }
 0xd36   :  { %26179 = vmatmul.mubr.msk.bf16.gmra.mrb[44].mxu1 %vm869_vm3, %v9895_v44  ;;  %v37071_v44 = vld [vmem:[#allocation31_spill] sm:$0xff] }
 0xd37   :  { %26184 = vmatprep.mubr.msk.bf16.mxu1 %vm869_vm3, %v30381_v45  ;;  %v37043_v45 = vld [vmem:[#allocation8_spill] sm:$0xff] }
 0xd3e   :  { %26185 = vmatmul.mubr.msk.bf16.vlgmr.msra.gmra.mrb[32].mxu1 %vm869_vm3, %v30377_v43  ;;  %v37046_v43 = vld [vmem:[#allocation4_spill] sm:$0xff] }
 0xd3f   :  { %26188 = vmatprep.mubr.msk.bf16.mxu1 %vm869_vm3, %v30414_v27  ;;  %26201 = vmatpush3.bf16.msra.mxu1 %v10158_v20  ;;  %v10276_v27 = vsel %vm1387_vm4, %v22198_v31, 0  ;;  %v37092_v20 = vld [vmem:[#allocation54_spill] sm:$0xff] }
 0xd40   :  { %29039 = vmatprep.subr.msk.bf16.mxu1 %vm1387_vm4, %v22198_v31  ;;  %v37093_v31 = vld [vmem:[#allocation53_spill] sm:$0xff] }
 0xd46   :  { %26189 = vmatmul.mubr.msk.bf16.gmra.mrb[36].mxu1 %vm869_vm3, %v30410_v59  ;;  %v22207_v59 = vld [vmem:[%s36699_s16 + $0x6] sm:$0x3] }
 0xd47   :  { %26192 = vmatprep.mubr.msk.bf16.mxu1 %vm869_vm3, %v37042_v37  ;;  %v10394_v11 = vsel %vm1387_vm4, %v22207_v59, 0  ;;  %v37094_v37 = vld [vmem:[#allocation56_spill] sm:$0xff] }
 0xd4e   :  { %26193 = vmatmul.mubr.msk.bf16.gmra.mrb[40].mxu1 %vm869_vm3, %v37043_v45  ;;  %v10984_v45 = vsel %vm1387_vm4, %v22252_v13, 0 }
 0xd4f   :  { %26196 = vmatprep.mubr.msk.bf16.mxu1 %vm869_vm3, %v37044_v14  ;;  %v37095_v14 = vld [vmem:[#allocation55_spill] sm:$0xff] }
 0xd56   :  { %26197 = vmatmul.mubr.msk.bf16.gmra.mrb[44].mxu1 %vm869_vm3, %v37045_v48  ;;  %v37096_v48 = vld [vmem:[#allocation58_spill] sm:$0xff] }
 0xd57   :  { %26202 = vmatprep.mubr.msk.bf16.mxu1 %vm869_vm3, %v37046_v43  ;;  %v37097_v43 = vld [vmem:[#allocation57_spill] sm:$0xff] }
 0xd5e   :  { %26203 = vmatmul.mubr.msk.bf16.vlgmr.msra.gmra.mrb[32].mxu1 %vm869_vm3, %v37047_v36  ;;  %v37100_v36 = vld [vmem:[#allocation62_spill] sm:$0xff] }
 0xd5f   :  { %26206 = vmatprep.mubr.msk.bf16.mxu1 %vm869_vm3, %v37048_v23  ;;  %26219 = vmatpush3.bf16.msra.mxu1 %v10276_v27  ;;  %v37098_v27 = vld [vmem:[#allocation60_spill] sm:$0xff]  ;;  %v37101_v23 = vld [vmem:[#allocation61_spill] sm:$0xff] }
 0xd60   :  { %29040 = vmatprep.subr.msk.bf16.mxu1 %vm1387_vm4, %v22207_v59  ;;  %v37099_v59 = vld [vmem:[#allocation59_spill] sm:$0xff] }
 0xd66   :  { %26207 = vmatmul.mubr.msk.bf16.gmra.mrb[36].mxu1 %vm869_vm3, %v37049_v29  ;;  %v37102_v29 = vld [vmem:[#allocation64_spill] sm:$0xff] }
 0xd67   :  { %26210 = vmatprep.mubr.msk.bf16.mxu1 %vm869_vm3, %v37050_v25  ;;  %v37103_v25 = vld [vmem:[#allocation63_spill] sm:$0xff] }
 0xd6e   :  { %26211 = vmatmul.mubr.msk.bf16.gmra.mrb[40].mxu1 %vm869_vm3, %v37051_v57  ;;  %v37104_v57 = vld [vmem:[#allocation66_spill] sm:$0xff] }
 0xd6f   :  { %26214 = vmatprep.mubr.msk.bf16.mxu1 %vm869_vm3, %v37052_v15  ;;  %v37105_v15 = vld [vmem:[#allocation65_spill] sm:$0xff] }
 0xd76   :  { %26215 = vmatmul.mubr.msk.bf16.gmra.mrb[44].mxu1 %vm869_vm3, %v37053_v38  ;;  %v37106_v38 = vld [vmem:[#allocation68_spill] sm:$0xff] }
 0xd77   :  { %26220 = vmatprep.mubr.msk.bf16.mxu1 %vm869_vm3, %v37054_v7  ;;  %v37107_v7 = vld [vmem:[#allocation67_spill] sm:$0xff] }
 0xd7e   :  { %26221 = vmatmul.mubr.msk.bf16.vlgmr.msra.gmra.mrb[32].mxu1 %vm869_vm3, %v37055_v62  ;;  %v22261_v62 = vld [vmem:[%s36700_s17] ss:$0 sm:$0xff] }
 0xd7f   :  { %26224 = vmatprep.mubr.msk.bf16.mxu1 %vm869_vm3, %v37056_v5  ;;  %26237 = vmatpush3.bf16.msra.mxu1 %v10394_v11  ;;  %v37108_v11 = vld [vmem:[#allocation70_spill] sm:$0xff] }
 0xd80   :  { %29041 = vmatprep.subr.msk.bf16.mxu1 %vm1387_vm4, %v22216_v3  ;;  %v37109_v3 = vld [vmem:[#allocation69_spill] sm:$0xff] }
 0xd86   :  { %26225 = vmatmul.mubr.msk.bf16.gmra.mrb[36].mxu1 %vm869_vm3, %v37057_v2 }
 0xd87   :  { %26228 = vmatprep.mubr.msk.bf16.mxu1 %vm869_vm3, %v37058_v10 }
 0xd8e   :  { %26229 = vmatmul.mubr.msk.bf16.gmra.mrb[40].mxu1 %vm869_vm3, %v37059_v42 }
 0xd8f   :  { %26232 = vmatprep.mubr.msk.bf16.mxu1 %vm869_vm3, %v37060_v22 }
 0xd96   :  { %26233 = vmatmul.mubr.msk.bf16.gmra.mrb[44].mxu1 %vm869_vm3, %v37061_v54 }
 0xd97   :  { %26238 = vmatprep.mubr.msk.bf16.mxu1 %vm869_vm3, %v37062_v63 }
 0xd9e   :  { %26239 = vmatmul.mubr.msk.bf16.vlgmr.msra.gmra.mrb[32].mxu1 %vm869_vm3, %v37063_v16 }
 0xd9f   :  { %26242 = vmatprep.mubr.msk.bf16.mxu1 %vm869_vm3, %v37064_v34  ;;  %26255 = vmatpush3.bf16.msra.mxu1 %v10512_v8 }
 0xda0   :  { %29042 = vmatprep.subr.msk.bf16.mxu1 %vm1387_vm4, %v22225_v17 }
 0xda6   :  { %26243 = vmatmul.mubr.msk.bf16.gmra.mrb[36].mxu1 %vm869_vm3, %v37065_v21 }
 0xda7   :  { %26246 = vmatprep.mubr.msk.bf16.mxu1 %vm869_vm3, %v37066_v40 }
 0xdae   :  { %26247 = vmatmul.mubr.msk.bf16.gmra.mrb[40].mxu1 %vm869_vm3, %v37067_v56 }
 0xdaf   :  { %26250 = vmatprep.mubr.msk.bf16.mxu1 %vm869_vm3, %v37068_v35 }
 0xdb6   :  { %26251 = vmatmul.mubr.msk.bf16.gmra.mrb[44].mxu1 %vm869_vm3, %v37069_v49 }
 0xdb7   :  { %26256 = vmatprep.mubr.msk.bf16.mxu1 %vm869_vm3, %v37070_v41 }
 0xdbe   :  { %26257 = vmatmul.mubr.msk.bf16.vlgmr.msra.gmra.mrb[32].mxu1 %vm869_vm3, %v37071_v44 }
 0xdbf   :  { %26260 = vmatprep.mubr.msk.bf16.mxu1 %vm869_vm3, %v37072_v32  ;;  %26273 = vmatpush3.bf16.msra.mxu1 %v10630_v33 }
 0xdc0   :  { %29043 = vmatprep.subr.msk.bf16.mxu1 %vm1387_vm4, %v22234_v39 }
 0xdc6   :  { %26261 = vmatmul.mubr.msk.bf16.gmra.mrb[36].mxu1 %vm869_vm3, %v37073_v6 }
 0xdc7   :  { %26264 = vmatprep.mubr.msk.bf16.mxu1 %vm869_vm3, %v37074_v46 }
 0xdce   :  { %26265 = vmatmul.mubr.msk.bf16.gmra.mrb[40].mxu1 %vm869_vm3, %v37075_v19 }
 0xdcf   :  { %26268 = vmatprep.mubr.msk.bf16.mxu1 %vm869_vm3, %v37076_v24 }
 0xdd6   :  { %26269 = vmatmul.mubr.msk.bf16.gmra.mrb[44].mxu1 %vm869_vm3, %v37077_v26 }
 0xdd7   :  { %26274 = vmatprep.mubr.msk.bf16.mxu1 %vm869_vm3, %v37078_v50 }
 0xdde   :  { %26275 = vmatmul.mubr.msk.bf16.vlgmr.msra.gmra.mrb[32].mxu1 %vm869_vm3, %v37079_v60 }
 0xddf   :  { %26278 = vmatprep.mubr.msk.bf16.mxu1 %vm869_vm3, %v37080_v61  ;;  %26291 = vmatpush3.bf16.msra.mxu1 %v10748_v1 }
 0xde0   :  { %29044 = vmatprep.subr.msk.bf16.mxu1 %vm1387_vm4, %v22243_v9 }
 0xde6   :  { %26279 = vmatmul.mubr.msk.bf16.gmra.mrb[36].mxu1 %vm869_vm3, %v37081_v30 }
 0xde7   :  { %26282 = vmatprep.mubr.msk.bf16.mxu1 %vm869_vm3, %v37082_v51 }
 0xdee   :  { %26283 = vmatmul.mubr.msk.bf16.gmra.mrb[40].mxu1 %vm869_vm3, %v37083_v53 }
 0xdef   :  { %26286 = vmatprep.mubr.msk.bf16.mxu1 %vm869_vm3, %v37084_v55 }
 0xdf6   :  { %26287 = vmatmul.mubr.msk.bf16.gmra.mrb[44].mxu1 %vm869_vm3, %v37085_v18 }
 0xdf7   :  { %26292 = vmatprep.mubr.msk.bf16.mxu1 %vm869_vm3, %v37086_v28 }
 0xdfe   :  { %26293 = vmatmul.mubr.msk.bf16.vlgmr.msra.gmra.mrb[32].mxu1 %vm869_vm3, %v37087_v4 }
 0xdff   :  { %26296 = vmatprep.mubr.msk.bf16.mxu1 %vm869_vm3, %v37088_v12  ;;  %26309 = vmatpush3.bf16.msra.mxu1 %v10866_v47 }
 0xe00   :  { %29045 = vmatprep.subr.msk.bf16.mxu1 %vm1387_vm4, %v22252_v13 }
 0xe06   :  { %26297 = vmatmul.mubr.msk.bf16.gmra.mrb[36].mxu1 %vm869_vm3, %v37089_v58 }
 0xe07   :  { %26300 = vmatprep.mubr.msk.bf16.mxu1 %vm869_vm3, %v37090_v52 }
 0xe0e   :  { %26301 = vmatmul.mubr.msk.bf16.gmra.mrb[40].mxu1 %vm869_vm3, %v37091_v0 }
 0xe0f   :  { %26304 = vmatprep.mubr.msk.bf16.mxu1 %vm869_vm3, %v37092_v20 }
 0xe16   :  { %26305 = vmatmul.mubr.msk.bf16.gmra.mrb[44].mxu1 %vm869_vm3, %v37093_v31 }
 0xe17   :  { %26310 = vmatprep.mubr.msk.bf16.mxu1 %vm869_vm3, %v37094_v37 }
 0xe1e   :  { %26311 = vmatmul.mubr.msk.bf16.vlgmr.msra.gmra.mrb[32].mxu1 %vm869_vm3, %v37095_v14 }
 0xe1f   :  { %26314 = vmatprep.mubr.msk.bf16.mxu1 %vm869_vm3, %v37096_v48  ;;  %26327 = vmatpush3.bf16.msra.mxu1 %v10984_v45 }
 0xe26   :  { %26315 = vmatmul.mubr.msk.bf16.gmra.mrb[36].mxu1 %vm869_vm3, %v37097_v43 }
 0xe27   :  { %26318 = vmatprep.mubr.msk.bf16.mxu1 %vm869_vm3, %v37098_v27 }
 0xe2e   :  { %26319 = vmatmul.mubr.msk.bf16.gmra.mrb[40].mxu1 %vm869_vm3, %v37099_v59 }
 0xe2f   :  { %26322 = vmatprep.mubr.msk.bf16.mxu1 %vm869_vm3, %v37100_v36 }
 0xe36   :  { %26323 = vmatmul.mubr.msk.bf16.gmra.mrb[44].mxu1 %vm869_vm3, %v37101_v23 }
 0xe37   :  { %26328 = vmatprep.mubr.msk.bf16.mxu1 %vm869_vm3, %v37102_v29 }
 0xe3e   :  { %26329 = vmatmul.mubr.msk.bf16.vlgmr.msra.gmra.mrb[32].mxu1 %vm869_vm3, %v37103_v25 }
 0xe3f   :  { %26332 = vmatprep.mubr.msk.bf16.mxu1 %vm869_vm3, %v37104_v57  ;;  %v29242_v57 = vld [vmem:[%s36701_s18] sm:$0xff]  }
 0xe46   :  { %26333 = vmatmul.mubr.msk.bf16.gmra.mrb[36].mxu1 %vm869_vm3, %v37105_v15 }
 0xe47   :  { %26336 = vmatprep.mubr.msk.bf16.mxu1 %vm869_vm3, %v37106_v38  ;;  %v29243_v38 = vld [vmem:[%s36701_s18 + $0x100] sm:$0xff]  }
 0xe48   :  { %26440 = vmatprep.mubr.bf16.mxu0 %v29243_v38 }
 0xe4e   :  { %26337 = vmatmul.mubr.msk.bf16.gmra.mrb[40].mxu1 %vm869_vm3, %v37107_v7 }
 0xe4f   :  { %26340 = vmatprep.mubr.msk.bf16.mxu1 %vm869_vm3, %v37108_v11 }
 0xe56   :  { %26341 = vmatmul.mubr.msk.bf16.gmra.mrb[44].mxu1 %vm869_vm3, %v37109_v3 }
 0xe57   :  { %26360 = vmatprep.mubr.bf16.mxu1 %v29242_v57 }
 0xf11   :  { %v26330_v5 = vpop.f32.mrb[32].mxu1 }
 0xf12   :  { %v11020_v2 = vpop.f32.mrb[33].mxu1  ;;  %v32486_v54 = vadd.f32 %v26330_v5, %v22261_v62 }
 0xf13   :  { %v32484_v10 = vadd.f32 %v22261_v62, %v11020_v2  ;;  %v26331_v42 = vpop.f32.mrb[34].mxu1 }
 0xf14   :  { %v11023_v22 = vpop.f32.mrb[35].mxu1  ;;  %v32492_v17 = vadd.f32 %v26331_v42, %v22261_v62  ;;  %v11126_v21 = vsel %vm11122_vm7, %v32486_v54, 0.0 }
 0xf15   :  { %v32488_v63 = vadd.f32 %v22261_v62, %v11023_v22  ;;  %v11123_v8 = vsel %vm11122_vm7, %v32484_v10, 0.0 }
 0xf16   :  { %v11128_v49 = vsel %vm11122_vm7, %v32492_v17, 0.0 }
 0xf17   :  { %v11124_v16 = vsel %vm11122_vm7, %v32488_v63, 0.0 }
 0xf18   :  { %v11125_v34 = vadd.f32 %v11124_v16, %v11123_v8 }
 0xf19   :  { %v26334_v40 = vpop.f32.mrb[36].mxu1 }
 0xf1a   :  { %v11127_v56 = vadd.f32 %v11126_v21, %v11125_v34  ;;  %v11036_v35 = vpop.f32.mrb[37].mxu1  ;;  %v11112_v32 = vadd.f32 %v26334_v40, %v22261_v62 }
 0xf1b   :  { %v32500_v41 = vadd.f32 %v22261_v62, %v11036_v35  ;;  %v26335_v33 = vpop.f32.mrb[38].mxu1 }
 0xf1c   :  { %v11129_v39 = vadd.f32 %v11128_v49, %v11127_v56  ;;  %v11039_v44 = vpop.f32.mrb[39].mxu1  ;;  %v11113_v24 = vadd.f32 %v26335_v33, %v22261_v62  ;;  %v11134_v1 = vsel %vm11122_vm7, %v11112_v32, 0.0 }
 0xf1d   :  { %v11130_v6 = vsel %vm11122_vm7, %v32500_v41, 0.0  ;;  %v11111_v46 = vadd.f32 %v22261_v62, %v11039_v44 }
 0xf1e   :  { %v11131_v19 = vadd.f32 %v11130_v6, %v11129_v39  ;;  %v11136_v30 = vsel %vm11122_vm7, %v11113_v24, 0.0 }
 0xf1f   :  { %v11132_v26 = vsel %vm11122_vm7, %v11111_v46, 0.0 }
 0xf20   :  { %v11133_v50 = vadd.f32 %v11132_v26, %v11131_v19 }
 0xf21   :  { %v26338_v9 = vpop.f32.mrb[40].mxu1 }
 0xf22   :  { %v11135_v60 = vadd.f32 %v11134_v1, %v11133_v50  ;;  %v11052_v61 = vpop.f32.mrb[41].mxu1  ;;  %v11116_v28 = vadd.f32 %v26338_v9, %v22261_v62 }
 0xf23   :  { %v11114_v51 = vadd.f32 %v22261_v62, %v11052_v61  ;;  %v26339_v53 = vpop.f32.mrb[42].mxu1 }
 0xf24   :  { %v11137_v55 = vadd.f32 %v11136_v30, %v11135_v60  ;;  %v11055_v18 = vpop.f32.mrb[43].mxu1  ;;  %v11117_v12 = vadd.f32 %v26339_v53, %v22261_v62  ;;  %v11142_v0 = vsel %vm11122_vm7, %v11116_v28, 0.0 }
 0xf25   :  { %v11138_v47 = vsel %vm11122_vm7, %v11114_v51, 0.0  ;;  %v11115_v13 = vadd.f32 %v22261_v62, %v11055_v18 }
 0xf26   :  { %v11139_v4 = vadd.f32 %v11138_v47, %v11137_v55  ;;  %v11144_v45 = vsel %vm11122_vm7, %v11117_v12, 0.0 }
 0xf27   :  { %v11140_v58 = vsel %vm11122_vm7, %v11115_v13, 0.0 }
 0xf28   :  { %v11141_v52 = vadd.f32 %v11140_v58, %v11139_v4 }
 0xf29   :  { %v26342_v20 = vpop.f32.mrb[44].mxu1 }
 0xf2a   :  { %v11143_v31 = vadd.f32 %v11142_v0, %v11141_v52  ;;  %v11068_v37 = vpop.f32.mrb[45].mxu1  ;;  %v11120_v59 = vadd.f32 %v26342_v20, %v22261_v62 }
 0xf2b   :  { %v11118_v14 = vadd.f32 %v22261_v62, %v11068_v37  ;;  %v26343_v48 = vpop.f32.mrb[46].mxu1 }
 0xf2c   :  { %v11145_v43 = vadd.f32 %v11144_v45, %v11143_v31  ;;  %v11071_v27 = vpop.f32.mrb[47].mxu1  ;;  %v11121_v23 = vadd.f32 %v26343_v48, %v22261_v62  ;;  %v11150_v11 = vsel %vm11122_vm7, %v11120_v59, 0.0 }
 0xf2d   :  { %v11146_v36 = vsel %vm11122_vm7, %v11118_v14, 0.0  ;;  %v11119_v29 = vadd.f32 %v22261_v62, %v11071_v27 }
 0xf2e   :  { %v11147_v25 = vadd.f32 %v11146_v36, %v11145_v43  ;;  %v11152_v3 = vsel %vm11122_vm7, %v11121_v23, 0.0 }
 0xf2f   :  { %v11148_v15 = vsel %vm11122_vm7, %v11119_v29, 0.0 }
 0xf30   :  { %v11149_v7 = vadd.f32 %v11148_v15, %v11147_v25 }
 0xf32   :  { %v11151_v5 = vadd.f32 %v11150_v11, %v11149_v7 }
 0xf34   :  { %v11153_v62 = vadd.f32 %v11152_v3, %v11151_v5 }
 0xf36   :  { %v11154_v2 = vrot.slane %v11153_v62, 4 }
 0xf38   :  { %v11155_v42 = vadd.f32 %v11154_v2, %v11153_v62 }
 0xf3a   :  { %v11156_v22 = vrot.slane %v11155_v42, 2 }
 0xf3c   :  { %v11157_v8 = vadd.f32 %v11156_v22, %v11155_v42 }
 0xf3e   :  { %v11158_v16 = vrot.slane %v11157_v8, 1 }
 0xf40   :  { %v11159_v34 = vadd.f32 %v11158_v16, %v11157_v8 }
 0xf42   :  { %v11160_v21 = vmul.f32 0.0078125, %v11159_v34 }
 0xf44   :  { %v32522_v40 = vsub.f32 %v32484_v10, %v11160_v21  ;;  %v32525_v56 = vsub.f32 %v32488_v63, %v11160_v21  ;;  %v32528_v35 = vsub.f32 %v32486_v54, %v11160_v21  ;;  %v32531_v49 = vsub.f32 %v32492_v17, %v11160_v21 }
 0xf45   :  { %v32534_v33 = vsub.f32 %v32500_v41, %v11160_v21  ;;  %v32536_v39 = vsub.f32 %v11111_v46, %v11160_v21  ;;  %v32538_v44 = vsub.f32 %v11112_v32, %v11160_v21  ;;  %v32540_v6 = vsub.f32 %v11113_v24, %v11160_v21 }
 0xf46   :  { %v32542_v10 = vsub.f32 %v11114_v51, %v11160_v21  ;;  %v32544_v19 = vsub.f32 %v11115_v13, %v11160_v21  ;;  %v32546_v63 = vsub.f32 %v11116_v28, %v11160_v21  ;;  %v32548_v54 = vsub.f32 %v11117_v12, %v11160_v21 }
 0xf47   :  { %v32550_v26 = vsub.f32 %v11118_v14, %v11160_v21  ;;  %v32552_v17 = vsub.f32 %v11119_v29, %v11160_v21  ;;  %v32554_v41 = vsub.f32 %v11120_v59, %v11160_v21  ;;  %v32556_v46 = vsub.f32 %v11121_v23, %v11160_v21 }
 0xf48   :  { %v11177_v32 = vmul.f32 %v32522_v40, %v32522_v40  ;;  %v11178_v24 = vmul.f32 %v32525_v56, %v32525_v56  ;;  %v11179_v50 = vmul.f32 %v32528_v35, %v32528_v35  ;;  %v11180_v1 = vmul.f32 %v32531_v49, %v32531_v49 }
 0xf49   :  { %v11181_v61 = vmul.f32 %v32534_v33, %v32534_v33  ;;  %v11182_v30 = vmul.f32 %v32536_v39, %v32536_v39  ;;  %v11183_v51 = vmul.f32 %v32538_v44, %v32538_v44  ;;  %v11184_v52 = vmul.f32 %v32540_v6, %v32540_v6 }
 0xf4a   :  { %v11193_v9 = vsel %vm11122_vm7, %v11177_v32, 0.0  ;;  %v11194_v60 = vsel %vm11122_vm7, %v11178_v24, 0.0  ;;  %v11196_v55 = vsel %vm11122_vm7, %v11179_v50, 0.0  ;;  %v11198_v28 = vsel %vm11122_vm7, %v11180_v1, 0.0 }
 0xf4b   :  { %v11195_v53 = vadd.f32 %v11194_v60, %v11193_v9  ;;  %v11200_v13 = vsel %vm11122_vm7, %v11181_v61, 0.0  ;;  %v11202_v4 = vsel %vm11122_vm7, %v11182_v30, 0.0  ;;  %v11204_v12 = vsel %vm11122_vm7, %v11183_v51, 0.0 }
 0xf4c   :  { %v11185_v0 = vmul.f32 %v32542_v10, %v32542_v10  ;;  %v11186_v20 = vmul.f32 %v32544_v19, %v32544_v19  ;;  %v11187_v31 = vmul.f32 %v32546_v63, %v32546_v63  ;;  %v11206_v14 = vsel %vm11122_vm7, %v11184_v52, 0.0 }
 0xf4d   :  { %v11197_v18 = vadd.f32 %v11196_v55, %v11195_v53  ;;  %v11188_v23 = vmul.f32 %v32548_v54, %v32548_v54  ;;  %v11189_v29 = vmul.f32 %v32550_v26, %v32550_v26  ;;  %v11190_v25 = vmul.f32 %v32552_v17, %v32552_v17 }
 0xf4e   :  { %v11208_v43 = vsel %vm11122_vm7, %v11185_v0, 0.0  ;;  %v11210_v27 = vsel %vm11122_vm7, %v11186_v20, 0.0  ;;  %v11212_v59 = vsel %vm11122_vm7, %v11187_v31, 0.0  ;;  %v11191_v57 = vmul.f32 %v32554_v41, %v32554_v41 }
 0xf4f   :  { %v11199_v47 = vadd.f32 %v11198_v28, %v11197_v18  ;;  %v11214_v7 = vsel %vm11122_vm7, %v11188_v23, 0.0  ;;  %v11216_v3 = vsel %vm11122_vm7, %v11189_v29, 0.0  ;;  %v11218_v5 = vsel %vm11122_vm7, %v11190_v25, 0.0 }
 0xf50   :  { %v11220_v62 = vsel %vm11122_vm7, %v11191_v57, 0.0  ;;  %v11192_v42 = vmul.f32 %v32556_v46, %v32556_v46  ;;  %v37114_v25 = vmov 65535  }
 0xf51   :  { %v11201_v58 = vadd.f32 %v11200_v13, %v11199_v47  ;;  %v12528_v57 = vsel %vm12527_vm8, 4294967295, %v37114_v25  ;;  %v29294_v25 = vld [vmem:[%s36701_s18 + $0xd0] sm:$0xff]  }
 0xf52   :  { %v11222_v16 = vsel %vm11122_vm7, %v11192_v42, 0.0  ;;  %v29249_v42 = vld [vmem:[%s36701_s18 + $0x118] sm:$0xff]  }
 0xf53   :  { %v11203_v37 = vadd.f32 %v11202_v4, %v11201_v58 }
 0xf55   :  { %v11205_v45 = vadd.f32 %v11204_v12, %v11203_v37 }
 0xf57   :  { %v11207_v48 = vadd.f32 %v11206_v14, %v11205_v45 }
 0xf59   :  { %v11209_v36 = vadd.f32 %v11208_v43, %v11207_v48 }
 0xf5b   :  { %v11211_v15 = vadd.f32 %v11210_v27, %v11209_v36 }
 0xf5d   :  { %v11213_v38 = vadd.f32 %v11212_v59, %v11211_v15  ;;  %v22390_v15 = vld [vmem:[%s36702_s19 + $0x2] sm:$0x3] }
 0xf5f   :  { %v11215_v11 = vadd.f32 %v11214_v7, %v11213_v38  ;;  %v32669_v38 = vsel %vm1387_vm4, %v12528_v57, 0  ;;  %v29244_v7 = vld [vmem:[%s36701_s18 + $0x8] sm:$0xff]   ;;  %v29295_v57 = vld [vmem:[%s36701_s18 + $0x1d0] sm:$0xff]  }
 0xf61   :  { %v11217_v2 = vadd.f32 %v11216_v3, %v11215_v11  ;;  %v29245_v11 = vld [vmem:[%s36701_s18 + $0x108] sm:$0xff]   ;;  %v12531_v3 = vand.u32 %v22390_v15, %v32669_v38 }
 0xf63   :  { %v11219_v22 = vadd.f32 %v11218_v5, %v11217_v2  ;;  %v29246_v5 = vld [vmem:[%s36701_s18 + $0x10] sm:$0xff]   ;;  %v29248_v2 = vld [vmem:[%s36701_s18 + $0x18] sm:$0xff]  }
 0xf65   :  { %v11221_v8 = vadd.f32 %v11220_v62, %v11219_v22  ;;  %v29247_v62 = vld [vmem:[%s36701_s18 + $0x110] sm:$0xff]   ;;  %v29250_v22 = vld [vmem:[%s36701_s18 + $0x20] sm:$0xff]  }
 0xf67   :  { %v11223_v34 = vadd.f32 %v11222_v16, %v11221_v8  ;;  %v29251_v8 = vld [vmem:[%s36701_s18 + $0x120] sm:$0xff]   ;;  %v29252_v16 = vld [vmem:[%s36701_s18 + $0x28] sm:$0xff]  }
 0xf69   :  { %v11224_v21 = vrot.slane %v11223_v34, 4 }
 0xf6b   :  { %v11225_v32 = vadd.f32 %v11224_v21, %v11223_v34  ;;  %v29253_v34 = vld [vmem:[%s36701_s18 + $0x128] sm:$0xff]   ;;  %v29254_v21 = vld [vmem:[%s36701_s18 + $0x30] sm:$0xff]  }
 0xf6d   :  { %v11226_v24 = vrot.slane %v11225_v32, 2 }
 0xf6f   :  { %v11227_v50 = vadd.f32 %v11226_v24, %v11225_v32  ;;  %v29255_v32 = vld [vmem:[%s36701_s18 + $0x130] sm:$0xff]   ;;  %v29256_v24 = vld [vmem:[%s36701_s18 + $0x38] sm:$0xff]  }
 0xf71   :  { %v11228_v1 = vrot.slane %v11227_v50, 1 }
 0xf73   :  { %v11229_v9 = vadd.f32 %v11228_v1, %v11227_v50  ;;  %v29257_v50 = vld [vmem:[%s36701_s18 + $0x138] sm:$0xff]   ;;  %v29258_v1 = vld [vmem:[%s36701_s18 + $0x40] sm:$0xff]  }
 0xf75   :  { %v11230_v60 = vmul.f32 0.0078125, %v11229_v9  ;;  %v29259_v9 = vld [vmem:[%s36701_s18 + $0x140] sm:$0xff]  }
 0xf77   :  { %v11231_v61 = vadd.f32 1e-05, %v11230_v60  ;;  %v29260_v60 = vld [vmem:[%s36701_s18 + $0x48] sm:$0xff]  }
 0xf79   :  { %29571 = vrsqrt.f32 %v11231_v61  ;;  %v29261_v61 = vld [vmem:[%s36701_s18 + $0x148] sm:$0xff]  }
 0xf83   :  { %v29572_v30 = vpop.eup %29571 }
 0xf84   :  { %v11233_v51 = vmul.f32 %v29572_v30, %v32522_v40  ;;  %v11234_v53 = vmul.f32 %v29572_v30, %v32525_v56  ;;  %v11235_v55 = vmul.f32 %v29572_v30, %v32528_v35  ;;  %v11236_v18 = vmul.f32 %v29572_v30, %v32531_v49 }
 0xf85   :  { %v11237_v28 = vmul.f32 %v29572_v30, %v32534_v33  ;;  %v11238_v47 = vmul.f32 %v29572_v30, %v32536_v39  ;;  %v11239_v13 = vmul.f32 %v29572_v30, %v32538_v44  ;;  %v11240_v4 = vmul.f32 %v29572_v30, %v32540_v6 }
 0xf86   :  { %v11241_v12 = vmul.f32 %v29572_v30, %v32542_v10  ;;  %v11242_v58 = vmul.f32 %v29572_v30, %v32544_v19  ;;  %v11243_v40 = vmul.f32 %v29572_v30, %v32546_v63  ;;  %v11244_v56 = vmul.f32 %v29572_v30, %v32548_v54 }
 0xf87   :  { %v11245_v35 = vmul.f32 %v29572_v30, %v32550_v26  ;;  %v11246_v49 = vmul.f32 %v29572_v30, %v32552_v17  ;;  %v11247_v33 = vmul.f32 %v29572_v30, %v32554_v41  ;;  %v11248_v39 = vmul.f32 %v29572_v30, %v32556_v46  ;;  %v29262_v30 = vld [vmem:[%s36701_s18 + $0x50] sm:$0xff]  }
 0xf88   :  { %v11249_v52 = vmax.f32 %v11233_v51, 0.0  ;;  %v11250_v44 = vmax.f32 %v11234_v53, 0.0  ;;  %v11251_v0 = vmax.f32 %v11235_v55, 0.0  ;;  %v11252_v6 = vmax.f32 %v11236_v18, 0.0  ;;  %v29263_v51 = vld [vmem:[%s36701_s18 + $0x150] sm:$0xff]   ;;  %v29264_v53 = vld [vmem:[%s36701_s18 + $0x58] sm:$0xff]  }
 0xf89   :  { %v11253_v20 = vmax.f32 %v11237_v28, 0.0  ;;  %v11254_v10 = vmax.f32 %v11238_v47, 0.0  ;;  %v11255_v31 = vmax.f32 %v11239_v13, 0.0  ;;  %v11256_v19 = vmax.f32 %v11240_v4, 0.0  ;;  %v29265_v55 = vld [vmem:[%s36701_s18 + $0x158] sm:$0xff]   ;;  %v29266_v18 = vld [vmem:[%s36701_s18 + $0x60] sm:$0xff]  }
 0xf8a   :  { %v11257_v37 = vmax.f32 %v11241_v12, 0.0  ;;  %v11258_v63 = vmax.f32 %v11242_v58, 0.0  ;;  %v11259_v45 = vmax.f32 %v11243_v40, 0.0  ;;  %v11260_v54 = vmax.f32 %v11244_v56, 0.0  ;;  %v29267_v28 = vld [vmem:[%s36701_s18 + $0x160] sm:$0xff]   ;;  %v29268_v47 = vld [vmem:[%s36701_s18 + $0x68] sm:$0xff]  }
 0xf8b   :  { %v11261_v14 = vmax.f32 %v11245_v35, 0.0  ;;  %v11262_v26 = vmax.f32 %v11246_v49, 0.0  ;;  %v11263_v48 = vmax.f32 %v11247_v33, 0.0  ;;  %v11264_v17 = vmax.f32 %v11248_v39, 0.0  ;;  %v29269_v13 = vld [vmem:[%s36701_s18 + $0x168] sm:$0xff]   ;;  %v29270_v4 = vld [vmem:[%s36701_s18 + $0x70] sm:$0xff]  }
 0xf8c   :  { %v32622_v43 = vpack.c.bf16 %v11250_v44, %v11249_v52  ;;  %v32624_v41 = vpack.c.bf16 %v11252_v6, %v11251_v0  ;;  %v32626_v46 = vpack.c.bf16 %v11254_v10, %v11253_v20  ;;  %v32628_v27 = vpack.c.bf16 %v11256_v19, %v11255_v31  ;;  %v29271_v12 = vld [vmem:[%s36701_s18 + $0x170] sm:$0xff]   ;;  %v29272_v58 = vld [vmem:[%s36701_s18 + $0x78] sm:$0xff]   ;;  %v29274_v56 = vld [vmem:[%s36701_s18 + $0x80] sm:$0xff]  }
 0xf8d   :  { %v32630_v59 = vpack.c.bf16 %v11258_v63, %v11257_v37  ;;  %v32632_v36 = vpack.c.bf16 %v11260_v54, %v11259_v45  ;;  %v32634_v23 = vpack.c.bf16 %v11262_v26, %v11261_v14  ;;  %v32636_v29 = vpack.c.bf16 %v11264_v17, %v11263_v48  ;;  %v29273_v40 = vld [vmem:[%s36701_s18 + $0x178] sm:$0xff]   ;;  %v29275_v35 = vld [vmem:[%s36701_s18 + $0x180] sm:$0xff]   ;;  %v29276_v49 = vld [vmem:[%s36701_s18 + $0x88] sm:$0xff]  }
 0xf8e   :  { %26344 = vmatprep.subr.bf16.mxu1 %v32622_v43  ;;  %26424 = vmatprep.subr.bf16.mxu0 %v32622_v43  ;;  %v29277_v33 = vld [vmem:[%s36701_s18 + $0x188] sm:$0xff]   ;;  %v29278_v39 = vld [vmem:[%s36701_s18 + $0x90] sm:$0xff]   ;;  %v29280_v44 = vld [vmem:[%s36701_s18 + $0x98] sm:$0xff]  }
 0xf8f   :  { %37110 = vst [vmem:[#allocation10_spill] sm:$0xff] %v32630_v59  ;;  %37111 = vst [vmem:[#allocation8_spill] sm:$0xff] %v32632_v36  ;;  %26345 = vmatpush3.bf16.msra.mxu1 %v32622_v43  ;;  %26425 = vmatpush3.bf16.msra.mxu0 %v32622_v43  ;;  %v29279_v52 = vld [vmem:[%s36701_s18 + $0x190] sm:$0xff]   ;;  %v29281_v0 = vld [vmem:[%s36701_s18 + $0x198] sm:$0xff]  }
 0xf90   :  { %37112 = vst [vmem:[#allocation14_spill] sm:$0xff] %v32634_v23  ;;  %37113 = vst [vmem:[#allocation12_spill] sm:$0xff] %v32636_v29  ;;  %26346 = vmatprep.subr.bf16.mxu1 %v32624_v41  ;;  %26426 = vmatprep.subr.bf16.mxu0 %v32624_v41  ;;  %v29282_v6 = vld [vmem:[%s36701_s18 + $0xa0] sm:$0xff]   ;;  %v29284_v10 = vld [vmem:[%s36701_s18 + $0xa8] sm:$0xff]  }
 0xf91   :  { %v29283_v20 = vld [vmem:[%s36701_s18 + $0x1a0] sm:$0xff]   ;;  %v29285_v31 = vld [vmem:[%s36701_s18 + $0x1a8] sm:$0xff]   ;;  %v29286_v19 = vld [vmem:[%s36701_s18 + $0xb0] sm:$0xff]  }
 0xf92   :  { %v29287_v37 = vld [vmem:[%s36701_s18 + $0x1b0] sm:$0xff]   ;;  %v29288_v63 = vld [vmem:[%s36701_s18 + $0xb8] sm:$0xff]   ;;  %v29290_v54 = vld [vmem:[%s36701_s18 + $0xc0] sm:$0xff]  }
 0xf93   :  { %26347 = vmatpush3.bf16.msra.mxu1 %v32624_v41  ;;  %26427 = vmatpush3.bf16.msra.mxu0 %v32624_v41  ;;  %v29289_v45 = vld [vmem:[%s36701_s18 + $0x1b8] sm:$0xff]   ;;  %v29291_v14 = vld [vmem:[%s36701_s18 + $0x1c0] sm:$0xff]   ;;  %v29292_v26 = vld [vmem:[%s36701_s18 + $0xc8] sm:$0xff]  }
 0xf94   :  { %26348 = vmatprep.subr.bf16.mxu1 %v32626_v46  ;;  %26428 = vmatprep.subr.bf16.mxu0 %v32626_v46  ;;  %v29293_v48 = vld [vmem:[%s36701_s18 + $0x1c8] sm:$0xff]   ;;  %v11850_v17 = vld [vmem:[%s36702_s19] sm:$0x3] }
 0xf95   :  { %v32855_v15 = vand.u32 %v32669_v38, %v11850_v17 }
 0xf97   :  { %26349 = vmatpush3.bf16.msra.mxu1 %v32626_v46  ;;  %26429 = vmatpush3.bf16.msra.mxu0 %v32626_v46 }
 0xf98   :  { %26350 = vmatprep.subr.bf16.mxu1 %v32628_v27  ;;  %26430 = vmatprep.subr.bf16.mxu0 %v32628_v27 }
 0xf9b   :  { %26351 = vmatpush3.bf16.msra.mxu1 %v32628_v27  ;;  %26431 = vmatpush3.bf16.msra.mxu0 %v32628_v27 }
 0xf9c   :  { %26352 = vmatprep.subr.bf16.mxu1 %v32630_v59  ;;  %26432 = vmatprep.subr.bf16.mxu0 %v32630_v59 }
 0xf9f   :  { %26353 = vmatpush3.bf16.msra.mxu1 %v32630_v59  ;;  %26433 = vmatpush3.bf16.msra.mxu0 %v32630_v59 }
 0xfa0   :  { %26354 = vmatprep.subr.bf16.mxu1 %v32632_v36  ;;  %26434 = vmatprep.subr.bf16.mxu0 %v32632_v36 }
 0xfa3   :  { %26355 = vmatpush3.bf16.msra.mxu1 %v32632_v36  ;;  %26435 = vmatpush3.bf16.msra.mxu0 %v32632_v36 }
 0xfa4   :  { %26356 = vmatprep.subr.bf16.mxu1 %v32634_v23  ;;  %26436 = vmatprep.subr.bf16.mxu0 %v32634_v23 }
 0xfa7   :  { %26357 = vmatpush3.bf16.msra.mxu1 %v32634_v23  ;;  %26437 = vmatpush3.bf16.msra.mxu0 %v32634_v23 }
 0xfa8   :  { %26358 = vmatprep.subr.bf16.mxu1 %v32636_v29  ;;  %26438 = vmatprep.subr.bf16.mxu0 %v32636_v29 }
 0xfab   :  { %26359 = vmatpush3.bf16.msra.mxu1 %v32636_v29  ;;  %26439 = vmatpush3.bf16.msra.mxu0 %v32636_v29 }
 0xfac   :  { %26636 = vmatprep.subr.bf16.mxu1 %v32622_v43  ;;  %26504 = vmatprep.subr.bf16.mxu0 %v12531_v3 }
 0xfae   :  { %26361 = vmatmul.mubr.bf16.vlgmr.msra.gmra.mrb[48].mxu1 %v29244_v7  ;;  %26441 = vmatmul.mubr.bf16.vlgmr.msra.gmra.mrb[176].mxu0 %v29245_v11  ;;  %v29296_v7 = vld [vmem:[%s36701_s18 + $0xd8] sm:$0xff]  }
 0xfaf   :  { %26637 = vmatpush3.bf16.msra.mxu1 %v32622_v43  ;;  %26364 = vmatprep.mubr.bf16.mxu1 %v29246_v5  ;;  %v29297_v11 = vld [vmem:[%s36701_s18 + $0x1d8] sm:$0xff]   ;;  %v29299_v5 = vld [vmem:[%s36701_s18 + $0x1e0] sm:$0xff]  }
 0xfb0   :  { %26638 = vmatprep.subr.bf16.mxu1 %v32624_v41  ;;  %26444 = vmatprep.mubr.bf16.mxu0 %v29247_v62  ;;  %v29300_v62 = vld [vmem:[%s36701_s18 + $0xe8] sm:$0xff]  }
 0xfb1   :  { %26505 = vmatpush3.bf16.msra.mxu0 %v12531_v3  ;;  %v29298_v3 = vld [vmem:[%s36701_s18 + $0xe0] sm:$0xff]  }
 0xfb2   :  { %26570 = vmatprep.subr.bf16.mxu0 %v32855_v15 }
 0xfb3   :  { %26639 = vmatpush3.bf16.msra.mxu1 %v32624_v41 }
 0xfb4   :  { %26640 = vmatprep.subr.bf16.mxu1 %v32626_v46 }
 0xfb6   :  { %26365 = vmatmul.mubr.bf16.gmra.mrb[52].mxu1 %v29248_v2  ;;  %26445 = vmatmul.mubr.bf16.gmra.mrb[180].mxu0 %v29249_v42  ;;  %v29301_v2 = vld [vmem:[%s36701_s18 + $0x1e8] sm:$0xff]   ;;  %v29302_v42 = vld [vmem:[%s36701_s18 + $0xf0] sm:$0xff]  }
 0xfb7   :  { %26641 = vmatpush3.bf16.msra.mxu1 %v32626_v46  ;;  %26368 = vmatprep.mubr.bf16.mxu1 %v29250_v22  ;;  %v29303_v22 = vld [vmem:[%s36701_s18 + $0x1f0] sm:$0xff]  }
 0xfb8   :  { %26642 = vmatprep.subr.bf16.mxu1 %v32628_v27  ;;  %26448 = vmatprep.mubr.bf16.mxu0 %v29251_v8  ;;  %v29304_v8 = vld [vmem:[%s36701_s18 + $0xf8] sm:$0xff]  }
 0xfbb   :  { %26643 = vmatpush3.bf16.msra.mxu1 %v32628_v27 }
 0xfbc   :  { %26644 = vmatprep.subr.bf16.mxu1 %v32630_v59 }
 0xfbe   :  { %26369 = vmatmul.mubr.bf16.gmra.mrb[56].mxu1 %v29252_v16  ;;  %26449 = vmatmul.mubr.bf16.gmra.mrb[184].mxu0 %v29253_v34  ;;  %v29305_v16 = vld [vmem:[%s36701_s18 + $0x1f8] sm:$0xff]   ;;  %v29306_v34 = vld [vmem:[%s36701_s18 + $0x200] sm:$0xff]  }
 0xfbf   :  { %26645 = vmatpush3.bf16.msra.mxu1 %v32630_v59  ;;  %26372 = vmatprep.mubr.bf16.mxu1 %v29254_v21  ;;  %v29307_v21 = vld [vmem:[%s36701_s18 + $0x208] sm:$0xff]  }
 0xfc0   :  { %26646 = vmatprep.subr.bf16.mxu1 %v32632_v36  ;;  %26452 = vmatprep.mubr.bf16.mxu0 %v29255_v32  ;;  %v29308_v32 = vld [vmem:[%s36701_s18 + $0x210] sm:$0xff]  }
 0xfc3   :  { %26647 = vmatpush3.bf16.msra.mxu1 %v32632_v36 }
 0xfc4   :  { %26648 = vmatprep.subr.bf16.mxu1 %v32634_v23 }
 0xfc6   :  { %26373 = vmatmul.mubr.bf16.gmra.mrb[60].mxu1 %v29256_v24  ;;  %26453 = vmatmul.mubr.bf16.gmra.mrb[188].mxu0 %v29257_v50  ;;  %v29309_v24 = vld [vmem:[%s36701_s18 + $0x218] sm:$0xff]   ;;  %v29310_v50 = vld [vmem:[%s36701_s18 + $0x220] sm:$0xff]  }
 0xfc7   :  { %26649 = vmatpush3.bf16.msra.mxu1 %v32634_v23  ;;  %26376 = vmatprep.mubr.bf16.mxu1 %v29258_v1  ;;  %v29311_v1 = vld [vmem:[%s36701_s18 + $0x228] sm:$0xff]  }
 0xfc8   :  { %26650 = vmatprep.subr.bf16.mxu1 %v32636_v29  ;;  %26456 = vmatprep.mubr.bf16.mxu0 %v29259_v9  ;;  %v29312_v9 = vld [vmem:[%s36701_s18 + $0x230] sm:$0xff]  }
 0xfcb   :  { %26651 = vmatpush3.bf16.msra.mxu1 %v32636_v29 }
 0xfcc   :  { %26782 = vmatprep.subr.bf16.mxu1 %v32622_v43 }
 0xfce   :  { %26377 = vmatmul.mubr.bf16.gmra.mrb[64].mxu1 %v29260_v60  ;;  %26457 = vmatmul.mubr.bf16.gmra.mrb[192].mxu0 %v29261_v61  ;;  %v29313_v60 = vld [vmem:[%s36701_s18 + $0x238] sm:$0xff]   ;;  %v29314_v61 = vld [vmem:[%s36701_s18 + $0x240] sm:$0xff]  }
 0xfcf   :  { %26380 = vmatprep.mubr.bf16.mxu1 %v29262_v30  ;;  %26460 = vmatprep.mubr.bf16.mxu0 %v29263_v51  ;;  %v29315_v30 = vld [vmem:[%s36701_s18 + $0x248] sm:$0xff]   ;;  %v29316_v51 = vld [vmem:[%s36701_s18 + $0x250] sm:$0xff]  }
 0xfd6   :  { %26381 = vmatmul.mubr.bf16.gmra.mrb[68].mxu1 %v29264_v53  ;;  %26461 = vmatmul.mubr.bf16.gmra.mrb[196].mxu0 %v29265_v55  ;;  %v29317_v53 = vld [vmem:[%s36701_s18 + $0x258] sm:$0xff]   ;;  %v29318_v55 = vld [vmem:[%s36701_s18 + $0x260] sm:$0xff]  }
 0xfd7   :  { %26384 = vmatprep.mubr.bf16.mxu1 %v29266_v18  ;;  %26464 = vmatprep.mubr.bf16.mxu0 %v29267_v28  ;;  %v29319_v18 = vld [vmem:[%s36701_s18 + $0x268] sm:$0xff]   ;;  %v29320_v28 = vld [vmem:[%s36701_s18 + $0x270] sm:$0xff]  }
 0xfde   :  { %26385 = vmatmul.mubr.bf16.gmra.mrb[72].mxu1 %v29268_v47  ;;  %26465 = vmatmul.mubr.bf16.gmra.mrb[200].mxu0 %v29269_v13  ;;  %v29321_v47 = vld [vmem:[%s36701_s18 + $0x278] sm:$0xff]   ;;  %v29322_v13 = vld [vmem:[%s36701_s18 + $0x280] sm:$0xff]  }
 0xfdf   :  { %26388 = vmatprep.mubr.bf16.mxu1 %v29270_v4  ;;  %26468 = vmatprep.mubr.bf16.mxu0 %v29271_v12  ;;  %v29323_v4 = vld [vmem:[%s36701_s18 + $0x288] sm:$0xff]   ;;  %v29324_v12 = vld [vmem:[%s36701_s18 + $0x290] sm:$0xff]  }
 0xfe6   :  { %26389 = vmatmul.mubr.bf16.gmra.mrb[76].mxu1 %v29272_v58  ;;  %26469 = vmatmul.mubr.bf16.gmra.mrb[204].mxu0 %v29273_v40  ;;  %v29325_v58 = vld [vmem:[%s36701_s18 + $0x298] sm:$0xff]   ;;  %v29326_v40 = vld [vmem:[%s36701_s18 + $0x2a0] sm:$0xff]  }
 0xfe7   :  { %26392 = vmatprep.mubr.bf16.mxu1 %v29274_v56  ;;  %26472 = vmatprep.mubr.bf16.mxu0 %v29275_v35  ;;  %v29327_v56 = vld [vmem:[%s36701_s18 + $0x2a8] sm:$0xff]   ;;  %v29328_v35 = vld [vmem:[%s36701_s18 + $0x2b0] sm:$0xff]  }
 0xfee   :  { %26393 = vmatmul.mubr.bf16.gmra.mrb[80].mxu1 %v29276_v49  ;;  %26473 = vmatmul.mubr.bf16.gmra.mrb[208].mxu0 %v29277_v33 }
 0xfef   :  { %26396 = vmatprep.mubr.bf16.mxu1 %v29278_v39  ;;  %26476 = vmatprep.mubr.bf16.mxu0 %v29279_v52  ;;  %v29329_v52 = vld [vmem:[%s36701_s18 + $0x2b8] sm:$0xff]  }
 0xff6   :  { %26397 = vmatmul.mubr.bf16.gmra.mrb[84].mxu1 %v29280_v44  ;;  %26477 = vmatmul.mubr.bf16.gmra.mrb[212].mxu0 %v29281_v0 }
 0xff7   :  { %26400 = vmatprep.mubr.bf16.mxu1 %v29282_v6  ;;  %26480 = vmatprep.mubr.bf16.mxu0 %v29283_v20  ;;  %v29330_v6 = vld [vmem:[%s36701_s18 + $0x2c0] sm:$0xff]  }
 0xffe   :  { %26401 = vmatmul.mubr.bf16.gmra.mrb[88].mxu1 %v29284_v10  ;;  %26481 = vmatmul.mubr.bf16.gmra.mrb[216].mxu0 %v29285_v31 }
 0xfff   :  { %26404 = vmatprep.mubr.bf16.mxu1 %v29286_v19  ;;  %26484 = vmatprep.mubr.bf16.mxu0 %v29287_v37 }
0x1006   :  { %26405 = vmatmul.mubr.bf16.gmra.mrb[92].mxu1 %v29288_v63  ;;  %26485 = vmatmul.mubr.bf16.gmra.mrb[220].mxu0 %v29289_v45 }
0x1007   :  { %26408 = vmatprep.mubr.bf16.mxu1 %v29290_v54  ;;  %26488 = vmatprep.mubr.bf16.mxu0 %v29291_v14  ;;  %v22551_v54 = vld [vmem:[%s36702_s19 + $0x4] sm:$0x3] }
0x100e   :  { %26409 = vmatmul.mubr.bf16.gmra.mrb[96].mxu1 %v29292_v26  ;;  %26489 = vmatmul.mubr.bf16.gmra.mrb[224].mxu0 %v29293_v48  ;;  %v33000_v48 = vand.u32 %v22551_v54, %v32669_v38 }
0x100f   :  { %26412 = vmatprep.mubr.bf16.mxu1 %v29294_v25  ;;  %26492 = vmatprep.mubr.bf16.mxu0 %v29295_v57  ;;  %v29331_v25 = vld [vmem:[%s36701_s18 + $0x2c8] sm:$0xff]  }
0x1016   :  { %26413 = vmatmul.mubr.bf16.gmra.mrb[100].mxu1 %v29296_v7  ;;  %26493 = vmatmul.mubr.bf16.gmra.mrb[228].mxu0 %v29297_v11  ;;  %v29332_v11 = vld [vmem:[%s36701_s18 + $0x2d0] sm:$0xff]  }
0x1017   :  { %26416 = vmatprep.mubr.bf16.mxu1 %v29298_v3  ;;  %26496 = vmatprep.mubr.bf16.mxu0 %v29299_v5 }
0x101e   :  { %26417 = vmatmul.mubr.bf16.gmra.mrb[104].mxu1 %v29300_v62  ;;  %26497 = vmatmul.mubr.bf16.gmra.mrb[232].mxu0 %v29301_v2 }
0x101f   :  { %26420 = vmatprep.mubr.bf16.mxu1 %v29302_v42  ;;  %26500 = vmatprep.mubr.bf16.mxu0 %v29303_v22 }
0x1026   :  { %26421 = vmatmul.mubr.bf16.gmra.mrb[108].mxu1 %v29304_v8  ;;  %26501 = vmatmul.mubr.bf16.gmra.mrb[236].mxu0 %v29305_v16 }
0x1027   :  { %26652 = vmatprep.mubr.bf16.mxu1 %v29306_v34 }
0x102e   :  { %26653 = vmatmul.mubr.bf16.vlgmr.msra.gmra.mrb[112].mxu1 %v29307_v21  ;;  %v29333_v21 = vld [vmem:[%s36701_s18 + $0x2d8] sm:$0xff]  }
0x102f   :  { %26783 = vmatpush3.bf16.msra.mxu1 %v32622_v43  ;;  %26656 = vmatprep.mubr.bf16.mxu1 %v29308_v32 }
0x1030   :  { %26784 = vmatprep.subr.bf16.mxu1 %v32624_v41 }
0x1033   :  { %26785 = vmatpush3.bf16.msra.mxu1 %v32624_v41 }
0x1034   :  { %26786 = vmatprep.subr.bf16.mxu1 %v32626_v46 }
0x1036   :  { %26657 = vmatmul.mubr.bf16.gmra.mrb[116].mxu1 %v29309_v24 }
0x1037   :  { %26787 = vmatpush3.bf16.msra.mxu1 %v32626_v46  ;;  %26660 = vmatprep.mubr.bf16.mxu1 %v29310_v50  ;;  %v29334_v50 = vld [vmem:[%s36701_s18 + $0x2e0] sm:$0xff]  }
0x1038   :  { %26788 = vmatprep.subr.bf16.mxu1 %v32628_v27 }
0x103b   :  { %26789 = vmatpush3.bf16.msra.mxu1 %v32628_v27 }
0x103c   :  { %26790 = vmatprep.subr.bf16.mxu1 %v32630_v59 }
0x103e   :  { %26661 = vmatmul.mubr.bf16.gmra.mrb[120].mxu1 %v29311_v1 }
0x103f   :  { %26791 = vmatpush3.bf16.msra.mxu1 %v32630_v59  ;;  %26664 = vmatprep.mubr.bf16.mxu1 %v29312_v9 }
0x1040   :  { %26792 = vmatprep.subr.bf16.mxu1 %v32632_v36 }
0x1043   :  { %26793 = vmatpush3.bf16.msra.mxu1 %v32632_v36 }
0x1044   :  { %26794 = vmatprep.subr.bf16.mxu1 %v32634_v23 }
0x1046   :  { %26665 = vmatmul.mubr.bf16.gmra.mrb[124].mxu1 %v29313_v60 }
0x1047   :  { %26795 = vmatpush3.bf16.msra.mxu1 %v32634_v23  ;;  %26668 = vmatprep.mubr.bf16.mxu1 %v29314_v61 }
0x1048   :  { %26796 = vmatprep.subr.bf16.mxu1 %v32636_v29 }
0x104b   :  { %26797 = vmatpush3.bf16.msra.mxu1 %v32636_v29 }
0x104c   :  { %26928 = vmatprep.subr.bf16.mxu1 %v32622_v43 }
0x104e   :  { %26669 = vmatmul.mubr.bf16.gmra.mrb[128].mxu1 %v29315_v30 }
0x104f   :  { %26672 = vmatprep.mubr.bf16.mxu1 %v29316_v51 }
0x1056   :  { %26673 = vmatmul.mubr.bf16.gmra.mrb[132].mxu1 %v29317_v53 }
0x1057   :  { %26676 = vmatprep.mubr.bf16.mxu1 %v29318_v55 }
0x105e   :  { %26677 = vmatmul.mubr.bf16.gmra.mrb[136].mxu1 %v29319_v18 }
0x105f   :  { %26680 = vmatprep.mubr.bf16.mxu1 %v29320_v28 }
0x1066   :  { %26681 = vmatmul.mubr.bf16.gmra.mrb[140].mxu1 %v29321_v47  ;;  %v29335_v47 = vld [vmem:[%s36701_s18 + $0x2e8] sm:$0xff]  }
0x1067   :  { %26684 = vmatprep.mubr.bf16.mxu1 %v29322_v13 }
0x106e   :  { %26685 = vmatmul.mubr.bf16.gmra.mrb[144].mxu1 %v29323_v4 }
0x106f   :  { %26688 = vmatprep.mubr.bf16.mxu1 %v29324_v12  ;;  %v29336_v12 = vld [vmem:[%s36701_s18 + $0x2f0] sm:$0xff]  }
0x1076   :  { %26689 = vmatmul.mubr.bf16.gmra.mrb[148].mxu1 %v29325_v58 }
0x1077   :  { %26692 = vmatprep.mubr.bf16.mxu1 %v29326_v40 }
0x107e   :  { %26693 = vmatmul.mubr.bf16.gmra.mrb[152].mxu1 %v29327_v56 }
0x107f   :  { %26696 = vmatprep.mubr.bf16.mxu1 %v29328_v35  ;;  %v29349_v35 = vld [vmem:[%s36701_s18 + $0x358] sm:$0xff]  }
0x1081   :  { %v26442_v49 = vpop.f32.mrb[176].mxu0  ;;  %v32973_v33 = vpop.f32.mrb[48].mxu1 }
0x1082   :  { %v12142_v39 = vpop.f32.mrb[177].mxu0  ;;  %v32978_v44 = vpop.f32.mrb[49].mxu1 }
0x1083   :  { %v26443_v0 = vpop.f32.mrb[178].mxu0  ;;  %v32983_v20 = vpop.f32.mrb[50].mxu1 }
0x1084   :  { %v12398_v10 = vpack.c.bf16 %v26443_v0, %v26442_v49  ;;  %v12145_v31 = vpop.f32.mrb[179].mxu0  ;;  %v32987_v37 = vpop.f32.mrb[51].mxu1 }
0x1085   :  { %v12397_v63 = vpack.c.bf16 %v12145_v31, %v12142_v39  ;;  %v29337_v31 = vld [vmem:[%s36701_s18 + $0x2f8] sm:$0xff]  }
0x1086   :  { %26697 = vmatmul.mubr.bf16.gmra.mrb[156].mxu1 %v29329_v52 }
0x1087   :  { %26506 = vmatprep.mubr.msk.bf16.mxu0 %vm11122_vm7, %v12397_v63  ;;  %26700 = vmatprep.mubr.bf16.mxu1 %v29330_v6 }
0x1088   :  { %26507 = vmatmul.mubr.msk.bf16.vlgmr.msra.gmra.mrb[240].mxu0 %vm11122_vm7, %v12398_v10 }
0x1089   :  { %v26446_v14 = vpop.f32.mrb[180].mxu0  ;;  %26571 = vmatpush3.bf16.msra.mxu0 %v32855_v15  ;;  %v32997_v26 = vpop.f32.mrb[52].mxu1 }
0x108a   :  { %v12158_v17 = vpop.f32.mrb[181].mxu0  ;;  %v33005_v57 = vpop.f32.mrb[53].mxu1  ;;  %26716 = vmatprep.subr.bf16.mxu0 %v33000_v48 }
0x108b   :  { %v26447_v7 = vpop.f32.mrb[182].mxu0  ;;  %v33011_v15 = vpop.f32.mrb[54].mxu1 }
0x108c   :  { %v12400_v3 = vpack.c.bf16 %v26447_v7, %v26446_v14  ;;  %v12161_v5 = vpop.f32.mrb[183].mxu0  ;;  %v33015_v2 = vpop.f32.mrb[55].mxu1  ;;  %v29338_v14 = vld [vmem:[%s36701_s18 + $0x300] sm:$0xff]  }
0x108d   :  { %v12399_v42 = vpack.c.bf16 %v12161_v5, %v12158_v17 }
0x108e   :  { %26701 = vmatmul.mubr.bf16.gmra.mrb[160].mxu1 %v29331_v25 }
0x108f   :  { %26510 = vmatprep.mubr.msk.bf16.mxu0 %vm11122_vm7, %v12399_v42  ;;  %26704 = vmatprep.mubr.bf16.mxu1 %v29332_v11  ;;  %v29346_v11 = vld [vmem:[%s36701_s18 + $0x340] sm:$0xff]  }
0x1090   :  { %26511 = vmatmul.mubr.msk.bf16.gmra.mrb[244].mxu0 %vm11122_vm7, %v12400_v3 }
0x1091   :  { %v26450_v8 = vpop.f32.mrb[184].mxu0  ;;  %v33021_v16 = vpop.f32.mrb[56].mxu1 }
0x1092   :  { %v12174_v34 = vpop.f32.mrb[185].mxu0  ;;  %v33026_v32 = vpop.f32.mrb[57].mxu1 }
0x1093   :  { %v26451_v24 = vpop.f32.mrb[186].mxu0  ;;  %v33031_v1 = vpop.f32.mrb[58].mxu1 }
0x1094   :  { %v12402_v9 = vpack.c.bf16 %v26451_v24, %v26450_v8  ;;  %v12177_v60 = vpop.f32.mrb[187].mxu0  ;;  %v33035_v30 = vpop.f32.mrb[59].mxu1  ;;  %v29339_v24 = vld [vmem:[%s36701_s18 + $0x308] sm:$0xff]  }
0x1095   :  { %v12401_v51 = vpack.c.bf16 %v12177_v60, %v12174_v34 }
0x1096   :  { %26705 = vmatmul.mubr.bf16.gmra.mrb[164].mxu1 %v29333_v21 }
0x1097   :  { %26514 = vmatprep.mubr.msk.bf16.mxu0 %vm11122_vm7, %v12401_v51  ;;  %26708 = vmatprep.mubr.bf16.mxu1 %v29334_v50 }
0x1098   :  { %26515 = vmatmul.mubr.msk.bf16.gmra.mrb[248].mxu0 %vm11122_vm7, %v12402_v9 }
0x1099   :  { %v26454_v55 = vpop.f32.mrb[188].mxu0  ;;  %v33041_v18 = vpop.f32.mrb[60].mxu1 }
0x109a   :  { %v12190_v28 = vpop.f32.mrb[189].mxu0  ;;  %v33046_v13 = vpop.f32.mrb[61].mxu1 }
0x109b   :  { %v26455_v4 = vpop.f32.mrb[190].mxu0  ;;  %v33051_v58 = vpop.f32.mrb[62].mxu1 }
0x109c   :  { %v12404_v40 = vpack.c.bf16 %v26455_v4, %v26454_v55  ;;  %v12193_v56 = vpop.f32.mrb[191].mxu0  ;;  %v33055_v49 = vpop.f32.mrb[63].mxu1 }
0x109d   :  { %v12403_v39 = vpack.c.bf16 %v12193_v56, %v12190_v28 }
0x109e   :  { %26709 = vmatmul.mubr.bf16.gmra.mrb[168].mxu1 %v29335_v47 }
0x109f   :  { %26518 = vmatprep.mubr.msk.bf16.mxu0 %vm11122_vm7, %v12403_v39  ;;  %26712 = vmatprep.mubr.bf16.mxu1 %v29336_v12  ;;  %v29340_v12 = vld [vmem:[%s36701_s18 + $0x310] sm:$0xff]  }
0x10a0   :  { %26519 = vmatmul.mubr.msk.bf16.gmra.mrb[252].mxu0 %vm11122_vm7, %v12404_v40 }
0x10a1   :  { %v26458_v0 = vpop.f32.mrb[192].mxu0  ;;  %v33061_v6 = vpop.f32.mrb[64].mxu1 }
0x10a2   :  { %v12206_v10 = vpop.f32.mrb[193].mxu0  ;;  %v33066_v63 = vpop.f32.mrb[65].mxu1 }
0x10a3   :  { %v26459_v54 = vpop.f32.mrb[194].mxu0  ;;  %v33071_v17 = vpop.f32.mrb[66].mxu1 }
0x10a4   :  { %v12406_v25 = vpack.c.bf16 %v26459_v54, %v26458_v0  ;;  %v12209_v7 = vpop.f32.mrb[195].mxu0  ;;  %v33075_v3 = vpop.f32.mrb[67].mxu1 }
0x10a5   :  { %v12405_v5 = vpack.c.bf16 %v12209_v7, %v12206_v10  ;;  %v29341_v10 = vld [vmem:[%s36701_s18 + $0x318] sm:$0xff]  }
0x10a6   :  { %26713 = vmatmul.mubr.bf16.gmra.mrb[172].mxu1 %v29337_v31 }
0x10a7   :  { %26522 = vmatprep.mubr.msk.bf16.mxu0 %vm11122_vm7, %v12405_v5  ;;  %26798 = vmatprep.mubr.bf16.mxu1 %v29338_v14  ;;  %v29344_v5 = vld [vmem:[%s36701_s18 + $0x330] sm:$0xff]  }
0x10a8   :  { %26523 = vmatmul.mubr.msk.bf16.gmra.mrb[0].mxu0 %vm11122_vm7, %v12406_v25 }
0x10a9   :  { %v26462_v8 = vpop.f32.mrb[196].mxu0  ;;  %v33081_v34 = vpop.f32.mrb[68].mxu1 }
0x10aa   :  { %v12222_v21 = vpop.f32.mrb[197].mxu0  ;;  %v33086_v50 = vpop.f32.mrb[69].mxu1 }
0x10ab   :  { %v26463_v9 = vpop.f32.mrb[198].mxu0  ;;  %v33088_v60 = vpop.f32.mrb[70].mxu1 }
0x10ac   :  { %v12408_v51 = vpack.c.bf16 %v26463_v9, %v26462_v8  ;;  %v12225_v55 = vpop.f32.mrb[199].mxu0  ;;  %v33092_v47 = vpop.f32.mrb[71].mxu1 }
0x10ad   :  { %v12407_v4 = vpack.c.bf16 %v12225_v55, %v12222_v21 }
0x10ae   :  { %26799 = vmatmul.mubr.bf16.vlgmr.msra.gmra.mrb[176].mxu1 %v29339_v24  ;;  %v29342_v24 = vld [vmem:[%s36701_s18 + $0x320] sm:$0xff]  }
0x10af   :  { %26929 = vmatpush3.bf16.msra.mxu1 %v32622_v43  ;;  %26526 = vmatprep.mubr.msk.bf16.mxu0 %vm11122_vm7, %v12407_v4 }
0x10b0   :  { %26930 = vmatprep.subr.bf16.mxu1 %v32624_v41  ;;  %26527 = vmatmul.mubr.msk.bf16.gmra.mrb[4].mxu0 %vm11122_vm7, %v12408_v51 }
0x10b1   :  { %v26466_v56 = vpop.f32.mrb[200].mxu0  ;;  %26802 = vmatprep.mubr.bf16.mxu1 %v29340_v12  ;;  %v33103_v39 = vpop.f32.mrb[72].mxu1  ;;  %v29343_v12 = vld [vmem:[%s36701_s18 + $0x328] sm:$0xff]  }
0x10b2   :  { %v12238_v0 = vpop.f32.mrb[201].mxu0  ;;  %v33108_v31 = vpop.f32.mrb[73].mxu1 }
0x10b3   :  { %26931 = vmatpush3.bf16.msra.mxu1 %v32624_v41  ;;  %v26467_v54 = vpop.f32.mrb[202].mxu0  ;;  %v33111_v14 = vpop.f32.mrb[74].mxu1 }
0x10b4   :  { %v12410_v25 = vpack.c.bf16 %v26467_v54, %v26466_v56  ;;  %26932 = vmatprep.subr.bf16.mxu1 %v32626_v46  ;;  %v12241_v7 = vpop.f32.mrb[203].mxu0  ;;  %v33116_v8 = vpop.f32.mrb[75].mxu1 }
0x10b5   :  { %v12409_v21 = vpack.c.bf16 %v12241_v7, %v12238_v0 }
0x10b6   :  { %26803 = vmatmul.mubr.bf16.gmra.mrb[180].mxu1 %v29341_v10 }
0x10b7   :  { %26933 = vmatpush3.bf16.msra.mxu1 %v32626_v46  ;;  %26530 = vmatprep.mubr.msk.bf16.mxu0 %vm11122_vm7, %v12409_v21 }
0x10b8   :  { %26934 = vmatprep.subr.bf16.mxu1 %v32628_v27  ;;  %26531 = vmatmul.mubr.msk.bf16.gmra.mrb[8].mxu0 %vm11122_vm7, %v12410_v25 }
0x10b9   :  { %v26470_v51 = vpop.f32.mrb[204].mxu0  ;;  %26806 = vmatprep.mubr.bf16.mxu1 %v29342_v24  ;;  %v33127_v55 = vpop.f32.mrb[76].mxu1 }
0x10ba   :  { %v12254_v4 = vpop.f32.mrb[205].mxu0  ;;  %v33132_v56 = vpop.f32.mrb[77].mxu1 }
0x10bb   :  { %26935 = vmatpush3.bf16.msra.mxu1 %v32628_v27  ;;  %v26471_v0 = vpop.f32.mrb[206].mxu0  ;;  %v33135_v10 = vpop.f32.mrb[78].mxu1 }
0x10bc   :  { %v12412_v54 = vpack.c.bf16 %v26471_v0, %v26470_v51  ;;  %26936 = vmatprep.subr.bf16.mxu1 %v32630_v59  ;;  %v12257_v25 = vpop.f32.mrb[207].mxu0  ;;  %v33140_v21 = vpop.f32.mrb[79].mxu1 }
0x10bd   :  { %v12411_v24 = vpack.c.bf16 %v12257_v25, %v12254_v4  ;;  %v29345_v25 = vld [vmem:[%s36701_s18 + $0x338] sm:$0xff]  }
0x10be   :  { %26807 = vmatmul.mubr.bf16.gmra.mrb[184].mxu1 %v29343_v12 }
0x10bf   :  { %26937 = vmatpush3.bf16.msra.mxu1 %v32630_v59  ;;  %26534 = vmatprep.mubr.msk.bf16.mxu0 %vm11122_vm7, %v12411_v24 }
0x10c0   :  { %26938 = vmatprep.subr.bf16.mxu1 %v32632_v36  ;;  %26535 = vmatmul.mubr.msk.bf16.gmra.mrb[12].mxu0 %vm11122_vm7, %v12412_v54 }
0x10c1   :  { %v26474_v51 = vpop.f32.mrb[208].mxu0  ;;  %26810 = vmatprep.mubr.bf16.mxu1 %v29344_v5  ;;  %v33151_v0 = vpop.f32.mrb[80].mxu1 }
0x10c2   :  { %v12270_v4 = vpop.f32.mrb[209].mxu0  ;;  %v33156_v7 = vpop.f32.mrb[81].mxu1 }
0x10c3   :  { %26939 = vmatpush3.bf16.msra.mxu1 %v32632_v36  ;;  %v26475_v12 = vpop.f32.mrb[210].mxu0  ;;  %v33159_v9 = vpop.f32.mrb[82].mxu1 }
0x10c4   :  { %v12414_v24 = vpack.c.bf16 %v26475_v12, %v26474_v51  ;;  %26940 = vmatprep.subr.bf16.mxu1 %v32634_v23  ;;  %v12273_v54 = vpop.f32.mrb[211].mxu0  ;;  %v33164_v28 = vpop.f32.mrb[83].mxu1 }
0x10c5   :  { %v12413_v40 = vpack.c.bf16 %v12273_v54, %v12270_v4  ;;  %v29347_v54 = vld [vmem:[%s36701_s18 + $0x348] sm:$0xff]  }
0x10c6   :  { %26811 = vmatmul.mubr.bf16.gmra.mrb[188].mxu1 %v29345_v25 }
0x10c7   :  { %26941 = vmatpush3.bf16.msra.mxu1 %v32634_v23  ;;  %26538 = vmatprep.mubr.msk.bf16.mxu0 %vm11122_vm7, %v12413_v40  ;;  %v29348_v40 = vld [vmem:[%s36701_s18 + $0x350] sm:$0xff]  }
0x10c8   :  { %26942 = vmatprep.subr.bf16.mxu1 %v32636_v29  ;;  %26539 = vmatmul.mubr.msk.bf16.gmra.mrb[16].mxu0 %vm11122_vm7, %v12414_v24 }
0x10c9   :  { %v26478_v51 = vpop.f32.mrb[212].mxu0  ;;  %26814 = vmatprep.mubr.bf16.mxu1 %v29346_v11  ;;  %v33175_v12 = vpop.f32.mrb[84].mxu1 }
0x10ca   :  { %37115 = vst [vmem:[#allocation4_spill] sm:$0xff] %v33175_v12  ;;  %v12286_v4 = vpop.f32.mrb[213].mxu0  ;;  %v33180_v5 = vpop.f32.mrb[85].mxu1 }
0x10cb   :  { %26943 = vmatpush3.bf16.msra.mxu1 %v32636_v29  ;;  %v26479_v25 = vpop.f32.mrb[214].mxu0  ;;  %v33186_v42 = vpop.f32.mrb[86].mxu1 }
0x10cc   :  { %37116 = vst [vmem:[#allocation3_spill] sm:$0xff] %v33186_v42  ;;  %v12416_v24 = vpack.c.bf16 %v26479_v25, %v26478_v51  ;;  %27074 = vmatprep.subr.bf16.mxu1 %v32622_v43  ;;  %v12289_v11 = vpop.f32.mrb[215].mxu0  ;;  %v33191_v52 = vpop.f32.mrb[87].mxu1 }
0x10cd   :  { %v12415_v61 = vpack.c.bf16 %v12289_v11, %v12286_v4 }
0x10ce   :  { %26815 = vmatmul.mubr.bf16.gmra.mrb[192].mxu1 %v29347_v54  ;;  %v29350_v54 = vld [vmem:[%s36701_s18 + $0x360] sm:$0xff]  }
0x10cf   :  { %26542 = vmatprep.mubr.msk.bf16.mxu0 %vm11122_vm7, %v12415_v61  ;;  %26818 = vmatprep.mubr.bf16.mxu1 %v29348_v40 }
0x10d0   :  { %26543 = vmatmul.mubr.msk.bf16.gmra.mrb[20].mxu0 %vm11122_vm7, %v12416_v24 }
0x10d1   :  { %v26482_v62 = vpop.f32.mrb[216].mxu0  ;;  %v33197_v51 = vpop.f32.mrb[88].mxu1 }
0x10d2   :  { %37117 = vst [vmem:[#allocation6_spill] sm:$0xff] %v33197_v51  ;;  %v12302_v25 = vpop.f32.mrb[217].mxu0  ;;  %v33202_v22 = vpop.f32.mrb[89].mxu1 }
0x10d3   :  { %37118 = vst [vmem:[#allocation5_spill] sm:$0xff] %v33202_v22  ;;  %v26483_v4 = vpop.f32.mrb[218].mxu0  ;;  %v33207_v11 = vpop.f32.mrb[90].mxu1 }
0x10d4   :  { %37119 = vst [vmem:[#allocation9_spill] sm:$0xff] %v33207_v11  ;;  %v12418_v61 = vpack.c.bf16 %v26483_v4, %v26482_v62  ;;  %v12305_v40 = vpop.f32.mrb[219].mxu0  ;;  %v33211_v53 = vpop.f32.mrb[91].mxu1  ;;  %v29351_v4 = vld [vmem:[%s36701_s18 + $0x368] sm:$0xff]  }
0x10d5   :  { %37120 = vst [vmem:[#allocation7_spill] sm:$0xff] %v33211_v53  ;;  %v12417_v19 = vpack.c.bf16 %v12305_v40, %v12302_v25 }
0x10d6   :  { %26819 = vmatmul.mubr.bf16.gmra.mrb[196].mxu1 %v29349_v35  ;;  %v29352_v35 = vld [vmem:[%s36701_s18 + $0x370] sm:$0xff]  }
0x10d7   :  { %26546 = vmatprep.mubr.msk.bf16.mxu0 %vm11122_vm7, %v12417_v19  ;;  %26822 = vmatprep.mubr.bf16.mxu1 %v29350_v54 }
0x10d8   :  { %26547 = vmatmul.mubr.msk.bf16.gmra.mrb[24].mxu0 %vm11122_vm7, %v12418_v61 }
0x10d9   :  { %v26486_v12 = vpop.f32.mrb[220].mxu0  ;;  %v33217_v42 = vpop.f32.mrb[92].mxu1 }
0x10da   :  { %37121 = vst [vmem:[#allocation13_spill] sm:$0xff] %v33217_v42  ;;  %v12318_v62 = vpop.f32.mrb[221].mxu0  ;;  %v33222_v24 = vpop.f32.mrb[93].mxu1 }
0x10db   :  { %37122 = vst [vmem:[#allocation11_spill] sm:$0xff] %v33222_v24  ;;  %v26487_v25 = vpop.f32.mrb[222].mxu0  ;;  %v33227_v40 = vpop.f32.mrb[94].mxu1 }
0x10dc   :  { %37123 = vst [vmem:[#allocation16_spill] sm:$0xff] %v33227_v40  ;;  %v12420_v19 = vpack.c.bf16 %v26487_v25, %v26486_v12  ;;  %v12321_v54 = vpop.f32.mrb[223].mxu0  ;;  %v33231_v45 = vpop.f32.mrb[95].mxu1  ;;  %v29353_v25 = vld [vmem:[%s36701_s18 + $0x378] sm:$0xff]  }
0x10dd   :  { %37124 = vst [vmem:[#allocation15_spill] sm:$0xff] %v33231_v45  ;;  %v12419_v51 = vpack.c.bf16 %v12321_v54, %v12318_v62 }
0x10de   :  { %26823 = vmatmul.mubr.bf16.gmra.mrb[200].mxu1 %v29351_v4  ;;  %v29354_v4 = vld [vmem:[%s36701_s18 + $0x380] sm:$0xff]  }
0x10df   :  { %26550 = vmatprep.mubr.msk.bf16.mxu0 %vm11122_vm7, %v12419_v51  ;;  %26826 = vmatprep.mubr.bf16.mxu1 %v29352_v35 }
0x10e0   :  { %26551 = vmatmul.mubr.msk.bf16.gmra.mrb[28].mxu0 %vm11122_vm7, %v12420_v19 }
0x10e1   :  { %v26490_v22 = vpop.f32.mrb[224].mxu0  ;;  %v33237_v53 = vpop.f32.mrb[96].mxu1 }
0x10e2   :  { %37125 = vst [vmem:[#allocation18_spill] sm:$0xff] %v33237_v53  ;;  %v12334_v12 = vpop.f32.mrb[225].mxu0  ;;  %v33242_v61 = vpop.f32.mrb[97].mxu1 }
0x10e3   :  { %37126 = vst [vmem:[#allocation17_spill] sm:$0xff] %v33242_v61  ;;  %v26491_v62 = vpop.f32.mrb[226].mxu0  ;;  %v33247_v54 = vpop.f32.mrb[98].mxu1 }
0x10e4   :  { %37127 = vst [vmem:[#allocation20_spill] sm:$0xff] %v33247_v54  ;;  %v12422_v51 = vpack.c.bf16 %v26491_v62, %v26490_v22  ;;  %v12337_v35 = vpop.f32.mrb[227].mxu0  ;;  %v33251_v11 = vpop.f32.mrb[99].mxu1  ;;  %v29355_v62 = vld [vmem:[%s36701_s18 + $0x388] sm:$0xff]  }
0x10e5   :  { %37128 = vst [vmem:[#allocation19_spill] sm:$0xff] %v33251_v11  ;;  %v12421_v42 = vpack.c.bf16 %v12337_v35, %v12334_v12 }
0x10e6   :  { %26827 = vmatmul.mubr.bf16.gmra.mrb[204].mxu1 %v29353_v25  ;;  %v29356_v25 = vld [vmem:[%s36701_s18 + $0x390] sm:$0xff]  }
0x10e7   :  { %26554 = vmatprep.mubr.msk.bf16.mxu0 %vm11122_vm7, %v12421_v42  ;;  %26830 = vmatprep.mubr.bf16.mxu1 %v29354_v4 }
0x10e8   :  { %26555 = vmatmul.mubr.msk.bf16.gmra.mrb[32].mxu0 %vm11122_vm7, %v12422_v51 }
0x10e9   :  { %v26494_v24 = vpop.f32.mrb[228].mxu0  ;;  %v33257_v45 = vpop.f32.mrb[100].mxu1 }
0x10ea   :  { %37129 = vst [vmem:[#allocation22_spill] sm:$0xff] %v33257_v45  ;;  %v12350_v22 = vpop.f32.mrb[229].mxu0  ;;  %v33262_v19 = vpop.f32.mrb[101].mxu1 }
0x10eb   :  { %37130 = vst [vmem:[#allocation21_spill] sm:$0xff] %v33262_v19  ;;  %v26495_v12 = vpop.f32.mrb[230].mxu0  ;;  %v33267_v35 = vpop.f32.mrb[102].mxu1 }
0x10ec   :  { %37131 = vst [vmem:[#allocation24_spill] sm:$0xff] %v33267_v35  ;;  %v12424_v42 = vpack.c.bf16 %v26495_v12, %v26494_v24  ;;  %v12353_v4 = vpop.f32.mrb[231].mxu0  ;;  %v33271_v40 = vpop.f32.mrb[103].mxu1  ;;  %v29357_v12 = vld [vmem:[%s36701_s18 + $0x398] sm:$0xff]  }
0x10ed   :  { %37132 = vst [vmem:[#allocation23_spill] sm:$0xff] %v33271_v40  ;;  %v12423_v53 = vpack.c.bf16 %v12353_v4, %v12350_v22 }
0x10ee   :  { %26831 = vmatmul.mubr.bf16.gmra.mrb[208].mxu1 %v29355_v62  ;;  %v29358_v62 = vld [vmem:[%s36701_s18 + $0x3a0] sm:$0xff]  }
0x10ef   :  { %26558 = vmatprep.mubr.msk.bf16.mxu0 %vm11122_vm7, %v12423_v53  ;;  %26834 = vmatprep.mubr.bf16.mxu1 %v29356_v25 }
0x10f0   :  { %26559 = vmatmul.mubr.msk.bf16.gmra.mrb[36].mxu0 %vm11122_vm7, %v12424_v42 }
0x10f1   :  { %v26498_v61 = vpop.f32.mrb[232].mxu0  ;;  %v33277_v11 = vpop.f32.mrb[104].mxu1 }
0x10f2   :  { %37133 = vst [vmem:[#allocation26_spill] sm:$0xff] %v33277_v11  ;;  %v12366_v24 = vpop.f32.mrb[233].mxu0  ;;  %v33282_v51 = vpop.f32.mrb[105].mxu1 }
0x10f3   :  { %37134 = vst [vmem:[#allocation25_spill] sm:$0xff] %v33282_v51  ;;  %v26499_v22 = vpop.f32.mrb[234].mxu0  ;;  %v33287_v4 = vpop.f32.mrb[106].mxu1  ;;  %v37136_v51 = vpack.c.bf16 %v32987_v37, %v32978_v44 }
0x10f4   :  { %37135 = vst [vmem:[#allocation28_spill] sm:$0xff] %v33287_v4  ;;  %v12426_v53 = vpack.c.bf16 %v26499_v22, %v26498_v61  ;;  %v12369_v25 = vpop.f32.mrb[235].mxu0  ;;  %v33291_v54 = vpop.f32.mrb[107].mxu1  ;;  %v29359_v22 = vld [vmem:[%s36701_s18 + $0x3a8] sm:$0xff]   ;;  %v37165_v4 = vld [vmem:[#allocation5_spill] sm:$0xff] }
0x10f5   :  { %v12425_v45 = vpack.c.bf16 %v12369_v25, %v12366_v24 }
0x10f6   :  { %26835 = vmatmul.mubr.bf16.gmra.mrb[212].mxu1 %v29357_v12  ;;  %v29360_v12 = vld [vmem:[%s36701_s18 + $0x3b0] sm:$0xff]  }
0x10f7   :  { %26562 = vmatprep.mubr.msk.bf16.mxu0 %vm11122_vm7, %v12425_v45  ;;  %26838 = vmatprep.mubr.bf16.mxu1 %v29358_v62 }
0x10f8   :  { %26563 = vmatmul.mubr.msk.bf16.gmra.mrb[40].mxu0 %vm11122_vm7, %v12426_v53 }
0x10f9   :  { %v26502_v19 = vpop.f32.mrb[236].mxu0  ;;  %v33297_v40 = vpop.f32.mrb[108].mxu1 }
0x10fa   :  { %v12382_v61 = vpop.f32.mrb[237].mxu0  ;;  %v33302_v42 = vpop.f32.mrb[109].mxu1 }
0x10fb   :  { %v26503_v24 = vpop.f32.mrb[238].mxu0  ;;  %v33307_v25 = vpop.f32.mrb[110].mxu1 }
0x10fc   :  { %v12428_v45 = vpack.c.bf16 %v26503_v24, %v26502_v19  ;;  %v12385_v62 = vpop.f32.mrb[239].mxu0  ;;  %v33311_v35 = vpop.f32.mrb[111].mxu1 }
0x10fd   :  { %v12427_v11 = vpack.c.bf16 %v12385_v62, %v12382_v61  ;;  %v29361_v61 = vld [vmem:[%s36701_s18 + $0x3b8] sm:$0xff]   ;;  %v37138_v62 = vpack.c.bf16 %v33015_v2, %v33005_v57 }
0x10fe   :  { %26839 = vmatmul.mubr.bf16.gmra.mrb[216].mxu1 %v29359_v22  ;;  %v29365_v2 = vld [vmem:[%s36701_s18 + $0x3d8] sm:$0xff]  }
0x10ff   :  { %26566 = vmatprep.mubr.msk.bf16.mxu0 %vm11122_vm7, %v12427_v11  ;;  %26842 = vmatprep.mubr.bf16.mxu1 %v29360_v12  ;;  %v29362_v11 = vld [vmem:[%s36701_s18 + $0x3c0] sm:$0xff]  }
0x1100   :  { %26567 = vmatmul.mubr.msk.bf16.gmra.mrb[44].mxu0 %vm11122_vm7, %v12428_v45  ;;  %v22680_v45 = vld [vmem:[%s36702_s19 + $0x6] sm:$0x3] }
0x1101   :  { %26572 = vmatprep.mubr.msk.bf16.mxu0 %vm11122_vm7, %v37136_v51  ;;  %v33321_v19 = vpop.f32.mrb[112].mxu1  ;;  %v37137_v51 = vpack.c.bf16 %v32983_v20, %v32973_v33  ;;  %v29363_v33 = vld [vmem:[%s36701_s18 + $0x3c8] sm:$0xff]  }
0x1102   :  { %v33326_v24 = vpop.f32.mrb[113].mxu1 }
0x1103   :  { %v33331_v22 = vpop.f32.mrb[114].mxu1 }
0x1104   :  { %v33335_v44 = vpop.f32.mrb[115].mxu1 }
0x1106   :  { %26843 = vmatmul.mubr.bf16.gmra.mrb[220].mxu1 %v29361_v61  ;;  %v33354_v61 = vand.u32 %v22680_v45, %v32669_v38  ;;  %v37139_v45 = vpack.c.bf16 %v33011_v15, %v32997_v26  ;;  %v29367_v15 = vld [vmem:[%s36701_s18 + $0x3e8] sm:$0xff]  }
0x1107   :  { %26846 = vmatprep.mubr.bf16.mxu1 %v29362_v11 }
0x1108   :  { %26573 = vmatmul.mubr.msk.bf16.vlgmr.msra.gmra.mrb[240].mxu0 %vm11122_vm7, %v37137_v51 }
0x1109   :  { %26717 = vmatpush3.bf16.msra.mxu0 %v33000_v48  ;;  %26576 = vmatprep.mubr.msk.bf16.mxu0 %vm11122_vm7, %v37138_v62  ;;  %v33351_v12 = vpop.f32.mrb[116].mxu1  ;;  %v29364_v48 = vld [vmem:[%s36701_s18 + $0x3d0] sm:$0xff]   ;;  %v37140_v62 = vpack.c.bf16 %v33035_v30, %v33026_v32 }
0x110a   :  { %v33359_v20 = vpop.f32.mrb[117].mxu1  ;;  %26862 = vmatprep.subr.bf16.mxu0 %v33354_v61 }
0x110b   :  { %v33365_v57 = vpop.f32.mrb[118].mxu1 }
0x110c   :  { %v33369_v11 = vpop.f32.mrb[119].mxu1 }
0x110e   :  { %26847 = vmatmul.mubr.bf16.gmra.mrb[224].mxu1 %v29363_v33  ;;  %v29366_v33 = vld [vmem:[%s36701_s18 + $0x3e0] sm:$0xff]  }
0x110f   :  { %26850 = vmatprep.mubr.bf16.mxu1 %v29364_v48  ;;  %v37141_v48 = vpack.c.bf16 %v33031_v1, %v33021_v16  ;;  %v29369_v1 = vld [vmem:[%s36701_s18 + $0x3f8] sm:$0xff]  }
0x1110   :  { %26577 = vmatmul.mubr.msk.bf16.gmra.mrb[244].mxu0 %vm11122_vm7, %v37139_v45  ;;  %v37142_v45 = vpack.c.bf16 %v33055_v49, %v33046_v13 }
0x1111   :  { %26580 = vmatprep.mubr.msk.bf16.mxu0 %vm11122_vm7, %v37140_v62  ;;  %v33381_v37 = vpop.f32.mrb[120].mxu1 }
0x1112   :  { %v33386_v53 = vpop.f32.mrb[121].mxu1 }
0x1113   :  { %v33391_v26 = vpop.f32.mrb[122].mxu1 }
0x1114   :  { %v33395_v32 = vpop.f32.mrb[123].mxu1 }
0x1116   :  { %26851 = vmatmul.mubr.bf16.gmra.mrb[228].mxu1 %v29365_v2  ;;  %v29368_v2 = vld [vmem:[%s36701_s18 + $0x3f0] sm:$0xff]  }
0x1117   :  { %26854 = vmatprep.mubr.bf16.mxu1 %v29366_v33  ;;  %v37143_v33 = vpack.c.bf16 %v33051_v58, %v33041_v18  ;;  %v29371_v58 = vld [vmem:[%s36701_s18 + $0x408] sm:$0xff]  }
0x1118   :  { %26581 = vmatmul.mubr.msk.bf16.gmra.mrb[248].mxu0 %vm11122_vm7, %v37141_v48  ;;  %v37144_v48 = vpack.c.bf16 %v33075_v3, %v33066_v63  ;;  %v37164_v3 = vld [vmem:[#allocation7_spill] sm:$0xff] }
0x1119   :  { %26584 = vmatprep.mubr.msk.bf16.mxu0 %vm11122_vm7, %v37142_v45  ;;  %v33407_v62 = vpop.f32.mrb[124].mxu1 }
0x111a   :  { %v33412_v51 = vpop.f32.mrb[125].mxu1 }
0x111b   :  { %v33417_v16 = vpop.f32.mrb[126].mxu1 }
0x111c   :  { %v33421_v13 = vpop.f32.mrb[127].mxu1 }
0x111e   :  { %26855 = vmatmul.mubr.bf16.gmra.mrb[232].mxu1 %v29367_v15  ;;  %v29370_v15 = vld [vmem:[%s36701_s18 + $0x400] sm:$0xff]  }
0x111f   :  { %26858 = vmatprep.mubr.bf16.mxu1 %v29368_v2  ;;  %v37145_v2 = vpack.c.bf16 %v33071_v17, %v33061_v6 }
0x1120   :  { %26585 = vmatmul.mubr.msk.bf16.gmra.mrb[252].mxu0 %vm11122_vm7, %v37143_v33  ;;  %v37146_v33 = vpack.c.bf16 %v33092_v47, %v33086_v50 }
0x1121   :  { %26588 = vmatprep.mubr.msk.bf16.mxu0 %vm11122_vm7, %v37144_v48  ;;  %v33433_v45 = vpop.f32.mrb[128].mxu1 }
0x1122   :  { %v33438_v30 = vpop.f32.mrb[129].mxu1 }
0x1123   :  { %v33443_v18 = vpop.f32.mrb[130].mxu1 }
0x1124   :  { %v33447_v63 = vpop.f32.mrb[131].mxu1 }
0x1126   :  { %26859 = vmatmul.mubr.bf16.gmra.mrb[236].mxu1 %v29369_v1  ;;  %v29372_v1 = vld [vmem:[%s36701_s18 + $0x410] sm:$0xff]  }
0x1127   :  { %26944 = vmatprep.mubr.bf16.mxu1 %v29370_v15  ;;  %v37147_v15 = vpack.c.bf16 %v33088_v60, %v33081_v34  ;;  %v29374_v34 = vld [vmem:[%s36701_s18 + $0x420] sm:$0xff]  }
0x1128   :  { %26589 = vmatmul.mubr.msk.bf16.gmra.mrb[0].mxu0 %vm11122_vm7, %v37145_v2  ;;  %v37148_v2 = vpack.c.bf16 %v33116_v8, %v33108_v31 }
0x1129   :  { %26592 = vmatprep.mubr.msk.bf16.mxu0 %vm11122_vm7, %v37146_v33  ;;  %v33459_v48 = vpop.f32.mrb[132].mxu1 }
0x112a   :  { %v33464_v49 = vpop.f32.mrb[133].mxu1 }
0x112b   :  { %v33469_v6 = vpop.f32.mrb[134].mxu1 }
0x112c   :  { %v33473_v50 = vpop.f32.mrb[135].mxu1 }
0x112e   :  { %26945 = vmatmul.mubr.bf16.vlgmr.msra.gmra.mrb[240].mxu1 %v29371_v58  ;;  %v29373_v58 = vld [vmem:[%s36701_s18 + $0x418] sm:$0xff]  }
0x112f   :  { %27075 = vmatpush3.bf16.msra.mxu1 %v32622_v43  ;;  %26948 = vmatprep.mubr.bf16.mxu1 %v29372_v1 }
0x1130   :  { %27076 = vmatprep.subr.bf16.mxu1 %v32624_v41  ;;  %26593 = vmatmul.mubr.msk.bf16.gmra.mrb[4].mxu0 %vm11122_vm7, %v37147_v15  ;;  %v37149_v15 = vpack.c.bf16 %v33111_v14, %v33103_v39  ;;  %v29376_v39 = vld [vmem:[%s36701_s18 + $0x430] sm:$0xff]  }
0x1131   :  { %26596 = vmatprep.mubr.msk.bf16.mxu0 %vm11122_vm7, %v37148_v2  ;;  %v33487_v33 = vpop.f32.mrb[136].mxu1  ;;  %v37150_v2 = vpack.c.bf16 %v33140_v21, %v33132_v56 }
0x1132   :  { %v33492_v17 = vpop.f32.mrb[137].mxu1 }
0x1133   :  { %27077 = vmatpush3.bf16.msra.mxu1 %v32624_v41  ;;  %v33498_v60 = vpop.f32.mrb[138].mxu1 }
0x1134   :  { %27078 = vmatprep.subr.bf16.mxu1 %v32626_v46  ;;  %v33503_v8 = vpop.f32.mrb[139].mxu1 }
0x1136   :  { %26949 = vmatmul.mubr.bf16.gmra.mrb[244].mxu1 %v29373_v58  ;;  %v29375_v58 = vld [vmem:[%s36701_s18 + $0x428] sm:$0xff]  }
0x1137   :  { %27079 = vmatpush3.bf16.msra.mxu1 %v32626_v46  ;;  %26952 = vmatprep.mubr.bf16.mxu1 %v29374_v34 }
0x1138   :  { %27080 = vmatprep.subr.bf16.mxu1 %v32628_v27  ;;  %26597 = vmatmul.mubr.msk.bf16.gmra.mrb[8].mxu0 %vm11122_vm7, %v37149_v15  ;;  %v37151_v15 = vpack.c.bf16 %v33135_v10, %v33127_v55  ;;  %v29378_v55 = vld [vmem:[%s36701_s18 + $0x440] sm:$0xff]  }
0x1139   :  { %26600 = vmatprep.mubr.msk.bf16.mxu0 %vm11122_vm7, %v37150_v2  ;;  %v33517_v31 = vpop.f32.mrb[140].mxu1  ;;  %v37152_v2 = vpack.c.bf16 %v33164_v28, %v33156_v7 }
0x113a   :  { %v33522_v1 = vpop.f32.mrb[141].mxu1 }
0x113b   :  { %27081 = vmatpush3.bf16.msra.mxu1 %v32628_v27  ;;  %v33528_v14 = vpop.f32.mrb[142].mxu1 }
0x113c   :  { %27082 = vmatprep.subr.bf16.mxu1 %v32630_v59  ;;  %v33533_v21 = vpop.f32.mrb[143].mxu1 }
0x113e   :  { %26953 = vmatmul.mubr.bf16.gmra.mrb[248].mxu1 %v29375_v58  ;;  %v29377_v58 = vld [vmem:[%s36701_s18 + $0x438] sm:$0xff]  }
0x113f   :  { %27083 = vmatpush3.bf16.msra.mxu1 %v32630_v59  ;;  %26956 = vmatprep.mubr.bf16.mxu1 %v29376_v39 }
0x1140   :  { %27084 = vmatprep.subr.bf16.mxu1 %v32632_v36  ;;  %26601 = vmatmul.mubr.msk.bf16.gmra.mrb[12].mxu0 %vm11122_vm7, %v37151_v15  ;;  %v37155_v15 = vpack.c.bf16 %v33159_v9, %v33151_v0  ;;  %v29380_v9 = vld [vmem:[%s36701_s18 + $0x450] sm:$0xff]  }
0x1141   :  { %26604 = vmatprep.mubr.msk.bf16.mxu0 %vm11122_vm7, %v37152_v2  ;;  %v33547_v56 = vpop.f32.mrb[144].mxu1  ;;  %v37156_v2 = vpack.c.bf16 %v33191_v52, %v33180_v5  ;;  %v29381_v52 = vld [vmem:[%s36701_s18 + $0x458] sm:$0xff]  }
0x1142   :  { %37153 = vst [vmem:[#allocation27_spill] sm:$0xff] %v33547_v56  ;;  %v33552_v34 = vpop.f32.mrb[145].mxu1  ;;  %v37166_v56 = vpack.c.bf16 %v37164_v3, %v37165_v4  ;;  %v37184_v3 = vld [vmem:[#allocation19_spill] sm:$0xff] }
0x1143   :  { %27085 = vmatpush3.bf16.msra.mxu1 %v32632_v36  ;;  %v33558_v10 = vpop.f32.mrb[146].mxu1 }
0x1144   :  { %37154 = vst [vmem:[#allocation30_spill] sm:$0xff] %v33558_v10  ;;  %27086 = vmatprep.subr.bf16.mxu1 %v32634_v23  ;;  %v33563_v7 = vpop.f32.mrb[147].mxu1 }
0x1146   :  { %26957 = vmatmul.mubr.bf16.gmra.mrb[252].mxu1 %v29377_v58  ;;  %v29379_v58 = vld [vmem:[%s36701_s18 + $0x448] sm:$0xff]  }
0x1147   :  { %27087 = vmatpush3.bf16.msra.mxu1 %v32634_v23  ;;  %26960 = vmatprep.mubr.bf16.mxu1 %v29378_v55  ;;  %v37174_v55 = vld [vmem:[#allocation15_spill] sm:$0xff] }
0x1148   :  { %27088 = vmatprep.subr.bf16.mxu1 %v32636_v29  ;;  %26605 = vmatmul.mubr.msk.bf16.gmra.mrb[16].mxu0 %vm11122_vm7, %v37155_v15  ;;  %v37161_v15 = vld [vmem:[#allocation3_spill] sm:$0xff] }
0x1149   :  { %26608 = vmatprep.mubr.msk.bf16.mxu0 %vm11122_vm7, %v37156_v2  ;;  %v33577_v28 = vpop.f32.mrb[148].mxu1  ;;  %v37162_v2 = vld [vmem:[#allocation4_spill] sm:$0xff] }
0x114a   :  { %37157 = vst [vmem:[#allocation29_spill] sm:$0xff] %v33577_v28  ;;  %v33582_v39 = vpop.f32.mrb[149].mxu1  ;;  %v37163_v47 = vpack.c.bf16 %v37161_v15, %v37162_v2  ;;  %v37172_v15 = vld [vmem:[#allocation6_spill] sm:$0xff] }
0x114b   :  { %37158 = vst [vmem:[#allocation32_spill] sm:$0xff] %v33582_v39  ;;  %27089 = vmatpush3.bf16.msra.mxu1 %v32636_v29  ;;  %v33588_v0 = vpop.f32.mrb[150].mxu1 }
0x114c   :  { %37159 = vst [vmem:[#allocation31_spill] sm:$0xff] %v33588_v0  ;;  %27220 = vmatprep.subr.bf16.mxu1 %v32622_v43  ;;  %v33593_v5 = vpop.f32.mrb[151].mxu1  ;;  %v37175_v0 = vld [vmem:[#allocation11_spill] sm:$0xff] }
0x114d   :  { %37160 = vst [vmem:[#allocation34_spill] sm:$0xff] %v33593_v5  ;;  %v37176_v39 = vpack.c.bf16 %v37174_v55, %v37175_v0  ;;  %v37181_v55 = vld [vmem:[#allocation16_spill] sm:$0xff] }
0x114e   :  { %26961 = vmatmul.mubr.bf16.gmra.mrb[0].mxu1 %v29379_v58  ;;  %v29382_v58 = vld [vmem:[%s36701_s18 + $0x460] sm:$0xff]  }
0x114f   :  { %26964 = vmatprep.mubr.bf16.mxu1 %v29380_v9 }
0x1150   :  { %26609 = vmatmul.mubr.msk.bf16.gmra.mrb[20].mxu0 %vm11122_vm7, %v37163_v47  ;;  %v29383_v47 = vld [vmem:[%s36701_s18 + $0x468] sm:$0xff]  }
0x1151   :  { %26612 = vmatprep.mubr.msk.bf16.mxu0 %vm11122_vm7, %v37166_v56  ;;  %v33605_v10 = vpop.f32.mrb[152].mxu1  ;;  %v37171_v56 = vld [vmem:[#allocation9_spill] sm:$0xff] }
0x1152   :  { %37167 = vst [vmem:[#allocation33_spill] sm:$0xff] %v33605_v10  ;;  %v33610_v28 = vpop.f32.mrb[153].mxu1  ;;  %v37173_v2 = vpack.c.bf16 %v37171_v56, %v37172_v15  ;;  %v37182_v15 = vld [vmem:[#allocation13_spill] sm:$0xff] }
0x1153   :  { %37168 = vst [vmem:[#allocation36_spill] sm:$0xff] %v33610_v28  ;;  %v33615_v9 = vpop.f32.mrb[154].mxu1  ;;  %v29385_v56 = vld [vmem:[%s36701_s18 + $0x478] sm:$0xff]  }
0x1154   :  { %37169 = vst [vmem:[#allocation35_spill] sm:$0xff] %v33615_v9  ;;  %v33619_v4 = vpop.f32.mrb[155].mxu1  ;;  %v37185_v9 = vld [vmem:[#allocation17_spill] sm:$0xff] }
0x1155   :  { %37170 = vst [vmem:[#allocation38_spill] sm:$0xff] %v33619_v4  ;;  %v37186_v28 = vpack.c.bf16 %v37184_v3, %v37185_v9  ;;  %v37190_v3 = vld [vmem:[#allocation20_spill] sm:$0xff] }
0x1156   :  { %26965 = vmatmul.mubr.bf16.gmra.mrb[4].mxu1 %v29381_v52  ;;  %v29384_v52 = vld [vmem:[%s36701_s18 + $0x470] sm:$0xff]  }
0x1157   :  { %26968 = vmatprep.mubr.bf16.mxu1 %v29382_v58 }
0x1158   :  { %26613 = vmatmul.mubr.msk.bf16.gmra.mrb[24].mxu0 %vm11122_vm7, %v37173_v2  ;;  %v37183_v2 = vpack.c.bf16 %v37181_v55, %v37182_v15  ;;  %v37191_v15 = vld [vmem:[#allocation18_spill] sm:$0xff]  ;;  %v29387_v55 = vld [vmem:[%s36701_s18 + $0x488] sm:$0xff]  }
0x1159   :  { %26616 = vmatprep.mubr.msk.bf16.mxu0 %vm11122_vm7, %v37176_v39  ;;  %v33631_v5 = vpop.f32.mrb[156].mxu1  ;;  %v37193_v39 = vld [vmem:[#allocation23_spill] sm:$0xff] }
0x115a   :  { %37177 = vst [vmem:[#allocation37_spill] sm:$0xff] %v33631_v5  ;;  %v33636_v10 = vpop.f32.mrb[157].mxu1 }
0x115b   :  { %37178 = vst [vmem:[#allocation40_spill] sm:$0xff] %v33636_v10  ;;  %v33641_v58 = vpop.f32.mrb[158].mxu1 }
0x115c   :  { %37179 = vst [vmem:[#allocation39_spill] sm:$0xff] %v33641_v58  ;;  %v33645_v0 = vpop.f32.mrb[159].mxu1  ;;  %v37194_v58 = vld [vmem:[#allocation21_spill] sm:$0xff] }
0x115d   :  { %37180 = vst [vmem:[#allocation42_spill] sm:$0xff] %v33645_v0  ;;  %v37195_v10 = vpack.c.bf16 %v37193_v39, %v37194_v58  ;;  %v37198_v39 = vld [vmem:[#allocation24_spill] sm:$0xff] }
0x115e   :  { %26969 = vmatmul.mubr.bf16.gmra.mrb[8].mxu1 %v29383_v47  ;;  %v29386_v47 = vld [vmem:[%s36701_s18 + $0x480] sm:$0xff]  }
0x115f   :  { %26972 = vmatprep.mubr.bf16.mxu1 %v29384_v52 }
0x1160   :  { %26617 = vmatmul.mubr.msk.bf16.gmra.mrb[28].mxu0 %vm11122_vm7, %v37183_v2  ;;  %v37192_v2 = vpack.c.bf16 %v37190_v3, %v37191_v15  ;;  %v37199_v15 = vld [vmem:[#allocation22_spill] sm:$0xff]  ;;  %v29389_v3 = vld [vmem:[%s36701_s18 + $0x498] sm:$0xff]  }
0x1161   :  { %26620 = vmatprep.mubr.msk.bf16.mxu0 %vm11122_vm7, %v37186_v28  ;;  %v33657_v4 = vpop.f32.mrb[160].mxu1  ;;  %v37201_v28 = vld [vmem:[#allocation25_spill] sm:$0xff] }
0x1162   :  { %37187 = vst [vmem:[#allocation41_spill] sm:$0xff] %v33657_v4  ;;  %v33662_v5 = vpop.f32.mrb[161].mxu1 }
0x1163   :  { %37188 = vst [vmem:[#allocation44_spill] sm:$0xff] %v33662_v5  ;;  %v33667_v52 = vpop.f32.mrb[162].mxu1 }
0x1164   :  { %37189 = vst [vmem:[#allocation43_spill] sm:$0xff] %v33667_v52  ;;  %v33671_v9 = vpop.f32.mrb[163].mxu1  ;;  %v37202_v52 = vpack.c.bf16 %v33291_v54, %v37201_v28  ;;  %v37204_v28 = vld [vmem:[#allocation28_spill] sm:$0xff] }
0x1166   :  { %26973 = vmatmul.mubr.bf16.gmra.mrb[12].mxu1 %v29385_v56  ;;  %v29388_v56 = vld [vmem:[%s36701_s18 + $0x490] sm:$0xff]  }
0x1167   :  { %26976 = vmatprep.mubr.bf16.mxu1 %v29386_v47 }
0x1168   :  { %26621 = vmatmul.mubr.msk.bf16.gmra.mrb[32].mxu0 %vm11122_vm7, %v37192_v2  ;;  %v37200_v2 = vpack.c.bf16 %v37198_v39, %v37199_v15  ;;  %v37205_v15 = vld [vmem:[#allocation26_spill] sm:$0xff]  ;;  %v29391_v39 = vld [vmem:[%s36701_s18 + $0x4a8] sm:$0xff]  }
0x1169   :  { %26624 = vmatprep.mubr.msk.bf16.mxu0 %vm11122_vm7, %v37195_v10  ;;  %v33683_v0 = vpop.f32.mrb[164].mxu1  ;;  %v37207_v10 = vpack.c.bf16 %v33311_v35, %v33302_v42 }
0x116a   :  { %37196 = vst [vmem:[#allocation46_spill] sm:$0xff] %v33683_v0  ;;  %v33688_v4 = vpop.f32.mrb[165].mxu1 }
0x116b   :  { %v33693_v47 = vpop.f32.mrb[166].mxu1 }
0x116c   :  { %37197 = vst [vmem:[#allocation45_spill] sm:$0xff] %v33693_v47  ;;  %v33697_v58 = vpop.f32.mrb[167].mxu1 }
0x116e   :  { %26977 = vmatmul.mubr.bf16.gmra.mrb[16].mxu1 %v29387_v55  ;;  %v29390_v55 = vld [vmem:[%s36701_s18 + $0x4a0] sm:$0xff]  }
0x116f   :  { %26980 = vmatprep.mubr.bf16.mxu1 %v29388_v56 }
0x1170   :  { %26625 = vmatmul.mubr.msk.bf16.gmra.mrb[36].mxu0 %vm11122_vm7, %v37200_v2  ;;  %v37206_v2 = vpack.c.bf16 %v37204_v28, %v37205_v15  ;;  %v37209_v15 = vpack.c.bf16 %v33335_v44, %v33326_v24  ;;  %v29393_v28 = vld [vmem:[%s36701_s18 + $0x4b8] sm:$0xff]  }
0x1171   :  { %26628 = vmatprep.mubr.msk.bf16.mxu0 %vm11122_vm7, %v37202_v52  ;;  %v33709_v5 = vpop.f32.mrb[168].mxu1 }
0x1172   :  { %37203 = vst [vmem:[#allocation48_spill] sm:$0xff] %v33709_v5  ;;  %v33714_v0 = vpop.f32.mrb[169].mxu1 }
0x1173   :  { %v33719_v56 = vpop.f32.mrb[170].mxu1 }
0x1174   :  { %v33723_v54 = vpop.f32.mrb[171].mxu1 }
0x1176   :  { %26981 = vmatmul.mubr.bf16.gmra.mrb[20].mxu1 %v29389_v3  ;;  %v29392_v3 = vld [vmem:[%s36701_s18 + $0x4b0] sm:$0xff]  }
0x1177   :  { %26984 = vmatprep.mubr.bf16.mxu1 %v29390_v55 }
0x1178   :  { %26629 = vmatmul.mubr.msk.bf16.gmra.mrb[40].mxu0 %vm11122_vm7, %v37206_v2 }
0x1179   :  { %26632 = vmatprep.mubr.msk.bf16.mxu0 %vm11122_vm7, %v37207_v10  ;;  %v33735_v47 = vpop.f32.mrb[172].mxu1  ;;  %v37208_v10 = vpack.c.bf16 %v33307_v25, %v33297_v40 }
0x117a   :  { %v33740_v5 = vpop.f32.mrb[173].mxu1 }
0x117b   :  { %v33745_v55 = vpop.f32.mrb[174].mxu1 }
0x117c   :  { %v33749_v35 = vpop.f32.mrb[175].mxu1 }
0x117e   :  { %26985 = vmatmul.mubr.bf16.gmra.mrb[24].mxu1 %v29391_v39  ;;  %v29394_v39 = vld [vmem:[%s36701_s18 + $0x4c0] sm:$0xff]  }
0x117f   :  { %26988 = vmatprep.mubr.bf16.mxu1 %v29392_v3  ;;  %v37210_v3 = vpack.c.bf16 %v33331_v22, %v33321_v19  ;;  %v29395_v19 = vld [vmem:[%s36701_s18 + $0x4c8] sm:$0xff]  }
0x1180   :  { %26633 = vmatmul.mubr.msk.bf16.gmra.mrb[44].mxu0 %vm11122_vm7, %v37208_v10  ;;  %v22809_v10 = vld [vmem:[%s36702_s19 + $0x8] sm:$0x3] }
0x1181   :  { %26718 = vmatprep.mubr.msk.bf16.mxu0 %vm11122_vm7, %v37209_v15  ;;  %v33761_v2 = vpop.f32.mrb[176].mxu1  ;;  %v37211_v15 = vpack.c.bf16 %v33369_v11, %v33359_v20  ;;  %v29397_v11 = vld [vmem:[%s36701_s18 + $0x4d8] sm:$0xff]  }
0x1182   :  { %v33766_v52 = vpop.f32.mrb[177].mxu1 }
0x1183   :  { %v33771_v40 = vpop.f32.mrb[178].mxu1 }
0x1184   :  { %v33775_v24 = vpop.f32.mrb[179].mxu1 }
0x1186   :  { %26989 = vmatmul.mubr.bf16.gmra.mrb[28].mxu1 %v29393_v28  ;;  %v33794_v28 = vand.u32 %v22809_v10, %v32669_v38  ;;  %v37212_v10 = vpack.c.bf16 %v33365_v57, %v33351_v12  ;;  %v29399_v57 = vld [vmem:[%s36701_s18 + $0x4e8] sm:$0xff]  }
0x1187   :  { %26992 = vmatprep.mubr.bf16.mxu1 %v29394_v39 }
0x1188   :  { %26719 = vmatmul.mubr.msk.bf16.vlgmr.msra.gmra.mrb[240].mxu0 %vm11122_vm7, %v37210_v3 }
0x1189   :  { %26863 = vmatpush3.bf16.msra.mxu0 %v33354_v61  ;;  %26722 = vmatprep.mubr.msk.bf16.mxu0 %vm11122_vm7, %v37211_v15  ;;  %v33791_v25 = vpop.f32.mrb[180].mxu1  ;;  %v29396_v61 = vld [vmem:[%s36701_s18 + $0x4d0] sm:$0xff]   ;;  %v37213_v15 = vpack.c.bf16 %v33395_v32, %v33386_v53 }
0x118a   :  { %v33799_v22 = vpop.f32.mrb[181].mxu1  ;;  %27008 = vmatprep.subr.bf16.mxu0 %v33794_v28 }
0x118b   :  { %v33805_v20 = vpop.f32.mrb[182].mxu1 }
0x118c   :  { %v33809_v39 = vpop.f32.mrb[183].mxu1 }
0x118e   :  { %26993 = vmatmul.mubr.bf16.gmra.mrb[32].mxu1 %v29395_v19  ;;  %v29398_v19 = vld [vmem:[%s36701_s18 + $0x4e0] sm:$0xff]  }
0x118f   :  { %26996 = vmatprep.mubr.bf16.mxu1 %v29396_v61  ;;  %v37214_v61 = vpack.c.bf16 %v33391_v26, %v33381_v37  ;;  %v29401_v26 = vld [vmem:[%s36701_s18 + $0x4f8] sm:$0xff]  }
0x1190   :  { %26723 = vmatmul.mubr.msk.bf16.gmra.mrb[244].mxu0 %vm11122_vm7, %v37212_v10  ;;  %v37215_v10 = vpack.c.bf16 %v33421_v13, %v33412_v51 }
0x1191   :  { %26726 = vmatprep.mubr.msk.bf16.mxu0 %vm11122_vm7, %v37213_v15  ;;  %v33821_v44 = vpop.f32.mrb[184].mxu1 }
0x1192   :  { %v33826_v42 = vpop.f32.mrb[185].mxu1 }
0x1193   :  { %v33831_v12 = vpop.f32.mrb[186].mxu1 }
0x1194   :  { %v33835_v53 = vpop.f32.mrb[187].mxu1 }
0x1196   :  { %26997 = vmatmul.mubr.bf16.gmra.mrb[36].mxu1 %v29397_v11  ;;  %v29400_v11 = vld [vmem:[%s36701_s18 + $0x4f0] sm:$0xff]  }
0x1197   :  { %27000 = vmatprep.mubr.bf16.mxu1 %v29398_v19  ;;  %v37216_v19 = vpack.c.bf16 %v33417_v16, %v33407_v62  ;;  %v29403_v16 = vld [vmem:[%s36701_s18 + $0x508] sm:$0xff]  }
0x1198   :  { %26727 = vmatmul.mubr.msk.bf16.gmra.mrb[248].mxu0 %vm11122_vm7, %v37214_v61  ;;  %v37217_v61 = vpack.c.bf16 %v33447_v63, %v33438_v30  ;;  %v37234_v63 = vld [vmem:[#allocation34_spill] sm:$0xff] }
0x1199   :  { %26730 = vmatprep.mubr.msk.bf16.mxu0 %vm11122_vm7, %v37215_v10  ;;  %v33847_v15 = vpop.f32.mrb[188].mxu1 }
0x119a   :  { %v33852_v3 = vpop.f32.mrb[189].mxu1 }
0x119b   :  { %v33857_v37 = vpop.f32.mrb[190].mxu1 }
0x119c   :  { %v33861_v51 = vpop.f32.mrb[191].mxu1 }
0x119e   :  { %27001 = vmatmul.mubr.bf16.gmra.mrb[40].mxu1 %v29399_v57  ;;  %v29402_v57 = vld [vmem:[%s36701_s18 + $0x500] sm:$0xff]  }
0x119f   :  { %27004 = vmatprep.mubr.bf16.mxu1 %v29400_v11  ;;  %v37218_v11 = vpack.c.bf16 %v33443_v18, %v33433_v45 }
0x11a0   :  { %26731 = vmatmul.mubr.msk.bf16.gmra.mrb[252].mxu0 %vm11122_vm7, %v37216_v19  ;;  %v37219_v19 = vpack.c.bf16 %v33473_v50, %v33464_v49 }
0x11a1   :  { %26734 = vmatprep.mubr.msk.bf16.mxu0 %vm11122_vm7, %v37217_v61  ;;  %v33873_v10 = vpop.f32.mrb[192].mxu1 }
0x11a2   :  { %v33878_v32 = vpop.f32.mrb[193].mxu1 }
0x11a3   :  { %v33883_v62 = vpop.f32.mrb[194].mxu1 }
0x11a4   :  { %v33887_v30 = vpop.f32.mrb[195].mxu1 }
0x11a6   :  { %27005 = vmatmul.mubr.bf16.gmra.mrb[44].mxu1 %v29401_v26  ;;  %v29404_v26 = vld [vmem:[%s36701_s18 + $0x510] sm:$0xff]  }
0x11a7   :  { %27090 = vmatprep.mubr.bf16.mxu1 %v29402_v57  ;;  %v37220_v57 = vpack.c.bf16 %v33469_v6, %v33459_v48  ;;  %v29406_v48 = vld [vmem:[%s36701_s18 + $0x520] sm:$0xff]  }
0x11a8   :  { %26735 = vmatmul.mubr.msk.bf16.gmra.mrb[0].mxu0 %vm11122_vm7, %v37218_v11  ;;  %v37221_v11 = vpack.c.bf16 %v33503_v8, %v33492_v17 }
0x11a9   :  { %26738 = vmatprep.mubr.msk.bf16.mxu0 %vm11122_vm7, %v37219_v19  ;;  %v33899_v61 = vpop.f32.mrb[196].mxu1 }
0x11aa   :  { %v33904_v13 = vpop.f32.mrb[197].mxu1 }
0x11ab   :  { %v33909_v45 = vpop.f32.mrb[198].mxu1 }
0x11ac   :  { %v33913_v49 = vpop.f32.mrb[199].mxu1 }
0x11ae   :  { %27091 = vmatmul.mubr.bf16.vlgmr.msra.gmra.mrb[48].mxu1 %v29403_v16  ;;  %v29405_v16 = vld [vmem:[%s36701_s18 + $0x518] sm:$0xff]  }
0x11af   :  { %27221 = vmatpush3.bf16.msra.mxu1 %v32622_v43  ;;  %27094 = vmatprep.mubr.bf16.mxu1 %v29404_v26 }
0x11b0   :  { %27222 = vmatprep.subr.bf16.mxu1 %v32624_v41  ;;  %26739 = vmatmul.mubr.msk.bf16.gmra.mrb[4].mxu0 %vm11122_vm7, %v37220_v57  ;;  %v37222_v57 = vpack.c.bf16 %v33498_v60, %v33487_v33  ;;  %v29408_v33 = vld [vmem:[%s36701_s18 + $0x530] sm:$0xff]  }
0x11b1   :  { %26742 = vmatprep.mubr.msk.bf16.mxu0 %vm11122_vm7, %v37221_v11  ;;  %v33927_v19 = vpop.f32.mrb[200].mxu1  ;;  %v37223_v11 = vpack.c.bf16 %v33533_v21, %v33522_v1 }
0x11b2   :  { %v33932_v18 = vpop.f32.mrb[201].mxu1 }
0x11b3   :  { %27223 = vmatpush3.bf16.msra.mxu1 %v32624_v41  ;;  %v33938_v6 = vpop.f32.mrb[202].mxu1 }
0x11b4   :  { %27224 = vmatprep.subr.bf16.mxu1 %v32626_v46  ;;  %v33943_v8 = vpop.f32.mrb[203].mxu1 }
0x11b6   :  { %27095 = vmatmul.mubr.bf16.gmra.mrb[52].mxu1 %v29405_v16  ;;  %v29407_v16 = vld [vmem:[%s36701_s18 + $0x528] sm:$0xff]  }
0x11b7   :  { %27225 = vmatpush3.bf16.msra.mxu1 %v32626_v46  ;;  %27098 = vmatprep.mubr.bf16.mxu1 %v29406_v48 }
0x11b8   :  { %27226 = vmatprep.subr.bf16.mxu1 %v32628_v27  ;;  %26743 = vmatmul.mubr.msk.bf16.gmra.mrb[8].mxu0 %vm11122_vm7, %v37222_v57  ;;  %v37226_v57 = vpack.c.bf16 %v33528_v14, %v33517_v31  ;;  %v29410_v31 = vld [vmem:[%s36701_s18 + $0x540] sm:$0xff]  }
0x11b9   :  { %26746 = vmatprep.mubr.msk.bf16.mxu0 %vm11122_vm7, %v37223_v11  ;;  %v33957_v17 = vpop.f32.mrb[204].mxu1  ;;  %v37227_v11 = vpack.c.bf16 %v33563_v7, %v33552_v34 }
0x11ba   :  { %37224 = vst [vmem:[#allocation47_spill] sm:$0xff] %v33957_v17  ;;  %v33962_v26 = vpop.f32.mrb[205].mxu1  ;;  %v37235_v17 = vld [vmem:[#allocation32_spill] sm:$0xff] }
0x11bb   :  { %27227 = vmatpush3.bf16.msra.mxu1 %v32628_v27  ;;  %v33968_v60 = vpop.f32.mrb[206].mxu1 }
0x11bc   :  { %37225 = vst [vmem:[#allocation50_spill] sm:$0xff] %v33968_v60  ;;  %27228 = vmatprep.subr.bf16.mxu1 %v32630_v59  ;;  %v33973_v21 = vpop.f32.mrb[207].mxu1  ;;  %v37236_v60 = vpack.c.bf16 %v37234_v63, %v37235_v17  ;;  %v29413_v63 = vld [vmem:[%s36701_s18 + $0x558] sm:$0xff]  }
0x11be   :  { %27099 = vmatmul.mubr.bf16.gmra.mrb[56].mxu1 %v29407_v16  ;;  %v29409_v16 = vld [vmem:[%s36701_s18 + $0x538] sm:$0xff]  }
0x11bf   :  { %27229 = vmatpush3.bf16.msra.mxu1 %v32630_v59  ;;  %27102 = vmatprep.mubr.bf16.mxu1 %v29408_v33 }
0x11c0   :  { %27230 = vmatprep.subr.bf16.mxu1 %v32632_v36  ;;  %26747 = vmatmul.mubr.msk.bf16.gmra.mrb[12].mxu0 %vm11122_vm7, %v37226_v57  ;;  %v37231_v57 = vld [vmem:[#allocation30_spill] sm:$0xff] }
0x11c1   :  { %26750 = vmatprep.mubr.msk.bf16.mxu0 %vm11122_vm7, %v37227_v11  ;;  %v33987_v1 = vpop.f32.mrb[208].mxu1  ;;  %v37232_v11 = vld [vmem:[#allocation27_spill] sm:$0xff] }
0x11c2   :  { %37228 = vst [vmem:[#allocation49_spill] sm:$0xff] %v33987_v1  ;;  %v33992_v48 = vpop.f32.mrb[209].mxu1  ;;  %v37233_v50 = vpack.c.bf16 %v37231_v57, %v37232_v11  ;;  %v37241_v57 = vld [vmem:[#allocation31_spill] sm:$0xff]  ;;  %v37242_v11 = vld [vmem:[#allocation29_spill] sm:$0xff] }
0x11c3   :  { %37229 = vst [vmem:[#allocation52_spill] sm:$0xff] %v33992_v48  ;;  %27231 = vmatpush3.bf16.msra.mxu1 %v32632_v36  ;;  %v33998_v14 = vpop.f32.mrb[210].mxu1  ;;  %v37243_v1 = vpack.c.bf16 %v37241_v57, %v37242_v11  ;;  %v37251_v57 = vld [vmem:[#allocation33_spill] sm:$0xff] }
0x11c4   :  { %37230 = vst [vmem:[#allocation51_spill] sm:$0xff] %v33998_v14  ;;  %27232 = vmatprep.subr.bf16.mxu1 %v32634_v23  ;;  %v34003_v7 = vpop.f32.mrb[211].mxu1  ;;  %v37244_v14 = vld [vmem:[#allocation38_spill] sm:$0xff] }
0x11c6   :  { %27103 = vmatmul.mubr.bf16.gmra.mrb[60].mxu1 %v29409_v16  ;;  %v29411_v16 = vld [vmem:[%s36701_s18 + $0x548] sm:$0xff]  }
0x11c7   :  { %27233 = vmatpush3.bf16.msra.mxu1 %v32634_v23  ;;  %27106 = vmatprep.mubr.bf16.mxu1 %v29410_v31  ;;  %v29412_v31 = vld [vmem:[%s36701_s18 + $0x550] sm:$0xff]  }
0x11c8   :  { %27234 = vmatprep.subr.bf16.mxu1 %v32636_v29  ;;  %26751 = vmatmul.mubr.msk.bf16.gmra.mrb[16].mxu0 %vm11122_vm7, %v37233_v50 }
0x11c9   :  { %26754 = vmatprep.mubr.msk.bf16.mxu0 %vm11122_vm7, %v37236_v60  ;;  %v34017_v34 = vpop.f32.mrb[212].mxu1  ;;  %v37253_v60 = vld [vmem:[#allocation42_spill] sm:$0xff] }
0x11ca   :  { %37237 = vst [vmem:[#allocation54_spill] sm:$0xff] %v34017_v34  ;;  %v34022_v33 = vpop.f32.mrb[213].mxu1 }
0x11cb   :  { %37238 = vst [vmem:[#allocation53_spill] sm:$0xff] %v34022_v33  ;;  %27235 = vmatpush3.bf16.msra.mxu1 %v32636_v29  ;;  %v34028_v50 = vpop.f32.mrb[214].mxu1  ;;  %v37245_v29 = vld [vmem:[#allocation36_spill] sm:$0xff] }
0x11cc   :  { %37239 = vst [vmem:[#allocation56_spill] sm:$0xff] %v34028_v50  ;;  %27366 = vmatprep.subr.bf16.mxu1 %v32622_v43  ;;  %v34033_v17 = vpop.f32.mrb[215].mxu1  ;;  %v37246_v23 = vpack.c.bf16 %v37244_v14, %v37245_v29  ;;  %v37250_v14 = vld [vmem:[#allocation35_spill] sm:$0xff]  ;;  %v37254_v50 = vld [vmem:[#allocation40_spill] sm:$0xff] }
0x11cd   :  { %37240 = vst [vmem:[#allocation55_spill] sm:$0xff] %v34033_v17  ;;  %v37252_v11 = vpack.c.bf16 %v37250_v14, %v37251_v57  ;;  %v37255_v33 = vpack.c.bf16 %v37253_v60, %v37254_v50  ;;  %v37258_v60 = vld [vmem:[#allocation39_spill] sm:$0xff]  ;;  %v37259_v57 = vld [vmem:[#allocation37_spill] sm:$0xff] }
0x11ce   :  { %27107 = vmatmul.mubr.bf16.gmra.mrb[64].mxu1 %v29411_v16  ;;  %v29414_v16 = vld [vmem:[%s36701_s18 + $0x560] sm:$0xff]   ;;  %v29417_v14 = vld [vmem:[%s36701_s18 + $0x578] sm:$0xff]  }
0x11cf   :  { %27110 = vmatprep.mubr.bf16.mxu1 %v29412_v31 }
0x11d0   :  { %26755 = vmatmul.mubr.msk.bf16.gmra.mrb[20].mxu0 %vm11122_vm7, %v37243_v1  ;;  %v29415_v1 = vld [vmem:[%s36701_s18 + $0x568] sm:$0xff]  }
0x11d1   :  { %26758 = vmatprep.mubr.msk.bf16.mxu0 %vm11122_vm7, %v37246_v23  ;;  %v34045_v48 = vpop.f32.mrb[216].mxu1  ;;  %v37261_v23 = vld [vmem:[#allocation44_spill] sm:$0xff] }
0x11d2   :  { %37247 = vst [vmem:[#allocation58_spill] sm:$0xff] %v34045_v48  ;;  %v34050_v34 = vpop.f32.mrb[217].mxu1 }
0x11d3   :  { %37248 = vst [vmem:[#allocation57_spill] sm:$0xff] %v34050_v34  ;;  %v34055_v31 = vpop.f32.mrb[218].mxu1 }
0x11d4   :  { %37249 = vst [vmem:[#allocation60_spill] sm:$0xff] %v34055_v31  ;;  %v34059_v29 = vpop.f32.mrb[219].mxu1  ;;  %v37262_v31 = vpack.c.bf16 %v33671_v9, %v37261_v23  ;;  %v37265_v23 = vld [vmem:[#allocation43_spill] sm:$0xff] }
0x11d6   :  { %27111 = vmatmul.mubr.bf16.gmra.mrb[68].mxu1 %v29413_v63  ;;  %v29416_v63 = vld [vmem:[%s36701_s18 + $0x570] sm:$0xff]  }
0x11d7   :  { %27114 = vmatprep.mubr.bf16.mxu1 %v29414_v16 }
0x11d8   :  { %26759 = vmatmul.mubr.msk.bf16.gmra.mrb[24].mxu0 %vm11122_vm7, %v37252_v11  ;;  %v37260_v11 = vpack.c.bf16 %v37258_v60, %v37259_v57  ;;  %v37266_v57 = vld [vmem:[#allocation41_spill] sm:$0xff]  ;;  %v29419_v60 = vld [vmem:[%s36701_s18 + $0x588] sm:$0xff]  }
0x11d9   :  { %26762 = vmatprep.mubr.msk.bf16.mxu0 %vm11122_vm7, %v37255_v33  ;;  %v34071_v17 = vpop.f32.mrb[220].mxu1  ;;  %v37268_v33 = vpack.c.bf16 %v33697_v58, %v33688_v4 }
0x11da   :  { %37256 = vst [vmem:[#allocation59_spill] sm:$0xff] %v34071_v17  ;;  %v34076_v48 = vpop.f32.mrb[221].mxu1 }
0x11db   :  { %v34081_v16 = vpop.f32.mrb[222].mxu1 }
0x11dc   :  { %37257 = vst [vmem:[#allocation62_spill] sm:$0xff] %v34081_v16  ;;  %v34085_v50 = vpop.f32.mrb[223].mxu1 }
0x11de   :  { %27115 = vmatmul.mubr.bf16.gmra.mrb[72].mxu1 %v29415_v1  ;;  %v29418_v1 = vld [vmem:[%s36701_s18 + $0x580] sm:$0xff]  }
0x11df   :  { %27118 = vmatprep.mubr.bf16.mxu1 %v29416_v63 }
0x11e0   :  { %26763 = vmatmul.mubr.msk.bf16.gmra.mrb[28].mxu0 %vm11122_vm7, %v37260_v11  ;;  %v37267_v11 = vpack.c.bf16 %v37265_v23, %v37266_v57  ;;  %v37271_v57 = vld [vmem:[#allocation46_spill] sm:$0xff]  ;;  %v29421_v23 = vld [vmem:[%s36701_s18 + $0x598] sm:$0xff]  }
0x11e1   :  { %26766 = vmatprep.mubr.msk.bf16.mxu0 %vm11122_vm7, %v37262_v31  ;;  %v34097_v34 = vpop.f32.mrb[224].mxu1  ;;  %v37273_v31 = vpack.c.bf16 %v33723_v54, %v33714_v0 }
0x11e2   :  { %37263 = vst [vmem:[#allocation61_spill] sm:$0xff] %v34097_v34  ;;  %v34102_v17 = vpop.f32.mrb[225].mxu1 }
0x11e3   :  { %v34107_v63 = vpop.f32.mrb[226].mxu1 }
0x11e4   :  { %37264 = vst [vmem:[#allocation64_spill] sm:$0xff] %v34107_v63  ;;  %v34111_v9 = vpop.f32.mrb[227].mxu1 }
0x11e6   :  { %27119 = vmatmul.mubr.bf16.gmra.mrb[76].mxu1 %v29417_v14  ;;  %v29420_v14 = vld [vmem:[%s36701_s18 + $0x590] sm:$0xff]  }
0x11e7   :  { %27122 = vmatprep.mubr.bf16.mxu1 %v29418_v1 }
0x11e8   :  { %26767 = vmatmul.mubr.msk.bf16.gmra.mrb[32].mxu0 %vm11122_vm7, %v37267_v11 }
0x11e9   :  { %26770 = vmatprep.mubr.msk.bf16.mxu0 %vm11122_vm7, %v37268_v33  ;;  %v34123_v16 = vpop.f32.mrb[228].mxu1  ;;  %v37270_v33 = vld [vmem:[#allocation45_spill] sm:$0xff] }
0x11ea   :  { %37269 = vst [vmem:[#allocation63_spill] sm:$0xff] %v34123_v16  ;;  %v34128_v34 = vpop.f32.mrb[229].mxu1  ;;  %v37272_v11 = vpack.c.bf16 %v37270_v33, %v37271_v57  ;;  %v29423_v33 = vld [vmem:[%s36701_s18 + $0x5a8] sm:$0xff]  }
0x11eb   :  { %v34133_v1 = vpop.f32.mrb[230].mxu1 }
0x11ec   :  { %v34137_v4 = vpop.f32.mrb[231].mxu1 }
0x11ee   :  { %27123 = vmatmul.mubr.bf16.gmra.mrb[80].mxu1 %v29419_v60  ;;  %v29422_v60 = vld [vmem:[%s36701_s18 + $0x5a0] sm:$0xff]  }
0x11ef   :  { %27126 = vmatprep.mubr.bf16.mxu1 %v29420_v14 }
0x11f0   :  { %26771 = vmatmul.mubr.msk.bf16.gmra.mrb[36].mxu0 %vm11122_vm7, %v37272_v11  ;;  %v37277_v11 = vpack.c.bf16 %v33749_v35, %v33740_v5 }
0x11f1   :  { %26774 = vmatprep.mubr.msk.bf16.mxu0 %vm11122_vm7, %v37273_v31  ;;  %v34149_v63 = vpop.f32.mrb[232].mxu1  ;;  %v37275_v31 = vld [vmem:[#allocation48_spill] sm:$0xff] }
0x11f2   :  { %37274 = vst [vmem:[#allocation66_spill] sm:$0xff] %v34149_v63  ;;  %v34154_v16 = vpop.f32.mrb[233].mxu1  ;;  %v37276_v57 = vpack.c.bf16 %v33719_v56, %v37275_v31  ;;  %v37278_v31 = vpack.c.bf16 %v33745_v55, %v33735_v47 }
0x11f3   :  { %v34159_v14 = vpop.f32.mrb[234].mxu1 }
0x11f4   :  { %v34163_v0 = vpop.f32.mrb[235].mxu1 }
0x11f6   :  { %27127 = vmatmul.mubr.bf16.gmra.mrb[84].mxu1 %v29421_v23  ;;  %v29424_v23 = vld [vmem:[%s36701_s18 + $0x5b0] sm:$0xff]  }
0x11f7   :  { %27130 = vmatprep.mubr.bf16.mxu1 %v29422_v60  ;;  %v29425_v60 = vld [vmem:[%s36701_s18 + $0x5b8] sm:$0xff]  }
0x11f8   :  { %26775 = vmatmul.mubr.msk.bf16.gmra.mrb[40].mxu0 %vm11122_vm7, %v37276_v57  ;;  %v37279_v57 = vpack.c.bf16 %v33775_v24, %v33766_v52 }
0x11f9   :  { %26778 = vmatprep.mubr.msk.bf16.mxu0 %vm11122_vm7, %v37277_v11  ;;  %v34175_v58 = vpop.f32.mrb[236].mxu1 }
0x11fa   :  { %v34180_v63 = vpop.f32.mrb[237].mxu1 }
0x11fb   :  { %v34185_v56 = vpop.f32.mrb[238].mxu1 }
0x11fc   :  { %v34189_v5 = vpop.f32.mrb[239].mxu1 }
0x11fe   :  { %27131 = vmatmul.mubr.bf16.gmra.mrb[88].mxu1 %v29423_v33  ;;  %v29426_v33 = vld [vmem:[%s36701_s18 + $0x5c0] sm:$0xff]  }
0x11ff   :  { %27134 = vmatprep.mubr.bf16.mxu1 %v29424_v23  ;;  %v37280_v23 = vpack.c.bf16 %v33771_v40, %v33761_v2  ;;  %v29427_v2 = vld [vmem:[%s36701_s18 + $0x5c8] sm:$0xff]  }
0x1200   :  { %26779 = vmatmul.mubr.msk.bf16.gmra.mrb[44].mxu0 %vm11122_vm7, %v37278_v31  ;;  %v22938_v31 = vld [vmem:[%s36702_s19 + $0xa] sm:$0x3] }
0x1201   :  { %26864 = vmatprep.mubr.msk.bf16.mxu0 %vm11122_vm7, %v37279_v57  ;;  %v34201_v11 = vpop.f32.mrb[240].mxu1  ;;  %v37281_v57 = vpack.c.bf16 %v33809_v39, %v33799_v22  ;;  %v29429_v39 = vld [vmem:[%s36701_s18 + $0x5d8] sm:$0xff]  }
0x1202   :  { %v34206_v54 = vpop.f32.mrb[241].mxu1 }
0x1203   :  { %v34211_v47 = vpop.f32.mrb[242].mxu1 }
0x1204   :  { %v34215_v52 = vpop.f32.mrb[243].mxu1 }
0x1206   :  { %27135 = vmatmul.mubr.bf16.gmra.mrb[92].mxu1 %v29425_v60  ;;  %v34234_v60 = vand.u32 %v22938_v31, %v32669_v38  ;;  %v37282_v31 = vpack.c.bf16 %v33805_v20, %v33791_v25  ;;  %v29431_v20 = vld [vmem:[%s36701_s18 + $0x5e8] sm:$0xff]  }
0x1207   :  { %27138 = vmatprep.mubr.bf16.mxu1 %v29426_v33 }
0x1208   :  { %26865 = vmatmul.mubr.msk.bf16.vlgmr.msra.gmra.mrb[240].mxu0 %vm11122_vm7, %v37280_v23 }
0x1209   :  { %27009 = vmatpush3.bf16.msra.mxu0 %v33794_v28  ;;  %26868 = vmatprep.mubr.msk.bf16.mxu0 %vm11122_vm7, %v37281_v57  ;;  %v34231_v55 = vpop.f32.mrb[244].mxu1  ;;  %v29428_v28 = vld [vmem:[%s36701_s18 + $0x5d0] sm:$0xff]   ;;  %v37283_v57 = vpack.c.bf16 %v33835_v53, %v33826_v42 }
0x120a   :  { %v34239_v40 = vpop.f32.mrb[245].mxu1  ;;  %27154 = vmatprep.subr.bf16.mxu0 %v34234_v60 }
0x120b   :  { %v34245_v22 = vpop.f32.mrb[246].mxu1 }
0x120c   :  { %v34249_v33 = vpop.f32.mrb[247].mxu1 }
0x120e   :  { %27139 = vmatmul.mubr.bf16.gmra.mrb[96].mxu1 %v29427_v2  ;;  %v29430_v2 = vld [vmem:[%s36701_s18 + $0x5e0] sm:$0xff]  }
0x120f   :  { %27142 = vmatprep.mubr.bf16.mxu1 %v29428_v28  ;;  %v37284_v28 = vpack.c.bf16 %v33831_v12, %v33821_v44  ;;  %v29433_v12 = vld [vmem:[%s36701_s18 + $0x5f8] sm:$0xff]  }
0x1210   :  { %26869 = vmatmul.mubr.msk.bf16.gmra.mrb[244].mxu0 %vm11122_vm7, %v37282_v31  ;;  %v37285_v31 = vpack.c.bf16 %v33861_v51, %v33852_v3 }
0x1211   :  { %26872 = vmatprep.mubr.msk.bf16.mxu0 %vm11122_vm7, %v37283_v57  ;;  %v34261_v24 = vpop.f32.mrb[248].mxu1 }
0x1212   :  { %v34266_v35 = vpop.f32.mrb[249].mxu1 }
0x1213   :  { %v34271_v25 = vpop.f32.mrb[250].mxu1 }
0x1214   :  { %v34275_v42 = vpop.f32.mrb[251].mxu1 }
0x1216   :  { %27143 = vmatmul.mubr.bf16.gmra.mrb[100].mxu1 %v29429_v39  ;;  %v29432_v39 = vld [vmem:[%s36701_s18 + $0x5f0] sm:$0xff]  }
0x1217   :  { %27146 = vmatprep.mubr.bf16.mxu1 %v29430_v2  ;;  %v37286_v2 = vpack.c.bf16 %v33857_v37, %v33847_v15  ;;  %v29435_v37 = vld [vmem:[%s36701_s18 + $0x608] sm:$0xff]  }
0x1218   :  { %26873 = vmatmul.mubr.msk.bf16.gmra.mrb[248].mxu0 %vm11122_vm7, %v37284_v28  ;;  %v37287_v28 = vpack.c.bf16 %v33887_v30, %v33878_v32  ;;  %v37302_v30 = vld [vmem:[#allocation52_spill] sm:$0xff] }
0x1219   :  { %26876 = vmatprep.mubr.msk.bf16.mxu0 %vm11122_vm7, %v37285_v31  ;;  %v34287_v57 = vpop.f32.mrb[252].mxu1 }
0x121a   :  { %v34292_v23 = vpop.f32.mrb[253].mxu1 }
0x121b   :  { %v34297_v44 = vpop.f32.mrb[254].mxu1 }
0x121c   :  { %v34301_v3 = vpop.f32.mrb[255].mxu1 }
0x121e   :  { %27147 = vmatmul.mubr.bf16.gmra.mrb[104].mxu1 %v29431_v20  ;;  %v29434_v20 = vld [vmem:[%s36701_s18 + $0x600] sm:$0xff]  }
0x121f   :  { %27150 = vmatprep.mubr.bf16.mxu1 %v29432_v39  ;;  %v37288_v39 = vpack.c.bf16 %v33883_v62, %v33873_v10 }
0x1220   :  { %26877 = vmatmul.mubr.msk.bf16.gmra.mrb[252].mxu0 %vm11122_vm7, %v37286_v2  ;;  %v37289_v2 = vpack.c.bf16 %v33913_v49, %v33904_v13 }
0x1221   :  { %26880 = vmatprep.mubr.msk.bf16.mxu0 %vm11122_vm7, %v37287_v28  ;;  %v34313_v31 = vpop.f32.mrb[0].mxu1 }
0x1222   :  { %v34318_v53 = vpop.f32.mrb[1].mxu1 }
0x1223   :  { %v34323_v15 = vpop.f32.mrb[2].mxu1 }
0x1224   :  { %v34327_v32 = vpop.f32.mrb[3].mxu1 }
0x1226   :  { %27151 = vmatmul.mubr.bf16.gmra.mrb[108].mxu1 %v29433_v12  ;;  %v29436_v12 = vld [vmem:[%s36701_s18 + $0x610] sm:$0xff]  }
0x1227   :  { %27236 = vmatprep.mubr.bf16.mxu1 %v29434_v20  ;;  %v37290_v20 = vpack.c.bf16 %v33909_v45, %v33899_v61  ;;  %v29438_v61 = vld [vmem:[%s36701_s18 + $0x620] sm:$0xff]  }
0x1228   :  { %26881 = vmatmul.mubr.msk.bf16.gmra.mrb[0].mxu0 %vm11122_vm7, %v37288_v39  ;;  %v37291_v39 = vpack.c.bf16 %v33943_v8, %v33932_v18 }
0x1229   :  { %26884 = vmatprep.mubr.msk.bf16.mxu0 %vm11122_vm7, %v37289_v2  ;;  %v34339_v28 = vpop.f32.mrb[4].mxu1 }
0x122a   :  { %v34344_v51 = vpop.f32.mrb[5].mxu1 }
0x122b   :  { %v34349_v10 = vpop.f32.mrb[6].mxu1 }
0x122c   :  { %v34353_v13 = vpop.f32.mrb[7].mxu1 }
0x122e   :  { %27237 = vmatmul.mubr.bf16.vlgmr.msra.gmra.mrb[112].mxu1 %v29435_v37  ;;  %v29437_v37 = vld [vmem:[%s36701_s18 + $0x618] sm:$0xff]  }
0x122f   :  { %27367 = vmatpush3.bf16.msra.mxu1 %v32622_v43  ;;  %27240 = vmatprep.mubr.bf16.mxu1 %v29436_v12 }
0x1230   :  { %27368 = vmatprep.subr.bf16.mxu1 %v32624_v41  ;;  %26885 = vmatmul.mubr.msk.bf16.gmra.mrb[4].mxu0 %vm11122_vm7, %v37290_v20  ;;  %v37293_v20 = vpack.c.bf16 %v33938_v6, %v33927_v19  ;;  %v29440_v19 = vld [vmem:[%s36701_s18 + $0x630] sm:$0xff]  }
0x1231   :  { %26888 = vmatprep.mubr.msk.bf16.mxu0 %vm11122_vm7, %v37291_v39  ;;  %v34367_v2 = vpop.f32.mrb[8].mxu1  ;;  %v37294_v39 = vpack.c.bf16 %v33973_v21, %v33962_v26 }
0x1232   :  { %37292 = vst [vmem:[#allocation65_spill] sm:$0xff] %v34367_v2  ;;  %v34372_v62 = vpop.f32.mrb[9].mxu1  ;;  %v37303_v2 = vpack.c.bf16 %v34003_v7, %v37302_v30 }
0x1233   :  { %27369 = vmatpush3.bf16.msra.mxu1 %v32624_v41  ;;  %v34378_v45 = vpop.f32.mrb[10].mxu1 }
0x1234   :  { %27370 = vmatprep.subr.bf16.mxu1 %v32626_v46  ;;  %v34383_v8 = vpop.f32.mrb[11].mxu1 }
0x1236   :  { %27241 = vmatmul.mubr.bf16.gmra.mrb[116].mxu1 %v29437_v37  ;;  %v29439_v37 = vld [vmem:[%s36701_s18 + $0x628] sm:$0xff]  }
0x1237   :  { %27371 = vmatpush3.bf16.msra.mxu1 %v32626_v46  ;;  %27244 = vmatprep.mubr.bf16.mxu1 %v29438_v61 }
0x1238   :  { %27372 = vmatprep.subr.bf16.mxu1 %v32628_v27  ;;  %26889 = vmatmul.mubr.msk.bf16.gmra.mrb[8].mxu0 %vm11122_vm7, %v37293_v20  ;;  %v37299_v20 = vld [vmem:[#allocation50_spill] sm:$0xff] }
0x1239   :  { %26892 = vmatprep.mubr.msk.bf16.mxu0 %vm11122_vm7, %v37294_v39  ;;  %v34397_v18 = vpop.f32.mrb[12].mxu1  ;;  %v37300_v39 = vld [vmem:[#allocation47_spill] sm:$0xff] }
0x123a   :  { %37295 = vst [vmem:[#allocation68_spill] sm:$0xff] %v34397_v18  ;;  %v34402_v12 = vpop.f32.mrb[13].mxu1  ;;  %v37301_v49 = vpack.c.bf16 %v37299_v20, %v37300_v39  ;;  %v37306_v20 = vld [vmem:[#allocation14_spill] sm:$0xff]  ;;  %v37307_v39 = vld [vmem:[#allocation12_spill] sm:$0xff]  ;;  %v37308_v18 = vld [vmem:[#allocation51_spill] sm:$0xff] }
0x123b   :  { %37296 = vst [vmem:[#allocation67_spill] sm:$0xff] %v34402_v12  ;;  %27373 = vmatpush3.bf16.msra.mxu1 %v32628_v27  ;;  %v34408_v6 = vpop.f32.mrb[14].mxu1  ;;  %v37312_v12 = vld [vmem:[#allocation53_spill] sm:$0xff] }
0x123c   :  { %37297 = vst [vmem:[#allocation70_spill] sm:$0xff] %v34408_v6  ;;  %27374 = vmatprep.subr.bf16.mxu1 %v32630_v59  ;;  %v34413_v21 = vpop.f32.mrb[15].mxu1  ;;  %v37309_v6 = vld [vmem:[#allocation49_spill] sm:$0xff] }
0x123d   :  { %37298 = vst [vmem:[#allocation69_spill] sm:$0xff] %v34413_v21 }
0x123e   :  { %27245 = vmatmul.mubr.bf16.gmra.mrb[120].mxu1 %v29439_v37  ;;  %v29441_v37 = vld [vmem:[%s36701_s18 + $0x638] sm:$0xff]  }
0x123f   :  { %27375 = vmatpush3.bf16.msra.mxu1 %v32630_v59  ;;  %27248 = vmatprep.mubr.bf16.mxu1 %v29440_v19  ;;  %v29442_v19 = vld [vmem:[%s36701_s18 + $0x640] sm:$0xff]   ;;  %v37311_v59 = vld [vmem:[#allocation55_spill] sm:$0xff] }
0x1240   :  { %27376 = vmatprep.subr.bf16.mxu1 %v32632_v36  ;;  %26893 = vmatmul.mubr.msk.bf16.gmra.mrb[12].mxu0 %vm11122_vm7, %v37301_v49  ;;  %v37313_v21 = vpack.c.bf16 %v37311_v59, %v37312_v12  ;;  %v29445_v59 = vld [vmem:[%s36701_s18 + $0x658] sm:$0xff]  }
0x1241   :  { %26896 = vmatprep.mubr.msk.bf16.mxu0 %vm11122_vm7, %v37303_v2  ;;  %v34427_v26 = vpop.f32.mrb[16].mxu1 }
0x1242   :  { %37304 = vst [vmem:[#allocation3_spill] sm:$0xff] %v34427_v26  ;;  %v34432_v61 = vpop.f32.mrb[17].mxu1 }
0x1243   :  { %27377 = vmatpush3.bf16.msra.mxu1 %v32632_v36  ;;  %v34438_v49 = vpop.f32.mrb[18].mxu1  ;;  %v37310_v36 = vpack.c.bf16 %v37308_v18, %v37309_v6  ;;  %v29444_v18 = vld [vmem:[%s36701_s18 + $0x650] sm:$0xff]   ;;  %v37326_v6 = vpack.c.bf16 %v34085_v50, %v34076_v48  ;;  %v37337_v50 = vpack.c.bf16 %v34137_v4, %v34128_v34 }
0x1244   :  { %37305 = vst [vmem:[#allocation4_spill] sm:$0xff] %v34438_v49  ;;  %27378 = vmatprep.subr.bf16.mxu1 %v37306_v20  ;;  %v34443_v30 = vpop.f32.mrb[19].mxu1  ;;  %v37319_v49 = vld [vmem:[#allocation57_spill] sm:$0xff] }
0x1246   :  { %27249 = vmatmul.mubr.bf16.gmra.mrb[124].mxu1 %v29441_v37  ;;  %v29443_v37 = vld [vmem:[%s36701_s18 + $0x648] sm:$0xff]  }
0x1247   :  { %27379 = vmatpush3.bf16.msra.mxu1 %v37306_v20  ;;  %27252 = vmatprep.mubr.bf16.mxu1 %v29442_v19  ;;  %v37317_v19 = vld [vmem:[#allocation54_spill] sm:$0xff] }
0x1248   :  { %27380 = vmatprep.subr.bf16.mxu1 %v37307_v39  ;;  %26897 = vmatmul.mubr.msk.bf16.gmra.mrb[16].mxu0 %vm11122_vm7, %v37310_v36 }
0x1249   :  { %26900 = vmatprep.mubr.msk.bf16.mxu0 %vm11122_vm7, %v37313_v21  ;;  %v34457_v7 = vpop.f32.mrb[20].mxu1  ;;  %v37316_v21 = vld [vmem:[#allocation56_spill] sm:$0xff] }
0x124a   :  { %37314 = vst [vmem:[#allocation7_spill] sm:$0xff] %v34457_v7  ;;  %v34462_v2 = vpop.f32.mrb[21].mxu1  ;;  %v37318_v26 = vpack.c.bf16 %v37316_v21, %v37317_v19  ;;  %v37324_v21 = vld [vmem:[#allocation58_spill] sm:$0xff] }
0x124b   :  { %27381 = vmatpush3.bf16.msra.mxu1 %v37307_v39  ;;  %v34468_v36 = vpop.f32.mrb[22].mxu1  ;;  %v37320_v39 = vpack.c.bf16 %v34059_v29, %v37319_v49  ;;  %v37332_v49 = vpack.c.bf16 %v34111_v9, %v34102_v17 }
0x124c   :  { %37315 = vst [vmem:[#allocation5_spill] sm:$0xff] %v34468_v36  ;;  %27512 = vmatprep.subr.bf16.mxu1 %v32622_v43  ;;  %v34473_v12 = vpop.f32.mrb[23].mxu1 }
0x124e   :  { %27253 = vmatmul.mubr.bf16.gmra.mrb[128].mxu1 %v29443_v37  ;;  %v29446_v37 = vld [vmem:[%s36701_s18 + $0x660] sm:$0xff]  }
0x124f   :  { %27256 = vmatprep.mubr.bf16.mxu1 %v29444_v18 }
0x1250   :  { %26901 = vmatmul.mubr.msk.bf16.gmra.mrb[20].mxu0 %vm11122_vm7, %v37318_v26  ;;  %v29447_v26 = vld [vmem:[%s36701_s18 + $0x668] sm:$0xff]  }
0x1251   :  { %26904 = vmatprep.mubr.msk.bf16.mxu0 %vm11122_vm7, %v37320_v39  ;;  %v34485_v20 = vpop.f32.mrb[24].mxu1  ;;  %v37323_v39 = vld [vmem:[#allocation60_spill] sm:$0xff] }
0x1252   :  { %37321 = vst [vmem:[#allocation9_spill] sm:$0xff] %v34485_v20  ;;  %v34490_v7 = vpop.f32.mrb[25].mxu1  ;;  %v37325_v19 = vpack.c.bf16 %v37323_v39, %v37324_v21  ;;  %v37330_v21 = vld [vmem:[#allocation59_spill] sm:$0xff]  ;;  %v29449_v39 = vld [vmem:[%s36701_s18 + $0x678] sm:$0xff]  }
0x1253   :  { %v34495_v18 = vpop.f32.mrb[26].mxu1 }
0x1254   :  { %37322 = vst [vmem:[#allocation6_spill] sm:$0xff] %v34495_v18  ;;  %v34499_v29 = vpop.f32.mrb[27].mxu1 }
0x1256   :  { %27257 = vmatmul.mubr.bf16.gmra.mrb[132].mxu1 %v29445_v59  ;;  %v29448_v59 = vld [vmem:[%s36701_s18 + $0x670] sm:$0xff]  }
0x1257   :  { %27260 = vmatprep.mubr.bf16.mxu1 %v29446_v37 }
0x1258   :  { %26905 = vmatmul.mubr.msk.bf16.gmra.mrb[24].mxu0 %vm11122_vm7, %v37325_v19 }
0x1259   :  { %26908 = vmatprep.mubr.msk.bf16.mxu0 %vm11122_vm7, %v37326_v6  ;;  %v34511_v36 = vpop.f32.mrb[28].mxu1  ;;  %v37329_v6 = vld [vmem:[#allocation62_spill] sm:$0xff] }
0x125a   :  { %37327 = vst [vmem:[#allocation15_spill] sm:$0xff] %v34511_v36  ;;  %v34516_v20 = vpop.f32.mrb[29].mxu1  ;;  %v37331_v19 = vpack.c.bf16 %v37329_v6, %v37330_v21  ;;  %v37335_v21 = vld [vmem:[#allocation61_spill] sm:$0xff]  ;;  %v29451_v6 = vld [vmem:[%s36701_s18 + $0x688] sm:$0xff]  }
0x125b   :  { %v34521_v37 = vpop.f32.mrb[30].mxu1 }
0x125c   :  { %37328 = vst [vmem:[#allocation11_spill] sm:$0xff] %v34521_v37  ;;  %v34525_v48 = vpop.f32.mrb[31].mxu1 }
0x125e   :  { %27261 = vmatmul.mubr.bf16.gmra.mrb[136].mxu1 %v29447_v26  ;;  %v29450_v26 = vld [vmem:[%s36701_s18 + $0x680] sm:$0xff]  }
0x125f   :  { %27264 = vmatprep.mubr.bf16.mxu1 %v29448_v59 }
0x1260   :  { %26909 = vmatmul.mubr.msk.bf16.gmra.mrb[28].mxu0 %vm11122_vm7, %v37331_v19 }
0x1261   :  { %26912 = vmatprep.mubr.msk.bf16.mxu0 %vm11122_vm7, %v37332_v49  ;;  %v34537_v18 = vpop.f32.mrb[32].mxu1  ;;  %v37334_v49 = vld [vmem:[#allocation64_spill] sm:$0xff] }
0x1262   :  { %37333 = vst [vmem:[#allocation16_spill] sm:$0xff] %v34537_v18  ;;  %v34542_v36 = vpop.f32.mrb[33].mxu1  ;;  %v37336_v19 = vpack.c.bf16 %v37334_v49, %v37335_v21  ;;  %v29453_v49 = vld [vmem:[%s36701_s18 + $0x698] sm:$0xff]  }
0x1263   :  { %v34547_v59 = vpop.f32.mrb[34].mxu1 }
0x1264   :  { %v34551_v17 = vpop.f32.mrb[35].mxu1 }
0x1266   :  { %27265 = vmatmul.mubr.bf16.gmra.mrb[140].mxu1 %v29449_v39  ;;  %v29452_v39 = vld [vmem:[%s36701_s18 + $0x690] sm:$0xff]  }
0x1267   :  { %27268 = vmatprep.mubr.bf16.mxu1 %v29450_v26 }
0x1268   :  { %26913 = vmatmul.mubr.msk.bf16.gmra.mrb[32].mxu0 %vm11122_vm7, %v37336_v19  ;;  %v37341_v19 = vpack.c.bf16 %v34163_v0, %v34154_v16 }
0x1269   :  { %26916 = vmatprep.mubr.msk.bf16.mxu0 %vm11122_vm7, %v37337_v50  ;;  %v34563_v37 = vpop.f32.mrb[36].mxu1  ;;  %v37339_v50 = vld [vmem:[#allocation63_spill] sm:$0xff] }
0x126a   :  { %37338 = vst [vmem:[#allocation13_spill] sm:$0xff] %v34563_v37  ;;  %v34568_v18 = vpop.f32.mrb[37].mxu1  ;;  %v37340_v21 = vpack.c.bf16 %v34133_v1, %v37339_v50  ;;  %v37343_v50 = vld [vmem:[#allocation66_spill] sm:$0xff] }
0x126b   :  { %v34573_v26 = vpop.f32.mrb[38].mxu1 }
0x126c   :  { %v34577_v34 = vpop.f32.mrb[39].mxu1 }
0x126e   :  { %27269 = vmatmul.mubr.bf16.gmra.mrb[144].mxu1 %v29451_v6  ;;  %v29454_v6 = vld [vmem:[%s36701_s18 + $0x6a0] sm:$0xff]  }
0x126f   :  { %27272 = vmatprep.mubr.bf16.mxu1 %v29452_v39  ;;  %v29455_v39 = vld [vmem:[%s36701_s18 + $0x6a8] sm:$0xff]  }
0x1270   :  { %26917 = vmatmul.mubr.msk.bf16.gmra.mrb[36].mxu0 %vm11122_vm7, %v37340_v21  ;;  %v37344_v21 = vpack.c.bf16 %v34159_v14, %v37343_v50  ;;  %v37346_v50 = vpack.c.bf16 %v34185_v56, %v34175_v58 }
0x1271   :  { %26920 = vmatprep.mubr.msk.bf16.mxu0 %vm11122_vm7, %v37341_v19  ;;  %v34589_v9 = vpop.f32.mrb[40].mxu1  ;;  %v37345_v19 = vpack.c.bf16 %v34189_v5, %v34180_v63 }
0x1272   :  { %37342 = vst [vmem:[#allocation19_spill] sm:$0xff] %v34589_v9  ;;  %v34594_v37 = vpop.f32.mrb[41].mxu1 }
0x1273   :  { %v34599_v1 = vpop.f32.mrb[42].mxu1 }
0x1274   :  { %v34603_v16 = vpop.f32.mrb[43].mxu1 }
0x1276   :  { %27273 = vmatmul.mubr.bf16.gmra.mrb[148].mxu1 %v29453_v49  ;;  %v29456_v49 = vld [vmem:[%s36701_s18 + $0x6b0] sm:$0xff]  }
0x1277   :  { %27276 = vmatprep.mubr.bf16.mxu1 %v29454_v6  ;;  %v29457_v6 = vld [vmem:[%s36701_s18 + $0x6b8] sm:$0xff]  }
0x1278   :  { %26921 = vmatmul.mubr.msk.bf16.gmra.mrb[40].mxu0 %vm11122_vm7, %v37344_v21  ;;  %v37347_v21 = vpack.c.bf16 %v34215_v52, %v34206_v54 }
0x1279   :  { %26924 = vmatprep.mubr.msk.bf16.mxu0 %vm11122_vm7, %v37345_v19  ;;  %v34615_v4 = vpop.f32.mrb[44].mxu1 }
0x127a   :  { %v34620_v9 = vpop.f32.mrb[45].mxu1 }
0x127b   :  { %v34625_v14 = vpop.f32.mrb[46].mxu1 }
0x127c   :  { %v34629_v63 = vpop.f32.mrb[47].mxu1 }
0x127e   :  { %27277 = vmatmul.mubr.bf16.gmra.mrb[152].mxu1 %v29455_v39  ;;  %v29458_v39 = vld [vmem:[%s36701_s18 + $0x6c0] sm:$0xff]  }
0x127f   :  { %27280 = vmatprep.mubr.bf16.mxu1 %v29456_v49  ;;  %v37348_v49 = vpack.c.bf16 %v34211_v47, %v34201_v11  ;;  %v29459_v11 = vld [vmem:[%s36701_s18 + $0x6c8] sm:$0xff]  }
0x1280   :  { %26925 = vmatmul.mubr.msk.bf16.gmra.mrb[44].mxu0 %vm11122_vm7, %v37346_v50  ;;  %v23067_v50 = vld [vmem:[%s36702_s19 + $0xc] sm:$0x3] }
0x1281   :  { %27010 = vmatprep.mubr.msk.bf16.mxu0 %vm11122_vm7, %v37347_v21  ;;  %v34641_v19 = vpop.f32.mrb[48].mxu1  ;;  %v37349_v21 = vpack.c.bf16 %v34249_v33, %v34239_v40  ;;  %v29461_v33 = vld [vmem:[%s36701_s18 + $0x6d8] sm:$0xff]  }
0x1282   :  { %v34646_v0 = vpop.f32.mrb[49].mxu1 }
0x1283   :  { %v34651_v58 = vpop.f32.mrb[50].mxu1 }
0x1284   :  { %v34655_v54 = vpop.f32.mrb[51].mxu1 }
0x1286   :  { %27281 = vmatmul.mubr.bf16.gmra.mrb[156].mxu1 %v29457_v6  ;;  %v34674_v6 = vand.u32 %v23067_v50, %v32669_v38  ;;  %v37350_v50 = vpack.c.bf16 %v34245_v22, %v34231_v55  ;;  %v29463_v22 = vld [vmem:[%s36701_s18 + $0x6e8] sm:$0xff]  }
0x1287   :  { %27284 = vmatprep.mubr.bf16.mxu1 %v29458_v39 }
0x1288   :  { %27011 = vmatmul.mubr.msk.bf16.vlgmr.msra.gmra.mrb[240].mxu0 %vm11122_vm7, %v37348_v49 }
0x1289   :  { %27155 = vmatpush3.bf16.msra.mxu0 %v34234_v60  ;;  %27014 = vmatprep.mubr.msk.bf16.mxu0 %vm11122_vm7, %v37349_v21  ;;  %v34671_v56 = vpop.f32.mrb[52].mxu1  ;;  %v29460_v60 = vld [vmem:[%s36701_s18 + $0x6d0] sm:$0xff]   ;;  %v37351_v21 = vpack.c.bf16 %v34275_v42, %v34266_v35 }
0x128a   :  { %v34679_v47 = vpop.f32.mrb[53].mxu1  ;;  %27300 = vmatprep.subr.bf16.mxu0 %v34674_v6 }
0x128b   :  { %v34685_v40 = vpop.f32.mrb[54].mxu1 }
0x128c   :  { %v34689_v39 = vpop.f32.mrb[55].mxu1 }
0x128e   :  { %27285 = vmatmul.mubr.bf16.gmra.mrb[160].mxu1 %v29459_v11  ;;  %v29462_v11 = vld [vmem:[%s36701_s18 + $0x6e0] sm:$0xff]  }
0x128f   :  { %27288 = vmatprep.mubr.bf16.mxu1 %v29460_v60  ;;  %v37352_v60 = vpack.c.bf16 %v34271_v25, %v34261_v24  ;;  %v29465_v25 = vld [vmem:[%s36701_s18 + $0x6f8] sm:$0xff]  }
0x1290   :  { %27015 = vmatmul.mubr.msk.bf16.gmra.mrb[244].mxu0 %vm11122_vm7, %v37350_v50  ;;  %v37353_v50 = vpack.c.bf16 %v34301_v3, %v34292_v23 }
0x1291   :  { %27018 = vmatprep.mubr.msk.bf16.mxu0 %vm11122_vm7, %v37351_v21  ;;  %v34701_v52 = vpop.f32.mrb[56].mxu1 }
0x1292   :  { %v34706_v5 = vpop.f32.mrb[57].mxu1 }
0x1293   :  { %v34711_v55 = vpop.f32.mrb[58].mxu1 }
0x1294   :  { %v34715_v35 = vpop.f32.mrb[59].mxu1 }
0x1296   :  { %27289 = vmatmul.mubr.bf16.gmra.mrb[164].mxu1 %v29461_v33  ;;  %v29464_v33 = vld [vmem:[%s36701_s18 + $0x6f0] sm:$0xff]  }
0x1297   :  { %27292 = vmatprep.mubr.bf16.mxu1 %v29462_v11  ;;  %v37354_v11 = vpack.c.bf16 %v34297_v44, %v34287_v57  ;;  %v29467_v44 = vld [vmem:[%s36701_s18 + $0x708] sm:$0xff]  }
0x1298   :  { %27019 = vmatmul.mubr.msk.bf16.gmra.mrb[248].mxu0 %vm11122_vm7, %v37352_v60  ;;  %v37355_v60 = vpack.c.bf16 %v34327_v32, %v34318_v53  ;;  %v29472_v32 = vld [vmem:[%s36701_s18 + $0x730] sm:$0xff]  }
0x1299   :  { %27022 = vmatprep.mubr.msk.bf16.mxu0 %vm11122_vm7, %v37353_v50  ;;  %v34727_v21 = vpop.f32.mrb[60].mxu1 }
0x129a   :  { %v34732_v49 = vpop.f32.mrb[61].mxu1 }
0x129b   :  { %v34737_v24 = vpop.f32.mrb[62].mxu1 }
0x129c   :  { %v34741_v23 = vpop.f32.mrb[63].mxu1 }
0x129e   :  { %27293 = vmatmul.mubr.bf16.gmra.mrb[168].mxu1 %v29463_v22  ;;  %v29466_v22 = vld [vmem:[%s36701_s18 + $0x700] sm:$0xff]  }
0x129f   :  { %27296 = vmatprep.mubr.bf16.mxu1 %v29464_v33  ;;  %v37356_v33 = vpack.c.bf16 %v34323_v15, %v34313_v31 }
0x12a0   :  { %27023 = vmatmul.mubr.msk.bf16.gmra.mrb[252].mxu0 %vm11122_vm7, %v37354_v11  ;;  %v37357_v11 = vpack.c.bf16 %v34353_v13, %v34344_v51  ;;  %v37358_v13 = vpack.c.bf16 %v34349_v10, %v34339_v28  ;;  %v37363_v10 = vld [vmem:[#allocation67_spill] sm:$0xff]  ;;  %v37370_v51 = vld [vmem:[#allocation68_spill] sm:$0xff] }
0x12a1   :  { %27026 = vmatprep.mubr.msk.bf16.mxu0 %vm11122_vm7, %v37355_v60  ;;  %v34753_v50 = vpop.f32.mrb[64].mxu1 }
0x12a2   :  { %v34758_v42 = vpop.f32.mrb[65].mxu1 }
0x12a3   :  { %v34763_v57 = vpop.f32.mrb[66].mxu1 }
0x12a4   :  { %v34767_v53 = vpop.f32.mrb[67].mxu1 }
0x12a6   :  { %27297 = vmatmul.mubr.bf16.gmra.mrb[172].mxu1 %v29465_v25 }
0x12a7   :  { %27382 = vmatprep.mubr.bf16.mxu1 %v29466_v22  ;;  %v29468_v22 = vld [vmem:[%s36701_s18 + $0x710] sm:$0xff]  }
0x12a8   :  { %27027 = vmatmul.mubr.msk.bf16.gmra.mrb[0].mxu0 %vm11122_vm7, %v37356_v33  ;;  %v37359_v33 = vpack.c.bf16 %v34383_v8, %v34372_v62 }
0x12a9   :  { %27030 = vmatprep.mubr.msk.bf16.mxu0 %vm11122_vm7, %v37357_v11  ;;  %v34779_v60 = vpop.f32.mrb[68].mxu1 }
0x12aa   :  { %v34784_v3 = vpop.f32.mrb[69].mxu1 }
0x12ab   :  { %v34786_v25 = vpop.f32.mrb[70].mxu1 }
0x12ac   :  { %v34790_v15 = vpop.f32.mrb[71].mxu1 }
0x12ae   :  { %27383 = vmatmul.mubr.bf16.vlgmr.msra.gmra.mrb[176].mxu1 %v29467_v44 }
0x12af   :  { %27513 = vmatpush3.bf16.msra.mxu1 %v32622_v43  ;;  %27386 = vmatprep.mubr.bf16.mxu1 %v29468_v22  ;;  %v29469_v43 = vld [vmem:[%s36701_s18 + $0x718] sm:$0xff]   ;;  %v29470_v22 = vld [vmem:[%s36701_s18 + $0x720] sm:$0xff]  }
0x12b0   :  { %27514 = vmatprep.subr.bf16.mxu1 %v32624_v41  ;;  %27031 = vmatmul.mubr.msk.bf16.gmra.mrb[4].mxu0 %vm11122_vm7, %v37358_v13  ;;  %v37360_v13 = vld [vmem:[#allocation65_spill] sm:$0xff] }
0x12b1   :  { %27034 = vmatprep.mubr.msk.bf16.mxu0 %vm11122_vm7, %v37359_v33  ;;  %v34807_v11 = vpop.f32.mrb[72].mxu1  ;;  %v37362_v33 = vld [vmem:[#allocation69_spill] sm:$0xff] }
0x12b2   :  { %v34809_v44 = vpop.f32.mrb[73].mxu1  ;;  %v37364_v31 = vpack.c.bf16 %v37362_v33, %v37363_v10  ;;  %v37369_v33 = vld [vmem:[#allocation70_spill] sm:$0xff]  ;;  %v37372_v10 = vpack.c.bf16 %v34443_v30, %v34432_v61  ;;  %v37379_v61 = vpack.c.bf16 %v34473_v12, %v34462_v2  ;;  %v37382_v12 = vld [vmem:[#allocation5_spill] sm:$0xff] }
0x12b3   :  { %27515 = vmatpush3.bf16.msra.mxu1 %v32624_v41  ;;  %v34815_v28 = vpop.f32.mrb[74].mxu1  ;;  %v37361_v41 = vpack.c.bf16 %v34378_v45, %v37360_v13  ;;  %v37367_v13 = vld [vmem:[#allocation10_spill] sm:$0xff] }
0x12b4   :  { %27516 = vmatprep.subr.bf16.mxu1 %v32626_v46  ;;  %v34820_v62 = vpop.f32.mrb[75].mxu1 }
0x12b6   :  { %27387 = vmatmul.mubr.bf16.gmra.mrb[180].mxu1 %v29469_v43 }
0x12b7   :  { %27517 = vmatpush3.bf16.msra.mxu1 %v32626_v46  ;;  %27390 = vmatprep.mubr.bf16.mxu1 %v29470_v22  ;;  %v29471_v46 = vld [vmem:[%s36701_s18 + $0x728] sm:$0xff]   ;;  %v37368_v22 = vld [vmem:[#allocation8_spill] sm:$0xff] }
0x12b8   :  { %27518 = vmatprep.subr.bf16.mxu1 %v32628_v27  ;;  %27035 = vmatmul.mubr.msk.bf16.gmra.mrb[8].mxu0 %vm11122_vm7, %v37361_v41 }
0x12b9   :  { %27038 = vmatprep.mubr.msk.bf16.mxu0 %vm11122_vm7, %v37364_v31  ;;  %v34837_v8 = vpop.f32.mrb[76].mxu1 }
0x12ba   :  { %37365 = vst [vmem:[#allocation17_spill] sm:$0xff] %v34837_v8  ;;  %v34839_v43 = vpop.f32.mrb[77].mxu1  ;;  %v37377_v8 = vld [vmem:[#allocation3_spill] sm:$0xff] }
0x12bb   :  { %27519 = vmatpush3.bf16.msra.mxu1 %v32628_v27  ;;  %v34845_v45 = vpop.f32.mrb[78].mxu1  ;;  %v37371_v27 = vpack.c.bf16 %v37369_v33, %v37370_v51  ;;  %v29473_v51 = vld [vmem:[%s36701_s18 + $0x738] sm:$0xff]   ;;  %v37374_v33 = vld [vmem:[#allocation14_spill] sm:$0xff] }
0x12bc   :  { %37366 = vst [vmem:[#allocation20_spill] sm:$0xff] %v34845_v45  ;;  %27520 = vmatprep.subr.bf16.mxu1 %v37367_v13  ;;  %v34850_v41 = vpop.f32.mrb[79].mxu1  ;;  %v29474_v45 = vld [vmem:[%s36701_s18 + $0x740] sm:$0xff]  }
0x12be   :  { %27391 = vmatmul.mubr.bf16.gmra.mrb[184].mxu1 %v29471_v46 }
0x12bf   :  { %27521 = vmatpush3.bf16.msra.mxu1 %v37367_v13  ;;  %27394 = vmatprep.mubr.bf16.mxu1 %v29472_v32  ;;  %v37375_v32 = vld [vmem:[#allocation12_spill] sm:$0xff] }
0x12c0   :  { %27522 = vmatprep.subr.bf16.mxu1 %v37368_v22  ;;  %27039 = vmatmul.mubr.msk.bf16.gmra.mrb[12].mxu0 %vm11122_vm7, %v37371_v27  ;;  %v37376_v27 = vld [vmem:[#allocation4_spill] sm:$0xff] }
0x12c1   :  { %27042 = vmatprep.mubr.msk.bf16.mxu0 %vm11122_vm7, %v37372_v10  ;;  %v34867_v31 = vpop.f32.mrb[80].mxu1 }
0x12c2   :  { %37373 = vst [vmem:[#allocation18_spill] sm:$0xff] %v34867_v31  ;;  %v34869_v46 = vpop.f32.mrb[81].mxu1  ;;  %v37385_v31 = vpack.c.bf16 %v34499_v29, %v34490_v7  ;;  %v37388_v29 = vld [vmem:[#allocation6_spill] sm:$0xff] }
0x12c3   :  { %27523 = vmatpush3.bf16.msra.mxu1 %v37368_v22  ;;  %v34875_v13 = vpop.f32.mrb[82].mxu1  ;;  %v37378_v22 = vpack.c.bf16 %v37376_v27, %v37377_v8  ;;  %v29475_v8 = vld [vmem:[%s36701_s18 + $0x748] sm:$0xff]  }
0x12c4   :  { %27524 = vmatprep.subr.bf16.mxu1 %v37374_v33  ;;  %v34880_v30 = vpop.f32.mrb[83].mxu1 }
0x12c6   :  { %27395 = vmatmul.mubr.bf16.gmra.mrb[188].mxu1 %v29473_v51 }
0x12c7   :  { %27525 = vmatpush3.bf16.msra.mxu1 %v37374_v33  ;;  %27398 = vmatprep.mubr.bf16.mxu1 %v29474_v45 }
0x12c8   :  { %27526 = vmatprep.subr.bf16.mxu1 %v37375_v32  ;;  %27043 = vmatmul.mubr.msk.bf16.gmra.mrb[16].mxu0 %vm11122_vm7, %v37378_v22 }
0x12c9   :  { %27046 = vmatprep.mubr.msk.bf16.mxu0 %vm11122_vm7, %v37379_v61  ;;  %v34897_v10 = vpop.f32.mrb[84].mxu1  ;;  %v37383_v61 = vld [vmem:[#allocation7_spill] sm:$0xff] }
0x12ca   :  { %37380 = vst [vmem:[#allocation23_spill] sm:$0xff] %v34897_v10  ;;  %v34899_v51 = vpop.f32.mrb[85].mxu1  ;;  %v37384_v45 = vpack.c.bf16 %v37382_v12, %v37383_v61 }
0x12cb   :  { %27527 = vmatpush3.bf16.msra.mxu1 %v37375_v32  ;;  %v34905_v33 = vpop.f32.mrb[86].mxu1  ;;  %v29476_v32 = vld [vmem:[%s36701_s18 + $0x750] sm:$0xff]  }
0x12cc   :  { %37381 = vst [vmem:[#allocation21_spill] sm:$0xff] %v34905_v33  ;;  %v34909_v22 = vpop.f32.mrb[87].mxu1  ;;  %v37391_v33 = vpack.c.bf16 %v34525_v48, %v34516_v20  ;;  %v37393_v48 = vld [vmem:[#allocation11_spill] sm:$0xff]  ;;  %v37400_v20 = vpack.c.bf16 %v34577_v34, %v34568_v18  ;;  %v37402_v34 = vld [vmem:[#allocation13_spill] sm:$0xff]  ;;  %v37408_v18 = vpack.c.bf16 %v34629_v63, %v34620_v9  ;;  %v37409_v63 = vpack.c.bf16 %v34625_v14, %v34615_v4 }
0x12cd   :  { %v29489_v4 = vld [vmem:[%s36701_s18 + $0x7b8] sm:$0xff]  }
0x12ce   :  { %27399 = vmatmul.mubr.bf16.gmra.mrb[192].mxu1 %v29475_v8  ;;  %v29477_v8 = vld [vmem:[%s36701_s18 + $0x758] sm:$0xff]  }
0x12cf   :  { %27402 = vmatprep.mubr.bf16.mxu1 %v29476_v32  ;;  %v29478_v32 = vld [vmem:[%s36701_s18 + $0x760] sm:$0xff]  }
0x12d0   :  { %27047 = vmatmul.mubr.msk.bf16.gmra.mrb[20].mxu0 %vm11122_vm7, %v37384_v45 }
0x12d1   :  { %27050 = vmatprep.mubr.msk.bf16.mxu0 %vm11122_vm7, %v37385_v31  ;;  %v34924_v27 = vpop.f32.mrb[88].mxu1  ;;  %v37389_v31 = vld [vmem:[#allocation9_spill] sm:$0xff] }
0x12d2   :  { %37386 = vst [vmem:[#allocation24_spill] sm:$0xff] %v34924_v27  ;;  %v34926_v10 = vpop.f32.mrb[89].mxu1  ;;  %v37390_v2 = vpack.c.bf16 %v37388_v29, %v37389_v31 }
0x12d3   :  { %v34931_v12 = vpop.f32.mrb[90].mxu1 }
0x12d4   :  { %37387 = vst [vmem:[#allocation22_spill] sm:$0xff] %v34931_v12  ;;  %v34935_v45 = vpop.f32.mrb[91].mxu1  ;;  %v37396_v12 = vpack.c.bf16 %v34551_v17, %v34542_v36  ;;  %v37398_v17 = vld [vmem:[#allocation16_spill] sm:$0xff]  ;;  %v37404_v36 = vpack.c.bf16 %v34603_v16, %v34594_v37  ;;  %v37406_v16 = vld [vmem:[#allocation19_spill] sm:$0xff] }
0x12d6   :  { %27403 = vmatmul.mubr.bf16.gmra.mrb[196].mxu1 %v29477_v8  ;;  %v29479_v8 = vld [vmem:[%s36701_s18 + $0x768] sm:$0xff]  }
0x12d7   :  { %27406 = vmatprep.mubr.bf16.mxu1 %v29478_v32  ;;  %v29480_v32 = vld [vmem:[%s36701_s18 + $0x770] sm:$0xff]  }
0x12d8   :  { %27051 = vmatmul.mubr.msk.bf16.gmra.mrb[24].mxu0 %vm11122_vm7, %v37390_v2 }
0x12d9   :  { %27054 = vmatprep.mubr.msk.bf16.mxu0 %vm11122_vm7, %v37391_v33  ;;  %v34950_v61 = vpop.f32.mrb[92].mxu1  ;;  %v37394_v33 = vld [vmem:[#allocation15_spill] sm:$0xff] }
0x12da   :  { %37392 = vst [vmem:[#allocation25_spill] sm:$0xff] %v34950_v61  ;;  %v34952_v27 = vpop.f32.mrb[93].mxu1  ;;  %v37395_v7 = vpack.c.bf16 %v37393_v48, %v37394_v33 }
0x12db   :  { %v34957_v29 = vpop.f32.mrb[94].mxu1 }
0x12dc   :  { %v34961_v31 = vpop.f32.mrb[95].mxu1 }
0x12de   :  { %27407 = vmatmul.mubr.bf16.gmra.mrb[200].mxu1 %v29479_v8  ;;  %v29481_v8 = vld [vmem:[%s36701_s18 + $0x778] sm:$0xff]  }
0x12df   :  { %27410 = vmatprep.mubr.bf16.mxu1 %v29480_v32  ;;  %v29482_v32 = vld [vmem:[%s36701_s18 + $0x780] sm:$0xff]  }
0x12e0   :  { %27055 = vmatmul.mubr.msk.bf16.gmra.mrb[28].mxu0 %vm11122_vm7, %v37395_v7 }
0x12e1   :  { %27058 = vmatprep.mubr.msk.bf16.mxu0 %vm11122_vm7, %v37396_v12  ;;  %v34976_v2 = vpop.f32.mrb[96].mxu1  ;;  %v37399_v12 = vpack.c.bf16 %v34547_v59, %v37398_v17  ;;  %v29483_v59 = vld [vmem:[%s36701_s18 + $0x788] sm:$0xff]  }
0x12e2   :  { %37397 = vst [vmem:[#allocation28_spill] sm:$0xff] %v34976_v2  ;;  %v34978_v61 = vpop.f32.mrb[97].mxu1 }
0x12e3   :  { %v34983_v48 = vpop.f32.mrb[98].mxu1 }
0x12e4   :  { %v34987_v33 = vpop.f32.mrb[99].mxu1 }
0x12e6   :  { %27411 = vmatmul.mubr.bf16.gmra.mrb[204].mxu1 %v29481_v8 }
0x12e7   :  { %27414 = vmatprep.mubr.bf16.mxu1 %v29482_v32  ;;  %v29484_v32 = vld [vmem:[%s36701_s18 + $0x790] sm:$0xff]  }
0x12e8   :  { %27059 = vmatmul.mubr.msk.bf16.gmra.mrb[32].mxu0 %vm11122_vm7, %v37399_v12 }
0x12e9   :  { %27062 = vmatprep.mubr.msk.bf16.mxu0 %vm11122_vm7, %v37400_v20  ;;  %v35002_v7 = vpop.f32.mrb[100].mxu1  ;;  %v37403_v20 = vpack.c.bf16 %v34573_v26, %v37402_v34  ;;  %v29485_v26 = vld [vmem:[%s36701_s18 + $0x798] sm:$0xff]  }
0x12ea   :  { %37401 = vst [vmem:[#allocation26_spill] sm:$0xff] %v35002_v7  ;;  %v35004_v2 = vpop.f32.mrb[101].mxu1 }
0x12eb   :  { %v35009_v8 = vpop.f32.mrb[102].mxu1 }
0x12ec   :  { %v35013_v12 = vpop.f32.mrb[103].mxu1 }
0x12ee   :  { %27415 = vmatmul.mubr.bf16.gmra.mrb[208].mxu1 %v29483_v59 }
0x12ef   :  { %27418 = vmatprep.mubr.bf16.mxu1 %v29484_v32  ;;  %v29486_v32 = vld [vmem:[%s36701_s18 + $0x7a0] sm:$0xff]  }
0x12f0   :  { %27063 = vmatmul.mubr.msk.bf16.gmra.mrb[36].mxu0 %vm11122_vm7, %v37403_v20 }
0x12f1   :  { %27066 = vmatprep.mubr.msk.bf16.mxu0 %vm11122_vm7, %v37404_v36  ;;  %v35028_v17 = vpop.f32.mrb[104].mxu1  ;;  %v37407_v36 = vpack.c.bf16 %v34599_v1, %v37406_v16  ;;  %v29487_v1 = vld [vmem:[%s36701_s18 + $0x7a8] sm:$0xff]  }
0x12f2   :  { %37405 = vst [vmem:[#allocation30_spill] sm:$0xff] %v35028_v17  ;;  %v35030_v7 = vpop.f32.mrb[105].mxu1 }
0x12f3   :  { %v35035_v59 = vpop.f32.mrb[106].mxu1 }
0x12f4   :  { %v35039_v20 = vpop.f32.mrb[107].mxu1 }
0x12f6   :  { %27419 = vmatmul.mubr.bf16.gmra.mrb[212].mxu1 %v29485_v26 }
0x12f7   :  { %27422 = vmatprep.mubr.bf16.mxu1 %v29486_v32  ;;  %v37410_v32 = vpack.c.bf16 %v34655_v54, %v34646_v0  ;;  %v37411_v54 = vpack.c.bf16 %v34651_v58, %v34641_v19  ;;  %v29490_v19 = vld [vmem:[%s36701_s18 + $0x7c0] sm:$0xff]   ;;  %v29492_v0 = vld [vmem:[%s36701_s18 + $0x7d0] sm:$0xff]  }
0x12f8   :  { %27067 = vmatmul.mubr.msk.bf16.gmra.mrb[40].mxu0 %vm11122_vm7, %v37407_v36 }
0x12f9   :  { %27070 = vmatprep.mubr.msk.bf16.mxu0 %vm11122_vm7, %v37408_v18  ;;  %v35054_v34 = vpop.f32.mrb[108].mxu1  ;;  %v29488_v18 = vld [vmem:[%s36701_s18 + $0x7b0] sm:$0xff]  }
0x12fa   :  { %v35056_v17 = vpop.f32.mrb[109].mxu1 }
0x12fb   :  { %v35061_v26 = vpop.f32.mrb[110].mxu1 }
0x12fc   :  { %v35065_v36 = vpop.f32.mrb[111].mxu1 }
0x12fe   :  { %27423 = vmatmul.mubr.bf16.gmra.mrb[216].mxu1 %v29487_v1 }
0x12ff   :  { %27426 = vmatprep.mubr.bf16.mxu1 %v29488_v18  ;;  %v23196_v18 = vld [vmem:[%s36702_s19 + $0xe] sm:$0x3] }
0x1300   :  { %27071 = vmatmul.mubr.msk.bf16.gmra.mrb[44].mxu0 %vm11122_vm7, %v37409_v63 }
0x1301   :  { %27156 = vmatprep.mubr.msk.bf16.mxu0 %vm11122_vm7, %v37410_v32  ;;  %v35080_v16 = vpop.f32.mrb[112].mxu1  ;;  %v37412_v32 = vpack.c.bf16 %v34689_v39, %v34679_v47 }
0x1302   :  { %v35082_v37 = vpop.f32.mrb[113].mxu1 }
0x1303   :  { %v35087_v14 = vpop.f32.mrb[114].mxu1 }
0x1304   :  { %v35091_v63 = vpop.f32.mrb[115].mxu1 }
0x1306   :  { %27427 = vmatmul.mubr.bf16.gmra.mrb[220].mxu1 %v29489_v4  ;;  %v35110_v4 = vand.u32 %v23196_v18, %v32669_v38 }
0x1307   :  { %27430 = vmatprep.mubr.bf16.mxu1 %v29490_v19  ;;  %v37414_v19 = vpack.c.bf16 %v34715_v35, %v34706_v5  ;;  %v37415_v35 = vpack.c.bf16 %v34711_v55, %v34701_v52  ;;  %v29495_v52 = vld [vmem:[%s36701_s18 + $0x7e8] sm:$0xff]  }
0x1308   :  { %27157 = vmatmul.mubr.msk.bf16.vlgmr.msra.gmra.mrb[240].mxu0 %vm11122_vm7, %v37411_v54 }
0x1309   :  { %27301 = vmatpush3.bf16.msra.mxu0 %v34674_v6  ;;  %27160 = vmatprep.mubr.msk.bf16.mxu0 %vm11122_vm7, %v37412_v32  ;;  %v35107_v1 = vpop.f32.mrb[116].mxu1  ;;  %v29491_v6 = vld [vmem:[%s36701_s18 + $0x7c8] sm:$0xff]   ;;  %v37413_v32 = vpack.c.bf16 %v34685_v40, %v34671_v56  ;;  %v29493_v56 = vld [vmem:[%s36701_s18 + $0x7d8] sm:$0xff]  }
0x130a   :  { %v35115_v58 = vpop.f32.mrb[117].mxu1  ;;  %27446 = vmatprep.subr.bf16.mxu0 %v35110_v4 }
0x130b   :  { %v35121_v47 = vpop.f32.mrb[118].mxu1 }
0x130c   :  { %v35125_v54 = vpop.f32.mrb[119].mxu1 }
0x130e   :  { %27431 = vmatmul.mubr.bf16.gmra.mrb[224].mxu1 %v29491_v6 }
0x130f   :  { %27434 = vmatprep.mubr.bf16.mxu1 %v29492_v0  ;;  %v29494_v0 = vld [vmem:[%s36701_s18 + $0x7e0] sm:$0xff]  }
0x1310   :  { %27161 = vmatmul.mubr.msk.bf16.gmra.mrb[244].mxu0 %vm11122_vm7, %v37413_v32 }
0x1311   :  { %27164 = vmatprep.mubr.msk.bf16.mxu0 %vm11122_vm7, %v37414_v19  ;;  %v35140_v39 = vpop.f32.mrb[120].mxu1  ;;  %v37416_v19 = vpack.c.bf16 %v34741_v23, %v34732_v49  ;;  %v37417_v23 = vpack.c.bf16 %v34737_v24, %v34727_v21  ;;  %v29497_v21 = vld [vmem:[%s36701_s18 + $0x7f8] sm:$0xff]  }
0x1312   :  { %v35142_v9 = vpop.f32.mrb[121].mxu1 }
0x1313   :  { %v35147_v40 = vpop.f32.mrb[122].mxu1 }
0x1314   :  { %v35151_v32 = vpop.f32.mrb[123].mxu1 }
0x1316   :  { %27435 = vmatmul.mubr.bf16.gmra.mrb[228].mxu1 %v29493_v56 }
0x1317   :  { %27438 = vmatprep.mubr.bf16.mxu1 %v29494_v0  ;;  %v29496_v0 = vld [vmem:[%s36701_s18 + $0x7f0] sm:$0xff]  }
0x1318   :  { %27165 = vmatmul.mubr.msk.bf16.gmra.mrb[248].mxu0 %vm11122_vm7, %v37415_v35 }
0x1319   :  { %27168 = vmatprep.mubr.msk.bf16.mxu0 %vm11122_vm7, %v37416_v19  ;;  %v35166_v6 = vpop.f32.mrb[124].mxu1  ;;  %v37418_v19 = vpack.c.bf16 %v34767_v53, %v34758_v42  ;;  %v37419_v53 = vpack.c.bf16 %v34763_v57, %v34753_v50  ;;  %v29499_v50 = vld [vmem:[%s36701_s18 + $0x808] sm:$0xff]  }
0x131a   :  { %v35168_v18 = vpop.f32.mrb[125].mxu1 }
0x131b   :  { %v35173_v55 = vpop.f32.mrb[126].mxu1 }
0x131c   :  { %v35177_v35 = vpop.f32.mrb[127].mxu1 }
0x131e   :  { %27439 = vmatmul.mubr.bf16.gmra.mrb[232].mxu1 %v29495_v52 }
0x131f   :  { %27442 = vmatprep.mubr.bf16.mxu1 %v29496_v0  ;;  %v29498_v0 = vld [vmem:[%s36701_s18 + $0x800] sm:$0xff]  }
0x1320   :  { %27169 = vmatmul.mubr.msk.bf16.gmra.mrb[252].mxu0 %vm11122_vm7, %v37417_v23 }
0x1321   :  { %27172 = vmatprep.mubr.msk.bf16.mxu0 %vm11122_vm7, %v37418_v19  ;;  %v35192_v56 = vpop.f32.mrb[128].mxu1  ;;  %v37420_v19 = vpack.c.bf16 %v34790_v15, %v34784_v3  ;;  %v37421_v15 = vpack.c.bf16 %v34786_v25, %v34779_v60  ;;  %v29501_v60 = vld [vmem:[%s36701_s18 + $0x818] sm:$0xff]  }
0x1322   :  { %v35194_v5 = vpop.f32.mrb[129].mxu1 }
0x1323   :  { %v35199_v24 = vpop.f32.mrb[130].mxu1 }
0x1324   :  { %v35203_v23 = vpop.f32.mrb[131].mxu1 }
0x1326   :  { %27443 = vmatmul.mubr.bf16.gmra.mrb[236].mxu1 %v29497_v21 }
0x1327   :  { %27528 = vmatprep.mubr.bf16.mxu1 %v29498_v0  ;;  %v29500_v0 = vld [vmem:[%s36701_s18 + $0x810] sm:$0xff]  }
0x1328   :  { %27173 = vmatmul.mubr.msk.bf16.gmra.mrb[0].mxu0 %vm11122_vm7, %v37419_v53 }
0x1329   :  { %27176 = vmatprep.mubr.msk.bf16.mxu0 %vm11122_vm7, %v37420_v19  ;;  %v35218_v52 = vpop.f32.mrb[132].mxu1  ;;  %v37422_v19 = vpack.c.bf16 %v34820_v62, %v34809_v44  ;;  %v37424_v62 = vpack.c.bf16 %v34815_v28, %v34807_v11  ;;  %v29503_v11 = vld [vmem:[%s36701_s18 + $0x828] sm:$0xff]  }
0x132a   :  { %v35220_v49 = vpop.f32.mrb[133].mxu1 }
0x132b   :  { %v35225_v57 = vpop.f32.mrb[134].mxu1 }
0x132c   :  { %v35229_v53 = vpop.f32.mrb[135].mxu1 }
0x132e   :  { %27529 = vmatmul.mubr.bf16.vlgmr.msra.gmra.mrb[240].mxu1 %v29499_v50 }
0x132f   :  { %27532 = vmatprep.mubr.bf16.mxu1 %v29500_v0  ;;  %v29502_v0 = vld [vmem:[%s36701_s18 + $0x820] sm:$0xff]  }
0x1330   :  { %27177 = vmatmul.mubr.msk.bf16.gmra.mrb[4].mxu0 %vm11122_vm7, %v37421_v15 }
0x1331   :  { %27180 = vmatprep.mubr.msk.bf16.mxu0 %vm11122_vm7, %v37422_v19  ;;  %v35244_v21 = vpop.f32.mrb[136].mxu1  ;;  %v37425_v19 = vpack.c.bf16 %v34850_v41, %v34839_v43  ;;  %v37427_v41 = vld [vmem:[#allocation20_spill] sm:$0xff]  ;;  %v37435_v43 = vpack.c.bf16 %v34909_v22, %v34899_v51  ;;  %v37438_v22 = vld [vmem:[#allocation21_spill] sm:$0xff] }
0x1332   :  { %37423 = vst [vmem:[#allocation27_spill] sm:$0xff] %v35244_v21  ;;  %v35246_v42 = vpop.f32.mrb[137].mxu1  ;;  %v37430_v21 = vpack.c.bf16 %v34880_v30, %v34869_v46  ;;  %v37433_v30 = vld [vmem:[#allocation18_spill] sm:$0xff] }
0x1333   :  { %v35251_v25 = vpop.f32.mrb[138].mxu1 }
0x1334   :  { %v35255_v15 = vpop.f32.mrb[139].mxu1 }
0x1336   :  { %27533 = vmatmul.mubr.bf16.gmra.mrb[244].mxu1 %v29501_v60 }
0x1337   :  { %27536 = vmatprep.mubr.bf16.mxu1 %v29502_v0  ;;  %v29504_v0 = vld [vmem:[%s36701_s18 + $0x830] sm:$0xff]  }
0x1338   :  { %27181 = vmatmul.mubr.msk.bf16.gmra.mrb[8].mxu0 %vm11122_vm7, %v37424_v62 }
0x1339   :  { %27184 = vmatprep.mubr.msk.bf16.mxu0 %vm11122_vm7, %v37425_v19  ;;  %v35270_v50 = vpop.f32.mrb[140].mxu1  ;;  %v37428_v19 = vld [vmem:[#allocation17_spill] sm:$0xff] }
0x133a   :  { %37426 = vst [vmem:[#allocation34_spill] sm:$0xff] %v35270_v50  ;;  %v35272_v3 = vpop.f32.mrb[141].mxu1  ;;  %v37429_v44 = vpack.c.bf16 %v37427_v41, %v37428_v19 }
0x133b   :  { %v35277_v28 = vpop.f32.mrb[142].mxu1 }
0x133c   :  { %v35281_v62 = vpop.f32.mrb[143].mxu1 }
0x133e   :  { %27537 = vmatmul.mubr.bf16.gmra.mrb[248].mxu1 %v29503_v11  ;;  %v29505_v11 = vld [vmem:[%s36701_s18 + $0x838] sm:$0xff]  }
0x133f   :  { %27540 = vmatprep.mubr.bf16.mxu1 %v29504_v0  ;;  %v29506_v0 = vld [vmem:[%s36701_s18 + $0x840] sm:$0xff]  }
0x1340   :  { %27185 = vmatmul.mubr.msk.bf16.gmra.mrb[12].mxu0 %vm11122_vm7, %v37429_v44 }
0x1341   :  { %27188 = vmatprep.mubr.msk.bf16.mxu0 %vm11122_vm7, %v37430_v21  ;;  %v35296_v60 = vpop.f32.mrb[144].mxu1  ;;  %v37434_v21 = vpack.c.bf16 %v34875_v13, %v37433_v30  ;;  %v29507_v13 = vld [vmem:[%s36701_s18 + $0x848] sm:$0xff]  }
0x1342   :  { %37431 = vst [vmem:[#allocation32_spill] sm:$0xff] %v35296_v60  ;;  %v35298_v50 = vpop.f32.mrb[145].mxu1 }
0x1343   :  { %v35303_v41 = vpop.f32.mrb[146].mxu1 }
0x1344   :  { %37432 = vst [vmem:[#allocation31_spill] sm:$0xff] %v35303_v41  ;;  %v35307_v19 = vpop.f32.mrb[147].mxu1  ;;  %v37441_v41 = vpack.c.bf16 %v34935_v45, %v34926_v10  ;;  %v37443_v45 = vld [vmem:[#allocation22_spill] sm:$0xff]  ;;  %v37450_v10 = vpack.c.bf16 %v34987_v33, %v34978_v61  ;;  %v37452_v33 = vld [vmem:[#allocation28_spill] sm:$0xff]  ;;  %v37458_v61 = vpack.c.bf16 %v35039_v20, %v35030_v7 }
0x1345   :  { %v37460_v20 = vld [vmem:[#allocation30_spill] sm:$0xff] }
0x1346   :  { %27541 = vmatmul.mubr.bf16.gmra.mrb[252].mxu1 %v29505_v11 }
0x1347   :  { %27544 = vmatprep.mubr.bf16.mxu1 %v29506_v0  ;;  %v29508_v0 = vld [vmem:[%s36701_s18 + $0x850] sm:$0xff]  }
0x1348   :  { %27189 = vmatmul.mubr.msk.bf16.gmra.mrb[16].mxu0 %vm11122_vm7, %v37434_v21 }
0x1349   :  { %27192 = vmatprep.mubr.msk.bf16.mxu0 %vm11122_vm7, %v37435_v43  ;;  %v35322_v44 = vpop.f32.mrb[148].mxu1  ;;  %v37439_v43 = vld [vmem:[#allocation23_spill] sm:$0xff] }
0x134a   :  { %37436 = vst [vmem:[#allocation29_spill] sm:$0xff] %v35322_v44  ;;  %v35324_v60 = vpop.f32.mrb[149].mxu1  ;;  %v37440_v46 = vpack.c.bf16 %v37438_v22, %v37439_v43 }
0x134b   :  { %v35329_v11 = vpop.f32.mrb[150].mxu1 }
0x134c   :  { %37437 = vst [vmem:[#allocation38_spill] sm:$0xff] %v35329_v11  ;;  %v35333_v21 = vpop.f32.mrb[151].mxu1  ;;  %v37446_v11 = vpack.c.bf16 %v34961_v31, %v34952_v27  ;;  %v37448_v31 = vld [vmem:[#allocation25_spill] sm:$0xff]  ;;  %v37454_v27 = vpack.c.bf16 %v35013_v12, %v35004_v2  ;;  %v37456_v12 = vld [vmem:[#allocation26_spill] sm:$0xff]  ;;  %v37462_v2 = vpack.c.bf16 %v35065_v36, %v35056_v17  ;;  %v37463_v36 = vpack.c.bf16 %v35061_v26, %v35054_v34 }
0x134d   :  { %v29521_v34 = vld [vmem:[%s36701_s18 + $0x8b8] sm:$0xff]  }
0x134e   :  { %27545 = vmatmul.mubr.bf16.gmra.mrb[0].mxu1 %v29507_v13  ;;  %v29509_v13 = vld [vmem:[%s36701_s18 + $0x858] sm:$0xff]  }
0x134f   :  { %27548 = vmatprep.mubr.bf16.mxu1 %v29508_v0  ;;  %v29510_v0 = vld [vmem:[%s36701_s18 + $0x860] sm:$0xff]  }
0x1350   :  { %27193 = vmatmul.mubr.msk.bf16.gmra.mrb[20].mxu0 %vm11122_vm7, %v37440_v46 }
0x1351   :  { %27196 = vmatprep.mubr.msk.bf16.mxu0 %vm11122_vm7, %v37441_v41  ;;  %v35348_v30 = vpop.f32.mrb[152].mxu1  ;;  %v37444_v41 = vld [vmem:[#allocation24_spill] sm:$0xff] }
0x1352   :  { %37442 = vst [vmem:[#allocation36_spill] sm:$0xff] %v35348_v30  ;;  %v35350_v44 = vpop.f32.mrb[153].mxu1  ;;  %v37445_v51 = vpack.c.bf16 %v37443_v45, %v37444_v41 }
0x1353   :  { %v35355_v22 = vpop.f32.mrb[154].mxu1 }
0x1354   :  { %v35359_v43 = vpop.f32.mrb[155].mxu1 }
0x1356   :  { %27549 = vmatmul.mubr.bf16.gmra.mrb[4].mxu1 %v29509_v13  ;;  %v29511_v13 = vld [vmem:[%s36701_s18 + $0x868] sm:$0xff]  }
0x1357   :  { %27552 = vmatprep.mubr.bf16.mxu1 %v29510_v0  ;;  %v29512_v0 = vld [vmem:[%s36701_s18 + $0x870] sm:$0xff]  }
0x1358   :  { %27197 = vmatmul.mubr.msk.bf16.gmra.mrb[24].mxu0 %vm11122_vm7, %v37445_v51 }
0x1359   :  { %27200 = vmatprep.mubr.msk.bf16.mxu0 %vm11122_vm7, %v37446_v11  ;;  %v35374_v46 = vpop.f32.mrb[156].mxu1  ;;  %v37449_v11 = vpack.c.bf16 %v34957_v29, %v37448_v31  ;;  %v29513_v29 = vld [vmem:[%s36701_s18 + $0x878] sm:$0xff]  }
0x135a   :  { %37447 = vst [vmem:[#allocation35_spill] sm:$0xff] %v35374_v46  ;;  %v35376_v30 = vpop.f32.mrb[157].mxu1 }
0x135b   :  { %v35381_v45 = vpop.f32.mrb[158].mxu1 }
0x135c   :  { %v35385_v41 = vpop.f32.mrb[159].mxu1 }
0x135e   :  { %27553 = vmatmul.mubr.bf16.gmra.mrb[8].mxu1 %v29511_v13 }
0x135f   :  { %27556 = vmatprep.mubr.bf16.mxu1 %v29512_v0  ;;  %v29514_v0 = vld [vmem:[%s36701_s18 + $0x880] sm:$0xff]  }
0x1360   :  { %27201 = vmatmul.mubr.msk.bf16.gmra.mrb[28].mxu0 %vm11122_vm7, %v37449_v11 }
0x1361   :  { %27204 = vmatprep.mubr.msk.bf16.mxu0 %vm11122_vm7, %v37450_v10  ;;  %v35400_v51 = vpop.f32.mrb[160].mxu1  ;;  %v37453_v10 = vpack.c.bf16 %v34983_v48, %v37452_v33  ;;  %v29515_v48 = vld [vmem:[%s36701_s18 + $0x888] sm:$0xff]  }
0x1362   :  { %37451 = vst [vmem:[#allocation33_spill] sm:$0xff] %v35400_v51  ;;  %v35402_v46 = vpop.f32.mrb[161].mxu1 }
0x1363   :  { %v35407_v13 = vpop.f32.mrb[162].mxu1 }
0x1364   :  { %v35411_v11 = vpop.f32.mrb[163].mxu1 }
0x1366   :  { %27557 = vmatmul.mubr.bf16.gmra.mrb[12].mxu1 %v29513_v29 }
0x1367   :  { %27560 = vmatprep.mubr.bf16.mxu1 %v29514_v0  ;;  %v29516_v0 = vld [vmem:[%s36701_s18 + $0x890] sm:$0xff]  }
0x1368   :  { %27205 = vmatmul.mubr.msk.bf16.gmra.mrb[32].mxu0 %vm11122_vm7, %v37453_v10 }
0x1369   :  { %27208 = vmatprep.mubr.msk.bf16.mxu0 %vm11122_vm7, %v37454_v27  ;;  %v35426_v31 = vpop.f32.mrb[164].mxu1  ;;  %v37457_v27 = vpack.c.bf16 %v35009_v8, %v37456_v12  ;;  %v29517_v8 = vld [vmem:[%s36701_s18 + $0x898] sm:$0xff]  }
0x136a   :  { %37455 = vst [vmem:[#allocation42_spill] sm:$0xff] %v35426_v31  ;;  %v35428_v51 = vpop.f32.mrb[165].mxu1 }
0x136b   :  { %v35433_v29 = vpop.f32.mrb[166].mxu1 }
0x136c   :  { %v35437_v10 = vpop.f32.mrb[167].mxu1 }
0x136e   :  { %27561 = vmatmul.mubr.bf16.gmra.mrb[16].mxu1 %v29515_v48 }
0x136f   :  { %27564 = vmatprep.mubr.bf16.mxu1 %v29516_v0  ;;  %v29518_v0 = vld [vmem:[%s36701_s18 + $0x8a0] sm:$0xff]  }
0x1370   :  { %27209 = vmatmul.mubr.msk.bf16.gmra.mrb[36].mxu0 %vm11122_vm7, %v37457_v27 }
0x1371   :  { %27212 = vmatprep.mubr.msk.bf16.mxu0 %vm11122_vm7, %v37458_v61  ;;  %v35452_v33 = vpop.f32.mrb[168].mxu1  ;;  %v37461_v61 = vpack.c.bf16 %v35035_v59, %v37460_v20  ;;  %v29519_v59 = vld [vmem:[%s36701_s18 + $0x8a8] sm:$0xff]  }
0x1372   :  { %37459 = vst [vmem:[#allocation40_spill] sm:$0xff] %v35452_v33  ;;  %v35454_v31 = vpop.f32.mrb[169].mxu1 }
0x1373   :  { %v35459_v48 = vpop.f32.mrb[170].mxu1 }
0x1374   :  { %v35463_v27 = vpop.f32.mrb[171].mxu1 }
0x1376   :  { %27565 = vmatmul.mubr.bf16.gmra.mrb[20].mxu1 %v29517_v8 }
0x1377   :  { %27568 = vmatprep.mubr.bf16.mxu1 %v29518_v0  ;;  %v37464_v0 = vpack.c.bf16 %v35091_v63, %v35082_v37  ;;  %v37465_v63 = vpack.c.bf16 %v35087_v14, %v35080_v16  ;;  %v29522_v16 = vld [vmem:[%s36701_s18 + $0x8c0] sm:$0xff]  }
0x1378   :  { %27213 = vmatmul.mubr.msk.bf16.gmra.mrb[40].mxu0 %vm11122_vm7, %v37461_v61 }
0x1379   :  { %27216 = vmatprep.mubr.msk.bf16.mxu0 %vm11122_vm7, %v37462_v2  ;;  %v35478_v12 = vpop.f32.mrb[172].mxu1  ;;  %v29520_v2 = vld [vmem:[%s36701_s18 + $0x8b0] sm:$0xff]  }
0x137a   :  { %v35480_v33 = vpop.f32.mrb[173].mxu1 }
0x137b   :  { %v35485_v8 = vpop.f32.mrb[174].mxu1 }
0x137c   :  { %v35489_v61 = vpop.f32.mrb[175].mxu1 }
0x137e   :  { %27569 = vmatmul.mubr.bf16.gmra.mrb[24].mxu1 %v29519_v59 }
0x137f   :  { %27572 = vmatprep.mubr.bf16.mxu1 %v29520_v2  ;;  %v23325_v2 = vld [vmem:[%s36702_s19 + $0x10] sm:$0x3] }
0x1380   :  { %27217 = vmatmul.mubr.msk.bf16.gmra.mrb[44].mxu0 %vm11122_vm7, %v37463_v36 }
0x1381   :  { %27302 = vmatprep.mubr.msk.bf16.mxu0 %vm11122_vm7, %v37464_v0  ;;  %v35504_v20 = vpop.f32.mrb[176].mxu1  ;;  %v37466_v0 = vpack.c.bf16 %v35125_v54, %v35115_v58 }
0x1382   :  { %v35506_v7 = vpop.f32.mrb[177].mxu1 }
0x1383   :  { %v35511_v26 = vpop.f32.mrb[178].mxu1 }
0x1384   :  { %v35515_v36 = vpop.f32.mrb[179].mxu1 }
0x1386   :  { %27573 = vmatmul.mubr.bf16.gmra.mrb[28].mxu1 %v29521_v34  ;;  %v35534_v34 = vand.u32 %v23325_v2, %v32669_v38  ;;  %v37467_v2 = vpack.c.bf16 %v35121_v47, %v35107_v1  ;;  %v29525_v1 = vld [vmem:[%s36701_s18 + $0x8d8] sm:$0xff]  }
0x1387   :  { %27576 = vmatprep.mubr.bf16.mxu1 %v29522_v16  ;;  %v37468_v16 = vpack.c.bf16 %v35151_v32, %v35142_v9  ;;  %v37469_v32 = vpack.c.bf16 %v35147_v40, %v35140_v39  ;;  %v29527_v39 = vld [vmem:[%s36701_s18 + $0x8e8] sm:$0xff]  }
0x1388   :  { %27303 = vmatmul.mubr.msk.bf16.vlgmr.msra.gmra.mrb[240].mxu0 %vm11122_vm7, %v37465_v63 }
0x1389   :  { %27447 = vmatpush3.bf16.msra.mxu0 %v35110_v4  ;;  %27306 = vmatprep.mubr.msk.bf16.mxu0 %vm11122_vm7, %v37466_v0  ;;  %v35531_v59 = vpop.f32.mrb[180].mxu1  ;;  %v29523_v4 = vld [vmem:[%s36701_s18 + $0x8c8] sm:$0xff]   ;;  %v29524_v0 = vld [vmem:[%s36701_s18 + $0x8d0] sm:$0xff]  }
0x138a   :  { %v35539_v14 = vpop.f32.mrb[181].mxu1  ;;  %27592 = vmatprep.subr.bf16.mxu0 %v35534_v34 }
0x138b   :  { %v35545_v58 = vpop.f32.mrb[182].mxu1 }
0x138c   :  { %v35549_v38 = vpop.f32.mrb[183].mxu1 }
0x138e   :  { %27577 = vmatmul.mubr.bf16.gmra.mrb[32].mxu1 %v29523_v4 }
0x138f   :  { %27580 = vmatprep.mubr.bf16.mxu1 %v29524_v0  ;;  %v29526_v0 = vld [vmem:[%s36701_s18 + $0x8e0] sm:$0xff]  }
0x1390   :  { %27307 = vmatmul.mubr.msk.bf16.gmra.mrb[244].mxu0 %vm11122_vm7, %v37467_v2 }
0x1391   :  { %27310 = vmatprep.mubr.msk.bf16.mxu0 %vm11122_vm7, %v37468_v16  ;;  %v35564_v54 = vpop.f32.mrb[184].mxu1  ;;  %v37470_v16 = vpack.c.bf16 %v35177_v35, %v35168_v18  ;;  %v37471_v35 = vpack.c.bf16 %v35173_v55, %v35166_v6  ;;  %v29529_v6 = vld [vmem:[%s36701_s18 + $0x8f8] sm:$0xff]  }
0x1392   :  { %v35566_v37 = vpop.f32.mrb[185].mxu1 }
0x1393   :  { %v35571_v47 = vpop.f32.mrb[186].mxu1 }
0x1394   :  { %v35575_v2 = vpop.f32.mrb[187].mxu1 }
0x1396   :  { %27581 = vmatmul.mubr.bf16.gmra.mrb[36].mxu1 %v29525_v1 }
0x1397   :  { %27584 = vmatprep.mubr.bf16.mxu1 %v29526_v0  ;;  %v29528_v0 = vld [vmem:[%s36701_s18 + $0x8f0] sm:$0xff]  }
0x1398   :  { %27311 = vmatmul.mubr.msk.bf16.gmra.mrb[248].mxu0 %vm11122_vm7, %v37469_v32 }
0x1399   :  { %27314 = vmatprep.mubr.msk.bf16.mxu0 %vm11122_vm7, %v37470_v16  ;;  %v35590_v4 = vpop.f32.mrb[188].mxu1  ;;  %v37472_v16 = vpack.c.bf16 %v35203_v23, %v35194_v5  ;;  %v37473_v23 = vpack.c.bf16 %v35199_v24, %v35192_v56  ;;  %v37475_v24 = vpack.c.bf16 %v35225_v57, %v35218_v52  ;;  %v37477_v57 = vld [vmem:[#allocation27_spill] sm:$0xff] }
0x139a   :  { %v35592_v63 = vpop.f32.mrb[189].mxu1 }
0x139b   :  { %v35597_v40 = vpop.f32.mrb[190].mxu1 }
0x139c   :  { %v35601_v32 = vpop.f32.mrb[191].mxu1 }
0x139e   :  { %27585 = vmatmul.mubr.bf16.gmra.mrb[40].mxu1 %v29527_v39 }
0x139f   :  { %27588 = vmatprep.mubr.bf16.mxu1 %v29528_v0  ;;  %v37474_v0 = vpack.c.bf16 %v35229_v53, %v35220_v49  ;;  %v37476_v49 = vpack.c.bf16 %v35255_v15, %v35246_v42  ;;  %v37479_v42 = vpack.c.bf16 %v35281_v62, %v35272_v3  ;;  %v37484_v3 = vpack.c.bf16 %v35307_v19, %v35298_v50 }
0x13a0   :  { %27315 = vmatmul.mubr.msk.bf16.gmra.mrb[252].mxu0 %vm11122_vm7, %v37471_v35  ;;  %v37490_v50 = vpack.c.bf16 %v35333_v21, %v35324_v60  ;;  %v37495_v60 = vpack.c.bf16 %v35359_v43, %v35350_v44  ;;  %v37499_v44 = vpack.c.bf16 %v35385_v41, %v35376_v30  ;;  %v37503_v30 = vpack.c.bf16 %v35411_v11, %v35402_v46 }
0x13a1   :  { %27318 = vmatprep.mubr.msk.bf16.mxu0 %vm11122_vm7, %v37472_v16  ;;  %v35616_v1 = vpop.f32.mrb[192].mxu1  ;;  %v37507_v46 = vpack.c.bf16 %v35437_v10, %v35428_v51  ;;  %v37511_v51 = vpack.c.bf16 %v35463_v27, %v35454_v31  ;;  %v37515_v31 = vpack.c.bf16 %v35489_v61, %v35480_v33  ;;  %v37517_v33 = vpack.c.bf16 %v35515_v36, %v35506_v7 }
0x13a2   :  { %v35618_v9 = vpop.f32.mrb[193].mxu1  ;;  %v37519_v7 = vpack.c.bf16 %v35549_v38, %v35539_v14  ;;  %v37521_v38 = vpack.c.bf16 %v35545_v58, %v35531_v59  ;;  %v37523_v58 = vpack.c.bf16 %v35571_v47, %v35564_v54  ;;  %v37525_v47 = vpack.c.bf16 %v35597_v40, %v35590_v4 }
0x13a3   :  { %v35623_v55 = vpop.f32.mrb[194].mxu1 }
0x13a4   :  { %v35627_v35 = vpop.f32.mrb[195].mxu1  ;;  %v37527_v40 = vpack.c.bf16 %v35623_v55, %v35616_v1 }
0x13a6   :  { %27589 = vmatmul.mubr.bf16.gmra.mrb[44].mxu1 %v29529_v6 }
0x13a8   :  { %27319 = vmatmul.mubr.msk.bf16.gmra.mrb[0].mxu0 %vm11122_vm7, %v37473_v23 }
0x13a9   :  { %27322 = vmatprep.mubr.msk.bf16.mxu0 %vm11122_vm7, %v37474_v0  ;;  %v35639_v16 = vpop.f32.mrb[196].mxu1 }
0x13aa   :  { %v35641_v18 = vpop.f32.mrb[197].mxu1 }
0x13ab   :  { %v35643_v39 = vpop.f32.mrb[198].mxu1 }
0x13ac   :  { %v35647_v6 = vpop.f32.mrb[199].mxu1  ;;  %v37529_v55 = vpack.c.bf16 %v35643_v39, %v35639_v16 }
0x13b0   :  { %27323 = vmatmul.mubr.msk.bf16.gmra.mrb[4].mxu0 %vm11122_vm7, %v37475_v24  ;;  %v37478_v24 = vpack.c.bf16 %v35251_v25, %v37477_v57  ;;  %v37482_v57 = vld [vmem:[#allocation34_spill] sm:$0xff] }
0x13b1   :  { %27326 = vmatprep.mubr.msk.bf16.mxu0 %vm11122_vm7, %v37476_v49  ;;  %v35659_v53 = vpop.f32.mrb[200].mxu1 }
0x13b2   :  { %v35661_v23 = vpop.f32.mrb[201].mxu1 }
0x13b3   :  { %v35663_v0 = vpop.f32.mrb[202].mxu1 }
0x13b4   :  { %v35667_v56 = vpop.f32.mrb[203].mxu1  ;;  %v37532_v16 = vpack.c.bf16 %v35663_v0, %v35659_v53 }
0x13b8   :  { %27327 = vmatmul.mubr.msk.bf16.gmra.mrb[8].mxu0 %vm11122_vm7, %v37478_v24  ;;  %v37483_v24 = vpack.c.bf16 %v35277_v28, %v37482_v57  ;;  %v37487_v57 = vld [vmem:[#allocation31_spill] sm:$0xff] }
0x13b9   :  { %27330 = vmatprep.mubr.msk.bf16.mxu0 %vm11122_vm7, %v37479_v42  ;;  %v35679_v15 = vpop.f32.mrb[204].mxu1 }
0x13ba   :  { %37480 = vst [vmem:[#allocation39_spill] sm:$0xff] %v35679_v15  ;;  %v35681_v49 = vpop.f32.mrb[205].mxu1 }
0x13bb   :  { %v35683_v5 = vpop.f32.mrb[206].mxu1 }
0x13bc   :  { %37481 = vst [vmem:[#allocation37_spill] sm:$0xff] %v35683_v5  ;;  %v35687_v52 = vpop.f32.mrb[207].mxu1 }
0x13c0   :  { %27331 = vmatmul.mubr.msk.bf16.gmra.mrb[12].mxu0 %vm11122_vm7, %v37483_v24  ;;  %v37488_v24 = vld [vmem:[#allocation32_spill] sm:$0xff] }
0x13c1   :  { %27334 = vmatprep.mubr.msk.bf16.mxu0 %vm11122_vm7, %v37484_v3  ;;  %v35699_v62 = vpop.f32.mrb[208].mxu1  ;;  %v37489_v5 = vpack.c.bf16 %v37487_v57, %v37488_v24  ;;  %v37493_v24 = vld [vmem:[#allocation29_spill] sm:$0xff] }
0x13c2   :  { %37485 = vst [vmem:[#allocation44_spill] sm:$0xff] %v35699_v62  ;;  %v35701_v42 = vpop.f32.mrb[209].mxu1 }
0x13c3   :  { %v35703_v17 = vpop.f32.mrb[210].mxu1  ;;  %v37536_v0 = vld [vmem:[#allocation37_spill] sm:$0xff] }
0x13c4   :  { %37486 = vst [vmem:[#allocation43_spill] sm:$0xff] %v35703_v17  ;;  %v35707_v25 = vpop.f32.mrb[211].mxu1 }
0x13c8   :  { %27335 = vmatmul.mubr.msk.bf16.gmra.mrb[16].mxu0 %vm11122_vm7, %v37489_v5  ;;  %v37492_v5 = vld [vmem:[#allocation38_spill] sm:$0xff] }
0x13c9   :  { %27338 = vmatprep.mubr.msk.bf16.mxu0 %vm11122_vm7, %v37490_v50  ;;  %v35719_v19 = vpop.f32.mrb[212].mxu1  ;;  %v37494_v17 = vpack.c.bf16 %v37492_v5, %v37493_v24 }
0x13ca   :  { %37491 = vst [vmem:[#allocation41_spill] sm:$0xff] %v35719_v19  ;;  %v35721_v3 = vpop.f32.mrb[213].mxu1 }
0x13cb   :  { %v35723_v15 = vpop.f32.mrb[214].mxu1 }
0x13cc   :  { %v35727_v28 = vpop.f32.mrb[215].mxu1 }
0x13d0   :  { %27339 = vmatmul.mubr.msk.bf16.gmra.mrb[20].mxu0 %vm11122_vm7, %v37494_v17  ;;  %v37497_v17 = vld [vmem:[#allocation36_spill] sm:$0xff] }
0x13d1   :  { %27342 = vmatprep.mubr.msk.bf16.mxu0 %vm11122_vm7, %v37495_v60  ;;  %v35739_v21 = vpop.f32.mrb[216].mxu1  ;;  %v37498_v24 = vpack.c.bf16 %v35355_v22, %v37497_v17  ;;  %v37501_v17 = vld [vmem:[#allocation35_spill] sm:$0xff] }
0x13d2   :  { %37496 = vst [vmem:[#allocation45_spill] sm:$0xff] %v35739_v21  ;;  %v35741_v50 = vpop.f32.mrb[217].mxu1 }
0x13d3   :  { %v35743_v62 = vpop.f32.mrb[218].mxu1 }
0x13d4   :  { %v35747_v57 = vpop.f32.mrb[219].mxu1 }
0x13d8   :  { %27343 = vmatmul.mubr.msk.bf16.gmra.mrb[24].mxu0 %vm11122_vm7, %v37498_v24  ;;  %v37502_v24 = vpack.c.bf16 %v35381_v45, %v37501_v17  ;;  %v37505_v17 = vld [vmem:[#allocation33_spill] sm:$0xff] }
0x13d9   :  { %27346 = vmatprep.mubr.msk.bf16.mxu0 %vm11122_vm7, %v37499_v44  ;;  %v35759_v43 = vpop.f32.mrb[220].mxu1 }
0x13da   :  { %37500 = vst [vmem:[#allocation46_spill] sm:$0xff] %v35759_v43  ;;  %v35761_v60 = vpop.f32.mrb[221].mxu1 }
0x13db   :  { %v35763_v19 = vpop.f32.mrb[222].mxu1 }
0x13dc   :  { %v35767_v5 = vpop.f32.mrb[223].mxu1 }
0x13e0   :  { %27347 = vmatmul.mubr.msk.bf16.gmra.mrb[28].mxu0 %vm11122_vm7, %v37502_v24  ;;  %v37506_v24 = vpack.c.bf16 %v35407_v13, %v37505_v17  ;;  %v37509_v17 = vld [vmem:[#allocation42_spill] sm:$0xff] }
0x13e1   :  { %27350 = vmatprep.mubr.msk.bf16.mxu0 %vm11122_vm7, %v37503_v30  ;;  %v35779_v41 = vpop.f32.mrb[224].mxu1 }
0x13e2   :  { %37504 = vst [vmem:[#allocation48_spill] sm:$0xff] %v35779_v41  ;;  %v35781_v44 = vpop.f32.mrb[225].mxu1 }
0x13e3   :  { %v35783_v21 = vpop.f32.mrb[226].mxu1 }
0x13e4   :  { %v35787_v22 = vpop.f32.mrb[227].mxu1 }
0x13e8   :  { %27351 = vmatmul.mubr.msk.bf16.gmra.mrb[32].mxu0 %vm11122_vm7, %v37506_v24  ;;  %v37510_v24 = vpack.c.bf16 %v35433_v29, %v37509_v17  ;;  %v37513_v17 = vld [vmem:[#allocation40_spill] sm:$0xff] }
0x13e9   :  { %27354 = vmatprep.mubr.msk.bf16.mxu0 %vm11122_vm7, %v37507_v46  ;;  %v35799_v11 = vpop.f32.mrb[228].mxu1 }
0x13ea   :  { %37508 = vst [vmem:[#allocation50_spill] sm:$0xff] %v35799_v11  ;;  %v35801_v30 = vpop.f32.mrb[229].mxu1 }
0x13eb   :  { %v35803_v43 = vpop.f32.mrb[230].mxu1 }
0x13ec   :  { %v35807_v45 = vpop.f32.mrb[231].mxu1 }
0x13f0   :  { %27355 = vmatmul.mubr.msk.bf16.gmra.mrb[36].mxu0 %vm11122_vm7, %v37510_v24  ;;  %v37514_v24 = vpack.c.bf16 %v35459_v48, %v37513_v17  ;;  %v37516_v17 = vpack.c.bf16 %v35485_v8, %v35478_v12  ;;  %v37518_v8 = vpack.c.bf16 %v35511_v26, %v35504_v20  ;;  %v37520_v20 = vld [vmem:[#allocation2_spill] sm:$0xff] }
0x13f1   :  { %27358 = vmatprep.mubr.msk.bf16.mxu0 %vm11122_vm7, %v37511_v51  ;;  %v35819_v10 = vpop.f32.mrb[232].mxu1 }
0x13f2   :  { %37512 = vst [vmem:[#allocation47_spill] sm:$0xff] %v35819_v10  ;;  %v35821_v46 = vpop.f32.mrb[233].mxu1 }
0x13f3   :  { %v35823_v41 = vpop.f32.mrb[234].mxu1 }
0x13f4   :  { %v35827_v13 = vpop.f32.mrb[235].mxu1 }
0x13f8   :  { %27359 = vmatmul.mubr.msk.bf16.gmra.mrb[40].mxu0 %vm11122_vm7, %v37514_v24 }
0x13f9   :  { %27362 = vmatprep.mubr.msk.bf16.mxu0 %vm11122_vm7, %v37515_v31  ;;  %v35839_v27 = vpop.f32.mrb[236].mxu1 }
0x13fa   :  { %v35841_v51 = vpop.f32.mrb[237].mxu1 }
0x13fb   :  { %v35843_v11 = vpop.f32.mrb[238].mxu1 }
0x13fc   :  { %v35847_v29 = vpop.f32.mrb[239].mxu1 }
0x1400   :  { %27363 = vmatmul.mubr.msk.bf16.gmra.mrb[44].mxu0 %vm11122_vm7, %v37516_v17 }
0x1401   :  { %27448 = vmatprep.mubr.msk.bf16.mxu0 %vm11122_vm7, %v37517_v33  ;;  %v35859_v61 = vpop.f32.mrb[240].mxu1  ;;  %v29530_v33 = vld [vmem:[%s36703_s20] sm:$0x1f]  }
0x1402   :  { %v35861_v24 = vpop.f32.mrb[241].mxu1  ;;  %v35890_v26 = vand.u32 %v29530_v33, %v37520_v20 }
0x1403   :  { %v35863_v31 = vpop.f32.mrb[242].mxu1 }
0x1404   :  { %v35867_v48 = vpop.f32.mrb[243].mxu1 }
0x1408   :  { %27449 = vmatmul.mubr.msk.bf16.vlgmr.msra.gmra.mrb[240].mxu0 %vm11122_vm7, %v37518_v8 }
0x1409   :  { %27593 = vmatpush3.bf16.msra.mxu0 %v35534_v34  ;;  %27452 = vmatprep.mubr.msk.bf16.mxu0 %vm11122_vm7, %v37519_v7  ;;  %v35880_v36 = vpop.f32.mrb[244].mxu1  ;;  %v37522_v7 = vpack.c.bf16 %v35575_v2, %v35566_v37  ;;  %v37524_v37 = vpack.c.bf16 %v35601_v32, %v35592_v63  ;;  %v37526_v63 = vpack.c.bf16 %v35627_v35, %v35618_v9 }
0x140a   :  { %v35882_v17 = vpop.f32.mrb[245].mxu1  ;;  %27658 = vmatprep.subr.bf16.mxu0 %v35890_v26  ;;  %v37528_v9 = vpack.c.bf16 %v35647_v6, %v35641_v18  ;;  %v37530_v18 = vpack.c.bf16 %v35667_v56, %v35661_v23  ;;  %v37533_v56 = vpack.c.bf16 %v35687_v52, %v35681_v49  ;;  %v37539_v52 = vpack.c.bf16 %v35707_v25, %v35701_v42 }
0x140b   :  { %v35887_v10 = vpop.f32.mrb[246].mxu1  ;;  %v37544_v25 = vpack.c.bf16 %v35727_v28, %v35721_v3  ;;  %v37549_v28 = vpack.c.bf16 %v35747_v57, %v35741_v50  ;;  %v37556_v57 = vpack.c.bf16 %v35767_v5, %v35761_v60  ;;  %v37559_v5 = vpack.c.bf16 %v35787_v22, %v35781_v44 }
0x140c   :  { %v35894_v8 = vpop.f32.mrb[247].mxu1 }
0x1410   :  { %27453 = vmatmul.mubr.msk.bf16.gmra.mrb[244].mxu0 %vm11122_vm7, %v37521_v38 }
0x1411   :  { %27456 = vmatprep.mubr.msk.bf16.mxu0 %vm11122_vm7, %v37522_v7  ;;  %v35907_v33 = vpop.f32.mrb[248].mxu1 }
0x1412   :  { %v35909_v20 = vpop.f32.mrb[249].mxu1 }
0x1413   :  { %v35911_v34 = vpop.f32.mrb[250].mxu1 }
0x1414   :  { %v35915_v12 = vpop.f32.mrb[251].mxu1 }
0x1418   :  { %27457 = vmatmul.mubr.msk.bf16.gmra.mrb[248].mxu0 %vm11122_vm7, %v37523_v58 }
0x1419   :  { %27460 = vmatprep.mubr.msk.bf16.mxu0 %vm11122_vm7, %v37524_v37  ;;  %v35927_v2 = vpop.f32.mrb[252].mxu1 }
0x141a   :  { %v35929_v38 = vpop.f32.mrb[253].mxu1 }
0x141b   :  { %v35931_v7 = vpop.f32.mrb[254].mxu1 }
0x141c   :  { %v35935_v59 = vpop.f32.mrb[255].mxu1 }
0x1420   :  { %27461 = vmatmul.mubr.msk.bf16.gmra.mrb[252].mxu0 %vm11122_vm7, %v37525_v47 }
0x1421   :  { %27464 = vmatprep.mubr.msk.bf16.mxu0 %vm11122_vm7, %v37526_v63  ;;  %v35947_v32 = vpop.f32.mrb[0].mxu1 }
0x1422   :  { %v35949_v58 = vpop.f32.mrb[1].mxu1 }
0x1423   :  { %v35951_v37 = vpop.f32.mrb[2].mxu1 }
0x1424   :  { %v35955_v54 = vpop.f32.mrb[3].mxu1 }
0x1428   :  { %27465 = vmatmul.mubr.msk.bf16.gmra.mrb[0].mxu0 %vm11122_vm7, %v37527_v40 }
0x1429   :  { %27468 = vmatprep.mubr.msk.bf16.mxu0 %vm11122_vm7, %v37528_v9  ;;  %v35967_v35 = vpop.f32.mrb[4].mxu1 }
0x142a   :  { %v35969_v47 = vpop.f32.mrb[5].mxu1 }
0x142b   :  { %v35971_v63 = vpop.f32.mrb[6].mxu1 }
0x142c   :  { %v35975_v4 = vpop.f32.mrb[7].mxu1 }
0x1430   :  { %27469 = vmatmul.mubr.msk.bf16.gmra.mrb[4].mxu0 %vm11122_vm7, %v37529_v55 }
0x1431   :  { %27472 = vmatprep.mubr.msk.bf16.mxu0 %vm11122_vm7, %v37530_v18  ;;  %v35987_v6 = vpop.f32.mrb[8].mxu1 }
0x1432   :  { %37531 = vst [vmem:[#allocation52_spill] sm:$0xff] %v35987_v6  ;;  %v35989_v40 = vpop.f32.mrb[9].mxu1 }
0x1433   :  { %v35991_v9 = vpop.f32.mrb[10].mxu1 }
0x1434   :  { %v35995_v1 = vpop.f32.mrb[11].mxu1 }
0x1438   :  { %27473 = vmatmul.mubr.msk.bf16.gmra.mrb[8].mxu0 %vm11122_vm7, %v37532_v16  ;;  %v37537_v16 = vld [vmem:[#allocation39_spill] sm:$0xff] }
0x1439   :  { %27476 = vmatprep.mubr.msk.bf16.mxu0 %vm11122_vm7, %v37533_v56  ;;  %v36007_v23 = vpop.f32.mrb[12].mxu1  ;;  %v37538_v6 = vpack.c.bf16 %v37536_v0, %v37537_v16  ;;  %v37542_v16 = vld [vmem:[#allocation44_spill] sm:$0xff] }
0x143a   :  { %37534 = vst [vmem:[#allocation51_spill] sm:$0xff] %v36007_v23  ;;  %v36009_v55 = vpop.f32.mrb[13].mxu1 }
0x143b   :  { %v36011_v18 = vpop.f32.mrb[14].mxu1 }
0x143c   :  { %37535 = vst [vmem:[#allocation49_spill] sm:$0xff] %v36011_v18  ;;  %v36015_v39 = vpop.f32.mrb[15].mxu1 }
0x1440   :  { %27477 = vmatmul.mubr.msk.bf16.gmra.mrb[12].mxu0 %vm11122_vm7, %v37538_v6  ;;  %v37541_v6 = vld [vmem:[#allocation43_spill] sm:$0xff] }
0x1441   :  { %27480 = vmatprep.mubr.msk.bf16.mxu0 %vm11122_vm7, %v37539_v52  ;;  %v36027_v49 = vpop.f32.mrb[16].mxu1  ;;  %v37543_v18 = vpack.c.bf16 %v37541_v6, %v37542_v16 }
0x1442   :  { %37540 = vst [vmem:[#allocation55_spill] sm:$0xff] %v36027_v49  ;;  %v36029_v56 = vpop.f32.mrb[17].mxu1 }
0x1443   :  { %v36031_v14 = vpop.f32.mrb[18].mxu1 }
0x1444   :  { %v36035_v53 = vpop.f32.mrb[19].mxu1 }
0x1448   :  { %27481 = vmatmul.mubr.msk.bf16.gmra.mrb[16].mxu0 %vm11122_vm7, %v37543_v18  ;;  %v37547_v18 = vld [vmem:[#allocation41_spill] sm:$0xff] }
0x1449   :  { %27484 = vmatprep.mubr.msk.bf16.mxu0 %vm11122_vm7, %v37544_v25  ;;  %v36047_v42 = vpop.f32.mrb[20].mxu1  ;;  %v37548_v16 = vpack.c.bf16 %v35723_v15, %v37547_v18  ;;  %v37554_v18 = vld [vmem:[#allocation45_spill] sm:$0xff] }
0x144a   :  { %37545 = vst [vmem:[#allocation53_spill] sm:$0xff] %v36047_v42  ;;  %v36049_v52 = vpop.f32.mrb[21].mxu1 }
0x144b   :  { %v36051_v23 = vpop.f32.mrb[22].mxu1 }
0x144c   :  { %37546 = vst [vmem:[#allocation56_spill] sm:$0xff] %v36051_v23  ;;  %v36055_v0 = vpop.f32.mrb[23].mxu1 }
0x1450   :  { %27485 = vmatmul.mubr.msk.bf16.gmra.mrb[20].mxu0 %vm11122_vm7, %v37548_v16  ;;  %v37555_v16 = vpack.c.bf16 %v35743_v62, %v37554_v18  ;;  %v37557_v62 = vld [vmem:[#allocation46_spill] sm:$0xff] }
0x1451   :  { %27488 = vmatprep.mubr.msk.bf16.mxu0 %vm11122_vm7, %v37549_v28  ;;  %v36067_v3 = vpop.f32.mrb[24].mxu1  ;;  %v37558_v18 = vpack.c.bf16 %v35763_v19, %v37557_v62  ;;  %v37562_v19 = vpack.c.bf16 %v35807_v45, %v35801_v30 }
0x1452   :  { %37550 = vst [vmem:[#allocation54_spill] sm:$0xff] %v36067_v3  ;;  %v36069_v25 = vpop.f32.mrb[25].mxu1 }
0x1453   :  { %37551 = vst [vmem:[#allocation57_spill] sm:$0xff] %v36069_v25  ;;  %v36071_v49 = vpop.f32.mrb[26].mxu1 }
0x1454   :  { %37552 = vst [vmem:[#allocation60_spill] sm:$0xff] %v36071_v49  ;;  %v36075_v6 = vpop.f32.mrb[27].mxu1 }
0x1455   :  { %37553 = vst [vmem:[#allocation58_spill] sm:$0xff] %v36075_v6 }
0x1458   :  { %27489 = vmatmul.mubr.msk.bf16.gmra.mrb[24].mxu0 %vm11122_vm7, %v37555_v16 }
0x1459   :  { %27492 = vmatprep.mubr.msk.bf16.mxu0 %vm11122_vm7, %v37556_v57  ;;  %v36087_v50 = vpop.f32.mrb[28].mxu1 }
0x145a   :  { %v36089_v28 = vpop.f32.mrb[29].mxu1 }
0x145b   :  { %v36091_v42 = vpop.f32.mrb[30].mxu1 }
0x145c   :  { %v19971_v3 = vpack.c.bf16 %v36091_v42, %v36087_v50  ;;  %v19872_v15 = vpop.f32.mrb[31].mxu1  ;;  %v37560_v42 = vld [vmem:[#allocation48_spill] sm:$0xff] }
0x145d   :  { %v19970_v49 = vpack.c.bf16 %v19872_v15, %v36089_v28  ;;  %v37561_v50 = vpack.c.bf16 %v35783_v21, %v37560_v42  ;;  %v37565_v21 = vpack.c.bf16 %v35827_v13, %v35821_v46 }
0x1460   :  { %27493 = vmatmul.mubr.msk.bf16.gmra.mrb[28].mxu0 %vm11122_vm7, %v37558_v18 }
0x1461   :  { %27496 = vmatprep.mubr.msk.bf16.mxu0 %vm11122_vm7, %v37559_v5  ;;  %v27578_v60 = vpop.f32.mrb[32].mxu1  ;;  %v37563_v5 = vld [vmem:[#allocation50_spill] sm:$0xff] }
0x1462   :  { %v19885_v16 = vpop.f32.mrb[33].mxu1 }
0x1463   :  { %v27579_v57 = vpop.f32.mrb[34].mxu1 }
0x1464   :  { %v19973_v25 = vpack.c.bf16 %v27579_v57, %v27578_v60  ;;  %v19888_v6 = vpop.f32.mrb[35].mxu1  ;;  %v37564_v60 = vpack.c.bf16 %v35803_v43, %v37563_v5  ;;  %v37568_v43 = vpack.c.bf16 %v35847_v29, %v35841_v51  ;;  %v37569_v5 = vpack.c.bf16 %v35843_v11, %v35839_v27 }
0x1465   :  { %v19972_v23 = vpack.c.bf16 %v19888_v6, %v19885_v16  ;;  %v37571_v29 = vpack.c.bf16 %v35863_v31, %v35859_v61  ;;  %v37572_v51 = vpack.c.bf16 %v35894_v8, %v35882_v17  ;;  %v37573_v11 = vpack.c.bf16 %v35887_v10, %v35880_v36 }
0x1466   :  { %v37574_v27 = vpack.c.bf16 %v35915_v12, %v35909_v20  ;;  %v37576_v61 = vpack.c.bf16 %v35935_v59, %v35929_v38  ;;  %v37577_v10 = vpack.c.bf16 %v35931_v7, %v35927_v2  ;;  %v37579_v31 = vpack.c.bf16 %v35951_v37, %v35947_v32  ;;  %v37587_v20 = vld [vmem:[#allocation51_spill] sm:$0xff]  ;;  %v37593_v32 = vld [vmem:[#allocation56_spill] sm:$0xff] }
0x1467   :  { %v37580_v12 = vpack.c.bf16 %v35975_v4, %v35969_v47  ;;  %v37581_v36 = vpack.c.bf16 %v35971_v63, %v35967_v35  ;;  %v37582_v17 = vpack.c.bf16 %v35995_v1, %v35989_v40  ;;  %v37585_v8 = vpack.c.bf16 %v36015_v39, %v36009_v55  ;;  %v37590_v38 = vld [vmem:[#allocation55_spill] sm:$0xff]  ;;  %v37596_v4 = vld [vmem:[#allocation58_spill] sm:$0xff]  ;;  %v37597_v35 = vld [vmem:[#allocation57_spill] sm:$0xff] }
0x1468   :  { %27497 = vmatmul.mubr.msk.bf16.gmra.mrb[32].mxu0 %vm11122_vm7, %v37561_v50  ;;  %v37566_v50 = vld [vmem:[#allocation47_spill] sm:$0xff]  ;;  %v37589_v2 = vpack.c.bf16 %v36035_v53, %v36029_v56  ;;  %v37591_v7 = vpack.c.bf16 %v36031_v14, %v37590_v38  ;;  %v37598_v47 = vpack.c.bf16 %v37596_v4, %v37597_v35  ;;  %v37599_v63 = vld [vmem:[#allocation60_spill] sm:$0xff]  ;;  %v37600_v1 = vld [vmem:[#allocation54_spill] sm:$0xff] }
0x1469   :  { %27500 = vmatprep.mubr.msk.bf16.mxu0 %vm11122_vm7, %v37562_v19  ;;  %v27582_v15 = vpop.f32.mrb[36].mxu1  ;;  %v37567_v19 = vpack.c.bf16 %v35823_v41, %v37566_v50  ;;  %v37570_v41 = vpack.c.bf16 %v35867_v48, %v35861_v24  ;;  %v37575_v48 = vpack.c.bf16 %v35911_v34, %v35907_v33  ;;  %v37578_v24 = vpack.c.bf16 %v35955_v54, %v35949_v58  ;;  %v37586_v33 = vld [vmem:[#allocation49_spill] sm:$0xff]  ;;  %v29531_v40 = vld [vmem:[%s36704_s1] sm:$0xff]   ;;  %v29533_v39 = vld [vmem:[%s36704_s1 + $0x10] sm:$0xff]  }
0x146a   :  { %v19901_v22 = vpop.f32.mrb[37].mxu1  ;;  %v37588_v59 = vpack.c.bf16 %v37586_v33, %v37587_v20  ;;  %v37592_v54 = vpack.c.bf16 %v36055_v0, %v36049_v52  ;;  %v37594_v58 = vld [vmem:[#allocation53_spill] sm:$0xff]  ;;  %v37601_v14 = vpack.c.bf16 %v37599_v63, %v37600_v1  ;;  %v29535_v55 = vld [vmem:[%s36704_s1 + $0x20] sm:$0xff]   ;;  %v29536_v53 = vld [vmem:[%s36704_s1 + $0x28] sm:$0xff]  }
0x146b   :  { %v27583_v44 = vpop.f32.mrb[38].mxu1  ;;  %v37595_v37 = vpack.c.bf16 %v37593_v32, %v37594_v58  ;;  %v29538_v56 = vld [vmem:[%s36704_s1 + $0x38] sm:$0xff]   ;;  %v29539_v0 = vld [vmem:[%s36704_s1 + $0x40] sm:$0xff]   ;;  %v29540_v52 = vld [vmem:[%s36704_s1 + $0x48] sm:$0xff]  }
0x146c   :  { %v19975_v28 = vpack.c.bf16 %v27583_v44, %v27582_v15  ;;  %v19904_v62 = vpop.f32.mrb[39].mxu1  ;;  %v29553_v50 = vld [vmem:[%s36704_s1 + $0xb0] sm:$0xff]  }
0x146d   :  { %v19974_v18 = vpack.c.bf16 %v19904_v62, %v19901_v22 }
0x1470   :  { %27501 = vmatmul.mubr.msk.bf16.gmra.mrb[36].mxu0 %vm11122_vm7, %v37564_v60  ;;  %v29545_v60 = vld [vmem:[%s36704_s1 + $0x70] sm:$0xff]  }
0x1471   :  { %27504 = vmatprep.mubr.msk.bf16.mxu0 %vm11122_vm7, %v37565_v21  ;;  %v27586_v6 = vpop.f32.mrb[40].mxu1  ;;  %v29546_v21 = vld [vmem:[%s36704_s1 + $0x78] sm:$0xff]  }
0x1472   :  { %v19917_v45 = vpop.f32.mrb[41].mxu1 }
0x1473   :  { %v27587_v30 = vpop.f32.mrb[42].mxu1 }
0x1474   :  { %v19977_v16 = vpack.c.bf16 %v27587_v30, %v27586_v6  ;;  %v19920_v57 = vpop.f32.mrb[43].mxu1  ;;  %v29547_v6 = vld [vmem:[%s36704_s1 + $0x80] sm:$0xff]   ;;  %v29549_v30 = vld [vmem:[%s36704_s1 + $0x90] sm:$0xff]  }
0x1475   :  { %v19976_v42 = vpack.c.bf16 %v19920_v57, %v19917_v45  ;;  %v29548_v45 = vld [vmem:[%s36704_s1 + $0x88] sm:$0xff]   ;;  %v29551_v57 = vld [vmem:[%s36704_s1 + $0xa0] sm:$0xff]  }
0x1478   :  { %27505 = vmatmul.mubr.msk.bf16.gmra.mrb[40].mxu0 %vm11122_vm7, %v37567_v19  ;;  %v29554_v19 = vld [vmem:[%s36704_s1 + $0xb8] sm:$0xff]  }
0x1479   :  { %27508 = vmatprep.mubr.msk.bf16.mxu0 %vm11122_vm7, %v37568_v43  ;;  %v27590_v15 = vpop.f32.mrb[44].mxu1  ;;  %v29555_v43 = vld [vmem:[%s36704_s1 + $0xc0] sm:$0xff]  }
0x147a   :  { %v19933_v13 = vpop.f32.mrb[45].mxu1 }
0x147b   :  { %v27591_v46 = vpop.f32.mrb[46].mxu1 }
0x147c   :  { %v19979_v22 = vpack.c.bf16 %v27591_v46, %v27590_v15  ;;  %v19936_v44 = vpop.f32.mrb[47].mxu1  ;;  %v29556_v15 = vld [vmem:[%s36704_s1 + $0xc8] sm:$0xff]   ;;  %v29558_v46 = vld [vmem:[%s36704_s1 + $0xd8] sm:$0xff]  }
0x147d   :  { %v19978_v62 = vpack.c.bf16 %v19936_v44, %v19933_v13  ;;  %v29557_v13 = vld [vmem:[%s36704_s1 + $0xd0] sm:$0xff]   ;;  %v29560_v44 = vld [vmem:[%s36704_s1 + $0xe8] sm:$0xff]  }
0x1480   :  { %27509 = vmatmul.mubr.msk.bf16.gmra.mrb[44].mxu0 %vm11122_vm7, %v37569_v5  ;;  %v29562_v5 = vld [vmem:[%s36704_s1 + $0xf8] sm:$0xff]  }
0x1481   :  { %27594 = vmatprep.mubr.msk.bf16.mxu0 %vm11122_vm7, %v37570_v41  ;;  %v36362_v41 = vld [vmem:[%s36705_s21] ss:$0 sm:$0xff] }
0x1488   :  { %27595 = vmatmul.mubr.msk.bf16.vlgmr.msra.gmra.mrb[240].mxu0 %vm11122_vm7, %v37571_v29 }
0x1489   :  { %27659 = vmatpush3.bf16.msra.mxu0 %v35890_v26  ;;  %27598 = vmatprep.mubr.msk.bf16.mxu0 %vm11122_vm7, %v37572_v51  ;;  %v37583_v26 = vld [vmem:[#allocation52_spill] sm:$0xff] }
0x148a   :  { %v37584_v34 = vpack.c.bf16 %v35991_v9, %v37583_v26  ;;  %v29532_v9 = vld [vmem:[%s36704_s1 + $0x8] sm:$0xff]  }
0x1490   :  { %27599 = vmatmul.mubr.msk.bf16.gmra.mrb[244].mxu0 %vm11122_vm7, %v37573_v11 }
0x1491   :  { %27602 = vmatprep.mubr.msk.bf16.mxu0 %vm11122_vm7, %v37574_v27 }
0x1498   :  { %27603 = vmatmul.mubr.msk.bf16.gmra.mrb[248].mxu0 %vm11122_vm7, %v37575_v48 }
0x1499   :  { %27606 = vmatprep.mubr.msk.bf16.mxu0 %vm11122_vm7, %v37576_v61 }
0x14a0   :  { %27607 = vmatmul.mubr.msk.bf16.gmra.mrb[252].mxu0 %vm11122_vm7, %v37577_v10 }
0x14a1   :  { %27610 = vmatprep.mubr.msk.bf16.mxu0 %vm11122_vm7, %v37578_v24 }
0x14a8   :  { %27611 = vmatmul.mubr.msk.bf16.gmra.mrb[0].mxu0 %vm11122_vm7, %v37579_v31 }
0x14a9   :  { %27614 = vmatprep.mubr.msk.bf16.mxu0 %vm11122_vm7, %v37580_v12 }
0x14b0   :  { %27615 = vmatmul.mubr.msk.bf16.gmra.mrb[4].mxu0 %vm11122_vm7, %v37581_v36 }
0x14b1   :  { %27618 = vmatprep.mubr.msk.bf16.mxu0 %vm11122_vm7, %v37582_v17 }
0x14b8   :  { %27619 = vmatmul.mubr.msk.bf16.gmra.mrb[8].mxu0 %vm11122_vm7, %v37584_v34 }
0x14b9   :  { %27622 = vmatprep.mubr.msk.bf16.mxu0 %vm11122_vm7, %v37585_v8 }
0x14c0   :  { %27623 = vmatmul.mubr.msk.bf16.gmra.mrb[12].mxu0 %vm11122_vm7, %v37588_v59 }
0x14c1   :  { %27626 = vmatprep.mubr.msk.bf16.mxu0 %vm11122_vm7, %v37589_v2 }
0x14c8   :  { %27627 = vmatmul.mubr.msk.bf16.gmra.mrb[16].mxu0 %vm11122_vm7, %v37591_v7 }
0x14c9   :  { %27630 = vmatprep.mubr.msk.bf16.mxu0 %vm11122_vm7, %v37592_v54 }
0x14d0   :  { %27631 = vmatmul.mubr.msk.bf16.gmra.mrb[20].mxu0 %vm11122_vm7, %v37595_v37 }
0x14d1   :  { %27634 = vmatprep.mubr.msk.bf16.mxu0 %vm11122_vm7, %v37598_v47 }
0x14d8   :  { %27635 = vmatmul.mubr.msk.bf16.gmra.mrb[24].mxu0 %vm11122_vm7, %v37601_v14 }
0x14d9   :  { %27638 = vmatprep.mubr.msk.bf16.mxu0 %vm11122_vm7, %v19970_v49  ;;  %v29537_v49 = vld [vmem:[%s36704_s1 + $0x30] sm:$0xff]  }
0x14e0   :  { %27639 = vmatmul.mubr.msk.bf16.gmra.mrb[28].mxu0 %vm11122_vm7, %v19971_v3  ;;  %v29541_v3 = vld [vmem:[%s36704_s1 + $0x50] sm:$0xff]  }
0x14e1   :  { %27642 = vmatprep.mubr.msk.bf16.mxu0 %vm11122_vm7, %v19972_v23  ;;  %v29534_v23 = vld [vmem:[%s36704_s1 + $0x18] sm:$0xff]  }
0x14e8   :  { %27643 = vmatmul.mubr.msk.bf16.gmra.mrb[32].mxu0 %vm11122_vm7, %v19973_v25  ;;  %v29542_v25 = vld [vmem:[%s36704_s1 + $0x58] sm:$0xff]  }
0x14e9   :  { %27646 = vmatprep.mubr.msk.bf16.mxu0 %vm11122_vm7, %v19974_v18  ;;  %v29544_v18 = vld [vmem:[%s36704_s1 + $0x68] sm:$0xff]  }
0x14f0   :  { %27647 = vmatmul.mubr.msk.bf16.gmra.mrb[36].mxu0 %vm11122_vm7, %v19975_v28  ;;  %v29543_v28 = vld [vmem:[%s36704_s1 + $0x60] sm:$0xff]  }
0x14f1   :  { %27650 = vmatprep.mubr.msk.bf16.mxu0 %vm11122_vm7, %v19976_v42  ;;  %v29552_v42 = vld [vmem:[%s36704_s1 + $0xa8] sm:$0xff]  }
0x14f8   :  { %27651 = vmatmul.mubr.msk.bf16.gmra.mrb[40].mxu0 %vm11122_vm7, %v19977_v16  ;;  %v29550_v16 = vld [vmem:[%s36704_s1 + $0x98] sm:$0xff]  }
0x14f9   :  { %27654 = vmatprep.mubr.msk.bf16.mxu0 %vm11122_vm7, %v19978_v62  ;;  %v29561_v62 = vld [vmem:[%s36704_s1 + $0xf0] sm:$0xff]  }
0x1500   :  { %27655 = vmatmul.mubr.msk.bf16.gmra.mrb[44].mxu0 %vm11122_vm7, %v19979_v22  ;;  %v29559_v22 = vld [vmem:[%s36704_s1 + $0xe0] sm:$0xff]  }
0x1501   :  { %27660 = vmatprep.mubr.msk.bf16.mxu0 %vm135_vm2, %v29531_v40 }
0x1508   :  { %27661 = vmatmul.mubr.msk.bf16.vlgmr.msra.gmra.mrb[240].mxu0 %vm135_vm2, %v29532_v9 }
0x1509   :  { %27664 = vmatprep.mubr.msk.bf16.mxu0 %vm135_vm2, %v29533_v39 }
0x1510   :  { %27665 = vmatmul.mubr.msk.bf16.gmra.mrb[244].mxu0 %vm135_vm2, %v29534_v23 }
0x1511   :  { %27668 = vmatprep.mubr.msk.bf16.mxu0 %vm135_vm2, %v29535_v55 }
0x1518   :  { %27669 = vmatmul.mubr.msk.bf16.gmra.mrb[248].mxu0 %vm135_vm2, %v29536_v53 }
0x1519   :  { %27672 = vmatprep.mubr.msk.bf16.mxu0 %vm135_vm2, %v29537_v49 }
0x1520   :  { %27673 = vmatmul.mubr.msk.bf16.gmra.mrb[252].mxu0 %vm135_vm2, %v29538_v56 }
0x1521   :  { %27676 = vmatprep.mubr.msk.bf16.mxu0 %vm135_vm2, %v29539_v0 }
0x1528   :  { %27677 = vmatmul.mubr.msk.bf16.gmra.mrb[0].mxu0 %vm135_vm2, %v29540_v52 }
0x1529   :  { %27680 = vmatprep.mubr.msk.bf16.mxu0 %vm135_vm2, %v29541_v3 }
0x1530   :  { %27681 = vmatmul.mubr.msk.bf16.gmra.mrb[4].mxu0 %vm135_vm2, %v29542_v25 }
0x1531   :  { %27684 = vmatprep.mubr.msk.bf16.mxu0 %vm135_vm2, %v29543_v28 }
0x1538   :  { %27685 = vmatmul.mubr.msk.bf16.gmra.mrb[8].mxu0 %vm135_vm2, %v29544_v18 }
0x1539   :  { %27688 = vmatprep.mubr.msk.bf16.mxu0 %vm135_vm2, %v29545_v60 }
0x1540   :  { %27689 = vmatmul.mubr.msk.bf16.gmra.mrb[12].mxu0 %vm135_vm2, %v29546_v21 }
0x1541   :  { %27692 = vmatprep.mubr.msk.bf16.mxu0 %vm135_vm2, %v29547_v6 }
0x1548   :  { %27693 = vmatmul.mubr.msk.bf16.gmra.mrb[16].mxu0 %vm135_vm2, %v29548_v45 }
0x1549   :  { %27696 = vmatprep.mubr.msk.bf16.mxu0 %vm135_vm2, %v29549_v30 }
0x1550   :  { %27697 = vmatmul.mubr.msk.bf16.gmra.mrb[20].mxu0 %vm135_vm2, %v29550_v16 }
0x1551   :  { %27700 = vmatprep.mubr.msk.bf16.mxu0 %vm135_vm2, %v29551_v57 }
0x1558   :  { %27701 = vmatmul.mubr.msk.bf16.gmra.mrb[24].mxu0 %vm135_vm2, %v29552_v42 }
0x1559   :  { %27704 = vmatprep.mubr.msk.bf16.mxu0 %vm135_vm2, %v29553_v50 }
0x1560   :  { %27705 = vmatmul.mubr.msk.bf16.gmra.mrb[28].mxu0 %vm135_vm2, %v29554_v19 }
0x1561   :  { %27708 = vmatprep.mubr.msk.bf16.mxu0 %vm135_vm2, %v29555_v43 }
0x1568   :  { %27709 = vmatmul.mubr.msk.bf16.gmra.mrb[32].mxu0 %vm135_vm2, %v29556_v15 }
0x1569   :  { %27712 = vmatprep.mubr.msk.bf16.mxu0 %vm135_vm2, %v29557_v13 }
0x1570   :  { %27713 = vmatmul.mubr.msk.bf16.gmra.mrb[36].mxu0 %vm135_vm2, %v29558_v46 }
0x1571   :  { %27716 = vmatprep.mubr.msk.bf16.mxu0 %vm135_vm2, %v29559_v22 }
0x1578   :  { %27717 = vmatmul.mubr.msk.bf16.gmra.mrb[40].mxu0 %vm135_vm2, %v29560_v44 }
0x1579   :  { %27720 = vmatprep.mubr.msk.bf16.mxu0 %vm135_vm2, %v29561_v62 }
0x1580   :  { %27721 = vmatmul.mubr.msk.bf16.gmra.mrb[44].mxu0 %vm135_vm2, %v29562_v5 }
0x15db   :  { %v27662_v29 = vpop.f32.mrb[240].mxu0 }
0x15dc   :  { %v27852_v51 = vadd.f32 %v27662_v29, %v36362_v41  ;;  %v20869_v11 = vpop.f32.mrb[241].mxu0 }
0x15dd   :  { %v27853_v27 = vadd.f32 %v36362_v41, %v20869_v11  ;;  %v27663_v48 = vpop.f32.mrb[242].mxu0 }
0x15de   :  { %21190 = vst.msk [vmem:[%s36706_s22 + $0x10] sm:$0xff] %vm11122_vm7, %v27852_v51  ;;  %v27854_v61 = vadd.f32 %v27663_v48, %v36362_v41  ;;  %v20872_v10 = vpop.f32.mrb[243].mxu0 }
0x15df   :  { %21188 = vst.msk [vmem:[%s36706_s22] sm:$0xff] %vm11122_vm7, %v27853_v27  ;;  %v27855_v24 = vadd.f32 %v36362_v41, %v20872_v10 }
0x15e0   :  { %21191 = vst.msk [vmem:[%s36706_s22 + $0x18] sm:$0xff] %vm11122_vm7, %v27854_v61 }
0x15e1   :  { %21189 = vst.msk [vmem:[%s36706_s22 + $0x8] sm:$0xff] %vm11122_vm7, %v27855_v24 }
0x15e3   :  { %v27666_v31 = vpop.f32.mrb[244].mxu0 }
0x15e4   :  { %v27856_v12 = vadd.f32 %v27666_v31, %v36362_v41  ;;  %v20885_v36 = vpop.f32.mrb[245].mxu0 }
0x15e5   :  { %v27857_v17 = vadd.f32 %v36362_v41, %v20885_v36  ;;  %v27667_v26 = vpop.f32.mrb[246].mxu0 }
0x15e6   :  { %21194 = vst.msk [vmem:[%s36706_s22 + $0x30] sm:$0xff] %vm11122_vm7, %v27856_v12  ;;  %v27858_v34 = vadd.f32 %v27667_v26, %v36362_v41  ;;  %v20888_v8 = vpop.f32.mrb[247].mxu0 }
0x15e7   :  { %21192 = vst.msk [vmem:[%s36706_s22 + $0x20] sm:$0xff] %vm11122_vm7, %v27857_v17  ;;  %v27859_v33 = vadd.f32 %v36362_v41, %v20888_v8 }
0x15e8   :  { %21195 = vst.msk [vmem:[%s36706_s22 + $0x38] sm:$0xff] %vm11122_vm7, %v27858_v34 }
0x15e9   :  { %21193 = vst.msk [vmem:[%s36706_s22 + $0x28] sm:$0xff] %vm11122_vm7, %v27859_v33 }
0x15eb   :  { %v27670_v20 = vpop.f32.mrb[248].mxu0 }
0x15ec   :  { %v27860_v59 = vadd.f32 %v27670_v20, %v36362_v41  ;;  %v20901_v2 = vpop.f32.mrb[249].mxu0 }
0x15ed   :  { %v27861_v38 = vadd.f32 %v36362_v41, %v20901_v2  ;;  %v27671_v7 = vpop.f32.mrb[250].mxu0 }
0x15ee   :  { %21198 = vst.msk [vmem:[%s36706_s22 + $0x50] sm:$0xff] %vm11122_vm7, %v27860_v59  ;;  %v27862_v54 = vadd.f32 %v27671_v7, %v36362_v41  ;;  %v20904_v32 = vpop.f32.mrb[251].mxu0 }
0x15ef   :  { %21196 = vst.msk [vmem:[%s36706_s22 + $0x40] sm:$0xff] %vm11122_vm7, %v27861_v38  ;;  %v27863_v58 = vadd.f32 %v36362_v41, %v20904_v32 }
0x15f0   :  { %21199 = vst.msk [vmem:[%s36706_s22 + $0x58] sm:$0xff] %vm11122_vm7, %v27862_v54 }
0x15f1   :  { %21197 = vst.msk [vmem:[%s36706_s22 + $0x48] sm:$0xff] %vm11122_vm7, %v27863_v58 }
0x15f3   :  { %v27674_v37 = vpop.f32.mrb[252].mxu0 }
0x15f4   :  { %v27864_v4 = vadd.f32 %v27674_v37, %v36362_v41  ;;  %v20917_v35 = vpop.f32.mrb[253].mxu0 }
0x15f5   :  { %v27865_v47 = vadd.f32 %v36362_v41, %v20917_v35  ;;  %v27675_v63 = vpop.f32.mrb[254].mxu0 }
0x15f6   :  { %21202 = vst.msk [vmem:[%s36706_s22 + $0x70] sm:$0xff] %vm11122_vm7, %v27864_v4  ;;  %v27866_v1 = vadd.f32 %v27675_v63, %v36362_v41  ;;  %v20920_v14 = vpop.f32.mrb[255].mxu0 }
0x15f7   :  { %21200 = vst.msk [vmem:[%s36706_s22 + $0x60] sm:$0xff] %vm11122_vm7, %v27865_v47  ;;  %v27867_v40 = vadd.f32 %v36362_v41, %v20920_v14 }
0x15f8   :  { %21203 = vst.msk [vmem:[%s36706_s22 + $0x78] sm:$0xff] %vm11122_vm7, %v27866_v1 }
0x15f9   :  { %21201 = vst.msk [vmem:[%s36706_s22 + $0x68] sm:$0xff] %vm11122_vm7, %v27867_v40 }
0x15fb   :  { %v27678_v9 = vpop.f32.mrb[0].mxu0 }
0x15fc   :  { %v27868_v39 = vadd.f32 %v27678_v9, %v36362_v41  ;;  %v20933_v23 = vpop.f32.mrb[1].mxu0 }
0x15fd   :  { %v27869_v55 = vadd.f32 %v36362_v41, %v20933_v23  ;;  %v27679_v53 = vpop.f32.mrb[2].mxu0 }
0x15fe   :  { %21206 = vst.msk [vmem:[%s36706_s22 + $0x90] sm:$0xff] %vm11122_vm7, %v27868_v39  ;;  %v27870_v49 = vadd.f32 %v27679_v53, %v36362_v41  ;;  %v20936_v56 = vpop.f32.mrb[3].mxu0 }
0x15ff   :  { %21204 = vst.msk [vmem:[%s36706_s22 + $0x80] sm:$0xff] %vm11122_vm7, %v27869_v55  ;;  %v27871_v0 = vadd.f32 %v36362_v41, %v20936_v56 }
0x1600   :  { %21207 = vst.msk [vmem:[%s36706_s22 + $0x98] sm:$0xff] %vm11122_vm7, %v27870_v49 }
0x1601   :  { %21205 = vst.msk [vmem:[%s36706_s22 + $0x88] sm:$0xff] %vm11122_vm7, %v27871_v0 }
0x1603   :  { %v27682_v52 = vpop.f32.mrb[4].mxu0 }
0x1604   :  { %v27872_v3 = vadd.f32 %v27682_v52, %v36362_v41  ;;  %v20949_v25 = vpop.f32.mrb[5].mxu0 }
0x1605   :  { %v27873_v28 = vadd.f32 %v36362_v41, %v20949_v25  ;;  %v27683_v18 = vpop.f32.mrb[6].mxu0 }
0x1606   :  { %21210 = vst.msk [vmem:[%s36706_s22 + $0xb0] sm:$0xff] %vm11122_vm7, %v27872_v3  ;;  %v27874_v60 = vadd.f32 %v27683_v18, %v36362_v41  ;;  %v20952_v21 = vpop.f32.mrb[7].mxu0 }
0x1607   :  { %21208 = vst.msk [vmem:[%s36706_s22 + $0xa0] sm:$0xff] %vm11122_vm7, %v27873_v28  ;;  %v27875_v6 = vadd.f32 %v36362_v41, %v20952_v21 }
0x1608   :  { %21211 = vst.msk [vmem:[%s36706_s22 + $0xb8] sm:$0xff] %vm11122_vm7, %v27874_v60 }
0x1609   :  { %21209 = vst.msk [vmem:[%s36706_s22 + $0xa8] sm:$0xff] %vm11122_vm7, %v27875_v6 }
0x160b   :  { %v27686_v45 = vpop.f32.mrb[8].mxu0 }
0x160c   :  { %v27876_v30 = vadd.f32 %v27686_v45, %v36362_v41  ;;  %v20965_v16 = vpop.f32.mrb[9].mxu0 }
0x160d   :  { %v27877_v57 = vadd.f32 %v36362_v41, %v20965_v16  ;;  %v27687_v42 = vpop.f32.mrb[10].mxu0 }
0x160e   :  { %21214 = vst.msk [vmem:[%s36706_s22 + $0xd0] sm:$0xff] %vm11122_vm7, %v27876_v30  ;;  %v27878_v50 = vadd.f32 %v27687_v42, %v36362_v41  ;;  %v20968_v19 = vpop.f32.mrb[11].mxu0 }
0x160f   :  { %21212 = vst.msk [vmem:[%s36706_s22 + $0xc0] sm:$0xff] %vm11122_vm7, %v27877_v57  ;;  %v27879_v43 = vadd.f32 %v36362_v41, %v20968_v19 }
0x1610   :  { %21215 = vst.msk [vmem:[%s36706_s22 + $0xd8] sm:$0xff] %vm11122_vm7, %v27878_v50 }
0x1611   :  { %21213 = vst.msk [vmem:[%s36706_s22 + $0xc8] sm:$0xff] %vm11122_vm7, %v27879_v43 }
0x1613   :  { %v27690_v15 = vpop.f32.mrb[12].mxu0 }
0x1614   :  { %v27880_v13 = vadd.f32 %v27690_v15, %v36362_v41  ;;  %v20981_v46 = vpop.f32.mrb[13].mxu0 }
0x1615   :  { %v27881_v22 = vadd.f32 %v36362_v41, %v20981_v46  ;;  %v27691_v44 = vpop.f32.mrb[14].mxu0 }
0x1616   :  { %21218 = vst.msk [vmem:[%s36706_s22 + $0xf0] sm:$0xff] %vm11122_vm7, %v27880_v13  ;;  %v27882_v62 = vadd.f32 %v27691_v44, %v36362_v41  ;;  %v20984_v5 = vpop.f32.mrb[15].mxu0 }
0x1617   :  { %21216 = vst.msk [vmem:[%s36706_s22 + $0xe0] sm:$0xff] %vm11122_vm7, %v27881_v22  ;;  %v27883_v29 = vadd.f32 %v36362_v41, %v20984_v5 }
0x1618   :  { %21219 = vst.msk [vmem:[%s36706_s22 + $0xf8] sm:$0xff] %vm11122_vm7, %v27882_v62 }
0x1619   :  { %21217 = vst.msk [vmem:[%s36706_s22 + $0xe8] sm:$0xff] %vm11122_vm7, %v27883_v29 }
0x161b   :  { %v27694_v51 = vpop.f32.mrb[16].mxu0 }
0x161c   :  { %v27884_v11 = vadd.f32 %v27694_v51, %v36362_v41  ;;  %v20997_v27 = vpop.f32.mrb[17].mxu0 }
0x161d   :  { %v27885_v48 = vadd.f32 %v36362_v41, %v20997_v27  ;;  %v27695_v61 = vpop.f32.mrb[18].mxu0 }
0x161e   :  { %21222 = vst.msk [vmem:[%s36706_s22 + $0x110] sm:$0xff] %vm11122_vm7, %v27884_v11  ;;  %v27886_v10 = vadd.f32 %v27695_v61, %v36362_v41  ;;  %v21000_v24 = vpop.f32.mrb[19].mxu0 }
0x161f   :  { %21220 = vst.msk [vmem:[%s36706_s22 + $0x100] sm:$0xff] %vm11122_vm7, %v27885_v48  ;;  %v27887_v31 = vadd.f32 %v36362_v41, %v21000_v24 }
0x1620   :  { %21223 = vst.msk [vmem:[%s36706_s22 + $0x118] sm:$0xff] %vm11122_vm7, %v27886_v10 }
0x1621   :  { %21221 = vst.msk [vmem:[%s36706_s22 + $0x108] sm:$0xff] %vm11122_vm7, %v27887_v31 }
0x1623   :  { %v27698_v12 = vpop.f32.mrb[20].mxu0 }
0x1624   :  { %v27888_v36 = vadd.f32 %v27698_v12, %v36362_v41  ;;  %v21013_v17 = vpop.f32.mrb[21].mxu0 }
0x1625   :  { %v27889_v26 = vadd.f32 %v36362_v41, %v21013_v17  ;;  %v27699_v34 = vpop.f32.mrb[22].mxu0 }
0x1626   :  { %21226 = vst.msk [vmem:[%s36706_s22 + $0x130] sm:$0xff] %vm11122_vm7, %v27888_v36  ;;  %v27890_v8 = vadd.f32 %v27699_v34, %v36362_v41  ;;  %v21016_v33 = vpop.f32.mrb[23].mxu0 }
0x1627   :  { %21224 = vst.msk [vmem:[%s36706_s22 + $0x120] sm:$0xff] %vm11122_vm7, %v27889_v26  ;;  %v27891_v20 = vadd.f32 %v36362_v41, %v21016_v33 }
0x1628   :  { %21227 = vst.msk [vmem:[%s36706_s22 + $0x138] sm:$0xff] %vm11122_vm7, %v27890_v8 }
0x1629   :  { %21225 = vst.msk [vmem:[%s36706_s22 + $0x128] sm:$0xff] %vm11122_vm7, %v27891_v20 }
0x162b   :  { %v27702_v59 = vpop.f32.mrb[24].mxu0 }
0x162c   :  { %v27892_v2 = vadd.f32 %v27702_v59, %v36362_v41  ;;  %v21029_v38 = vpop.f32.mrb[25].mxu0 }
0x162d   :  { %v27893_v7 = vadd.f32 %v36362_v41, %v21029_v38  ;;  %v27703_v54 = vpop.f32.mrb[26].mxu0 }
0x162e   :  { %21230 = vst.msk [vmem:[%s36706_s22 + $0x150] sm:$0xff] %vm11122_vm7, %v27892_v2  ;;  %v27894_v32 = vadd.f32 %v27703_v54, %v36362_v41  ;;  %v21032_v58 = vpop.f32.mrb[27].mxu0 }
0x162f   :  { %21228 = vst.msk [vmem:[%s36706_s22 + $0x140] sm:$0xff] %vm11122_vm7, %v27893_v7  ;;  %v27895_v37 = vadd.f32 %v36362_v41, %v21032_v58 }
0x1630   :  { %21231 = vst.msk [vmem:[%s36706_s22 + $0x158] sm:$0xff] %vm11122_vm7, %v27894_v32 }
0x1631   :  { %21229 = vst.msk [vmem:[%s36706_s22 + $0x148] sm:$0xff] %vm11122_vm7, %v27895_v37 }
0x1633   :  { %v27706_v4 = vpop.f32.mrb[28].mxu0 }
0x1634   :  { %v27896_v35 = vadd.f32 %v27706_v4, %v36362_v41  ;;  %v21045_v47 = vpop.f32.mrb[29].mxu0 }
0x1635   :  { %v27897_v63 = vadd.f32 %v36362_v41, %v21045_v47  ;;  %v27707_v1 = vpop.f32.mrb[30].mxu0 }
0x1636   :  { %21234 = vst.msk [vmem:[%s36706_s22 + $0x170] sm:$0xff] %vm11122_vm7, %v27896_v35  ;;  %v27898_v14 = vadd.f32 %v27707_v1, %v36362_v41  ;;  %v21048_v40 = vpop.f32.mrb[31].mxu0 }
0x1637   :  { %21232 = vst.msk [vmem:[%s36706_s22 + $0x160] sm:$0xff] %vm11122_vm7, %v27897_v63  ;;  %v27899_v9 = vadd.f32 %v36362_v41, %v21048_v40 }
0x1638   :  { %21235 = vst.msk [vmem:[%s36706_s22 + $0x178] sm:$0xff] %vm11122_vm7, %v27898_v14 }
0x1639   :  { %21233 = vst.msk [vmem:[%s36706_s22 + $0x168] sm:$0xff] %vm11122_vm7, %v27899_v9 }
0x163b   :  { %v27710_v39 = vpop.f32.mrb[32].mxu0 }
0x163c   :  { %v27900_v23 = vadd.f32 %v27710_v39, %v36362_v41  ;;  %v21061_v55 = vpop.f32.mrb[33].mxu0 }
0x163d   :  { %v27901_v53 = vadd.f32 %v36362_v41, %v21061_v55  ;;  %v27711_v49 = vpop.f32.mrb[34].mxu0 }
0x163e   :  { %21238 = vst.msk [vmem:[%s36706_s22 + $0x190] sm:$0xff] %vm11122_vm7, %v27900_v23  ;;  %v27902_v56 = vadd.f32 %v27711_v49, %v36362_v41  ;;  %v21064_v0 = vpop.f32.mrb[35].mxu0 }
0x163f   :  { %21236 = vst.msk [vmem:[%s36706_s22 + $0x180] sm:$0xff] %vm11122_vm7, %v27901_v53  ;;  %v27903_v52 = vadd.f32 %v36362_v41, %v21064_v0 }
0x1640   :  { %21239 = vst.msk [vmem:[%s36706_s22 + $0x198] sm:$0xff] %vm11122_vm7, %v27902_v56 }
0x1641   :  { %21237 = vst.msk [vmem:[%s36706_s22 + $0x188] sm:$0xff] %vm11122_vm7, %v27903_v52 }
0x1643   :  { %v27714_v3 = vpop.f32.mrb[36].mxu0 }
0x1644   :  { %v27904_v25 = vadd.f32 %v27714_v3, %v36362_v41  ;;  %v21077_v28 = vpop.f32.mrb[37].mxu0 }
0x1645   :  { %v27905_v18 = vadd.f32 %v36362_v41, %v21077_v28  ;;  %v27715_v60 = vpop.f32.mrb[38].mxu0 }
0x1646   :  { %21242 = vst.msk [vmem:[%s36706_s22 + $0x1b0] sm:$0xff] %vm11122_vm7, %v27904_v25  ;;  %v27906_v21 = vadd.f32 %v27715_v60, %v36362_v41  ;;  %v21080_v6 = vpop.f32.mrb[39].mxu0 }
0x1647   :  { %21240 = vst.msk [vmem:[%s36706_s22 + $0x1a0] sm:$0xff] %vm11122_vm7, %v27905_v18  ;;  %v27907_v45 = vadd.f32 %v36362_v41, %v21080_v6 }
0x1648   :  { %21243 = vst.msk [vmem:[%s36706_s22 + $0x1b8] sm:$0xff] %vm11122_vm7, %v27906_v21 }
0x1649   :  { %21241 = vst.msk [vmem:[%s36706_s22 + $0x1a8] sm:$0xff] %vm11122_vm7, %v27907_v45 }
0x164b   :  { %v27718_v30 = vpop.f32.mrb[40].mxu0 }
0x164c   :  { %v27908_v16 = vadd.f32 %v27718_v30, %v36362_v41  ;;  %v21093_v57 = vpop.f32.mrb[41].mxu0 }
0x164d   :  { %v27909_v42 = vadd.f32 %v36362_v41, %v21093_v57  ;;  %v27719_v50 = vpop.f32.mrb[42].mxu0 }
0x164e   :  { %21246 = vst.msk [vmem:[%s36706_s22 + $0x1d0] sm:$0xff] %vm11122_vm7, %v27908_v16  ;;  %v27910_v19 = vadd.f32 %v27719_v50, %v36362_v41  ;;  %v21096_v43 = vpop.f32.mrb[43].mxu0 }
0x164f   :  { %21244 = vst.msk [vmem:[%s36706_s22 + $0x1c0] sm:$0xff] %vm11122_vm7, %v27909_v42  ;;  %v27911_v15 = vadd.f32 %v36362_v41, %v21096_v43 }
0x1650   :  { %21247 = vst.msk [vmem:[%s36706_s22 + $0x1d8] sm:$0xff] %vm11122_vm7, %v27910_v19 }
0x1651   :  { %21245 = vst.msk [vmem:[%s36706_s22 + $0x1c8] sm:$0xff] %vm11122_vm7, %v27911_v15 }
0x1653   :  { %v27722_v13 = vpop.f32.mrb[44].mxu0 }
0x1654   :  { %v27912_v46 = vadd.f32 %v27722_v13, %v36362_v41  ;;  %v21109_v22 = vpop.f32.mrb[45].mxu0 }
0x1655   :  { %v27913_v44 = vadd.f32 %v36362_v41, %v21109_v22  ;;  %v27723_v62 = vpop.f32.mrb[46].mxu0 }
0x1656   :  { %21250 = vst.msk [vmem:[%s36706_s22 + $0x1f0] sm:$0xff] %vm11122_vm7, %v27912_v46  ;;  %v27914_v5 = vadd.f32 %v27723_v62, %v36362_v41  ;;  %v21112_v29 = vpop.f32.mrb[47].mxu0 }
0x1657   :  { %21248 = vst.msk [vmem:[%s36706_s22 + $0x1e0] sm:$0xff] %vm11122_vm7, %v27913_v44  ;;  %v27915_v51 = vadd.f32 %v36362_v41, %v21112_v29 }
0x1658   :  { %21251 = vst.msk [vmem:[%s36706_s22 + $0x1f8] sm:$0xff] %vm11122_vm7, %v27914_v5 }
0x1659   :  { %21249 = vst.msk [vmem:[%s36706_s22 + $0x1e8] sm:$0xff] %vm11122_vm7, %v27915_v51 }

</bundles_post_ra>
